<compile_context>
chip_gen: v5e
topology: v5e:2x2
jax: 0.10.0
libtpu: 0.0.40
codegen_flags: <defaults>
</compile_context>

<pallas_src>
import jax
import jax.numpy as jnp
from jax.experimental import pallas as pl
from jax.experimental.pallas import tpu as pltpu

EPS = 1e-5
HIDDEN = 512
OUT_DIM = 2
OUT_PAD = 128          # lane-dense padded output width
NUM_PHASES = 4         # one phase per Linear layer (phased two-pass BN)


def _round_up(x, m):
    return ((x + m - 1) // m) * m


def _make_kernel(batch, tile_b, batch_pad):
    """Build the kernel closure for a given true batch size / tile size."""
    needs_mask = batch_pad != batch
    inv_n = 1.0 / float(batch)

    def kernel(x_ref,
               w1_ref, g1_ref, be1_ref,
               w2_ref, g2_ref, be2_ref,
               w3_ref, g3_ref, be3_ref,
               w4_ref, b4_ref,
               out_ref,
               acc_ref,   # VMEM (6, H) f32: rows 2l / 2l+1 = sum / sumsq of layer l
               aff_ref):  # VMEM (6, H) f32: rows 2l / 2l+1 = folded scale / shift
        phase = pl.program_id(0)
        tile = pl.program_id(1)
        bf16 = jnp.bfloat16

        # Zero the statistic accumulators once, at the very first grid step.
        @pl.when((phase == 0) & (tile == 0))
        def _():
            acc_ref[...] = jnp.zeros_like(acc_ref)

        x = x_ref[...]                              # [TB, 2D] bf16

        if needs_mask:
            rows = tile * tile_b + jax.lax.broadcasted_iota(
                jnp.int32, (tile_b, 1), 0)
            valid = rows < batch                    # [TB, 1] bool
        else:
            valid = None

        def masked(z):
            return jnp.where(valid, z, 0.0) if needs_mask else z

        def accumulate(l, z):
            zm = masked(z)
            acc_ref[2 * l:2 * l + 1, :] += jnp.sum(zm, axis=0, keepdims=True)
            acc_ref[2 * l + 1:2 * l + 2, :] += jnp.sum(zm * zm, axis=0,
                                                       keepdims=True)

        def finalize(l, g_ref, be_ref):
            # Fold BN into scale/shift from the full-batch sums.
            mean = acc_ref[2 * l:2 * l + 1, :] * inv_n
            var = acc_ref[2 * l + 1:2 * l + 2, :] * inv_n - mean * mean
            var = jnp.maximum(var, 0.0)             # guard one-pass cancellation
            scale = g_ref[...] * jax.lax.rsqrt(var + EPS)
            aff_ref[2 * l:2 * l + 1, :] = scale
            aff_ref[2 * l + 1:2 * l + 2, :] = be_ref[...] - mean * scale

        def bn_relu(l, z):
            scale = aff_ref[2 * l:2 * l + 1, :]
            shift = aff_ref[2 * l + 1:2 * l + 2, :]
            return jnp.maximum(z * scale + shift, 0.0)

        def z1():
            # Single K=2D MXU matmul. Linear biases before a BatchNorm cancel
            # exactly under the mean subtraction, so b1 is not added.
            return jnp.dot(x, w1_ref[...], preferred_element_type=jnp.float32)

        def z_next(h, w_ref):
            return jnp.dot(h.astype(bf16), w_ref[...],
                           preferred_element_type=jnp.float32)

        # ---- phase 0: accumulate layer-1 statistics -------------------------
        @pl.when(phase == 0)
        def _():
            accumulate(0, z1())

        # ---- phase 1: finalize L1 stats, accumulate layer-2 statistics ------
        @pl.when(phase == 1)
        def _():
            @pl.when(tile == 0)
            def _():
                finalize(0, g1_ref, be1_ref)
            h1 = bn_relu(0, z1())
            accumulate(1, z_next(h1, w2_ref))

        # ---- phase 2: finalize L2 stats, accumulate layer-3 statistics ------
        @pl.when(phase == 2)
        def _():
            @pl.when(tile == 0)
            def _():
                finalize(1, g2_ref, be2_ref)
            h1 = bn_relu(0, z1())
            h2 = bn_relu(1, z_next(h1, w2_ref))
            accumulate(2, z_next(h2, w3_ref))

        # ---- phase 3: finalize L3 stats, produce logits ----------------------
        @pl.when(phase == NUM_PHASES - 1)
        def _():
            @pl.when(tile == 0)
            def _():
                finalize(2, g3_ref, be3_ref)
            h1 = bn_relu(0, z1())
            h2 = bn_relu(1, z_next(h1, w2_ref))
            h3 = bn_relu(2, z_next(h2, w3_ref))
            out = z_next(h3, w4_ref) + b4_ref[...]
            out_ref[...] = out.astype(out_ref.dtype)

    return kernel


def reachability_net_forward(o1, o2, params, *, tile_batch=1024):
    """Fused ReachabilityNet forward. o1, o2: [B, D] f32 -> [B, 2] f32 logits."""
    B, D = o1.shape
    in_dim = 2 * D

    # Pre-concat + bf16 inputs (one cheap XLA op; halves input DMA).
    x = jnp.concatenate([o1, o2], axis=1).astype(jnp.bfloat16)   # [B, 2D]

    TB = min(tile_batch, _round_up(max(B, 1), 8))
    B_pad = _round_up(B, TB)
    if B_pad != B:
        x = jnp.pad(x, ((0, B_pad - B), (0, 0)))
    num_tiles = B_pad // TB

    weights = (
        params["w1"], params["g1"], params["be1"],
        params["w2"], params["g2"], params["be2"],
        params["w3"], params["g3"], params["be3"],
        params["w4p"], params["b4p"],
    )
    inputs = (x,) + weights

    const = lambda p, t: (0, 0)
    in_specs = [pl.BlockSpec((TB, in_dim), lambda p, t: (t, 0))] + [
        pl.BlockSpec(w.shape, const) for w in weights
    ]
    # Output blocks are only produced in the last phase; park the block index at 0
    # during the stats phases so no garbage tiles are written back to HBM.
    out_specs = pl.BlockSpec(
        (TB, OUT_PAD),
        lambda p, t: (jnp.where(p == NUM_PHASES - 1, t, 0), 0),
    )

    # Advisory cost estimate (recompute schedule: w1 x4, w2 x3, w3 x2, w4 x1).
    flops = 2 * B_pad * (4 * in_dim * HIDDEN + 5 * HIDDEN * HIDDEN
                         + HIDDEN * OUT_PAD)
    bytes_accessed = sum(int(a.size) * a.dtype.itemsize for a in weights)
    bytes_accessed += NUM_PHASES * int(x.size) * x.dtype.itemsize
    bytes_accessed += B_pad * OUT_PAD * 2
    cost = pl.CostEstimate(flops=flops, transcendentals=3 * HIDDEN,
                           bytes_accessed=bytes_accessed)

    out_padded = pl.pallas_call(
        _make_kernel(B, TB, B_pad),
        out_shape=jax.ShapeDtypeStruct((B_pad, OUT_PAD), jnp.bfloat16),
        grid_spec=pltpu.PrefetchScalarGridSpec(
            num_scalar_prefetch=0,
            grid=(NUM_PHASES, num_tiles),
            in_specs=in_specs,
            out_specs=out_specs,
            scratch_shapes=[
                pltpu.VMEM((6, HIDDEN), jnp.float32),   # sum / sumsq per layer
                pltpu.VMEM((6, HIDDEN), jnp.float32),   # folded scale / shift
            ],
        ),
        compiler_params=pltpu.CompilerParams(
            # Both axes carry state (phase ordering / BN accumulation).
            dimension_semantics=("arbitrary", "arbitrary"),
            # Resident weights (~1.2 MiB) + double-buffered tiles + f32
            # temporaries; comfortably under v7x's 64 MiB physical VMEM.
            vmem_limit_bytes=32 * 1024 * 1024,
        ),
        cost_estimate=cost,
    )(*inputs)
    return out_padded[:B, :OUT_DIM].astype(jnp.float32)


def init_params(key, obs_dim, hidden=HIDDEN, out_dim=OUT_DIM):
    """Deterministic synthetic parameters (same shapes as the torch module).

    Linear weights are stored transposed ([in, out]) and cast to bf16; w4/b4 are
    zero-padded to OUT_PAD lanes. b1..b3 are kept for the reference but are not
    used by the kernel (BatchNorm cancels them exactly).
    """
    keys = jax.random.split(key, 8)
    in_dim = obs_dim * 2

    def lin(kw, kb, fan_in, fan_out):
        scale = 1.0 / jnp.sqrt(fan_in)
        w = jax.random.uniform(kw, (fan_in, fan_out), jnp.float32, -scale, scale)
        b = jax.random.uniform(kb, (1, fan_out), jnp.float32, -scale, scale)
        return w, b

    w1, b1 = lin(keys[0], keys[1], in_dim, hidden)
    w2, b2 = lin(keys[2], keys[3], hidden, hidden)
    w3, b3 = lin(keys[4], keys[5], hidden, hidden)
    w4, b4 = lin(keys[6], keys[7], hidden, out_dim)

    w4p = jnp.zeros((hidden, OUT_PAD), jnp.float32).at[:, :out_dim].set(w4)
    b4p = jnp.zeros((1, OUT_PAD), jnp.float32).at[:, :out_dim].set(b4)

    ones = lambda f: jnp.ones((1, f), jnp.float32)
    zeros = lambda f: jnp.zeros((1, f), jnp.float32)
    bf = jnp.bfloat16

    return dict(
        w1=w1.astype(bf), b1=b1, g1=ones(hidden), be1=zeros(hidden),
        w2=w2.astype(bf), b2=b2, g2=ones(hidden), be2=zeros(hidden),
        w3=w3.astype(bf), b3=b3, g3=ones(hidden), be3=zeros(hidden),
        w4p=w4p.astype(bf), b4p=b4p,
    )


def _reference_forward(o1, o2, params):
    """Pure-JAX reference: PyTorch structure (biases included, standard BN
    formula) with the same bf16-matmul / f32-statistics precision choices."""
    bf = jnp.bfloat16
    x = jnp.concatenate([o1, o2], axis=1).astype(bf)

    def bn_relu(z, g, be):
        mu = jnp.mean(z, axis=0, keepdims=True)
        var = jnp.maximum(jnp.mean(z * z, axis=0, keepdims=True) - mu * mu, 0.0)
        zn = (z - mu) * jax.lax.rsqrt(var + EPS)
        return jnp.maximum(zn * g + be, 0.0)

    z1 = jnp.dot(x, params["w1"], preferred_element_type=jnp.float32) + params["b1"]
    h = bn_relu(z1, params["g1"], params["be1"])
    z2 = jnp.dot(h.astype(bf), params["w2"],
                 preferred_element_type=jnp.float32) + params["b2"]
    h = bn_relu(z2, params["g2"], params["be2"])
    z3 = jnp.dot(h.astype(bf), params["w3"],
                 preferred_element_type=jnp.float32) + params["b3"]
    h = bn_relu(z3, params["g3"], params["be3"])
    out = jnp.dot(h.astype(bf), params["w4p"],
                  preferred_element_type=jnp.float32) + params["b4p"]
    # Kernel stores the padded logits in bf16; mirror that rounding.
    return out[:, :OUT_DIM].astype(bf).astype(jnp.float32)


if __name__ == "__main__":
    key = jax.random.PRNGKey(0)
    k_p, k_o1, k_o2 = jax.random.split(key, 3)

    OBS_DIM = 16   # observation_space
    BATCH = 8      # >= 2 so BatchNorm batch statistics are well-defined

    params = init_params(k_p, OBS_DIM)
    o1 = jax.random.normal(k_o1, (BATCH, OBS_DIM), jnp.float32)
    o2 = jax.random.normal(k_o2, (BATCH, OBS_DIM), jnp.float32)

    # Case 1: single batch tile, no padding.
    out = jax.block_until_ready(reachability_net_forward(o1, o2, params))
    ref = jax.block_until_ready(_reference_forward(o1, o2, params))
    assert out.shape == (BATCH, OUT_DIM)
    assert jnp.allclose(out, ref, atol=1e-2, rtol=1e-2)

    # Case 2: multiple batch tiles + padded last tile (exercises the phased
    # two-pass BN accumulation across tiles and the row mask).
    B2 = 20
    o1b = jax.random.normal(jax.random.PRNGKey(1), (B2, OBS_DIM), jnp.float32)
    o2b = jax.random.normal(jax.random.PRNGKey(2), (B2, OBS_DIM), jnp.float32)
    out2 = jax.block_until_ready(
        reachability_net_forward(o1b, o2b, params, tile_batch=8))
    ref2 = jax.block_until_ready(_reference_forward(o1b, o2b, params))
    assert out2.shape == (B2, OUT_DIM)
    assert jnp.allclose(out2, ref2, atol=1e-2, rtol=1e-2)

    print("KERNEL_OK")
</pallas_src>

<mosaic_0001>
module attributes {stable_mosaic.version = 11 : i64} {
  func.func @kernel(%arg0: i32, %arg1: i32, %arg2: memref<8x32xbf16, #tpu.memory_space<vmem>>, %arg3: memref<32x512xbf16, #tpu.memory_space<vmem>>, %arg4: memref<1x512xf32, #tpu.memory_space<vmem>>, %arg5: memref<1x512xf32, #tpu.memory_space<vmem>>, %arg6: memref<512x512xbf16, #tpu.memory_space<vmem>>, %arg7: memref<1x512xf32, #tpu.memory_space<vmem>>, %arg8: memref<1x512xf32, #tpu.memory_space<vmem>>, %arg9: memref<512x512xbf16, #tpu.memory_space<vmem>>, %arg10: memref<1x512xf32, #tpu.memory_space<vmem>>, %arg11: memref<1x512xf32, #tpu.memory_space<vmem>>, %arg12: memref<512x128xbf16, #tpu.memory_space<vmem>>, %arg13: memref<1x128xf32, #tpu.memory_space<vmem>>, %arg14: memref<8x128xbf16, #tpu.memory_space<vmem>>, %arg15: memref<6x512xf32, #tpu.memory_space<vmem>>, %arg16: memref<6x512xf32, #tpu.memory_space<vmem>>) attributes {dimension_semantics = [#tpu.dimension_semantics<arbitrary>, #tpu.dimension_semantics<arbitrary>], iteration_bounds = array<i64: 4, 1>, scalar_prefetch = 0 : i64, scratch_operands = 2 : i64, tpu.core_type = #tpu.core_type<tc>, window_params = [{transform_indices = @transform_0, window_bounds = array<i64: 8, 32>}, {pipeline_mode = #tpu.pipeline_mode<synchronous>, transform_indices = @transform_1, window_bounds = array<i64: 32, 512>}, {pipeline_mode = #tpu.pipeline_mode<synchronous>, transform_indices = @transform_2, window_bounds = array<i64: 1, 512>}, {pipeline_mode = #tpu.pipeline_mode<synchronous>, transform_indices = @transform_3, window_bounds = array<i64: 1, 512>}, {pipeline_mode = #tpu.pipeline_mode<synchronous>, transform_indices = @transform_4, window_bounds = array<i64: 512, 512>}, {pipeline_mode = #tpu.pipeline_mode<synchronous>, transform_indices = @transform_5, window_bounds = array<i64: 1, 512>}, {pipeline_mode = #tpu.pipeline_mode<synchronous>, transform_indices = @transform_6, window_bounds = array<i64: 1, 512>}, {pipeline_mode = #tpu.pipeline_mode<synchronous>, transform_indices = @transform_7, window_bounds = array<i64: 512, 512>}, {pipeline_mode = #tpu.pipeline_mode<synchronous>, transform_indices = @transform_8, window_bounds = array<i64: 1, 512>}, {pipeline_mode = #tpu.pipeline_mode<synchronous>, transform_indices = @transform_9, window_bounds = array<i64: 1, 512>}, {pipeline_mode = #tpu.pipeline_mode<synchronous>, transform_indices = @transform_10, window_bounds = array<i64: 512, 128>}, {pipeline_mode = #tpu.pipeline_mode<synchronous>, transform_indices = @transform_11, window_bounds = array<i64: 1, 128>}, {transform_indices = @transform_12, window_bounds = array<i64: 8, 128>}]} {
    %c0_i32 = arith.constant 0 : i32
    %0 = arith.cmpi eq, %arg0, %c0_i32 : i32
    %c0_i32_0 = arith.constant 0 : i32
    %1 = arith.cmpi eq, %arg1, %c0_i32_0 : i32
    %2 = arith.andi %0, %1 : i1
    %3 = arith.extui %2 : i1 to i32
    %c0_i32_1 = arith.constant 0 : i32
    %4 = arith.cmpi ne, %3, %c0_i32_1 : i32
    scf.if %4 {
      %cst = arith.constant 0.000000e+00 : f32
      %18 = vector.broadcast %cst : f32 to vector<6x512xf32>
      %c0_8 = arith.constant 0 : index
      %c0_9 = arith.constant 0 : index
      %19 = vector.load %arg15[%c0_8, %c0_9] : memref<6x512xf32, #tpu.memory_space<vmem>>, vector<6x512xf32>
      tpu.vector_store %arg15[%c0_8, %c0_9], %18 {strides = array<i32>} : memref<6x512xf32, #tpu.memory_space<vmem>>, vector<6x512xf32>,
    } else {
    }
    %c0 = arith.constant 0 : index
    %c0_2 = arith.constant 0 : index
    %5 = vector.load %arg2[%c0, %c0_2] : memref<8x32xbf16, #tpu.memory_space<vmem>>, vector<8x32xbf16>
    %c0_i32_3 = arith.constant 0 : i32
    %6 = arith.cmpi eq, %arg0, %c0_i32_3 : i32
    %7 = arith.extui %6 : i1 to i32
    %c0_i32_4 = arith.constant 0 : i32
    %8 = arith.cmpi ne, %7, %c0_i32_4 : i32
    scf.if %8 {
      %c0_8 = arith.constant 0 : index
      %c0_9 = arith.constant 0 : index
      %18 = vector.load %arg3[%c0_8, %c0_9] : memref<32x512xbf16, #tpu.memory_space<vmem>>, vector<32x512xbf16>
      %cst = arith.constant dense<0.000000e+00> : vector<8x512xf32>
      %19 = tpu.matmul %5, %18, %cst {dimension_numbers = #tpu.dot_dimension_numbers<[1], [0], [0], [1], [0, 0, 1, 1], [], []>} : vector<8x32xbf16>, vector<32x512xbf16>, vector<8x512xf32> -> vector<8x512xf32>
      %c0_10 = arith.constant 0 : index
      %c0_11 = arith.constant 0 : index
      %20 = vector.load %arg15[%c0_10, %c0_11] : memref<6x512xf32, #tpu.memory_space<vmem>>, vector<1x512xf32>
      %cst_12 = arith.constant dense<0.000000e+00> : vector<512xf32>
      %21 = vector.multi_reduction <add>, %19, %cst_12 [0] : vector<8x512xf32> to vector<512xf32>
      %22 = vector.shape_cast %21 : vector<512xf32> to vector<1x512xf32>
      %23 = arith.addf %20, %22 : vector<1x512xf32>
      %c0_13 = arith.constant 0 : index
      %c0_14 = arith.constant 0 : index
      %24 = vector.load %arg15[%c0_13, %c0_14] : memref<6x512xf32, #tpu.memory_space<vmem>>, vector<1x512xf32>
      tpu.vector_store %arg15[%c0_13, %c0_14], %23 {strides = array<i32>} : memref<6x512xf32, #tpu.memory_space<vmem>>, vector<1x512xf32>,
      %c1 = arith.constant 1 : index
      %c0_15 = arith.constant 0 : index
      %25 = vector.load %arg15[%c1, %c0_15] : memref<6x512xf32, #tpu.memory_space<vmem>>, vector<1x512xf32>
      %26 = arith.mulf %19, %19 : vector<8x512xf32>
      %cst_16 = arith.constant dense<0.000000e+00> : vector<512xf32>
      %27 = vector.multi_reduction <add>, %26, %cst_16 [0] : vector<8x512xf32> to vector<512xf32>
      %28 = vector.shape_cast %27 : vector<512xf32> to vector<1x512xf32>
      %29 = arith.addf %25, %28 : vector<1x512xf32>
      %c1_17 = arith.constant 1 : index
      %c0_18 = arith.constant 0 : index
      %30 = vector.load %arg15[%c1_17, %c0_18] : memref<6x512xf32, #tpu.memory_space<vmem>>, vector<1x512xf32>
      tpu.vector_store %arg15[%c1_17, %c0_18], %29 {strides = array<i32>} : memref<6x512xf32, #tpu.memory_space<vmem>>, vector<1x512xf32>,
    } else {
    }
    %c1_i32 = arith.constant 1 : i32
    %9 = arith.cmpi eq, %arg0, %c1_i32 : i32
    %10 = arith.extui %9 : i1 to i32
    %c0_i32_5 = arith.constant 0 : i32
    %11 = arith.cmpi ne, %10, %c0_i32_5 : i32
    scf.if %11 {
      %c0_i32_8 = arith.constant 0 : i32
      %18 = arith.cmpi eq, %arg1, %c0_i32_8 : i32
      %19 = arith.extui %18 : i1 to i32
      %c0_i32_9 = arith.constant 0 : i32
      %20 = arith.cmpi ne, %19, %c0_i32_9 : i32
      scf.if %20 {
        %c0_27 = arith.constant 0 : index
        %c0_28 = arith.constant 0 : index
        %45 = vector.load %arg15[%c0_27, %c0_28] : memref<6x512xf32, #tpu.memory_space<vmem>>, vector<1x512xf32>
        %cst_29 = arith.constant 1.250000e-01 : f32
        %46 = vector.broadcast %cst_29 : f32 to vector<1x512xf32>
        %47 = arith.mulf %45, %46 : vector<1x512xf32>
        %c1_30 = arith.constant 1 : index
        %c0_31 = arith.constant 0 : index
        %48 = vector.load %arg15[%c1_30, %c0_31] : memref<6x512xf32, #tpu.memory_space<vmem>>, vector<1x512xf32>
        %cst_32 = arith.constant 1.250000e-01 : f32
        %49 = vector.broadcast %cst_32 : f32 to vector<1x512xf32>
        %50 = arith.mulf %48, %49 : vector<1x512xf32>
        %51 = arith.mulf %47, %47 : vector<1x512xf32>
        %52 = arith.subf %50, %51 : vector<1x512xf32>
        %cst_33 = arith.constant 0.000000e+00 : f32
        %53 = vector.broadcast %cst_33 : f32 to vector<1x512xf32>
        %54 = arith.maximumf %52, %53 : vector<1x512xf32>
        %c0_34 = arith.constant 0 : index
        %c0_35 = arith.constant 0 : index
        %55 = vector.load %arg4[%c0_34, %c0_35] : memref<1x512xf32, #tpu.memory_space<vmem>>, vector<1x512xf32>
        %cst_36 = arith.constant 9.99999974E-6 : f32
        %56 = vector.broadcast %cst_36 : f32 to vector<1x512xf32>
        %57 = arith.addf %54, %56 : vector<1x512xf32>
        %58 = math.rsqrt %57 : vector<1x512xf32>
        %59 = arith.mulf %55, %58 : vector<1x512xf32>
        %c0_37 = arith.constant 0 : index
        %c0_38 = arith.constant 0 : index
        %60 = vector.load %arg16[%c0_37, %c0_38] : memref<6x512xf32, #tpu.memory_space<vmem>>, vector<1x512xf32>
        tpu.vector_store %arg16[%c0_37, %c0_38], %59 {strides = array<i32>} : memref<6x512xf32, #tpu.memory_space<vmem>>, vector<1x512xf32>,
        %c0_39 = arith.constant 0 : index
        %c0_40 = arith.constant 0 : index
        %61 = vector.load %arg5[%c0_39, %c0_40] : memref<1x512xf32, #tpu.memory_space<vmem>>, vector<1x512xf32>
        %62 = arith.mulf %47, %59 : vector<1x512xf32>
        %63 = arith.subf %61, %62 : vector<1x512xf32>
        %c1_41 = arith.constant 1 : index
        %c0_42 = arith.constant 0 : index
        %64 = vector.load %arg16[%c1_41, %c0_42] : memref<6x512xf32, #tpu.memory_space<vmem>>, vector<1x512xf32>
        tpu.vector_store %arg16[%c1_41, %c0_42], %63 {strides = array<i32>} : memref<6x512xf32, #tpu.memory_space<vmem>>, vector<1x512xf32>,
      } else {
      }
      %c0_10 = arith.constant 0 : index
      %c0_11 = arith.constant 0 : index
      %21 = vector.load %arg3[%c0_10, %c0_11] : memref<32x512xbf16, #tpu.memory_space<vmem>>, vector<32x512xbf16>
      %cst = arith.constant dense<0.000000e+00> : vector<8x512xf32>
      %22 = tpu.matmul %5, %21, %cst {dimension_numbers = #tpu.dot_dimension_numbers<[1], [0], [0], [1], [0, 0, 1, 1], [], []>} : vector<8x32xbf16>, vector<32x512xbf16>, vector<8x512xf32> -> vector<8x512xf32>
      %c0_12 = arith.constant 0 : index
      %c0_13 = arith.constant 0 : index
      %23 = vector.load %arg16[%c0_12, %c0_13] : memref<6x512xf32, #tpu.memory_space<vmem>>, vector<1x512xf32>
      %c1 = arith.constant 1 : index
      %c0_14 = arith.constant 0 : index
      %24 = vector.load %arg16[%c1, %c0_14] : memref<6x512xf32, #tpu.memory_space<vmem>>, vector<1x512xf32>
      %25 = vector.broadcast %23 : vector<1x512xf32> to vector<8x512xf32>
      %26 = arith.mulf %22, %25 : vector<8x512xf32>
      %27 = vector.broadcast %24 : vector<1x512xf32> to vector<8x512xf32>
      %28 = arith.addf %26, %27 : vector<8x512xf32>
      %cst_15 = arith.constant 0.000000e+00 : f32
      %29 = vector.broadcast %cst_15 : f32 to vector<8x512xf32>
      %30 = arith.maximumf %28, %29 : vector<8x512xf32>
      %31 = arith.truncf %30 : vector<8x512xf32> to vector<8x512xbf16>
      %c0_16 = arith.constant 0 : index
      %c0_17 = arith.constant 0 : index
      %32 = vector.load %arg6[%c0_16, %c0_17] : memref<512x512xbf16, #tpu.memory_space<vmem>>, vector<512x512xbf16>
      %cst_18 = arith.constant dense<0.000000e+00> : vector<8x512xf32>
      %33 = tpu.matmul %31, %32, %cst_18 {dimension_numbers = #tpu.dot_dimension_numbers<[1], [0], [0], [1], [0, 0, 1, 1], [], []>} : vector<8x512xbf16>, vector<512x512xbf16>, vector<8x512xf32> -> vector<8x512xf32>
      %c2 = arith.constant 2 : index
      %c0_19 = arith.constant 0 : index
      %34 = vector.load %arg15[%c2, %c0_19] : memref<6x512xf32, #tpu.memory_space<vmem>>, vector<1x512xf32>
      %cst_20 = arith.constant dense<0.000000e+00> : vector<512xf32>
      %35 = vector.multi_reduction <add>, %33, %cst_20 [0] : vector<8x512xf32> to vector<512xf32>
      %36 = vector.shape_cast %35 : vector<512xf32> to vector<1x512xf32>
      %37 = arith.addf %34, %36 : vector<1x512xf32>
      %c2_21 = arith.constant 2 : index
      %c0_22 = arith.constant 0 : index
      %38 = vector.load %arg15[%c2_21, %c0_22] : memref<6x512xf32, #tpu.memory_space<vmem>>, vector<1x512xf32>
      tpu.vector_store %arg15[%c2_21, %c0_22], %37 {strides = array<i32>} : memref<6x512xf32, #tpu.memory_space<vmem>>, vector<1x512xf32>,
      %c3 = arith.constant 3 : index
      %c0_23 = arith.constant 0 : index
      %39 = vector.load %arg15[%c3, %c0_23] : memref<6x512xf32, #tpu.memory_space<vmem>>, vector<1x512xf32>
      %40 = arith.mulf %33, %33 : vector<8x512xf32>
      %cst_24 = arith.constant dense<0.000000e+00> : vector<512xf32>
      %41 = vector.multi_reduction <add>, %40, %cst_24 [0] : vector<8x512xf32> to vector<512xf32>
      %42 = vector.shape_cast %41 : vector<512xf32> to vector<1x512xf32>
      %43 = arith.addf %39, %42 : vector<1x512xf32>
      %c3_25 = arith.constant 3 : index
      %c0_26 = arith.constant 0 : index
      %44 = vector.load %arg15[%c3_25, %c0_26] : memref<6x512xf32, #tpu.memory_space<vmem>>, vector<1x512xf32>
      tpu.vector_store %arg15[%c3_25, %c0_26], %43 {strides = array<i32>} : memref<6x512xf32, #tpu.memory_space<vmem>>, vector<1x512xf32>,
    } else {
    }
    %c2_i32 = arith.constant 2 : i32
    %12 = arith.cmpi eq, %arg0, %c2_i32 : i32
    %13 = arith.extui %12 : i1 to i32
    %c0_i32_6 = arith.constant 0 : i32
    %14 = arith.cmpi ne, %13, %c0_i32_6 : i32
    scf.if %14 {
      %c0_i32_8 = arith.constant 0 : i32
      %18 = arith.cmpi eq, %arg1, %c0_i32_8 : i32
      %19 = arith.extui %18 : i1 to i32
      %c0_i32_9 = arith.constant 0 : i32
      %20 = arith.cmpi ne, %19, %c0_i32_9 : i32
      scf.if %20 {
        %c2_33 = arith.constant 2 : index
        %c0_34 = arith.constant 0 : index
        %56 = vector.load %arg15[%c2_33, %c0_34] : memref<6x512xf32, #tpu.memory_space<vmem>>, vector<1x512xf32>
        %cst_35 = arith.constant 1.250000e-01 : f32
        %57 = vector.broadcast %cst_35 : f32 to vector<1x512xf32>
        %58 = arith.mulf %56, %57 : vector<1x512xf32>
        %c3_36 = arith.constant 3 : index
        %c0_37 = arith.constant 0 : index
        %59 = vector.load %arg15[%c3_36, %c0_37] : memref<6x512xf32, #tpu.memory_space<vmem>>, vector<1x512xf32>
        %cst_38 = arith.constant 1.250000e-01 : f32
        %60 = vector.broadcast %cst_38 : f32 to vector<1x512xf32>
        %61 = arith.mulf %59, %60 : vector<1x512xf32>
        %62 = arith.mulf %58, %58 : vector<1x512xf32>
        %63 = arith.subf %61, %62 : vector<1x512xf32>
        %cst_39 = arith.constant 0.000000e+00 : f32
        %64 = vector.broadcast %cst_39 : f32 to vector<1x512xf32>
        %65 = arith.maximumf %63, %64 : vector<1x512xf32>
        %c0_40 = arith.constant 0 : index
        %c0_41 = arith.constant 0 : index
        %66 = vector.load %arg7[%c0_40, %c0_41] : memref<1x512xf32, #tpu.memory_space<vmem>>, vector<1x512xf32>
        %cst_42 = arith.constant 9.99999974E-6 : f32
        %67 = vector.broadcast %cst_42 : f32 to vector<1x512xf32>
        %68 = arith.addf %65, %67 : vector<1x512xf32>
        %69 = math.rsqrt %68 : vector<1x512xf32>
        %70 = arith.mulf %66, %69 : vector<1x512xf32>
        %c2_43 = arith.constant 2 : index
        %c0_44 = arith.constant 0 : index
        %71 = vector.load %arg16[%c2_43, %c0_44] : memref<6x512xf32, #tpu.memory_space<vmem>>, vector<1x512xf32>
        tpu.vector_store %arg16[%c2_43, %c0_44], %70 {strides = array<i32>} : memref<6x512xf32, #tpu.memory_space<vmem>>, vector<1x512xf32>,
        %c0_45 = arith.constant 0 : index
        %c0_46 = arith.constant 0 : index
        %72 = vector.load %arg8[%c0_45, %c0_46] : memref<1x512xf32, #tpu.memory_space<vmem>>, vector<1x512xf32>
        %73 = arith.mulf %58, %70 : vector<1x512xf32>
        %74 = arith.subf %72, %73 : vector<1x512xf32>
        %c3_47 = arith.constant 3 : index
        %c0_48 = arith.constant 0 : index
        %75 = vector.load %arg16[%c3_47, %c0_48] : memref<6x512xf32, #tpu.memory_space<vmem>>, vector<1x512xf32>
        tpu.vector_store %arg16[%c3_47, %c0_48], %74 {strides = array<i32>} : memref<6x512xf32, #tpu.memory_space<vmem>>, vector<1x512xf32>,
      } else {
      }
      %c0_10 = arith.constant 0 : index
      %c0_11 = arith.constant 0 : index
      %21 = vector.load %arg3[%c0_10, %c0_11] : memref<32x512xbf16, #tpu.memory_space<vmem>>, vector<32x512xbf16>
      %cst = arith.constant dense<0.000000e+00> : vector<8x512xf32>
      %22 = tpu.matmul %5, %21, %cst {dimension_numbers = #tpu.dot_dimension_numbers<[1], [0], [0], [1], [0, 0, 1, 1], [], []>} : vector<8x32xbf16>, vector<32x512xbf16>, vector<8x512xf32> -> vector<8x512xf32>
      %c0_12 = arith.constant 0 : index
      %c0_13 = arith.constant 0 : index
      %23 = vector.load %arg16[%c0_12, %c0_13] : memref<6x512xf32, #tpu.memory_space<vmem>>, vector<1x512xf32>
      %c1 = arith.constant 1 : index
      %c0_14 = arith.constant 0 : index
      %24 = vector.load %arg16[%c1, %c0_14] : memref<6x512xf32, #tpu.memory_space<vmem>>, vector<1x512xf32>
      %25 = vector.broadcast %23 : vector<1x512xf32> to vector<8x512xf32>
      %26 = arith.mulf %22, %25 : vector<8x512xf32>
      %27 = vector.broadcast %24 : vector<1x512xf32> to vector<8x512xf32>
      %28 = arith.addf %26, %27 : vector<8x512xf32>
      %cst_15 = arith.constant 0.000000e+00 : f32
      %29 = vector.broadcast %cst_15 : f32 to vector<8x512xf32>
      %30 = arith.maximumf %28, %29 : vector<8x512xf32>
      %31 = arith.truncf %30 : vector<8x512xf32> to vector<8x512xbf16>
      %c0_16 = arith.constant 0 : index
      %c0_17 = arith.constant 0 : index
      %32 = vector.load %arg6[%c0_16, %c0_17] : memref<512x512xbf16, #tpu.memory_space<vmem>>, vector<512x512xbf16>
      %cst_18 = arith.constant dense<0.000000e+00> : vector<8x512xf32>
      %33 = tpu.matmul %31, %32, %cst_18 {dimension_numbers = #tpu.dot_dimension_numbers<[1], [0], [0], [1], [0, 0, 1, 1], [], []>} : vector<8x512xbf16>, vector<512x512xbf16>, vector<8x512xf32> -> vector<8x512xf32>
      %c2 = arith.constant 2 : index
      %c0_19 = arith.constant 0 : index
      %34 = vector.load %arg16[%c2, %c0_19] : memref<6x512xf32, #tpu.memory_space<vmem>>, vector<1x512xf32>
      %c3 = arith.constant 3 : index
      %c0_20 = arith.constant 0 : index
      %35 = vector.load %arg16[%c3, %c0_20] : memref<6x512xf32, #tpu.memory_space<vmem>>, vector<1x512xf32>
      %36 = vector.broadcast %34 : vector<1x512xf32> to vector<8x512xf32>
      %37 = arith.mulf %33, %36 : vector<8x512xf32>
      %38 = vector.broadcast %35 : vector<1x512xf32> to vector<8x512xf32>
      %39 = arith.addf %37, %38 : vector<8x512xf32>
      %cst_21 = arith.constant 0.000000e+00 : f32
      %40 = vector.broadcast %cst_21 : f32 to vector<8x512xf32>
      %41 = arith.maximumf %39, %40 : vector<8x512xf32>
      %42 = arith.truncf %41 : vector<8x512xf32> to vector<8x512xbf16>
      %c0_22 = arith.constant 0 : index
      %c0_23 = arith.constant 0 : index
      %43 = vector.load %arg9[%c0_22, %c0_23] : memref<512x512xbf16, #tpu.memory_space<vmem>>, vector<512x512xbf16>
      %cst_24 = arith.constant dense<0.000000e+00> : vector<8x512xf32>
      %44 = tpu.matmul %42, %43, %cst_24 {dimension_numbers = #tpu.dot_dimension_numbers<[1], [0], [0], [1], [0, 0, 1, 1], [], []>} : vector<8x512xbf16>, vector<512x512xbf16>, vector<8x512xf32> -> vector<8x512xf32>
      %c4 = arith.constant 4 : index
      %c0_25 = arith.constant 0 : index
      %45 = vector.load %arg15[%c4, %c0_25] : memref<6x512xf32, #tpu.memory_space<vmem>>, vector<1x512xf32>
      %cst_26 = arith.constant dense<0.000000e+00> : vector<512xf32>
      %46 = vector.multi_reduction <add>, %44, %cst_26 [0] : vector<8x512xf32> to vector<512xf32>
      %47 = vector.shape_cast %46 : vector<512xf32> to vector<1x512xf32>
      %48 = arith.addf %45, %47 : vector<1x512xf32>
      %c4_27 = arith.constant 4 : index
      %c0_28 = arith.constant 0 : index
      %49 = vector.load %arg15[%c4_27, %c0_28] : memref<6x512xf32, #tpu.memory_space<vmem>>, vector<1x512xf32>
      tpu.vector_store %arg15[%c4_27, %c0_28], %48 {strides = array<i32>} : memref<6x512xf32, #tpu.memory_space<vmem>>, vector<1x512xf32>,
      %c5 = arith.constant 5 : index
      %c0_29 = arith.constant 0 : index
      %50 = vector.load %arg15[%c5, %c0_29] : memref<6x512xf32, #tpu.memory_space<vmem>>, vector<1x512xf32>
      %51 = arith.mulf %44, %44 : vector<8x512xf32>
      %cst_30 = arith.constant dense<0.000000e+00> : vector<512xf32>
      %52 = vector.multi_reduction <add>, %51, %cst_30 [0] : vector<8x512xf32> to vector<512xf32>
      %53 = vector.shape_cast %52 : vector<512xf32> to vector<1x512xf32>
      %54 = arith.addf %50, %53 : vector<1x512xf32>
      %c5_31 = arith.constant 5 : index
      %c0_32 = arith.constant 0 : index
      %55 = vector.load %arg15[%c5_31, %c0_32] : memref<6x512xf32, #tpu.memory_space<vmem>>, vector<1x512xf32>
      tpu.vector_store %arg15[%c5_31, %c0_32], %54 {strides = array<i32>} : memref<6x512xf32, #tpu.memory_space<vmem>>, vector<1x512xf32>,
    } else {
    }
    %c3_i32 = arith.constant 3 : i32
    %15 = arith.cmpi eq, %arg0, %c3_i32 : i32
    %16 = arith.extui %15 : i1 to i32
    %c0_i32_7 = arith.constant 0 : i32
    %17 = arith.cmpi ne, %16, %c0_i32_7 : i32
    scf.if %17 {
      %c0_i32_8 = arith.constant 0 : i32
      %18 = arith.cmpi eq, %arg1, %c0_i32_8 : i32
      %19 = arith.extui %18 : i1 to i32
      %c0_i32_9 = arith.constant 0 : i32
      %20 = arith.cmpi ne, %19, %c0_i32_9 : i32
      scf.if %20 {
        %c4_35 = arith.constant 4 : index
        %c0_36 = arith.constant 0 : index
        %61 = vector.load %arg15[%c4_35, %c0_36] : memref<6x512xf32, #tpu.memory_space<vmem>>, vector<1x512xf32>
        %cst_37 = arith.constant 1.250000e-01 : f32
        %62 = vector.broadcast %cst_37 : f32 to vector<1x512xf32>
        %63 = arith.mulf %61, %62 : vector<1x512xf32>
        %c5_38 = arith.constant 5 : index
        %c0_39 = arith.constant 0 : index
        %64 = vector.load %arg15[%c5_38, %c0_39] : memref<6x512xf32, #tpu.memory_space<vmem>>, vector<1x512xf32>
        %cst_40 = arith.constant 1.250000e-01 : f32
        %65 = vector.broadcast %cst_40 : f32 to vector<1x512xf32>
        %66 = arith.mulf %64, %65 : vector<1x512xf32>
        %67 = arith.mulf %63, %63 : vector<1x512xf32>
        %68 = arith.subf %66, %67 : vector<1x512xf32>
        %cst_41 = arith.constant 0.000000e+00 : f32
        %69 = vector.broadcast %cst_41 : f32 to vector<1x512xf32>
        %70 = arith.maximumf %68, %69 : vector<1x512xf32>
        %c0_42 = arith.constant 0 : index
        %c0_43 = arith.constant 0 : index
        %71 = vector.load %arg10[%c0_42, %c0_43] : memref<1x512xf32, #tpu.memory_space<vmem>>, vector<1x512xf32>
        %cst_44 = arith.constant 9.99999974E-6 : f32
        %72 = vector.broadcast %cst_44 : f32 to vector<1x512xf32>
        %73 = arith.addf %70, %72 : vector<1x512xf32>
        %74 = math.rsqrt %73 : vector<1x512xf32>
        %75 = arith.mulf %71, %74 : vector<1x512xf32>
        %c4_45 = arith.constant 4 : index
        %c0_46 = arith.constant 0 : index
        %76 = vector.load %arg16[%c4_45, %c0_46] : memref<6x512xf32, #tpu.memory_space<vmem>>, vector<1x512xf32>
        tpu.vector_store %arg16[%c4_45, %c0_46], %75 {strides = array<i32>} : memref<6x512xf32, #tpu.memory_space<vmem>>, vector<1x512xf32>,
        %c0_47 = arith.constant 0 : index
        %c0_48 = arith.constant 0 : index
        %77 = vector.load %arg11[%c0_47, %c0_48] : memref<1x512xf32, #tpu.memory_space<vmem>>, vector<1x512xf32>
        %78 = arith.mulf %63, %75 : vector<1x512xf32>
        %79 = arith.subf %77, %78 : vector<1x512xf32>
        %c5_49 = arith.constant 5 : index
        %c0_50 = arith.constant 0 : index
        %80 = vector.load %arg16[%c5_49, %c0_50] : memref<6x512xf32, #tpu.memory_space<vmem>>, vector<1x512xf32>
        tpu.vector_store %arg16[%c5_49, %c0_50], %79 {strides = array<i32>} : memref<6x512xf32, #tpu.memory_space<vmem>>, vector<1x512xf32>,
      } else {
      }
      %c0_10 = arith.constant 0 : index
      %c0_11 = arith.constant 0 : index
      %21 = vector.load %arg3[%c0_10, %c0_11] : memref<32x512xbf16, #tpu.memory_space<vmem>>, vector<32x512xbf16>
      %cst = arith.constant dense<0.000000e+00> : vector<8x512xf32>
      %22 = tpu.matmul %5, %21, %cst {dimension_numbers = #tpu.dot_dimension_numbers<[1], [0], [0], [1], [0, 0, 1, 1], [], []>} : vector<8x32xbf16>, vector<32x512xbf16>, vector<8x512xf32> -> vector<8x512xf32>
      %c0_12 = arith.constant 0 : index
      %c0_13 = arith.constant 0 : index
      %23 = vector.load %arg16[%c0_12, %c0_13] : memref<6x512xf32, #tpu.memory_space<vmem>>, vector<1x512xf32>
      %c1 = arith.constant 1 : index
      %c0_14 = arith.constant 0 : index
      %24 = vector.load %arg16[%c1, %c0_14] : memref<6x512xf32, #tpu.memory_space<vmem>>, vector<1x512xf32>
      %25 = vector.broadcast %23 : vector<1x512xf32> to vector<8x512xf32>
      %26 = arith.mulf %22, %25 : vector<8x512xf32>
      %27 = vector.broadcast %24 : vector<1x512xf32> to vector<8x512xf32>
      %28 = arith.addf %26, %27 : vector<8x512xf32>
      %cst_15 = arith.constant 0.000000e+00 : f32
      %29 = vector.broadcast %cst_15 : f32 to vector<8x512xf32>
      %30 = arith.maximumf %28, %29 : vector<8x512xf32>
      %31 = arith.truncf %30 : vector<8x512xf32> to vector<8x512xbf16>
      %c0_16 = arith.constant 0 : index
      %c0_17 = arith.constant 0 : index
      %32 = vector.load %arg6[%c0_16, %c0_17] : memref<512x512xbf16, #tpu.memory_space<vmem>>, vector<512x512xbf16>
      %cst_18 = arith.constant dense<0.000000e+00> : vector<8x512xf32>
      %33 = tpu.matmul %31, %32, %cst_18 {dimension_numbers = #tpu.dot_dimension_numbers<[1], [0], [0], [1], [0, 0, 1, 1], [], []>} : vector<8x512xbf16>, vector<512x512xbf16>, vector<8x512xf32> -> vector<8x512xf32>
      %c2 = arith.constant 2 : index
      %c0_19 = arith.constant 0 : index
      %34 = vector.load %arg16[%c2, %c0_19] : memref<6x512xf32, #tpu.memory_space<vmem>>, vector<1x512xf32>
      %c3 = arith.constant 3 : index
      %c0_20 = arith.constant 0 : index
      %35 = vector.load %arg16[%c3, %c0_20] : memref<6x512xf32, #tpu.memory_space<vmem>>, vector<1x512xf32>
      %36 = vector.broadcast %34 : vector<1x512xf32> to vector<8x512xf32>
      %37 = arith.mulf %33, %36 : vector<8x512xf32>
      %38 = vector.broadcast %35 : vector<1x512xf32> to vector<8x512xf32>
      %39 = arith.addf %37, %38 : vector<8x512xf32>
      %cst_21 = arith.constant 0.000000e+00 : f32
      %40 = vector.broadcast %cst_21 : f32 to vector<8x512xf32>
      %41 = arith.maximumf %39, %40 : vector<8x512xf32>
      %42 = arith.truncf %41 : vector<8x512xf32> to vector<8x512xbf16>
      %c0_22 = arith.constant 0 : index
      %c0_23 = arith.constant 0 : index
      %43 = vector.load %arg9[%c0_22, %c0_23] : memref<512x512xbf16, #tpu.memory_space<vmem>>, vector<512x512xbf16>
      %cst_24 = arith.constant dense<0.000000e+00> : vector<8x512xf32>
      %44 = tpu.matmul %42, %43, %cst_24 {dimension_numbers = #tpu.dot_dimension_numbers<[1], [0], [0], [1], [0, 0, 1, 1], [], []>} : vector<8x512xbf16>, vector<512x512xbf16>, vector<8x512xf32> -> vector<8x512xf32>
      %c4 = arith.constant 4 : index
      %c0_25 = arith.constant 0 : index
      %45 = vector.load %arg16[%c4, %c0_25] : memref<6x512xf32, #tpu.memory_space<vmem>>, vector<1x512xf32>
      %c5 = arith.constant 5 : index
      %c0_26 = arith.constant 0 : index
      %46 = vector.load %arg16[%c5, %c0_26] : memref<6x512xf32, #tpu.memory_space<vmem>>, vector<1x512xf32>
      %47 = vector.broadcast %45 : vector<1x512xf32> to vector<8x512xf32>
      %48 = arith.mulf %44, %47 : vector<8x512xf32>
      %49 = vector.broadcast %46 : vector<1x512xf32> to vector<8x512xf32>
      %50 = arith.addf %48, %49 : vector<8x512xf32>
      %cst_27 = arith.constant 0.000000e+00 : f32
      %51 = vector.broadcast %cst_27 : f32 to vector<8x512xf32>
      %52 = arith.maximumf %50, %51 : vector<8x512xf32>
      %53 = arith.truncf %52 : vector<8x512xf32> to vector<8x512xbf16>
      %c0_28 = arith.constant 0 : index
      %c0_29 = arith.constant 0 : index
      %54 = vector.load %arg12[%c0_28, %c0_29] : memref<512x128xbf16, #tpu.memory_space<vmem>>, vector<512x128xbf16>
      %cst_30 = arith.constant dense<0.000000e+00> : vector<8x128xf32>
      %55 = tpu.matmul %53, %54, %cst_30 {dimension_numbers = #tpu.dot_dimension_numbers<[1], [0], [0], [1], [0, 0, 1, 1], [], []>} : vector<8x512xbf16>, vector<512x128xbf16>, vector<8x128xf32> -> vector<8x128xf32>
      %c0_31 = arith.constant 0 : index
      %c0_32 = arith.constant 0 : index
      %56 = vector.load %arg13[%c0_31, %c0_32] : memref<1x128xf32, #tpu.memory_space<vmem>>, vector<1x128xf32>
      %57 = vector.broadcast %56 : vector<1x128xf32> to vector<8x128xf32>
      %58 = arith.addf %55, %57 : vector<8x128xf32>
      %59 = arith.truncf %58 : vector<8x128xf32> to vector<8x128xbf16>
      %c0_33 = arith.constant 0 : index
      %c0_34 = arith.constant 0 : index
      %60 = vector.load %arg14[%c0_33, %c0_34] : memref<8x128xbf16, #tpu.memory_space<vmem>>, vector<8x128xbf16>
      tpu.vector_store %arg14[%c0_33, %c0_34], %59 {strides = array<i32>} : memref<8x128xbf16, #tpu.memory_space<vmem>>, vector<8x128xbf16>,
    } else {
    }
    return
  }
  func.func @transform_0(%arg0: i32, %arg1: i32) -> (i32, i32) {
    %c0_i32 = arith.constant 0 : i32
    %c0_i32_0 = arith.constant 0 : i32
    return %arg1, %c0_i32 : i32, i32
  }
  func.func @transform_1(%arg0: i32, %arg1: i32) -> (i32, i32) {
    %c0_i32 = arith.constant 0 : i32
    %c0_i32_0 = arith.constant 0 : i32
    %c0_i32_1 = arith.constant 0 : i32
    return %c0_i32, %c0_i32_0 : i32, i32
  }
  func.func @transform_2(%arg0: i32, %arg1: i32) -> (i32, i32) {
    %c0_i32 = arith.constant 0 : i32
    %c0_i32_0 = arith.constant 0 : i32
    %c0_i32_1 = arith.constant 0 : i32
    return %c0_i32, %c0_i32_0 : i32, i32
  }
  func.func @transform_3(%arg0: i32, %arg1: i32) -> (i32, i32) {
    %c0_i32 = arith.constant 0 : i32
    %c0_i32_0 = arith.constant 0 : i32
    %c0_i32_1 = arith.constant 0 : i32
    return %c0_i32, %c0_i32_0 : i32, i32
  }
  func.func @transform_4(%arg0: i32, %arg1: i32) -> (i32, i32) {
    %c0_i32 = arith.constant 0 : i32
    %c0_i32_0 = arith.constant 0 : i32
    %c0_i32_1 = arith.constant 0 : i32
    return %c0_i32, %c0_i32_0 : i32, i32
  }
  func.func @transform_5(%arg0: i32, %arg1: i32) -> (i32, i32) {
    %c0_i32 = arith.constant 0 : i32
    %c0_i32_0 = arith.constant 0 : i32
    %c0_i32_1 = arith.constant 0 : i32
    return %c0_i32, %c0_i32_0 : i32, i32
  }
  func.func @transform_6(%arg0: i32, %arg1: i32) -> (i32, i32) {
    %c0_i32 = arith.constant 0 : i32
    %c0_i32_0 = arith.constant 0 : i32
    %c0_i32_1 = arith.constant 0 : i32
    return %c0_i32, %c0_i32_0 : i32, i32
  }
  func.func @transform_7(%arg0: i32, %arg1: i32) -> (i32, i32) {
    %c0_i32 = arith.constant 0 : i32
    %c0_i32_0 = arith.constant 0 : i32
    %c0_i32_1 = arith.constant 0 : i32
    return %c0_i32, %c0_i32_0 : i32, i32
  }
  func.func @transform_8(%arg0: i32, %arg1: i32) -> (i32, i32) {
    %c0_i32 = arith.constant 0 : i32
    %c0_i32_0 = arith.constant 0 : i32
    %c0_i32_1 = arith.constant 0 : i32
    return %c0_i32, %c0_i32_0 : i32, i32
  }
  func.func @transform_9(%arg0: i32, %arg1: i32) -> (i32, i32) {
    %c0_i32 = arith.constant 0 : i32
    %c0_i32_0 = arith.constant 0 : i32
    %c0_i32_1 = arith.constant 0 : i32
    return %c0_i32, %c0_i32_0 : i32, i32
  }
  func.func @transform_10(%arg0: i32, %arg1: i32) -> (i32, i32) {
    %c0_i32 = arith.constant 0 : i32
    %c0_i32_0 = arith.constant 0 : i32
    %c0_i32_1 = arith.constant 0 : i32
    return %c0_i32, %c0_i32_0 : i32, i32
  }
  func.func @transform_11(%arg0: i32, %arg1: i32) -> (i32, i32) {
    %c0_i32 = arith.constant 0 : i32
    %c0_i32_0 = arith.constant 0 : i32
    %c0_i32_1 = arith.constant 0 : i32
    return %c0_i32, %c0_i32_0 : i32, i32
  }
  func.func @transform_12(%arg0: i32, %arg1: i32) -> (i32, i32) {
    %c3_i32 = arith.constant 3 : i32
    %0 = arith.cmpi eq, %arg0, %c3_i32 : i32
    %c0_i32 = arith.constant 0 : i32
    %1 = arith.select %0, %arg1, %c0_i32 : i32
    %c0_i32_0 = arith.constant 0 : i32
    %c0_i32_1 = arith.constant 0 : i32
    return %1, %c0_i32_0 : i32, i32
  }
}

</mosaic_0001>

<bundles_post_ra>
// kernel: tpu_custom_call.1
= control target key start
LH: loop header
LB: loop body
LE: loop exit
PB: predicated region body
PF: predicated region fallthrough
CT: control target
= control target key end

     0   :  { %s11492_s0 = inlined_call_operand.hbm [shape: bf16[8,32], index: 0, kind: input, shape index: {}]   ;;  %s11493_s1 = inlined_call_operand.hbm [shape: bf16[32,512], index: 1, kind: input, shape index: {}]   ;;  %s11494_s2 = inlined_call_operand.hbm [shape: f32[1,512], index: 2, kind: input, shape index: {}]   ;;  %s11495_s3 = inlined_call_operand.hbm [shape: f32[1,512], index: 3, kind: input, shape index: {}]   ;;  %s11496_s4 = inlined_call_operand.hbm [shape: bf16[512,512], index: 4, kind: input, shape index: {}]   ;;  %s11497_s5 = inlined_call_operand.vmem [shape: f32[1,512], index: 5, kind: input, shape index: {}]   ;;  %s11498_s6 = inlined_call_operand.hbm [shape: f32[1,512], index: 6, kind: input, shape index: {}]   ;;  %s11499_s7 = inlined_call_operand.hbm [shape: bf16[512,512], index: 7, kind: input, shape index: {}]   ;;  %s11500_s8 = inlined_call_operand.hbm [shape: f32[1,512], index: 8, kind: input, shape index: {}]   ;;  %s11501_s9 = inlined_call_operand.vmem [shape: f32[1,512], index: 9, kind: input, shape index: {}]   ;;  %s11502_s10 = inlined_call_operand.hbm [shape: bf16[512,128], index: 10, kind: input, shape index: {}]   ;;  %s11503_s11 = inlined_call_operand.vmem [shape: f32[1,128], index: 11, kind: input, shape index: {}]   ;;  %s11504_s12 = inlined_call_operand.hbm [shape: bf16[8,128], index: 12, kind: output, shape index: {}]  }
   0x1   :  { %11510 = sst [smem:[#allocation26_spill]] %s11492_s0 }
   0x2   :  { %11511 = sst [smem:[#allocation27_spill]] %s11493_s1 }
   0x3   :  { %11512 = sst [smem:[#allocation28_spill]] %s11495_s3 }
   0x4   :  { %17 = vsyncpa [#allocation5], 0 }
   0x5   :  { %18 = vsyncpa [#allocation8], 0 }
   0x6   :  { %19 = vsyncpa [#allocation11], 0 }
   0x7   :  { %20 = vsyncpa [#allocation14], 0 }
   0x8   :  { %21 = vsyncpa [#allocation17], 0 }
   0x9   :  { %22 = vsyncpa [#allocation6], 0 }
   0xa   :  { %24 = vsyncpa [#allocation6 + $0x1], 0  ;;  %s11098_s21 = smov 0   ;;  %s11100_s22 = smov 0  }
   0xb   :  { %s11102_s23 = smov 0  }
   0xc LB: > { %s11513_s1 = sld [smem:[#allocation27_spill]]  ;;  %s11505_s27 = sadd.s32 4294967295, %s11016_s23   ;;  %s11016_s23 = sphi %s11102_s23, %s30_s23   ;;  %s11012_s22 = sphi %s11100_s22, %s11528_s22   ;;  %s11008_s21 = sphi %s11098_s21, %s11527_s21  }
   0xd   : > { %p6967_p0 = scmp.ge.s32.totalorder %s11016_s23, 1  ;;  %p334_p1 = scmp.lt.s32.totalorder %s11016_s23, 5 }
   0xe   : > { %p11122_p2 = scmp.eq.s32.totalorder %s11505_s27, 0  ;;  %s11018_s13 = smov [#allocation7]  }
   0xf   : > { %p11126_p3 = pnand %p6967_p0, %p334_p1  ;;  %s361_s14 = sshll.u32 %s11018_s13, 4  ;;  %s362_s14 = int_to_ptr.vmem [resolvable:$true] %s361_s14 }
  0x10   : > { %s11516_s3 = sld [smem:[#allocation28_spill]]  ;;  %s415_s24 = sshll.u32 %s11498_s6, 4  ;;  %s416_s24 = int_to_ptr.hbm [resolvable:$true] %s415_s24 }
  0x11   : > { %p10573_p4 = pneg %p11126_p3  ;;  %s11019_s25 = smov [#allocation10]  }
  0x12   : > { %s359_s26 = sshll.u32 %s11513_s1, 4  ;;  %s388_s13 = sshll.u32 %s11019_s25, 4  ;;  %s360_s26 = int_to_ptr.hbm [resolvable:$true] %s359_s26  ;;  %s389_s13 = int_to_ptr.vmem [resolvable:$true] %s388_s13 }
  0x13   : > { %p11137_p5 = pnand %p11122_p2, %p10573_p4  ;;  %s11506_s28 = smov 256  }
  0x14   : > { %s11508_s15 = smov 16   ;;  %s441_s19 = sshll.u32 %s11500_s8, 4  ;;  %s442_s19 = int_to_ptr.hbm [resolvable:$true] %s441_s19 }
  0x15   : > { %10579 = dma.hbm_to_vmem [thread:$0]  (!%p11137_p5), %s360_s26, 1024, %s362_s14, [#allocation8], %s11506_s28, %s11506_s28, %s11508_s15  }
  0x16   : > { %s386_s17 = sshll.u32 %s11516_s3, 4  ;;  %s11022_s20 = smov [#allocation13]   ;;  %s387_s17 = int_to_ptr.hbm [resolvable:$true] %s386_s17 }
  0x17   : > { %10585 = dma.hbm_to_vmem [thread:$0]  (!%p11137_p5), %s387_s17, 64, %s389_s13, [#allocation11]  }
  0x18   : > { %s417_s1 = sshll.u32 %s11022_s20, 4  ;;  %s11023_s25 = smov [#allocation16]   ;;  %s418_s1 = int_to_ptr.vmem [resolvable:$true] %s417_s1 }
  0x19   : > { %10591 = dma.hbm_to_vmem [thread:$0]  (!%p11137_p5), %s416_s24, 64, %s418_s1, [#allocation14]  }
  0x1a   : > { %s443_s3 = sshll.u32 %s11023_s25, 4  ;;  %s42_s26 = sadd.s32 1, %s11012_s22  ;;  %s444_s3 = int_to_ptr.vmem [resolvable:$true] %s443_s3 }
  0x1b   : > { %10597 = dma.hbm_to_vmem [thread:$0]  (!%p11137_p5), %s442_s19, 64, %s444_s3, [#allocation17]  }
  0x1c   : > { %s11518_s0 = sld [smem:[#allocation26_spill]]  ;;  %p44_p6 = scmp.ge.s32.totalorder %s42_s26, 4 }
  0x1d   : > { %s374_s16 = sshll.u32 %s11494_s2, 4  ;;  %s11024_s1 = smov [#allocation4]   ;;  %s375_s16 = int_to_ptr.hbm [resolvable:$true] %s374_s16 }
  0x1e   : > { %s11530_s26 = smov (%p44_p6, %s42_s26), 0  ;;  %s350_s24 = sshll.u32 %s11024_s1, 4  ;;  %s351_s24 = int_to_ptr.vmem [resolvable:$true] %s350_s24 }
  0x1f   : > { %s11025_s3 = smov [#allocation9]   ;;  %s397_s25 = sshll.u32 %s11496_s4, 4  ;;  %s398_s25 = int_to_ptr.hbm [resolvable:$true] %s397_s25 }
  0x20   : > { %s376_s19 = sshll.u32 %s11025_s3, 4  ;;  %s426_s13 = sshll.u32 %s11499_s7, 4  ;;  %s377_s19 = int_to_ptr.vmem [resolvable:$true] %s376_s19  ;;  %s427_s13 = int_to_ptr.hbm [resolvable:$true] %s426_s13 }
  0x21   : > { %10582 = dma.hbm_to_vmem [thread:$0]  (!%p11137_p5), %s375_s16, 64, %s377_s19, [#allocation8]  }
  0x22   : > { %s348_s17 = sshll.u32 %s11518_s0, 4  ;;  %s11026_s1 = smov [#allocation12]   ;;  %s349_s17 = int_to_ptr.hbm [resolvable:$true] %s348_s17 }
  0x23   : > { %10576 = dma.hbm_to_vmem [thread:$0]  (!%p11137_p5), %s349_s17, 64, %s351_s24, [#allocation5]  }
  0x24   : > { %s399_s15 = sshll.u32 %s11026_s1, 4  ;;  %s11519_s17 = smov 16   ;;  %s400_s15 = int_to_ptr.vmem [resolvable:$true] %s399_s15 }
  0x25   : > { %s11520_s24 = smov 256   ;;  %s11027_s3 = smov [#allocation15]  }
  0x26   : > { %10588 = dma.hbm_to_vmem [thread:$0]  (!%p11137_p5), %s398_s25, 16384, %s400_s15, [#allocation11], %s11520_s24, %s11520_s24, %s11519_s17  }
  0x27   : > { %s428_s28 = sshll.u32 %s11027_s3, 4  ;;  %s455_s16 = sshll.u32 %s11502_s10, 4  ;;  %s429_s28 = int_to_ptr.vmem [resolvable:$true] %s428_s28  ;;  %s456_s16 = int_to_ptr.hbm [resolvable:$true] %s455_s16 }
  0x28   : > { %10594 = dma.hbm_to_vmem [thread:$0]  (!%p11137_p5), %s427_s13, 16384, %s429_s28, [#allocation14], %s11520_s24, %s11520_s24, %s11519_s17  }
  0x29   : > { %s11028_s19 = smov [#allocation18]   ;;  %s11029_s27 = smov 64  }
  0x2a   : > { %s457_s14 = sshll.u32 %s11028_s19, 4  ;;  %s11030_s1 = smov 4   ;;  %s458_s14 = int_to_ptr.vmem [resolvable:$true] %s457_s14 }
  0x2b   : > { %10600 = dma.hbm_to_vmem [thread:$0]  (!%p11137_p5), %s456_s16, 4096, %s458_s14, [#allocation17], %s11029_s27, %s11029_s27, %s11030_s1  }
  0x2c   : > { %476 = sbr.rel (%p11126_p3) target bundleno = 1920 (0x780), region = 68 }
  0x31   : > { %10983 = dma.done.wait (%p11122_p2), [#allocation5], 64  }
  0x32   : > { %10985 = vsyncadd (%p11122_p2), [#allocation5], 4294967232 }
  0x33   : > { %10987 = dma.done.wait (%p11122_p2), [#allocation8], 1088  }
  0x34   : > { %10989 = vsyncadd (%p11122_p2), [#allocation8], 4294966208 }
  0x35   : > { %10991 = dma.done.wait (%p11122_p2), [#allocation11], 16448  }
  0x36   : > { %10993 = vsyncadd (%p11122_p2), [#allocation11], 4294950848 }
  0x37   : > { %10995 = dma.done.wait (%p11122_p2), [#allocation14], 16448  }
  0x38   : > { %10997 = vsyncadd (%p11122_p2), [#allocation14], 4294950848 }
  0x39   : > { %10999 = dma.done.wait (%p11122_p2), [#allocation17], 4160  }
  0x3a   : > { %11001 = vsyncadd (%p11122_p2), [#allocation17], 4294963136  ;;  %p557_p7 = scmp.eq.s32.totalorder %s11008_s21, 0 }
  0x3b   : > { %v11031_v0 = vmov (%p557_p7), 0.0  }
  0x3c   : > { %562 = sbr.rel (!%p557_p7) target bundleno = 65 (0x41), region = 108  ;;  %563 = vst [vmem:[#allocation2] sm:$0x3f] (%p557_p7), %v11031_v0 }
  0x3d   : > { %564 = vst [vmem:[#allocation2 + $0x8] sm:$0x3f] (%p557_p7), %v11031_v0 }
  0x3e   : > { %565 = vst [vmem:[#allocation2 + $0x10] sm:$0x3f] (%p557_p7), %v11031_v0 }
  0x3f   : > { %566 = vst [vmem:[#allocation2 + $0x18] sm:$0x3f] (%p557_p7), %v11031_v0 }
  0x41 PF: > { %v11215_v1 = vld [vmem:[#allocation4] sm:$0xf]  ;;  %p6988_p8 = scmp.ne.s32.totalorder %s11008_s21, 0 }
  0x43   : > { %570 = sbr.rel (%p6988_p8) target bundleno = 237 (0xed), region = 112 }
  0x48   : > { %v7007_v2 = vld [vmem:[#allocation7 + $0x20] sm:$0xf]  ;;  %v9835_v3 = vld [vmem:[#allocation7 + $0x2c] sm:$0xf0]  ;;  %v9833_v4 = vld [vmem:[#allocation7 + $0x24] sm:$0xf] }
  0x49   : > { %v7008_v5 = vor.u32 %v9835_v3, %v7007_v2  ;;  %v7009_v6 = vld [vmem:[#allocation7 + $0x30] sm:$0xf0]  ;;  %v7015_v7 = vld [vmem:[#allocation7 + $0x28] sm:$0xf]  ;;  %v9836_v8 = vld [vmem:[#allocation7 + $0x34] sm:$0xf0] }
  0x4a   : > { %v7012_v9 = vor.u32 %v9833_v4, %v7009_v6  ;;  %v7016_v10 = vor.u32 %v9836_v8, %v7015_v7  ;;  %v9834_v11 = vld [vmem:[#allocation7 + $0x2c] sm:$0xf]  ;;  %v7017_v12 = vld [vmem:[#allocation7 + $0x38] sm:$0xf0]  ;;  %v6991_v13 = vld [vmem:[#allocation7] sm:$0xf] }
  0x4b   : > { %629 = vmatpush.bf16.msra.mxu0 %v7008_v5  ;;  %v7020_v14 = vor.u32 %v9834_v11, %v7017_v12  ;;  %v9831_v15 = vld [vmem:[#allocation7 + $0xc] sm:$0xf0]  ;;  %v9829_v16 = vld [vmem:[#allocation7 + $0x4] sm:$0xf]  ;;  %v6993_v17 = vld [vmem:[#allocation7 + $0x10] sm:$0xf0] }
  0x4c   : > { %642 = vmatpush.bf16.msra.mxu1 %v7012_v9  ;;  %655 = vmatpush.bf16.msra.mxu2 %v7016_v10  ;;  %v6992_v18 = vor.u32 %v9831_v15, %v6991_v13  ;;  %v6996_v19 = vor.u32 %v9829_v16, %v6993_v17  ;;  %v6999_v20 = vld [vmem:[#allocation7 + $0x8] sm:$0xf]  ;;  %v9832_v21 = vld [vmem:[#allocation7 + $0x14] sm:$0xf0]  ;;  %v9830_v22 = vld [vmem:[#allocation7 + $0xc] sm:$0xf] }
  0x4d   : > { %668 = vmatpush.bf16.msra.mxu3 %v7020_v14  ;;  %v7000_v23 = vor.u32 %v9832_v21, %v6999_v20  ;;  %v7001_v24 = vld [vmem:[#allocation7 + $0x18] sm:$0xf0]  ;;  %vm619_vm0 = vcmask 261120   ;;  %vm707_vm1 = vcmask 1040384   ;;  %vm709_vm2 = vcmask 1042434  }
  0x4e   : > { %v7004_v25 = vor.u32 %v9830_v22, %v7001_v24  ;;  %vm711_vm3 = vcmask 1041408  }
  0x4f   : > { %630 = vmatpush.bf16.msra.mxu0 %v6992_v18 }
  0x50   : > { %643 = vmatpush.bf16.msra.mxu1 %v6996_v19  ;;  %656 = vmatpush.bf16.msra.mxu2 %v7000_v23  ;;  %v715_v23 = vlaneseq }
  0x51   : > { %669 = vmatpush.bf16.msra.mxu3 %v7004_v25 }
  0x52   : > { %7021 = vmatmul.msk.bf16.vlgmr.msra.gmra.mxu0 %vm619_vm0, %v11215_v1  ;;  %vm717_vm4 = vcmp.lt.s32.totalorder %v715_v23, 512 }
  0x53   : > { %7022 = vmatmul.msk.bf16.vlgmr.msra.gmra.mxu1 %vm619_vm0, %v11215_v1  ;;  %7023 = vmatmul.msk.bf16.vlgmr.msra.gmra.mxu2 %vm619_vm0, %v11215_v1 }
  0x54   : > { %7024 = vmatmul.msk.bf16.vlgmr.msra.gmra.mxu3 %vm619_vm0, %v11215_v1 }
  0xcf   : > { %v632_v26 = vpop.f32.mrf.mxu0 }
  0xd0   : > { %v676_v27 = vrot.slane %v632_v26, 4  ;;  %v723_v28 = vmul.f32 %v632_v26, %v632_v26  ;;  %v645_v29 = vpop.f32.mrf.mxu1 }
  0xd1   : > { %v682_v30 = vrot.slane %v645_v29, 4  ;;  %v724_v31 = vmul.f32 %v645_v29, %v645_v29 }
  0xd2   : > { %v677_v32 = vadd.f32 %v676_v27, %v632_v26  ;;  %v727_v33 = vrot.slane %v723_v28, 4 }
  0xd3   : > { %v683_v34 = vadd.f32 %v682_v30, %v645_v29  ;;  %v733_v35 = vrot.slane %v724_v31, 4  ;;  %v675_v29 = vld [vmem:[#allocation2] ss:$8 sm:$0xf] }
  0xd4   : > { %v728_v36 = vadd.f32 %v727_v33, %v723_v28  ;;  %v678_v39 = vrot.slane %v677_v32, 2 }
  0xd5   : > { %v684_v37 = vrot.slane %v683_v34, 2  ;;  %v734_v38 = vadd.f32 %v733_v35, %v724_v31 }
  0xd6   : > { %v658_v40 = vpop.f32.mrf.mxu2  ;;  %v729_v47 = vrot.slane %v728_v36, 2  ;;  %v679_v54 = vadd.f32 %v678_v39, %v677_v32 }
  0xd7   : > { %v685_v41 = vadd.f32 %v684_v37, %v683_v34  ;;  %v735_v42 = vrot.slane %v734_v38, 2  ;;  %v688_v43 = vrot.slane %v658_v40, 4  ;;  %v725_v44 = vmul.f32 %v658_v40, %v658_v40  ;;  %v671_v45 = vpop.f32.mrf.mxu3  ;;  %v634_v46 = vpop.f32.mrf.mxu0  ;;  %v722_v34 = vld [vmem:[#allocation2 + $0x1] ss:$8 sm:$0xf] }
  0xd8   : > { %v694_v48 = vrot.slane %v671_v45, 4  ;;  %v726_v49 = vmul.f32 %v671_v45, %v671_v45  ;;  %v647_v50 = vpop.f32.mrf.mxu1  ;;  %v730_v60 = vadd.f32 %v729_v47, %v728_v36  ;;  %v680_v3 = vrot.slane %v679_v54, 1 }
  0xd9   : > { %v736_v51 = vadd.f32 %v735_v42, %v734_v38  ;;  %v689_v52 = vadd.f32 %v688_v43, %v658_v40  ;;  %v739_v53 = vrot.slane %v725_v44, 4  ;;  %v686_v55 = vrot.slane %v685_v41, 1 }
  0xda   : > { %v695_v56 = vadd.f32 %v694_v48, %v671_v45  ;;  %v745_v57 = vrot.slane %v726_v49, 4  ;;  %v731_v11 = vrot.slane %v730_v60, 1  ;;  %v681_v17 = vadd.f32 %v680_v3, %v679_v54 }
  0xdb   : > { %v690_v58 = vrot.slane %v689_v52, 2  ;;  %v740_v59 = vadd.f32 %v739_v53, %v725_v44  ;;  %v737_v61 = vrot.slane %v736_v51, 1  ;;  %v687_v4 = vadd.f32 %v686_v55, %v685_v41 }
  0xdc   : > { %v696_v62 = vrot.slane %v695_v56, 2  ;;  %v746_v63 = vadd.f32 %v745_v57, %v726_v49  ;;  %v732_v24 = vadd.f32 %v731_v11, %v730_v60 }
  0xdd   : > { %v691_v0 = vadd.f32 %v690_v58, %v689_v52  ;;  %v741_v2 = vrot.slane %v740_v59, 2  ;;  %v738_v12 = vadd.f32 %v737_v61, %v736_v51  ;;  %v704_v18 = vrot.slane %v687_v4, 7 }
  0xde   : > { %v697_v5 = vadd.f32 %v696_v62, %v695_v56  ;;  %v747_v6 = vrot.slane %v746_v63, 2  ;;  %v660_v7 = vpop.f32.mrf.mxu2 }
  0xdf   : > { %v692_v8 = vrot.slane %v691_v0, 1  ;;  %v742_v9 = vadd.f32 %v741_v2, %v740_v59  ;;  %v673_v10 = vpop.f32.mrf.mxu3  ;;  %v755_v25 = vrot.slane %v738_v12, 7  ;;  %v708_v30 = vsel %vm707_vm1, %v681_v17, %v704_v18 }
  0xe0   : > { %v698_v13 = vrot.slane %v697_v5, 1  ;;  %v748_v14 = vadd.f32 %v747_v6, %v746_v63 }
  0xe1   : > { %v693_v15 = vadd.f32 %v692_v8, %v691_v0  ;;  %v743_v16 = vrot.slane %v742_v9, 1  ;;  %v758_v35 = vsel %vm707_vm1, %v732_v24, %v755_v25 }
  0xe2   : > { %v699_v19 = vadd.f32 %v698_v13, %v697_v5  ;;  %v749_v20 = vrot.slane %v748_v14, 1 }
  0xe3   : > { %v705_v21 = vrot.slane %v693_v15, 6  ;;  %v744_v22 = vadd.f32 %v743_v16, %v742_v9 }
  0xe4   : > { %v706_v26 = vrot.slane %v699_v19, 5  ;;  %v750_v27 = vadd.f32 %v749_v20, %v748_v14 }
  0xe5   : > { %v756_v28 = vrot.slane %v744_v22, 6 }
  0xe6   : > { %v710_v31 = vsel %vm709_vm2, %v705_v21, %v706_v26  ;;  %v757_v32 = vrot.slane %v750_v27, 5 }
  0xe7   : > { %v712_v33 = vsel %vm711_vm3, %v708_v30, %v710_v31 }
  0xe8   : > { %v714_v36 = vadd.f32 %v712_v33, %v675_v29  ;;  %v759_v37 = vsel %vm709_vm2, %v756_v28, %v757_v32 }
  0xe9   : > { %v760_v38 = vsel %vm711_vm3, %v758_v35, %v759_v37 }
  0xea   : > { %719 = vst.msk [vmem:[#allocation2] ss:$8 sm:$0xf] %vm717_vm4, %v714_v36  ;;  %v762_v39 = vadd.f32 %v760_v38, %v722_v34 }
  0xec   : > { %763 = vst.msk [vmem:[#allocation2 + $0x1] ss:$8 sm:$0xf] %vm717_vm4, %v762_v39 }
  0xed PF: > { %p7025_p9 = scmp.ne.s32.totalorder %s11008_s21, 1 }
  0xef   : > { %768 = sbr.rel (%p7025_p9) target bundleno = 617 (0x269), region = 116 }
  0xf4   : > { %v7044_v40 = vld [vmem:[#allocation7 + $0x20] sm:$0xf]  ;;  %v9843_v41 = vld [vmem:[#allocation7 + $0x2c] sm:$0xf0]  ;;  %v9841_v42 = vld [vmem:[#allocation7 + $0x24] sm:$0xf] }
  0xf5   : > { %v7045_v43 = vor.u32 %v9843_v41, %v7044_v40  ;;  %v7046_v44 = vld [vmem:[#allocation7 + $0x30] sm:$0xf0]  ;;  %v7052_v45 = vld [vmem:[#allocation7 + $0x28] sm:$0xf]  ;;  %v9844_v46 = vld [vmem:[#allocation7 + $0x34] sm:$0xf0] }
  0xf6   : > { %v7049_v47 = vor.u32 %v9841_v42, %v7046_v44  ;;  %v7053_v48 = vor.u32 %v9844_v46, %v7052_v45  ;;  %v9842_v49 = vld [vmem:[#allocation7 + $0x2c] sm:$0xf]  ;;  %v7054_v50 = vld [vmem:[#allocation7 + $0x38] sm:$0xf0]  ;;  %v7028_v51 = vld [vmem:[#allocation7] sm:$0xf] }
  0xf7   : > { %863 = vmatpush.bf16.msra.mxu0 %v7045_v43  ;;  %v7057_v52 = vor.u32 %v9842_v49, %v7054_v50  ;;  %v9839_v53 = vld [vmem:[#allocation7 + $0xc] sm:$0xf0]  ;;  %v9837_v54 = vld [vmem:[#allocation7 + $0x4] sm:$0xf]  ;;  %v7030_v55 = vld [vmem:[#allocation7 + $0x10] sm:$0xf0] }
  0xf8   : > { %876 = vmatpush.bf16.msra.mxu1 %v7049_v47  ;;  %889 = vmatpush.bf16.msra.mxu2 %v7053_v48  ;;  %v7029_v56 = vor.u32 %v9839_v53, %v7028_v51  ;;  %v7033_v57 = vor.u32 %v9837_v54, %v7030_v55  ;;  %v7036_v58 = vld [vmem:[#allocation7 + $0x8] sm:$0xf]  ;;  %v9840_v59 = vld [vmem:[#allocation7 + $0x14] sm:$0xf0]  ;;  %v9838_v60 = vld [vmem:[#allocation7 + $0xc] sm:$0xf] }
  0xf9   : > { %902 = vmatpush.bf16.msra.mxu3 %v7057_v52  ;;  %v7037_v61 = vor.u32 %v9840_v59, %v7036_v58  ;;  %v7038_v62 = vld [vmem:[#allocation7 + $0x18] sm:$0xf0]  ;;  %vm853_vm5 = vcmask 261120   ;;  %v7176_v63 = vld [vmem:[#allocation12 + $0xe0] sm:$0xf]  ;;  %vm1955_vm10 = vcmask 1040384  }
  0xfa   : > { %v7041_v0 = vor.u32 %v9838_v60, %v7038_v62  ;;  %v9875_v2 = vld [vmem:[#allocation12 + $0xec] sm:$0xf0]  ;;  %v7304_v3 = vld [vmem:[#allocation12 + $0x1e0] sm:$0xf]  ;;  %vm1957_vm11 = vcmask 1042434   ;;  %vm1959_vm12 = vcmask 1041408  }
  0xfb   : > { %v9907_v4 = vld [vmem:[#allocation12 + $0x1ec] sm:$0xf0]  ;;  %864 = vmatpush.bf16.msra.mxu0 %v7029_v56  ;;  %v7177_v5 = vor.u32 %v9875_v2, %v7176_v63  ;;  %v7160_v7 = vld [vmem:[#allocation12 + $0xc0] sm:$0xf] }
  0xfc   : > { %v7305_v6 = vor.u32 %v9907_v4, %v7304_v3  ;;  %v9871_v8 = vld [vmem:[#allocation12 + $0xcc] sm:$0xf0]  ;;  %v7288_v9 = vld [vmem:[#allocation12 + $0x1c0] sm:$0xf]  ;;  %877 = vmatpush.bf16.msra.mxu1 %v7033_v57  ;;  %890 = vmatpush.bf16.msra.mxu2 %v7037_v61 }
  0xfd   : > { %v9903_v10 = vld [vmem:[#allocation12 + $0x1cc] sm:$0xf0]  ;;  %v7432_v11 = vld [vmem:[#allocation12 + $0x2e0] sm:$0xf]  ;;  %903 = vmatpush.bf16.msra.mxu3 %v7041_v0  ;;  %v7161_v13 = vor.u32 %v9871_v8, %v7160_v7 }
  0xfe   : > { %v9939_v12 = vld [vmem:[#allocation12 + $0x2ec] sm:$0xf0]  ;;  %v7560_v15 = vld [vmem:[#allocation12 + $0x3e0] sm:$0xf]  ;;  %7058 = vmatmul.msk.bf16.vlgmr.msra.gmra.mxu0 %vm853_vm5, %v11215_v1  ;;  %v7289_v18 = vor.u32 %v9903_v10, %v7288_v9 }
  0xff   : > { %1714 = vmatpush.bf16.msrb.mxu0 %v7177_v5  ;;  %v7433_v14 = vor.u32 %v9939_v12, %v7432_v11  ;;  %v9971_v16 = vld [vmem:[#allocation12 + $0x3ec] sm:$0xf0]  ;;  %v7144_v17 = vld [vmem:[#allocation12 + $0xa0] sm:$0xf]  ;;  %7059 = vmatmul.msk.bf16.vlgmr.msra.gmra.mxu1 %vm853_vm5, %v11215_v1 }
 0x100   : > { %1727 = vmatpush.bf16.msrb.mxu1 %v7305_v6  ;;  %v7561_v19 = vor.u32 %v9971_v16, %v7560_v15  ;;  %v9867_v20 = vld [vmem:[#allocation12 + $0xac] sm:$0xf0]  ;;  %v7272_v21 = vld [vmem:[#allocation12 + $0x1a0] sm:$0xf]  ;;  %7060 = vmatmul.msk.bf16.vlgmr.msra.gmra.mxu2 %vm853_vm5, %v11215_v1 }
 0x101   : > { %v9899_v22 = vld [vmem:[#allocation12 + $0x1ac] sm:$0xf0]  ;;  %v7416_v23 = vld [vmem:[#allocation12 + $0x2c0] sm:$0xf]  ;;  %7061 = vmatmul.msk.bf16.vlgmr.msra.gmra.mxu3 %vm853_vm5, %v11215_v1  ;;  %1740 = vmatpush.bf16.msrb.mxu2 %v7433_v14  ;;  %v7145_v28 = vor.u32 %v9867_v20, %v7144_v17 }
 0x102   : > { %v9935_v24 = vld [vmem:[#allocation12 + $0x2cc] sm:$0xf0]  ;;  %v7544_v25 = vld [vmem:[#allocation12 + $0x3c0] sm:$0xf]  ;;  %1753 = vmatpush.bf16.msrb.mxu3 %v7561_v19  ;;  %v7273_v33 = vor.u32 %v9899_v22, %v7272_v21 }
 0x103   : > { %v7417_v26 = vor.u32 %v9935_v24, %v7416_v23  ;;  %v9967_v27 = vld [vmem:[#allocation12 + $0x3cc] sm:$0xf0]  ;;  %1715 = vmatpush.bf16.msrb.mxu0 %v7161_v13  ;;  %v7128_v30 = vld [vmem:[#allocation12 + $0x80] sm:$0xf]  ;;  %v9873_v24 = vld [vmem:[#allocation12 + $0xe4] sm:$0xf] }
 0x104   : > { %v7545_v29 = vor.u32 %v9967_v27, %v7544_v25  ;;  %v9863_v31 = vld [vmem:[#allocation12 + $0x8c] sm:$0xf0]  ;;  %v7400_v32 = vld [vmem:[#allocation12 + $0x2a0] sm:$0xf]  ;;  %1728 = vmatpush.bf16.msrb.mxu1 %v7289_v18  ;;  %v7178_v25 = vld [vmem:[#allocation12 + $0xf0] sm:$0xf0] }
 0x105   : > { %v9931_v34 = vld [vmem:[#allocation12 + $0x2ac] sm:$0xf0]  ;;  %v7528_v35 = vld [vmem:[#allocation12 + $0x3a0] sm:$0xf]  ;;  %1741 = vmatpush.bf16.msrb.mxu2 %v7417_v26  ;;  %v7129_v40 = vor.u32 %v9863_v31, %v7128_v30  ;;  %v9905_v26 = vld [vmem:[#allocation12 + $0x1e4] sm:$0xf] }
 0x106   : > { %v9963_v36 = vld [vmem:[#allocation12 + $0x3ac] sm:$0xf0]  ;;  %v7256_v37 = vld [vmem:[#allocation12 + $0x180] sm:$0xf]  ;;  %v7401_v39 = vor.u32 %v9931_v34, %v7400_v32  ;;  %1754 = vmatpush.bf16.msrb.mxu3 %v7545_v29  ;;  %v7306_v27 = vld [vmem:[#allocation12 + $0x1f0] sm:$0xf0] }
 0x107   : > { %v9895_v38 = vld [vmem:[#allocation12 + $0x18c] sm:$0xf0]  ;;  %1716 = vmatpush.bf16.msrb.mxu0 %v7145_v28  ;;  %v7529_v41 = vor.u32 %v9963_v36, %v7528_v35  ;;  %v7112_v42 = vld [vmem:[#allocation12 + $0x60] sm:$0xf]  ;;  %v9869_v31 = vld [vmem:[#allocation12 + $0xc4] sm:$0xf]  ;;  %v7181_v36 = vor.u32 %v9873_v24, %v7178_v25 }
 0x108   : > { %v7384_v43 = vld [vmem:[#allocation12 + $0x280] sm:$0xf]  ;;  %v9927_v44 = vld [vmem:[#allocation12 + $0x28c] sm:$0xf0]  ;;  %1729 = vmatpush.bf16.msrb.mxu1 %v7273_v33  ;;  %v7257_v45 = vor.u32 %v9895_v38, %v7256_v37  ;;  %v9937_v38 = vld [vmem:[#allocation12 + $0x2e4] sm:$0xf] }
 0x109   : > { %v9859_v46 = vld [vmem:[#allocation12 + $0x6c] sm:$0xf0]  ;;  %v7512_v47 = vld [vmem:[#allocation12 + $0x380] sm:$0xf]  ;;  %1742 = vmatpush.bf16.msrb.mxu2 %v7401_v39  ;;  %v7385_v51 = vor.u32 %v9927_v44, %v7384_v43  ;;  %v7434_v39 = vld [vmem:[#allocation12 + $0x2f0] sm:$0xf0] }
 0x10a   : > { %v9959_v48 = vld [vmem:[#allocation12 + $0x38c] sm:$0xf0]  ;;  %v7240_v49 = vld [vmem:[#allocation12 + $0x160] sm:$0xf]  ;;  %1755 = vmatpush.bf16.msrb.mxu3 %v7529_v41  ;;  %v7113_v52 = vor.u32 %v9859_v46, %v7112_v42  ;;  %v7162_v41 = vld [vmem:[#allocation12 + $0xd0] sm:$0xf0] }
 0x10b   : > { %v9891_v50 = vld [vmem:[#allocation12 + $0x16c] sm:$0xf0]  ;;  %1717 = vmatpush.bf16.msrb.mxu0 %v7129_v40  ;;  %v7513_v53 = vor.u32 %v9959_v48, %v7512_v47  ;;  %v7096_v54 = vld [vmem:[#allocation12 + $0x40] sm:$0xf]  ;;  %v7309_v40 = vor.u32 %v9905_v26, %v7306_v27  ;;  %v9969_v42 = vld [vmem:[#allocation12 + $0x3e4] sm:$0xf]  ;;  %v7437_v48 = vor.u32 %v9937_v38, %v7434_v39  ;;  %v793_v38 = vlaneseq }
 0x10c   : > { %v7368_v55 = vld [vmem:[#allocation12 + $0x260] sm:$0xf]  ;;  %v9923_v56 = vld [vmem:[#allocation12 + $0x26c] sm:$0xf0]  ;;  %1730 = vmatpush.bf16.msrb.mxu1 %v7257_v45  ;;  %v7241_v57 = vor.u32 %v9891_v50, %v7240_v49  ;;  %v7562_v43 = vld [vmem:[#allocation12 + $0x3f0] sm:$0xf0] }
 0x10d   : > { %v9855_v58 = vld [vmem:[#allocation12 + $0x4c] sm:$0xf0]  ;;  %v7496_v59 = vld [vmem:[#allocation12 + $0x360] sm:$0xf]  ;;  %1743 = vmatpush.bf16.msrb.mxu2 %v7385_v51  ;;  %v7369_v63 = vor.u32 %v9923_v56, %v7368_v55  ;;  %v9901_v44 = vld [vmem:[#allocation12 + $0x1c4] sm:$0xf] }
 0x10e   : > { %v9955_v60 = vld [vmem:[#allocation12 + $0x36c] sm:$0xf0]  ;;  %v7224_v61 = vld [vmem:[#allocation12 + $0x140] sm:$0xf]  ;;  %1756 = vmatpush.bf16.msrb.mxu3 %v7513_v53  ;;  %v7097_v0 = vor.u32 %v9855_v58, %v7096_v54  ;;  %v7290_v45 = vld [vmem:[#allocation12 + $0x1d0] sm:$0xf0]  ;;  %v7565_v53 = vor.u32 %v9969_v42, %v7562_v43 }
 0x10f   : > { %v9887_v62 = vld [vmem:[#allocation12 + $0x14c] sm:$0xf0]  ;;  %1718 = vmatpush.bf16.msrb.mxu0 %v7113_v52  ;;  %v7497_v2 = vor.u32 %v9955_v60, %v7496_v59  ;;  %v7080_v3 = vld [vmem:[#allocation12 + $0x20] sm:$0xf]  ;;  %v9865_v49 = vld [vmem:[#allocation12 + $0xa4] sm:$0xf]  ;;  %v7165_v52 = vor.u32 %v9869_v31, %v7162_v41 }
 0x110   : > { %v7352_v4 = vld [vmem:[#allocation12 + $0x240] sm:$0xf]  ;;  %v9919_v5 = vld [vmem:[#allocation12 + $0x24c] sm:$0xf0]  ;;  %1731 = vmatpush.bf16.msrb.mxu1 %v7241_v57  ;;  %v7225_v6 = vor.u32 %v9887_v62, %v7224_v61  ;;  %v7146_v50 = vld [vmem:[#allocation12 + $0xb0] sm:$0xf0]  ;;  %v7293_v57 = vor.u32 %v9901_v44, %v7290_v45 }
 0x111   : > { %v9851_v7 = vld [vmem:[#allocation12 + $0x2c] sm:$0xf0]  ;;  %v7480_v8 = vld [vmem:[#allocation12 + $0x340] sm:$0xf]  ;;  %1744 = vmatpush.bf16.msrb.mxu2 %v7369_v63  ;;  %v7353_v12 = vor.u32 %v9919_v5, %v7352_v4  ;;  %v9933_v51 = vld [vmem:[#allocation12 + $0x2c4] sm:$0xf] }
 0x112   : > { %v9951_v9 = vld [vmem:[#allocation12 + $0x34c] sm:$0xf0]  ;;  %v7208_v10 = vld [vmem:[#allocation12 + $0x120] sm:$0xf]  ;;  %1757 = vmatpush.bf16.msrb.mxu3 %v7497_v2  ;;  %v7081_v14 = vor.u32 %v9851_v7, %v7080_v3  ;;  %v7418_v54 = vld [vmem:[#allocation12 + $0x2d0] sm:$0xf0]  ;;  %v7149_v2 = vor.u32 %v9865_v49, %v7146_v50 }
 0x113   : > { %v9883_v11 = vld [vmem:[#allocation12 + $0x12c] sm:$0xf0]  ;;  %v7064_v13 = vld [vmem:[#allocation12] sm:$0xf]  ;;  %1719 = vmatpush.bf16.msrb.mxu0 %v7097_v0  ;;  %v7481_v15 = vor.u32 %v9951_v9, %v7480_v8  ;;  %v9965_v55 = vld [vmem:[#allocation12 + $0x3c4] sm:$0xf]  ;;  %v7421_v0 = vor.u32 %v9933_v51, %v7418_v54 }
 0x114   : > { %v9847_v16 = vld [vmem:[#allocation12 + $0xc] sm:$0xf0]  ;;  %v7336_v17 = vld [vmem:[#allocation12 + $0x220] sm:$0xf]  ;;  %1732 = vmatpush.bf16.msrb.mxu1 %v7225_v6  ;;  %v7209_v19 = vor.u32 %v9883_v11, %v7208_v10  ;;  %v7546_v56 = vld [vmem:[#allocation12 + $0x3d0] sm:$0xf0] }
 0x115   : > { %v9915_v18 = vld [vmem:[#allocation12 + $0x22c] sm:$0xf0]  ;;  %v7192_v20 = vld [vmem:[#allocation12 + $0x100] sm:$0xf]  ;;  %1745 = vmatpush.bf16.msrb.mxu2 %v7353_v12  ;;  %v7065_v29 = vor.u32 %v9847_v16, %v7064_v13  ;;  %v9897_v60 = vld [vmem:[#allocation12 + $0x1a4] sm:$0xf]  ;;  %v7549_v3 = vor.u32 %v9965_v55, %v7546_v56 }
 0x116   : > { %v7464_v21 = vld [vmem:[#allocation12 + $0x320] sm:$0xf]  ;;  %v9947_v22 = vld [vmem:[#allocation12 + $0x32c] sm:$0xf0]  ;;  %v7337_v28 = vor.u32 %v9915_v18, %v7336_v17  ;;  %1758 = vmatpush.bf16.msrb.mxu3 %v7481_v15  ;;  %v7274_v61 = vld [vmem:[#allocation12 + $0x1b0] sm:$0xf0] }
 0x117   : > { %v9879_v23 = vld [vmem:[#allocation12 + $0x10c] sm:$0xf0]  ;;  %1720 = vmatpush.bf16.msrb.mxu0 %v7081_v14  ;;  %v7465_v30 = vor.u32 %v9947_v22, %v7464_v21  ;;  %v7320_v32 = vld [vmem:[#allocation12 + $0x200] sm:$0xf]  ;;  %v9861_v4 = vld [vmem:[#allocation12 + $0x84] sm:$0xf]  ;;  %v7277_v8 = vor.u32 %v9897_v60, %v7274_v61 }
 0x118   : > { %v9911_v33 = vld [vmem:[#allocation12 + $0x20c] sm:$0xf0]  ;;  %v7448_v34 = vld [vmem:[#allocation12 + $0x300] sm:$0xf]  ;;  %1733 = vmatpush.bf16.msrb.mxu1 %v7209_v19  ;;  %v7193_v35 = vor.u32 %v9879_v23, %v7192_v20  ;;  %v9929_v5 = vld [vmem:[#allocation12 + $0x2a4] sm:$0xf] }
 0x119   : > { %v9943_v37 = vld [vmem:[#allocation12 + $0x30c] sm:$0xf0]  ;;  %1746 = vmatpush.bf16.msrb.mxu2 %v7337_v28  ;;  %v7321_v46 = vor.u32 %v9911_v33, %v7320_v32  ;;  %v772_v58 = vld [vmem:[#allocation2] ss:$8 sm:$0xf]  ;;  %vm11241_vm9 = vcmp.lt.s32.totalorder %v793_v38, 512 }
 0x11a   : > { %1759 = vmatpush.bf16.msrb.mxu3 %v7465_v30  ;;  %v7449_v47 = vor.u32 %v9943_v37, %v7448_v34  ;;  %v775_v59 = vld [vmem:[#allocation2 + $0x1] ss:$8 sm:$0xf]  ;;  %v11237_v62 = vmul.f32 0.125, %v772_v58  ;;  %v780_v39 = vld [vmem:[#allocation9] sm:$0xf] }
 0x11b   : > { %1721 = vmatpush.bf16.msrb.mxu0 %v7065_v29  ;;  %v776_v63 = vmul.f32 0.125, %v775_v59  ;;  %v7402_v6 = vld [vmem:[#allocation12 + $0x2b0] sm:$0xf0]  ;;  %v9961_v10 = vld [vmem:[#allocation12 + $0x3a4] sm:$0xf] }
 0x11c   : > { %1734 = vmatpush.bf16.msrb.mxu1 %v7193_v35  ;;  %v777_v7 = vmul.f32 %v11237_v62, %v11237_v62  ;;  %v7130_v9 = vld [vmem:[#allocation12 + $0x90] sm:$0xf0]  ;;  %v9893_v12 = vld [vmem:[#allocation12 + $0x184] sm:$0xf]  ;;  %v7405_v15 = vor.u32 %v9929_v5, %v7402_v6  ;;  %v799_v44 = vld [vmem:[#allocation10] sm:$0xf] }
 0x11d   : > { %1747 = vmatpush.bf16.msrb.mxu2 %v7321_v46  ;;  %v7530_v11 = vld [vmem:[#allocation12 + $0x3b0] sm:$0xf0]  ;;  %v9857_v16 = vld [vmem:[#allocation12 + $0x64] sm:$0xf]  ;;  %v7133_v17 = vor.u32 %v9861_v4, %v7130_v9  ;;  %v9876_v38 = vld [vmem:[#allocation12 + $0xf4] sm:$0xf0] }
 0x11e   : > { %1760 = vmatpush.bf16.msrb.mxu3 %v7449_v47  ;;  %v7258_v13 = vld [vmem:[#allocation12 + $0x190] sm:$0xf0]  ;;  %v778_v14 = vsub.f32 %v776_v63, %v777_v7  ;;  %v7533_v18 = vor.u32 %v9961_v10, %v7530_v11  ;;  %v9925_v19 = vld [vmem:[#allocation12 + $0x284] sm:$0xf] }
 0x11f   : > { %1766 = vmatpush.bf16.msra.mxu0 %v7181_v36  ;;  %v7386_v20 = vld [vmem:[#allocation12 + $0x290] sm:$0xf0]  ;;  %v7261_v22 = vor.u32 %v9893_v12, %v7258_v13  ;;  %v9957_v24 = vld [vmem:[#allocation12 + $0x384] sm:$0xf] }
 0x120   : > { %1779 = vmatpush.bf16.msra.mxu1 %v7309_v40  ;;  %v779_v21 = vmax.f32 %v778_v14, 0.0  ;;  %v7114_v23 = vld [vmem:[#allocation12 + $0x70] sm:$0xf0]  ;;  %v9889_v26 = vld [vmem:[#allocation12 + $0x164] sm:$0xf]  ;;  %v7389_v29 = vor.u32 %v9925_v19, %v7386_v20 }
 0x121   : > { %1792 = vmatpush.bf16.msra.mxu2 %v7437_v48  ;;  %v7514_v25 = vld [vmem:[#allocation12 + $0x390] sm:$0xf0]  ;;  %v7117_v30 = vor.u32 %v9857_v16, %v7114_v23  ;;  %v9853_v47 = vld [vmem:[#allocation12 + $0x44] sm:$0xf] }
 0x122   : > { %1805 = vmatpush.bf16.msra.mxu3 %v7565_v53  ;;  %v7242_v27 = vld [vmem:[#allocation12 + $0x170] sm:$0xf0]  ;;  %v781_v28 = vadd.f32 1e-05, %v779_v21  ;;  %v7517_v31 = vor.u32 %v9957_v24, %v7514_v25  ;;  %v9885_v49 = vld [vmem:[#allocation12 + $0x144] sm:$0xf] }
 0x123   : > { %1767 = vmatpush.bf16.msra.mxu0 %v7165_v52  ;;  %v7245_v32 = vor.u32 %v9889_v26, %v7242_v27  ;;  %v7098_v48 = vld [vmem:[#allocation12 + $0x50] sm:$0xf0]  ;;  %v9921_v53 = vld [vmem:[#allocation12 + $0x264] sm:$0xf] }
 0x124   : > { %1780 = vmatpush.bf16.msra.mxu1 %v7293_v57  ;;  %10665 = vrsqrt.f32 %v781_v28  ;;  %vm788_vm6 = vweird.f32 %v781_v28  ;;  %v7101_v50 = vor.u32 %v9853_v47, %v7098_v48  ;;  %v7226_v51 = vld [vmem:[#allocation12 + $0x150] sm:$0xf0]  ;;  %v9953_v55 = vld [vmem:[#allocation12 + $0x364] sm:$0xf] }
 0x125   : > { %1793 = vmatpush.bf16.msra.mxu2 %v7421_v0  ;;  %v7229_v52 = vor.u32 %v9885_v49, %v7226_v51  ;;  %v7370_v54 = vld [vmem:[#allocation12 + $0x270] sm:$0xf0]  ;;  %v9849_v58 = vld [vmem:[#allocation12 + $0x24] sm:$0xf] }
 0x126   : > { %1806 = vmatpush.bf16.msra.mxu3 %v7549_v3  ;;  %v7373_v56 = vor.u32 %v9921_v53, %v7370_v54  ;;  %v7498_v57 = vld [vmem:[#allocation12 + $0x370] sm:$0xf0]  ;;  %v9881_v61 = vld [vmem:[#allocation12 + $0x124] sm:$0xf]  ;;  %v7168_v53 = vld [vmem:[#allocation12 + $0xc8] sm:$0xf] }
 0x127   : > { %1768 = vmatpush.bf16.msra.mxu0 %v7149_v2  ;;  %v7501_v59 = vor.u32 %v9953_v55, %v7498_v57  ;;  %v7082_v60 = vld [vmem:[#allocation12 + $0x30] sm:$0xf0]  ;;  %v9917_v2 = vld [vmem:[#allocation12 + $0x244] sm:$0xf]  ;;  %v9872_v54 = vld [vmem:[#allocation12 + $0xd4] sm:$0xf0] }
 0x128   : > { %1781 = vmatpush.bf16.msra.mxu1 %v7277_v8  ;;  %v7085_v63 = vor.u32 %v9849_v58, %v7082_v60  ;;  %v7354_v3 = vld [vmem:[#allocation12 + $0x250] sm:$0xf0]  ;;  %v9949_v4 = vld [vmem:[#allocation12 + $0x344] sm:$0xf]  ;;  %v9904_v60 = vld [vmem:[#allocation12 + $0x1d4] sm:$0xf0] }
 0x129   : > { %1794 = vmatpush.bf16.msra.mxu2 %v7405_v15  ;;  %v7357_v5 = vor.u32 %v9917_v2, %v7354_v3  ;;  %v7482_v6 = vld [vmem:[#allocation12 + $0x350] sm:$0xf0]  ;;  %v9845_v8 = vld [vmem:[#allocation12 + $0x4] sm:$0xf]  ;;  %v7440_v2 = vld [vmem:[#allocation12 + $0x2e8] sm:$0xf] }
 0x12a   : > { %1807 = vmatpush.bf16.msra.mxu3 %v7533_v18  ;;  %v10666_v33 = vpop.eup %10665  ;;  %v7485_v7 = vor.u32 %v9949_v4, %v7482_v6  ;;  %v7066_v9 = vld [vmem:[#allocation12 + $0x10] sm:$0xf0]  ;;  %v9877_v11 = vld [vmem:[#allocation12 + $0x104] sm:$0xf]  ;;  %v9940_v3 = vld [vmem:[#allocation12 + $0x2f4] sm:$0xf0] }
 0x12b   : > { %1769 = vmatpush.bf16.msra.mxu0 %v7133_v17  ;;  %v783_v34 = vmul.f32 %v10666_v33, %v781_v28  ;;  %vm789_vm7 = vweird.f32 %v10666_v33  ;;  %v7069_v10 = vor.u32 %v9845_v8, %v7066_v9  ;;  %v7194_v12 = vld [vmem:[#allocation12 + $0x110] sm:$0xf0]  ;;  %v9913_v14 = vld [vmem:[#allocation12 + $0x224] sm:$0xf]  ;;  %v7568_v4 = vld [vmem:[#allocation12 + $0x3e8] sm:$0xf] }
 0x12c   : > { %1782 = vmatpush.bf16.msra.mxu1 %v7261_v22  ;;  %vm790_vm8 = vmor %vm788_vm6, %vm789_vm7  ;;  %v7197_v13 = vor.u32 %v9877_v11, %v7194_v12  ;;  %v7338_v15 = vld [vmem:[#allocation12 + $0x230] sm:$0xf0]  ;;  %v9945_v16 = vld [vmem:[#allocation12 + $0x324] sm:$0xf] }
 0x12d   : > { %1795 = vmatpush.bf16.msra.mxu2 %v7389_v29  ;;  %v784_v35 = vmul.f32 %v10666_v33, %v783_v34  ;;  %v7466_v17 = vld [vmem:[#allocation12 + $0x330] sm:$0xf0]  ;;  %v7341_v18 = vor.u32 %v9913_v14, %v7338_v15  ;;  %v9909_v20 = vld [vmem:[#allocation12 + $0x204] sm:$0xf]  ;;  %v7152_v8 = vld [vmem:[#allocation12 + $0xa8] sm:$0xf]  ;;  %v7441_v14 = vor.u32 %v9940_v3, %v7440_v2 }
 0x12e   : > { %1808 = vmatpush.bf16.msra.mxu3 %v7517_v31  ;;  %v7469_v19 = vor.u32 %v9945_v16, %v7466_v17  ;;  %v7322_v21 = vld [vmem:[#allocation12 + $0x210] sm:$0xf0]  ;;  %v9941_v23 = vld [vmem:[#allocation12 + $0x304] sm:$0xf]  ;;  %v9868_v9 = vld [vmem:[#allocation12 + $0xb4] sm:$0xf0] }
 0x12f   : > { %1770 = vmatpush.bf16.msra.mxu0 %v7117_v30  ;;  %v785_v36 = vmul.f32 0.5, %v784_v35  ;;  %v7325_v22 = vor.u32 %v9909_v20, %v7322_v21  ;;  %v7450_v24 = vld [vmem:[#allocation12 + $0x310] sm:$0xf0]  ;;  %v7280_v11 = vld [vmem:[#allocation12 + $0x1a8] sm:$0xf]  ;;  %v7153_v17 = vor.u32 %v9868_v9, %v7152_v8 }
 0x130   : > { %1783 = vmatpush.bf16.msra.mxu1 %v7245_v32  ;;  %v7453_v25 = vor.u32 %v9941_v23, %v7450_v24  ;;  %v9900_v12 = vld [vmem:[#allocation12 + $0x1b4] sm:$0xf0]  ;;  %v7552_v20 = vld [vmem:[#allocation12 + $0x3c8] sm:$0xf] }
 0x131   : > { %v786_v37 = vsub.f32 1.5, %v785_v36  ;;  %1796 = vmatpush.bf16.msra.mxu2 %v7373_v56  ;;  %v7281_v23 = vor.u32 %v9900_v12, %v7280_v11  ;;  %v9968_v24 = vld [vmem:[#allocation12 + $0x3d4] sm:$0xf0]  ;;  %v7088_v2 = vld [vmem:[#allocation12 + $0x28] sm:$0xf] }
 0x132   : > { %1809 = vmatpush.bf16.msra.mxu3 %v7501_v59  ;;  %v7296_v59 = vld [vmem:[#allocation12 + $0x1c8] sm:$0xf]  ;;  %v9852_v3 = vld [vmem:[#allocation12 + $0x34] sm:$0xf0] }
 0x133   : > { %v787_v40 = vmul.f32 %v10666_v33, %v786_v37  ;;  %1771 = vmatpush.bf16.msra.mxu0 %v7101_v50  ;;  %v7184_v37 = vld [vmem:[#allocation12 + $0xe8] sm:$0xf]  ;;  %v7297_v6 = vor.u32 %v9904_v60, %v7296_v59  ;;  %v9924_v60 = vld [vmem:[#allocation12 + $0x274] sm:$0xf0]  ;;  %v7089_v11 = vor.u32 %v9852_v3, %v7088_v2  ;;  %v9966_v2 = vld [vmem:[#allocation12 + $0x3cc] sm:$0xf] }
 0x134   : > { %1784 = vmatpush.bf16.msra.mxu1 %v7229_v52  ;;  %v7185_v48 = vor.u32 %v9876_v38, %v7184_v37  ;;  %v9964_v37 = vld [vmem:[#allocation12 + $0x3b4] sm:$0xf0]  ;;  %v7120_v38 = vld [vmem:[#allocation12 + $0x68] sm:$0xf]  ;;  %v7554_v3 = vld [vmem:[#allocation12 + $0x3d8] sm:$0xf0] }
 0x135   : > { %v791_v41 = vsel %vm790_vm8, %v10666_v33, %v787_v40  ;;  %1797 = vmatpush.bf16.msra.mxu2 %v7357_v5  ;;  %v7376_v59 = vld [vmem:[#allocation12 + $0x268] sm:$0xf]  ;;  %v9920_v9 = vld [vmem:[#allocation12 + $0x254] sm:$0xf0] }
 0x136   : > { %v792_v43 = vmul.f32 %v791_v41, %v780_v39  ;;  %1810 = vmatpush.bf16.msra.mxu3 %v7485_v7  ;;  %v7312_v41 = vld [vmem:[#allocation12 + $0x1e8] sm:$0xf]  ;;  %v9972_v7 = vld [vmem:[#allocation12 + $0x3f4] sm:$0xf0] }
 0x137   : > { %1772 = vmatpush.bf16.msra.mxu0 %v7085_v63  ;;  %v7569_v16 = vor.u32 %v9972_v7, %v7568_v4  ;;  %v7216_v4 = vld [vmem:[#allocation12 + $0x128] sm:$0xf] }
 0x138   : > { %797 = vst.msk [vmem:[#allocation3] ss:$8 sm:$0xf] %vm11241_vm9, %v792_v43  ;;  %v800_v45 = vmul.f32 %v792_v43, %v11237_v62  ;;  %v7210_v62 = vld [vmem:[#allocation12 + $0x130] sm:$0xf0] }
 0x139   : > { %v7213_v0 = vor.u32 %v9881_v61, %v7210_v62  ;;  %1798 = vmatpush.bf16.msra.mxu2 %v7341_v18  ;;  %v9908_v43 = vld [vmem:[#allocation12 + $0x1f4] sm:$0xf0]  ;;  %v7424_v18 = vld [vmem:[#allocation12 + $0x2c8] sm:$0xf] }
 0x13a   : > { %v801_v46 = vsub.f32 %v799_v44, %v800_v45  ;;  %1811 = vmatpush.bf16.msra.mxu3 %v7469_v19  ;;  %v7313_v52 = vor.u32 %v9908_v43, %v7312_v41  ;;  %v9936_v19 = vld [vmem:[#allocation12 + $0x2d4] sm:$0xf0]  ;;  %v7360_v8 = vld [vmem:[#allocation12 + $0x248] sm:$0xf] }
 0x13b   : > { %1785 = vmatpush.bf16.msra.mxu1 %v7213_v0  ;;  %1773 = vmatpush.bf16.msra.mxu0 %v7069_v10  ;;  %v7169_v0 = vor.u32 %v9872_v54, %v7168_v53  ;;  %v9892_v41 = vld [vmem:[#allocation12 + $0x174] sm:$0xf0]  ;;  %v7232_v54 = vld [vmem:[#allocation12 + $0x148] sm:$0xf] }
 0x13c   : > { %803 = vst.msk [vmem:[#allocation3 + $0x1] ss:$8 sm:$0xf] %vm11241_vm9, %v801_v46  ;;  %v9856_v53 = vld [vmem:[#allocation12 + $0x54] sm:$0xf0] }
 0x13d   : > { %1799 = vmatpush.bf16.msra.mxu2 %v7325_v22 }
 0x13e   : > { %1812 = vmatpush.bf16.msra.mxu3 %v7453_v25  ;;  %v7136_v25 = vld [vmem:[#allocation12 + $0x88] sm:$0xf] }
 0x13f   : > { %1786 = vmatpush.bf16.msra.mxu1 %v7197_v13  ;;  %v909_v26 = vld [vmem:[#allocation3] ss:$8 sm:$0xf] }
 0x140   : > { %v913_v28 = vperm.slane %v909_v26, 0  ;;  %v914_v29 = vperm.slane %v909_v26, 1  ;;  %v915_v40 = vperm.slane %v909_v26, 2  ;;  %v916_v45 = vperm.slane %v909_v26, 3  ;;  %v9864_v26 = vld [vmem:[#allocation12 + $0x94] sm:$0xf0] }
 0x143   : > { %v911_v27 = vld [vmem:[#allocation3 + $0x1] ss:$8 sm:$0xf] }
 0x144   : > { %v926_v30 = vperm.slane %v911_v27, 0  ;;  %v927_v32 = vperm.slane %v911_v27, 1  ;;  %v928_v47 = vperm.slane %v911_v27, 2  ;;  %v929_v51 = vperm.slane %v911_v27, 3 }
 0x17b   : > { %v866_v31 = vpop.f32.mrf.mxu0 }
 0x17c   : > { %v921_v33 = vmul.f32 %v913_v28, %v866_v31  ;;  %v879_v34 = vpop.f32.mrf.mxu1  ;;  %v7264_v28 = vld [vmem:[#allocation12 + $0x188] sm:$0xf]  ;;  %v7553_v31 = vor.u32 %v9968_v24, %v7552_v20  ;;  %v7361_v20 = vor.u32 %v9920_v9, %v7360_v8  ;;  %v7314_v24 = vld [vmem:[#allocation12 + $0x1f8] sm:$0xf0]  ;;  %v7557_v9 = vor.u32 %v9966_v2, %v7554_v3 }
 0x17d   : > { %v922_v35 = vmul.f32 %v914_v29, %v879_v34  ;;  %v9896_v29 = vld [vmem:[#allocation12 + $0x194] sm:$0xf0] }
 0x17e   : > { %v934_v36 = vadd.f32 %v926_v30, %v921_v33  ;;  %v7425_v30 = vor.u32 %v9936_v19, %v7424_v18  ;;  %v7408_v33 = vld [vmem:[#allocation12 + $0x2a8] sm:$0xf]  ;;  %v9932_v34 = vld [vmem:[#allocation12 + $0x2b4] sm:$0xf0]  ;;  %v9874_v19 = vld [vmem:[#allocation12 + $0xec] sm:$0xf] }
 0x17f   : > { %v935_v39 = vadd.f32 %v927_v32, %v922_v35  ;;  %v7137_v32 = vor.u32 %v9864_v26, %v7136_v25  ;;  %v7265_v35 = vor.u32 %v9896_v29, %v7264_v28  ;;  %v7409_v43 = vor.u32 %v9932_v34, %v7408_v33  ;;  %v9880_v18 = vld [vmem:[#allocation12 + $0x114] sm:$0xf0]  ;;  %v7344_v26 = vld [vmem:[#allocation12 + $0x228] sm:$0xf]  ;;  %v9870_v34 = vld [vmem:[#allocation12 + $0xcc] sm:$0xf] }
 0x180   : > { %v938_v44 = vmax.f32 %v934_v36, 0.0  ;;  %v7536_v36 = vld [vmem:[#allocation12 + $0x3a8] sm:$0xf] }
 0x181   : > { %v939_v46 = vmax.f32 %v935_v39, 0.0  ;;  %v9860_v39 = vld [vmem:[#allocation12 + $0x74] sm:$0xf0] }
 0x182   : > { %v11250_v49 = vpack.c.bf16 %v938_v44, %v938_v44  ;;  %v7537_v44 = vor.u32 %v9964_v37, %v7536_v36  ;;  %v7170_v36 = vld [vmem:[#allocation12 + $0xd8] sm:$0xf0]  ;;  %v9902_v37 = vld [vmem:[#allocation12 + $0x1cc] sm:$0xf] }
 0x183   : > { %v892_v50 = vpop.f32.mrf.mxu2  ;;  %v11252_v55 = vpack.c.bf16 %v939_v46, %v939_v46  ;;  %v868_v58 = vpop.f32.mrf.mxu0  ;;  %v9928_v46 = vld [vmem:[#allocation12 + $0x294] sm:$0xf0] }
 0x184   : > { %v923_v56 = vmul.f32 %v915_v40, %v892_v50  ;;  %v905_v57 = vpop.f32.mrf.mxu3  ;;  %1722 = vmatmul.bf16.vlgmr.msrb.gmra.mxu0 %v11250_v49  ;;  %v881_v62 = vpop.f32.mrf.mxu1  ;;  %v7248_v40 = vld [vmem:[#allocation12 + $0x168] sm:$0xf] }
 0x185   : > { %v924_v61 = vmul.f32 %v916_v45, %v905_v57  ;;  %1735 = vmatmul.bf16.vlgmr.msrb.gmra.mxu1 %v11252_v55  ;;  %1818 = vmatpush.bf16.msrb.mxu0 %v7185_v48  ;;  %v7392_v45 = vld [vmem:[#allocation12 + $0x288] sm:$0xf]  ;;  %v7249_v48 = vor.u32 %v9892_v41, %v7248_v40  ;;  %v9912_v41 = vld [vmem:[#allocation12 + $0x214] sm:$0xf0] }
 0x186   : > { %v936_v63 = vadd.f32 %v928_v47, %v923_v56  ;;  %1831 = vmatpush.bf16.msrb.mxu1 %v7313_v52  ;;  %v7121_v47 = vor.u32 %v9860_v39, %v7120_v38  ;;  %v7520_v50 = vld [vmem:[#allocation12 + $0x388] sm:$0xf]  ;;  %v9888_v56 = vld [vmem:[#allocation12 + $0x154] sm:$0xf0]  ;;  %v7393_v57 = vor.u32 %v9928_v46, %v7392_v45  ;;  %v7298_v38 = vld [vmem:[#allocation12 + $0x1d8] sm:$0xf0] }
 0x187   : > { %v937_v5 = vadd.f32 %v929_v51, %v924_v61  ;;  %v9960_v51 = vld [vmem:[#allocation12 + $0x394] sm:$0xf0]  ;;  %v7104_v52 = vld [vmem:[#allocation12 + $0x48] sm:$0xf]  ;;  %v7233_v62 = vor.u32 %v9888_v56, %v7232_v54  ;;  %v9938_v45 = vld [vmem:[#allocation12 + $0x2ec] sm:$0xf] }
 0x188   : > { %v940_v10 = vmax.f32 %v936_v63, 0.0  ;;  %v7521_v58 = vor.u32 %v9960_v51, %v7520_v50  ;;  %v7105_v61 = vor.u32 %v9856_v53, %v7104_v52  ;;  %v7504_v63 = vld [vmem:[#allocation12 + $0x368] sm:$0xf]  ;;  %v7442_v46 = vld [vmem:[#allocation12 + $0x2f8] sm:$0xf0] }
 0x189   : > { %v941_v13 = vmax.f32 %v937_v5, 0.0  ;;  %1819 = vmatpush.bf16.msrb.mxu0 %v7169_v0  ;;  %v9956_v0 = vld [vmem:[#allocation12 + $0x374] sm:$0xf0]  ;;  %v7328_v40 = vld [vmem:[#allocation12 + $0x208] sm:$0xf] }
 0x18a   : > { %v11256_v15 = vpack.c.bf16 %v940_v10, %v940_v10  ;;  %1832 = vmatpush.bf16.msrb.mxu1 %v7297_v6  ;;  %v9884_v5 = vld [vmem:[#allocation12 + $0x134] sm:$0xf0]  ;;  %v7377_v6 = vor.u32 %v9924_v60, %v7376_v59  ;;  %v7505_v7 = vor.u32 %v9956_v0, %v7504_v63  ;;  %v7488_v10 = vld [vmem:[#allocation12 + $0x348] sm:$0xf]  ;;  %v9970_v50 = vld [vmem:[#allocation12 + $0x3ec] sm:$0xf]  ;;  %v7329_v53 = vor.u32 %v9912_v41, %v7328_v40 }
 0x18b   : > { %v11258_v21 = vpack.c.bf16 %v941_v13, %v941_v13  ;;  %v894_v22 = vpop.f32.mrf.mxu2  ;;  %v7217_v12 = vor.u32 %v9884_v5, %v7216_v4  ;;  %v9952_v13 = vld [vmem:[#allocation12 + $0x354] sm:$0xf0]  ;;  %v7570_v51 = vld [vmem:[#allocation12 + $0x3f8] sm:$0xf0]  ;;  %v9866_v52 = vld [vmem:[#allocation12 + $0xac] sm:$0xf]  ;;  %v7445_v59 = vor.u32 %v9938_v45, %v7442_v46 }
 0x18c   : > { %v907_v27 = vpop.f32.mrf.mxu3  ;;  %1748 = vmatmul.bf16.vlgmr.msrb.gmra.mxu2 %v11256_v15  ;;  %v7186_v22 = vld [vmem:[#allocation12 + $0xf8] sm:$0xf0]  ;;  %v7489_v25 = vor.u32 %v9952_v13, %v7488_v10  ;;  %v9898_v56 = vld [vmem:[#allocation12 + $0x1ac] sm:$0xf]  ;;  %v7573_v60 = vor.u32 %v9970_v50, %v7570_v51 }
 0x18d   : > { %1761 = vmatmul.bf16.vlgmr.msrb.gmra.mxu3 %v11258_v21  ;;  %1844 = vmatpush.bf16.msrb.mxu2 %v7441_v14  ;;  %v7072_v14 = vld [vmem:[#allocation12 + $0x8] sm:$0xf]  ;;  %v9916_v27 = vld [vmem:[#allocation12 + $0x234] sm:$0xf0]  ;;  %v7154_v54 = vld [vmem:[#allocation12 + $0xb8] sm:$0xf0] }
 0x18e   : > { %1857 = vmatpush.bf16.msrb.mxu3 %v7569_v16  ;;  %1820 = vmatpush.bf16.msrb.mxu0 %v7153_v17  ;;  %v9848_v16 = vld [vmem:[#allocation12 + $0x14] sm:$0xf0]  ;;  %v7200_v17 = vld [vmem:[#allocation12 + $0x108] sm:$0xf]  ;;  %v7157_v63 = vor.u32 %v9866_v52, %v7154_v54  ;;  %v9862_v4 = vld [vmem:[#allocation12 + $0x8c] sm:$0xf] }
 0x18f   : > { %1833 = vmatpush.bf16.msrb.mxu1 %v7281_v23  ;;  %v9906_v23 = vld [vmem:[#allocation12 + $0x1ec] sm:$0xf]  ;;  %v7073_v28 = vor.u32 %v9848_v16, %v7072_v14  ;;  %v7201_v29 = vor.u32 %v9880_v18, %v7200_v17  ;;  %v7138_v5 = vld [vmem:[#allocation12 + $0x98] sm:$0xf0] }
 0x190   : > { %v7317_v33 = vor.u32 %v9906_v23, %v7314_v24  ;;  %v9930_v10 = vld [vmem:[#allocation12 + $0x2ac] sm:$0xf]  ;;  %v7538_v16 = vld [vmem:[#allocation12 + $0x3b8] sm:$0xf0] }
 0x191   : > { %1845 = vmatpush.bf16.msrb.mxu2 %v7425_v30  ;;  %v7472_v30 = vld [vmem:[#allocation12 + $0x328] sm:$0xf]  ;;  %v9962_v14 = vld [vmem:[#allocation12 + $0x3ac] sm:$0xf]  ;;  %v7122_v18 = vld [vmem:[#allocation12 + $0x78] sm:$0xf0] }
 0x192   : > { %1858 = vmatpush.bf16.msrb.mxu3 %v7553_v31  ;;  %1821 = vmatpush.bf16.msrb.mxu0 %v7137_v32  ;;  %v9948_v31 = vld [vmem:[#allocation12 + $0x334] sm:$0xf0]  ;;  %v7189_v32 = vor.u32 %v9874_v19, %v7186_v22  ;;  %v9858_v17 = vld [vmem:[#allocation12 + $0x6c] sm:$0xf]  ;;  %v7541_v23 = vor.u32 %v9962_v14, %v7538_v16  ;;  %v7506_v41 = vld [vmem:[#allocation12 + $0x378] sm:$0xf0] }
 0x193   : > { %1834 = vmatpush.bf16.msrb.mxu1 %v7265_v35  ;;  %v7345_v35 = vor.u32 %v9916_v27, %v7344_v26  ;;  %v7473_v39 = vor.u32 %v9948_v31, %v7472_v30  ;;  %v9890_v19 = vld [vmem:[#allocation12 + $0x16c] sm:$0xf]  ;;  %v7125_v26 = vor.u32 %v9858_v17, %v7122_v18  ;;  %v7106_v31 = vld [vmem:[#allocation12 + $0x58] sm:$0xf0] }
 0x194   : > { %1774 = vmatmul.bf16.vlgmr.msra.gmra.mxu0 %v11250_v49  ;;  %v9926_v24 = vld [vmem:[#allocation12 + $0x28c] sm:$0xf]  ;;  %v7218_v46 = vld [vmem:[#allocation12 + $0x138] sm:$0xf0] }
 0x195   : > { %1846 = vmatpush.bf16.msrb.mxu2 %v7409_v43  ;;  %1787 = vmatmul.bf16.vlgmr.msra.gmra.mxu1 %v11252_v55  ;;  %v7456_v43 = vld [vmem:[#allocation12 + $0x308] sm:$0xf]  ;;  %v9854_v30 = vld [vmem:[#allocation12 + $0x4c] sm:$0xf]  ;;  %v7362_v51 = vld [vmem:[#allocation12 + $0x258] sm:$0xf0] }
 0x196   : > { %1859 = vmatpush.bf16.msrb.mxu3 %v7537_v44  ;;  %1822 = vmatpush.bf16.msrb.mxu0 %v7121_v47  ;;  %v9944_v44 = vld [vmem:[#allocation12 + $0x314] sm:$0xf0]  ;;  %v7173_v47 = vor.u32 %v9870_v34, %v7170_v36  ;;  %v9922_v36 = vld [vmem:[#allocation12 + $0x26c] sm:$0xf] }
 0x197   : > { %1835 = vmatpush.bf16.msrb.mxu1 %v7249_v48  ;;  %v7301_v48 = vor.u32 %v9902_v37, %v7298_v38  ;;  %v7378_v37 = vld [vmem:[#allocation12 + $0x278] sm:$0xf0]  ;;  %v7109_v38 = vor.u32 %v9854_v30, %v7106_v31  ;;  %v9954_v40 = vld [vmem:[#allocation12 + $0x36c] sm:$0xf] }
 0x198   : > { %v9882_v45 = vld [vmem:[#allocation12 + $0x12c] sm:$0xf] }
 0x199   : > { %1847 = vmatpush.bf16.msrb.mxu2 %v7393_v57  ;;  %v7282_v57 = vld [vmem:[#allocation12 + $0x1b8] sm:$0xf0]  ;;  %v9918_v50 = vld [vmem:[#allocation12 + $0x24c] sm:$0xf] }
 0x19a   : > { %1860 = vmatpush.bf16.msrb.mxu3 %v7521_v58  ;;  %1823 = vmatpush.bf16.msrb.mxu0 %v7105_v61  ;;  %v7457_v58 = vor.u32 %v9944_v44, %v7456_v43  ;;  %v9934_v61 = vld [vmem:[#allocation12 + $0x2cc] sm:$0xf]  ;;  %v7285_v0 = vor.u32 %v9898_v56, %v7282_v57  ;;  %v7090_v44 = vld [vmem:[#allocation12 + $0x38] sm:$0xf0] }
 0x19b   : > { %1836 = vmatpush.bf16.msrb.mxu1 %v7233_v62  ;;  %v7426_v62 = vld [vmem:[#allocation12 + $0x2d8] sm:$0xf0]  ;;  %v9850_v43 = vld [vmem:[#allocation12 + $0x2c] sm:$0xf] }
 0x19c   : > { %1800 = vmatmul.bf16.vlgmr.msra.gmra.mxu2 %v11256_v15  ;;  %v7429_v8 = vor.u32 %v9934_v61, %v7426_v62  ;;  %v7093_v52 = vor.u32 %v9850_v43, %v7090_v44  ;;  %v9950_v54 = vld [vmem:[#allocation12 + $0x34c] sm:$0xf]  ;;  %v7490_v56 = vld [vmem:[#allocation12 + $0x358] sm:$0xf0]  ;;  %v7365_v61 = vor.u32 %v9918_v50, %v7362_v51 }
 0x19d   : > { %1813 = vmatmul.bf16.vlgmr.msra.gmra.mxu3 %v11258_v21  ;;  %1848 = vmatpush.bf16.msrb.mxu2 %v7377_v6  ;;  %v9894_v6 = vld [vmem:[#allocation12 + $0x18c] sm:$0xf]  ;;  %v7493_v62 = vor.u32 %v9950_v54, %v7490_v56 }
 0x19e   : > { %1861 = vmatpush.bf16.msrb.mxu3 %v7505_v7  ;;  %1824 = vmatpush.bf16.msrb.mxu0 %v7089_v11  ;;  %v7266_v7 = vld [vmem:[#allocation12 + $0x198] sm:$0xf0]  ;;  %v9846_v57 = vld [vmem:[#allocation12 + $0xc] sm:$0xf] }
 0x19f   : > { %1837 = vmatpush.bf16.msrb.mxu1 %v7217_v12  ;;  %v7410_v11 = vld [vmem:[#allocation12 + $0x2b8] sm:$0xf0]  ;;  %v7141_v12 = vor.u32 %v9862_v4, %v7138_v5  ;;  %v7269_v13 = vor.u32 %v9894_v6, %v7266_v7  ;;  %v9946_v4 = vld [vmem:[#allocation12 + $0x32c] sm:$0xf] }
 0x1a0   : > { %v7413_v22 = vor.u32 %v9930_v10, %v7410_v11  ;;  %v7474_v5 = vld [vmem:[#allocation12 + $0x338] sm:$0xf0]  ;;  %v9942_v10 = vld [vmem:[#allocation12 + $0x30c] sm:$0xf] }
 0x1a1   : > { %1849 = vmatpush.bf16.msrb.mxu2 %v7361_v20  ;;  %v7250_v20 = vld [vmem:[#allocation12 + $0x178] sm:$0xf0]  ;;  %v7477_v7 = vor.u32 %v9946_v4, %v7474_v5 }
 0x1a2   : > { %1862 = vmatpush.bf16.msrb.mxu3 %v7489_v25  ;;  %1825 = vmatpush.bf16.msrb.mxu0 %v7073_v28  ;;  %v7394_v25 = vld [vmem:[#allocation12 + $0x298] sm:$0xf0]  ;;  %v7253_v27 = vor.u32 %v9890_v19, %v7250_v20  ;;  %v9958_v28 = vld [vmem:[#allocation12 + $0x38c] sm:$0xf] }
 0x1a3   : > { %1838 = vmatpush.bf16.msrb.mxu1 %v7201_v29  ;;  %v7522_v29 = vld [vmem:[#allocation12 + $0x398] sm:$0xf0]  ;;  %v7397_v34 = vor.u32 %v9926_v24, %v7394_v25 }
 0x1a4   : > { %v7458_v11 = vld [vmem:[#allocation12 + $0x318] sm:$0xf0] }
 0x1a5   : > { %1850 = vmatpush.bf16.msrb.mxu2 %v7345_v35  ;;  %1826 = vmatmul.bf16.vlgmr.msrb.gmra.mxu0 %v11250_v49  ;;  %v7525_v35 = vor.u32 %v9958_v28, %v7522_v29 }
 0x1a6   : > { %1870 = vmatpush.bf16.msra.mxu0 %v7189_v32  ;;  %1863 = vmatpush.bf16.msrb.mxu3 %v7473_v39  ;;  %v9886_v32 = vld [vmem:[#allocation12 + $0x14c] sm:$0xf] }
 0x1a7   : > { %1883 = vmatpush.bf16.msra.mxu1 %v7317_v33  ;;  %v7234_v33 = vld [vmem:[#allocation12 + $0x158] sm:$0xf0] }
 0x1a8   : > { %1839 = vmatmul.bf16.vlgmr.msrb.gmra.mxu1 %v11252_v55  ;;  %v7237_v39 = vor.u32 %v9886_v32, %v7234_v33 }
 0x1a9   : > { %1851 = vmatpush.bf16.msrb.mxu2 %v7329_v53  ;;  %v7221_v53 = vor.u32 %v9882_v45, %v7218_v46 }
 0x1aa   : > { %1871 = vmatpush.bf16.msra.mxu0 %v7173_v47  ;;  %1864 = vmatpush.bf16.msrb.mxu3 %v7457_v58  ;;  %v7381_v47 = vor.u32 %v9922_v36, %v7378_v37  ;;  %v7074_v58 = vld [vmem:[#allocation12 + $0x18] sm:$0xf0] }
 0x1ab   : > { %1884 = vmatpush.bf16.msra.mxu1 %v7301_v48  ;;  %v7509_v48 = vor.u32 %v9954_v40, %v7506_v41  ;;  %v7077_v2 = vor.u32 %v9846_v57, %v7074_v58 }
 0x1ac   : > { %1852 = vmatmul.bf16.vlgmr.msrb.gmra.mxu2 %v11256_v15 }
 0x1ad   : > { %1896 = vmatpush.bf16.msra.mxu2 %v7445_v59  ;;  %1865 = vmatmul.bf16.vlgmr.msrb.gmra.mxu3 %v11258_v21  ;;  %v9878_v59 = vld [vmem:[#allocation12 + $0x10c] sm:$0xf] }
 0x1ae   : > { %1909 = vmatpush.bf16.msra.mxu3 %v7573_v60  ;;  %1872 = vmatpush.bf16.msra.mxu0 %v7157_v63  ;;  %v7202_v60 = vld [vmem:[#allocation12 + $0x118] sm:$0xf0]  ;;  %v9914_v63 = vld [vmem:[#allocation12 + $0x22c] sm:$0xf] }
 0x1af   : > { %1885 = vmatpush.bf16.msra.mxu1 %v7285_v0  ;;  %v7346_v0 = vld [vmem:[#allocation12 + $0x238] sm:$0xf0]  ;;  %v7205_v3 = vor.u32 %v9878_v59, %v7202_v60 }
 0x1b0   : > { %v7349_v6 = vor.u32 %v9914_v63, %v7346_v0 }
 0x1b1   : > { %1897 = vmatpush.bf16.msra.mxu2 %v7429_v8  ;;  %v9910_v8 = vld [vmem:[#allocation12 + $0x20c] sm:$0xf] }
 0x1b2   : > { %1910 = vmatpush.bf16.msra.mxu3 %v7557_v9  ;;  %1873 = vmatpush.bf16.msra.mxu0 %v7141_v12  ;;  %v7330_v9 = vld [vmem:[#allocation12 + $0x218] sm:$0xf0] }
 0x1b3   : > { %1886 = vmatpush.bf16.msra.mxu1 %v7269_v13  ;;  %v7333_v12 = vor.u32 %v9910_v8, %v7330_v9  ;;  %v7461_v13 = vor.u32 %v9942_v10, %v7458_v11 }
 0x1b5   : > { %1898 = vmatpush.bf16.msra.mxu2 %v7413_v22 }
 0x1b6   : > { %1911 = vmatpush.bf16.msra.mxu3 %v7541_v23  ;;  %1874 = vmatpush.bf16.msra.mxu0 %v7125_v26 }
 0x1b7   : > { %1887 = vmatpush.bf16.msra.mxu1 %v7253_v27 }
 0x1b9   : > { %1899 = vmatpush.bf16.msra.mxu2 %v7397_v34 }
 0x1ba   : > { %1912 = vmatpush.bf16.msra.mxu3 %v7525_v35  ;;  %1875 = vmatpush.bf16.msra.mxu0 %v7109_v38 }
 0x1bb   : > { %1888 = vmatpush.bf16.msra.mxu1 %v7237_v39 }
 0x1bd   : > { %1900 = vmatpush.bf16.msra.mxu2 %v7381_v47 }
 0x1be   : > { %1913 = vmatpush.bf16.msra.mxu3 %v7509_v48  ;;  %1876 = vmatpush.bf16.msra.mxu0 %v7093_v52 }
 0x1bf   : > { %1889 = vmatpush.bf16.msra.mxu1 %v7221_v53 }
 0x1c1   : > { %1901 = vmatpush.bf16.msra.mxu2 %v7365_v61 }
 0x1c2   : > { %1914 = vmatpush.bf16.msra.mxu3 %v7493_v62  ;;  %1877 = vmatpush.bf16.msra.mxu0 %v7077_v2 }
 0x1c3   : > { %1890 = vmatpush.bf16.msra.mxu1 %v7205_v3 }
 0x1c5   : > { %1902 = vmatpush.bf16.msra.mxu2 %v7349_v6  ;;  %1878 = vmatmul.bf16.vlgmr.msra.gmra.mxu0 %v11250_v49 }
 0x1c6   : > { %1915 = vmatpush.bf16.msra.mxu3 %v7477_v7  ;;  %1891 = vmatmul.bf16.vlgmr.msra.gmra.mxu1 %v11252_v55 }
 0x1c9   : > { %1903 = vmatpush.bf16.msra.mxu2 %v7333_v12 }
 0x1ca   : > { %1916 = vmatpush.bf16.msra.mxu3 %v7461_v13 }
 0x1cc   : > { %1904 = vmatmul.bf16.vlgmr.msra.gmra.mxu2 %v11256_v15 }
 0x1cd   : > { %1917 = vmatmul.bf16.vlgmr.msra.gmra.mxu3 %v11258_v21 }
 0x201   : > { %v1723_v14 = vpop.f32.mrf.mxu0 }
 0x202   : > { %v1736_v16 = vpop.f32.mrf.mxu1 }
 0x203   : > { %v1737_v17 = vadd.f32 %v1736_v16, %v1723_v14 }
 0x209   : > { %v1725_v18 = vpop.f32.mrf.mxu0 }
 0x20a   : > { %v1738_v19 = vpop.f32.mrf.mxu1 }
 0x20f   : > { %v1749_v20 = vpop.f32.mrf.mxu2 }
 0x210   : > { %v1750_v22 = vadd.f32 %v1749_v20, %v1737_v17  ;;  %v1762_v23 = vpop.f32.mrf.mxu3 }
 0x211   : > { %v1775_v25 = vpop.f32.mrf.mxu0 }
 0x212   : > { %v1763_v24 = vadd.f32 %v1762_v23, %v1750_v22  ;;  %v1788_v49 = vpop.f32.mrf.mxu1 }
 0x213   : > { %v1789_v37 = vadd.f32 %v1788_v49, %v1775_v25 }
 0x214   : > { %v1971_v54 = vmul.f32 %v1763_v24, %v1763_v24  ;;  %v1924_v58 = vrot.slane %v1763_v24, 4 }
 0x216   : > { %v1975_v63 = vrot.slane %v1971_v54, 4  ;;  %v1925_v4 = vadd.f32 %v1924_v58, %v1763_v24 }
 0x217   : > { %v1751_v26 = vpop.f32.mrf.mxu2 }
 0x218   : > { %v1764_v27 = vpop.f32.mrf.mxu3  ;;  %v1976_v10 = vadd.f32 %v1975_v63, %v1971_v54  ;;  %v1926_v14 = vrot.slane %v1925_v4, 2 }
 0x219   : > { %v1777_v55 = vpop.f32.mrf.mxu0 }
 0x21a   : > { %v1790_v28 = vpop.f32.mrf.mxu1  ;;  %v1977_v20 = vrot.slane %v1976_v10, 2  ;;  %v1927_v24 = vadd.f32 %v1926_v14, %v1925_v4 }
 0x21f   : > { %v1801_v29 = vpop.f32.mrf.mxu2 }
 0x220   : > { %v1814_v30 = vpop.f32.mrf.mxu3  ;;  %v1802_v38 = vadd.f32 %v1801_v29, %v1789_v37 }
 0x222   : > { %v1827_v15 = vpop.f32.mrf.mxu0  ;;  %v1815_v44 = vadd.f32 %v1814_v30, %v1802_v38 }
 0x224   : > { %v1972_v46 = vmul.f32 %v1815_v44, %v1815_v44  ;;  %v1930_v50 = vrot.slane %v1815_v44, 4 }
 0x225   : > { %v1840_v31 = vpop.f32.mrf.mxu1 }
 0x226   : > { %v1841_v41 = vadd.f32 %v1840_v31, %v1827_v15  ;;  %v1981_v52 = vrot.slane %v1972_v46, 4  ;;  %v1931_v56 = vadd.f32 %v1930_v50, %v1815_v44  ;;  %v1978_v15 = vadd.f32 %v1977_v20, %v1976_v10 }
 0x227   : > { %v1803_v21 = vpop.f32.mrf.mxu2 }
 0x228   : > { %v1816_v32 = vpop.f32.mrf.mxu3  ;;  %v1982_v59 = vadd.f32 %v1981_v52, %v1972_v46  ;;  %v1932_v0 = vrot.slane %v1931_v56, 2  ;;  %v1923_v52 = vld [vmem:[#allocation2 + $0x2] ss:$8 sm:$0xf] }
 0x22a   : > { %v1829_v33 = vpop.f32.mrf.mxu0  ;;  %v1983_v5 = vrot.slane %v1982_v59, 2  ;;  %v1933_v11 = vadd.f32 %v1932_v0, %v1931_v56 }
 0x22c   : > { %v1984_v16 = vadd.f32 %v1983_v5, %v1982_v59  ;;  %v1934_v22 = vrot.slane %v1933_v11, 1  ;;  %v1970_v59 = vld [vmem:[#allocation2 + $0x3] ss:$8 sm:$0xf] }
 0x22d   : > { %v1842_v34 = vpop.f32.mrf.mxu1 }
 0x22e   : > { %v1985_v26 = vrot.slane %v1984_v16, 1  ;;  %v1935_v31 = vadd.f32 %v1934_v22, %v1933_v11  ;;  %v1928_v34 = vrot.slane %v1927_v24, 1 }
 0x22f   : > { %v1853_v35 = vpop.f32.mrf.mxu2 }
 0x230   : > { %v1866_v36 = vpop.f32.mrf.mxu3  ;;  %v1854_v43 = vadd.f32 %v1853_v35, %v1841_v41  ;;  %v1986_v35 = vadd.f32 %v1985_v26, %v1984_v16 }
 0x232   : > { %v1867_v45 = vadd.f32 %v1866_v36, %v1854_v43  ;;  %v2003_v46 = vrot.slane %v1986_v35, 7 }
 0x234   : > { %v1973_v51 = vmul.f32 %v1867_v45, %v1867_v45  ;;  %v1936_v53 = vrot.slane %v1867_v45, 4 }
 0x236   : > { %v1987_v57 = vrot.slane %v1973_v51, 4  ;;  %v1937_v61 = vadd.f32 %v1936_v53, %v1867_v45  ;;  %v1929_v45 = vadd.f32 %v1928_v34, %v1927_v24 }
 0x237   : > { %v1855_v39 = vpop.f32.mrf.mxu2 }
 0x238   : > { %v1868_v40 = vpop.f32.mrf.mxu3  ;;  %v1988_v2 = vadd.f32 %v1987_v57, %v1973_v51  ;;  %v1938_v7 = vrot.slane %v1937_v61, 2  ;;  %v1979_v39 = vrot.slane %v1978_v15, 1 }
 0x239   : > { %v1952_v40 = vrot.slane %v1935_v31, 7 }
 0x23a   : > { %v1989_v12 = vrot.slane %v1988_v2, 2  ;;  %v1939_v17 = vadd.f32 %v1938_v7, %v1937_v61  ;;  %v1980_v51 = vadd.f32 %v1979_v39, %v1978_v15 }
 0x23b   : > { %v1956_v53 = vsel %vm1955_vm10, %v1929_v45, %v1952_v40 }
 0x23c   : > { %v1990_v23 = vadd.f32 %v1989_v12, %v1988_v2  ;;  %v1940_v55 = vrot.slane %v1939_v17, 1 }
 0x23e   : > { %v1991_v21 = vrot.slane %v1990_v23, 1  ;;  %v1941_v36 = vadd.f32 %v1940_v55, %v1939_v17 }
 0x240   : > { %v1992_v41 = vadd.f32 %v1991_v21, %v1990_v23 }
 0x242   : > { %v1879_v47 = vpop.f32.mrf.mxu0  ;;  %v2004_v54 = vrot.slane %v1992_v41, 6 }
 0x243   : > { %v1892_v48 = vpop.f32.mrf.mxu1 }
 0x244   : > { %v1893_v3 = vadd.f32 %v1892_v48, %v1879_v47  ;;  %v1953_v47 = vrot.slane %v1941_v36, 6 }
 0x24a   : > { %v1881_v60 = vpop.f32.mrf.mxu0 }
 0x24b   : > { %v1894_v62 = vpop.f32.mrf.mxu1  ;;  %v2006_v60 = vsel %vm1955_vm10, %v1980_v51, %v2003_v46 }
 0x24f   : > { %v1905_v6 = vpop.f32.mrf.mxu2 }
 0x250   : > { %v1906_v8 = vadd.f32 %v1905_v6, %v1893_v3  ;;  %v1918_v9 = vpop.f32.mrf.mxu3 }
 0x252   : > { %v1919_v13 = vadd.f32 %v1918_v9, %v1906_v8 }
 0x254   : > { %v1942_v18 = vrot.slane %v1919_v13, 4  ;;  %v1974_v19 = vmul.f32 %v1919_v13, %v1919_v13 }
 0x256   : > { %v1943_v25 = vadd.f32 %v1942_v18, %v1919_v13  ;;  %v1993_v49 = vrot.slane %v1974_v19, 4 }
 0x257   : > { %v1907_v27 = vpop.f32.mrf.mxu2 }
 0x258   : > { %v1944_v28 = vrot.slane %v1943_v25, 2  ;;  %v1994_v29 = vadd.f32 %v1993_v49, %v1974_v19  ;;  %v1920_v30 = vpop.f32.mrf.mxu3 }
 0x25a   : > { %v1945_v32 = vadd.f32 %v1944_v28, %v1943_v25  ;;  %v1995_v33 = vrot.slane %v1994_v29, 2 }
 0x25c   : > { %v1946_v37 = vrot.slane %v1945_v32, 1  ;;  %v1996_v38 = vadd.f32 %v1995_v33, %v1994_v29 }
 0x25e   : > { %v1947_v43 = vadd.f32 %v1946_v37, %v1945_v32  ;;  %v1997_v44 = vrot.slane %v1996_v38, 1 }
 0x260   : > { %v1954_v48 = vrot.slane %v1947_v43, 5  ;;  %v1998_v50 = vadd.f32 %v1997_v44, %v1996_v38 }
 0x262   : > { %v1958_v56 = vsel %vm1957_vm11, %v1953_v47, %v1954_v48  ;;  %v2005_v57 = vrot.slane %v1998_v50, 5 }
 0x263   : > { %v1960_v58 = vsel %vm1959_vm12, %v1956_v53, %v1958_v56 }
 0x264   : > { %v1962_v61 = vadd.f32 %v1960_v58, %v1923_v52  ;;  %v2007_v62 = vsel %vm1957_vm11, %v2004_v54, %v2005_v57 }
 0x265   : > { %v2008_v63 = vsel %vm1959_vm12, %v2006_v60, %v2007_v62 }
 0x266   : > { %1967 = vst.msk [vmem:[#allocation2 + $0x2] ss:$8 sm:$0xf] %vm11241_vm9, %v1962_v61  ;;  %v2010_v0 = vadd.f32 %v2008_v63, %v1970_v59 }
 0x268   : > { %2011 = vst.msk [vmem:[#allocation2 + $0x3] ss:$8 sm:$0xf] %vm11241_vm9, %v2010_v0 }
 0x269 PF: > { %p7574_p10 = scmp.ne.s32.totalorder %s11008_s21, 2 }
 0x26b   : > { %2016 = sbr.rel (%p7574_p10) target bundleno = 1203 (0x4b3), region = 124 }
 0x270   : > { %v7593_v2 = vld [vmem:[#allocation7 + $0x20] sm:$0xf]  ;;  %v9979_v3 = vld [vmem:[#allocation7 + $0x2c] sm:$0xf0]  ;;  %v9977_v4 = vld [vmem:[#allocation7 + $0x24] sm:$0xf] }
 0x271   : > { %v7594_v5 = vor.u32 %v9979_v3, %v7593_v2  ;;  %v7595_v6 = vld [vmem:[#allocation7 + $0x30] sm:$0xf0]  ;;  %v7601_v7 = vld [vmem:[#allocation7 + $0x28] sm:$0xf]  ;;  %v9980_v8 = vld [vmem:[#allocation7 + $0x34] sm:$0xf0] }
 0x272   : > { %v7598_v9 = vor.u32 %v9977_v4, %v7595_v6  ;;  %v7602_v10 = vor.u32 %v9980_v8, %v7601_v7  ;;  %v9978_v11 = vld [vmem:[#allocation7 + $0x2c] sm:$0xf]  ;;  %v7603_v12 = vld [vmem:[#allocation7 + $0x38] sm:$0xf0]  ;;  %v7577_v13 = vld [vmem:[#allocation7] sm:$0xf] }
 0x273   : > { %2113 = vmatpush.bf16.msra.mxu0 %v7594_v5  ;;  %v7606_v14 = vor.u32 %v9978_v11, %v7603_v12  ;;  %v9975_v42 = vld [vmem:[#allocation7 + $0xc] sm:$0xf0]  ;;  %v9973_v16 = vld [vmem:[#allocation7 + $0x4] sm:$0xf]  ;;  %v7579_v17 = vld [vmem:[#allocation7 + $0x10] sm:$0xf0] }
 0x274   : > { %2126 = vmatpush.bf16.msra.mxu1 %v7598_v9  ;;  %2139 = vmatpush.bf16.msra.mxu2 %v7602_v10  ;;  %v7578_v18 = vor.u32 %v9975_v42, %v7577_v13  ;;  %v7582_v19 = vor.u32 %v9973_v16, %v7579_v17  ;;  %v7585_v20 = vld [vmem:[#allocation7 + $0x8] sm:$0xf]  ;;  %v9976_v22 = vld [vmem:[#allocation7 + $0x14] sm:$0xf0]  ;;  %v9974_v23 = vld [vmem:[#allocation7 + $0xc] sm:$0xf] }
 0x275   : > { %2152 = vmatpush.bf16.msra.mxu3 %v7606_v14  ;;  %v7586_v25 = vor.u32 %v9976_v22, %v7585_v20  ;;  %v7587_v49 = vld [vmem:[#allocation7 + $0x18] sm:$0xf0]  ;;  %vm2103_vm13 = vcmask 261120   ;;  %v7725_v24 = vld [vmem:[#allocation12 + $0xe0] sm:$0xf]  ;;  %vm4219_vm2 = vcmask 1040384  }
 0x276   : > { %v7590_v26 = vor.u32 %v9974_v23, %v7587_v49  ;;  %v10011_v27 = vld [vmem:[#allocation12 + $0xec] sm:$0xf0]  ;;  %v7853_v55 = vld [vmem:[#allocation12 + $0x1e0] sm:$0xf]  ;;  %vm4221_vm3 = vcmask 1042434   ;;  %vm4223_vm4 = vcmask 1041408  }
 0x277   : > { %v10043_v28 = vld [vmem:[#allocation12 + $0x1ec] sm:$0xf0]  ;;  %2114 = vmatpush.bf16.msra.mxu0 %v7578_v18  ;;  %v7726_v29 = vor.u32 %v10011_v27, %v7725_v24  ;;  %v7709_v15 = vld [vmem:[#allocation12 + $0xc0] sm:$0xf] }
 0x278   : > { %v7854_v30 = vor.u32 %v10043_v28, %v7853_v55  ;;  %v10007_v31 = vld [vmem:[#allocation12 + $0xcc] sm:$0xf0]  ;;  %v7837_v21 = vld [vmem:[#allocation12 + $0x1c0] sm:$0xf]  ;;  %2127 = vmatpush.bf16.msra.mxu1 %v7582_v19  ;;  %2140 = vmatpush.bf16.msra.mxu2 %v7586_v25 }
 0x279   : > { %v10039_v32 = vld [vmem:[#allocation12 + $0x1cc] sm:$0xf0]  ;;  %v7981_v33 = vld [vmem:[#allocation12 + $0x2e0] sm:$0xf]  ;;  %2153 = vmatpush.bf16.msra.mxu3 %v7590_v26  ;;  %v7710_v35 = vor.u32 %v10007_v31, %v7709_v15 }
 0x27a   : > { %v10075_v34 = vld [vmem:[#allocation12 + $0x2ec] sm:$0xf0]  ;;  %v8109_v37 = vld [vmem:[#allocation12 + $0x3e0] sm:$0xf]  ;;  %7607 = vmatmul.msk.bf16.vlgmr.msra.gmra.mxu0 %vm2103_vm13, %v11215_v1  ;;  %v7838_v40 = vor.u32 %v10039_v32, %v7837_v21 }
 0x27b   : > { %2964 = vmatpush.bf16.msrb.mxu0 %v7726_v29  ;;  %v7982_v36 = vor.u32 %v10075_v34, %v7981_v33  ;;  %v10107_v38 = vld [vmem:[#allocation12 + $0x3ec] sm:$0xf0]  ;;  %v7693_v39 = vld [vmem:[#allocation12 + $0xa0] sm:$0xf]  ;;  %7608 = vmatmul.msk.bf16.vlgmr.msra.gmra.mxu1 %vm2103_vm13, %v11215_v1 }
 0x27c   : > { %2977 = vmatpush.bf16.msrb.mxu1 %v7854_v30  ;;  %v8110_v41 = vor.u32 %v10107_v38, %v8109_v37  ;;  %v10003_v43 = vld [vmem:[#allocation12 + $0xac] sm:$0xf0]  ;;  %v7821_v44 = vld [vmem:[#allocation12 + $0x1a0] sm:$0xf]  ;;  %7609 = vmatmul.msk.bf16.vlgmr.msra.gmra.mxu2 %vm2103_vm13, %v11215_v1 }
 0x27d   : > { %v10035_v45 = vld [vmem:[#allocation12 + $0x1ac] sm:$0xf0]  ;;  %v7965_v46 = vld [vmem:[#allocation12 + $0x2c0] sm:$0xf]  ;;  %7610 = vmatmul.msk.bf16.vlgmr.msra.gmra.mxu3 %vm2103_vm13, %v11215_v1  ;;  %2990 = vmatpush.bf16.msrb.mxu2 %v7982_v36  ;;  %v7694_v52 = vor.u32 %v10003_v43, %v7693_v39 }
 0x27e   : > { %v10071_v47 = vld [vmem:[#allocation12 + $0x2cc] sm:$0xf0]  ;;  %v8093_v48 = vld [vmem:[#allocation12 + $0x3c0] sm:$0xf]  ;;  %3003 = vmatpush.bf16.msrb.mxu3 %v8110_v41  ;;  %v7822_v58 = vor.u32 %v10035_v45, %v7821_v44 }
 0x27f   : > { %v7966_v50 = vor.u32 %v10071_v47, %v7965_v46  ;;  %v10103_v51 = vld [vmem:[#allocation12 + $0x3cc] sm:$0xf0]  ;;  %2965 = vmatpush.bf16.msrb.mxu0 %v7710_v35  ;;  %v7677_v54 = vld [vmem:[#allocation12 + $0x80] sm:$0xf]  ;;  %v10009_v47 = vld [vmem:[#allocation12 + $0xe4] sm:$0xf] }
 0x280   : > { %v8094_v53 = vor.u32 %v10103_v51, %v8093_v48  ;;  %v9999_v56 = vld [vmem:[#allocation12 + $0x8c] sm:$0xf0]  ;;  %v7949_v57 = vld [vmem:[#allocation12 + $0x2a0] sm:$0xf]  ;;  %2978 = vmatpush.bf16.msrb.mxu1 %v7838_v40  ;;  %v7727_v48 = vld [vmem:[#allocation12 + $0xf0] sm:$0xf0] }
 0x281   : > { %v10067_v59 = vld [vmem:[#allocation12 + $0x2ac] sm:$0xf0]  ;;  %v8077_v60 = vld [vmem:[#allocation12 + $0x3a0] sm:$0xf]  ;;  %2991 = vmatpush.bf16.msrb.mxu2 %v7966_v50  ;;  %v7678_v2 = vor.u32 %v9999_v56, %v7677_v54  ;;  %v10041_v50 = vld [vmem:[#allocation12 + $0x1e4] sm:$0xf] }
 0x282   : > { %v10099_v61 = vld [vmem:[#allocation12 + $0x3ac] sm:$0xf0]  ;;  %v7805_v62 = vld [vmem:[#allocation12 + $0x180] sm:$0xf]  ;;  %v7950_v0 = vor.u32 %v10067_v59, %v7949_v57  ;;  %3004 = vmatpush.bf16.msrb.mxu3 %v8094_v53  ;;  %v7855_v51 = vld [vmem:[#allocation12 + $0x1f0] sm:$0xf0] }
 0x283   : > { %v10031_v63 = vld [vmem:[#allocation12 + $0x18c] sm:$0xf0]  ;;  %2966 = vmatpush.bf16.msrb.mxu0 %v7694_v52  ;;  %v8078_v3 = vor.u32 %v10099_v61, %v8077_v60  ;;  %v7661_v4 = vld [vmem:[#allocation12 + $0x60] sm:$0xf]  ;;  %v10005_v56 = vld [vmem:[#allocation12 + $0xc4] sm:$0xf]  ;;  %v7730_v61 = vor.u32 %v10009_v47, %v7727_v48 }
 0x284   : > { %v7933_v5 = vld [vmem:[#allocation12 + $0x280] sm:$0xf]  ;;  %v10063_v6 = vld [vmem:[#allocation12 + $0x28c] sm:$0xf0]  ;;  %2979 = vmatpush.bf16.msrb.mxu1 %v7822_v58  ;;  %v7806_v7 = vor.u32 %v10031_v63, %v7805_v62  ;;  %v10073_v63 = vld [vmem:[#allocation12 + $0x2e4] sm:$0xf] }
 0x285   : > { %v9995_v8 = vld [vmem:[#allocation12 + $0x6c] sm:$0xf0]  ;;  %v8061_v9 = vld [vmem:[#allocation12 + $0x380] sm:$0xf]  ;;  %2992 = vmatpush.bf16.msrb.mxu2 %v7950_v0  ;;  %v7934_v13 = vor.u32 %v10063_v6, %v7933_v5  ;;  %v7983_v0 = vld [vmem:[#allocation12 + $0x2f0] sm:$0xf0] }
 0x286   : > { %v10095_v10 = vld [vmem:[#allocation12 + $0x38c] sm:$0xf0]  ;;  %v7789_v11 = vld [vmem:[#allocation12 + $0x160] sm:$0xf]  ;;  %3005 = vmatpush.bf16.msrb.mxu3 %v8078_v3  ;;  %v7662_v14 = vor.u32 %v9995_v8, %v7661_v4  ;;  %v7711_v3 = vld [vmem:[#allocation12 + $0xd0] sm:$0xf0] }
 0x287   : > { %v10027_v12 = vld [vmem:[#allocation12 + $0x16c] sm:$0xf0]  ;;  %2967 = vmatpush.bf16.msrb.mxu0 %v7678_v2  ;;  %v8062_v42 = vor.u32 %v10095_v10, %v8061_v9  ;;  %v7645_v16 = vld [vmem:[#allocation12 + $0x40] sm:$0xf]  ;;  %v7858_v2 = vor.u32 %v10041_v50, %v7855_v51  ;;  %v10105_v4 = vld [vmem:[#allocation12 + $0x3e4] sm:$0xf]  ;;  %v7986_v10 = vor.u32 %v10073_v63, %v7983_v0 }
 0x288   : > { %v7917_v17 = vld [vmem:[#allocation12 + $0x260] sm:$0xf]  ;;  %v10059_v18 = vld [vmem:[#allocation12 + $0x26c] sm:$0xf0]  ;;  %2980 = vmatpush.bf16.msrb.mxu1 %v7806_v7  ;;  %v7790_v19 = vor.u32 %v10027_v12, %v7789_v11  ;;  %v8111_v5 = vld [vmem:[#allocation12 + $0x3f0] sm:$0xf0]  ;;  %v7714_v11 = vor.u32 %v10005_v56, %v7711_v3 }
 0x289   : > { %v9991_v20 = vld [vmem:[#allocation12 + $0x4c] sm:$0xf0]  ;;  %v8045_v22 = vld [vmem:[#allocation12 + $0x360] sm:$0xf]  ;;  %2993 = vmatpush.bf16.msrb.mxu2 %v7934_v13  ;;  %v7918_v24 = vor.u32 %v10059_v18, %v7917_v17  ;;  %v10037_v6 = vld [vmem:[#allocation12 + $0x1c4] sm:$0xf]  ;;  %v8114_v12 = vor.u32 %v10105_v4, %v8111_v5 }
 0x28a   : > { %v10091_v23 = vld [vmem:[#allocation12 + $0x36c] sm:$0xf0]  ;;  %v7773_v25 = vld [vmem:[#allocation12 + $0x140] sm:$0xf]  ;;  %3006 = vmatpush.bf16.msrb.mxu3 %v8062_v42  ;;  %v7646_v26 = vor.u32 %v9991_v20, %v7645_v16  ;;  %v7839_v7 = vld [vmem:[#allocation12 + $0x1d0] sm:$0xf0] }
 0x28b   : > { %v10023_v49 = vld [vmem:[#allocation12 + $0x14c] sm:$0xf0]  ;;  %2968 = vmatpush.bf16.msrb.mxu0 %v7662_v14  ;;  %v8046_v27 = vor.u32 %v10091_v23, %v8045_v22  ;;  %v7629_v55 = vld [vmem:[#allocation12 + $0x20] sm:$0xf]  ;;  %v10001_v13 = vld [vmem:[#allocation12 + $0xa4] sm:$0xf]  ;;  %v7842_v16 = vor.u32 %v10037_v6, %v7839_v7 }
 0x28c   : > { %v7901_v28 = vld [vmem:[#allocation12 + $0x240] sm:$0xf]  ;;  %v10055_v29 = vld [vmem:[#allocation12 + $0x24c] sm:$0xf0]  ;;  %2981 = vmatpush.bf16.msrb.mxu1 %v7790_v19  ;;  %v7774_v30 = vor.u32 %v10023_v49, %v7773_v25  ;;  %v10069_v14 = vld [vmem:[#allocation12 + $0x2c4] sm:$0xf] }
 0x28d   : > { %v9987_v15 = vld [vmem:[#allocation12 + $0x2c] sm:$0xf0]  ;;  %v8029_v31 = vld [vmem:[#allocation12 + $0x340] sm:$0xf]  ;;  %2994 = vmatpush.bf16.msrb.mxu2 %v7918_v24  ;;  %v7902_v34 = vor.u32 %v10055_v29, %v7901_v28  ;;  %v7967_v42 = vld [vmem:[#allocation12 + $0x2d0] sm:$0xf0] }
 0x28e   : > { %v10087_v21 = vld [vmem:[#allocation12 + $0x34c] sm:$0xf0]  ;;  %v7757_v32 = vld [vmem:[#allocation12 + $0x120] sm:$0xf]  ;;  %3007 = vmatpush.bf16.msrb.mxu3 %v8046_v27  ;;  %v7630_v36 = vor.u32 %v9987_v15, %v7629_v55  ;;  %v7695_v17 = vld [vmem:[#allocation12 + $0xb0] sm:$0xf0]  ;;  %v7970_v23 = vor.u32 %v10069_v14, %v7967_v42 }
 0x28f   : > { %v10019_v33 = vld [vmem:[#allocation12 + $0x12c] sm:$0xf0]  ;;  %v7613_v35 = vld [vmem:[#allocation12] sm:$0xf]  ;;  %2969 = vmatpush.bf16.msrb.mxu0 %v7646_v26  ;;  %v8030_v37 = vor.u32 %v10087_v21, %v8029_v31  ;;  %v10101_v18 = vld [vmem:[#allocation12 + $0x3c4] sm:$0xf]  ;;  %v7698_v25 = vor.u32 %v10001_v13, %v7695_v17 }
 0x290   : > { %v9983_v38 = vld [vmem:[#allocation12 + $0xc] sm:$0xf0]  ;;  %v7885_v39 = vld [vmem:[#allocation12 + $0x220] sm:$0xf]  ;;  %2982 = vmatpush.bf16.msrb.mxu1 %v7774_v30  ;;  %v7758_v41 = vor.u32 %v10019_v33, %v7757_v32  ;;  %v8095_v19 = vld [vmem:[#allocation12 + $0x3d0] sm:$0xf0] }
 0x291   : > { %v10051_v40 = vld [vmem:[#allocation12 + $0x22c] sm:$0xf0]  ;;  %v7741_v43 = vld [vmem:[#allocation12 + $0x100] sm:$0xf]  ;;  %2995 = vmatpush.bf16.msrb.mxu2 %v7902_v34  ;;  %v7614_v53 = vor.u32 %v9983_v38, %v7613_v35  ;;  %v10033_v20 = vld [vmem:[#allocation12 + $0x1a4] sm:$0xf]  ;;  %v8098_v49 = vor.u32 %v10101_v18, %v8095_v19 }
 0x292   : > { %v8013_v44 = vld [vmem:[#allocation12 + $0x320] sm:$0xf]  ;;  %v10083_v45 = vld [vmem:[#allocation12 + $0x32c] sm:$0xf0]  ;;  %v7886_v52 = vor.u32 %v10051_v40, %v7885_v39  ;;  %3008 = vmatpush.bf16.msrb.mxu3 %v8030_v37  ;;  %v7823_v22 = vld [vmem:[#allocation12 + $0x1b0] sm:$0xf0] }
 0x293   : > { %v10015_v46 = vld [vmem:[#allocation12 + $0x10c] sm:$0xf0]  ;;  %2970 = vmatpush.bf16.msrb.mxu0 %v7630_v36  ;;  %v8014_v54 = vor.u32 %v10083_v45, %v8013_v44  ;;  %v7869_v57 = vld [vmem:[#allocation12 + $0x200] sm:$0xf]  ;;  %v9997_v24 = vld [vmem:[#allocation12 + $0x84] sm:$0xf]  ;;  %v7826_v55 = vor.u32 %v10033_v20, %v7823_v22 }
 0x294   : > { %v10047_v58 = vld [vmem:[#allocation12 + $0x20c] sm:$0xf0]  ;;  %v7997_v59 = vld [vmem:[#allocation12 + $0x300] sm:$0xf]  ;;  %2983 = vmatpush.bf16.msrb.mxu1 %v7758_v41  ;;  %v7742_v60 = vor.u32 %v10015_v46, %v7741_v43  ;;  %v10065_v26 = vld [vmem:[#allocation12 + $0x2a4] sm:$0xf] }
 0x295   : > { %v10079_v62 = vld [vmem:[#allocation12 + $0x30c] sm:$0xf0]  ;;  %2996 = vmatpush.bf16.msrb.mxu2 %v7886_v52  ;;  %v7870_v8 = vor.u32 %v10047_v58, %v7869_v57  ;;  %v7951_v27 = vld [vmem:[#allocation12 + $0x2b0] sm:$0xf0]  ;;  %v10097_v29 = vld [vmem:[#allocation12 + $0x3a4] sm:$0xf] }
 0x296   : > { %3009 = vmatpush.bf16.msrb.mxu3 %v8014_v54  ;;  %v7998_v9 = vor.u32 %v10079_v62, %v7997_v59  ;;  %v7679_v28 = vld [vmem:[#allocation12 + $0x90] sm:$0xf0]  ;;  %v10029_v15 = vld [vmem:[#allocation12 + $0x184] sm:$0xf]  ;;  %v7954_v21 = vor.u32 %v10065_v26, %v7951_v27 }
 0x297   : > { %2971 = vmatpush.bf16.msrb.mxu0 %v7614_v53  ;;  %v8079_v30 = vld [vmem:[#allocation12 + $0x3b0] sm:$0xf0]  ;;  %v7682_v32 = vor.u32 %v9997_v24, %v7679_v28  ;;  %v9993_v34 = vld [vmem:[#allocation12 + $0x64] sm:$0xf] }
 0x298   : > { %2984 = vmatpush.bf16.msrb.mxu1 %v7742_v60  ;;  %v7807_v31 = vld [vmem:[#allocation12 + $0x190] sm:$0xf0]  ;;  %v8082_v33 = vor.u32 %v10097_v29, %v8079_v30  ;;  %v10061_v35 = vld [vmem:[#allocation12 + $0x284] sm:$0xf] }
 0x299   : > { %2997 = vmatpush.bf16.msrb.mxu2 %v7870_v8  ;;  %v7935_v36 = vld [vmem:[#allocation12 + $0x290] sm:$0xf0]  ;;  %v7810_v37 = vor.u32 %v10029_v15, %v7807_v31  ;;  %v10093_v39 = vld [vmem:[#allocation12 + $0x384] sm:$0xf] }
 0x29a   : > { %3010 = vmatpush.bf16.msrb.mxu3 %v7998_v9  ;;  %v7663_v38 = vld [vmem:[#allocation12 + $0x70] sm:$0xf0]  ;;  %v10025_v41 = vld [vmem:[#allocation12 + $0x164] sm:$0xf]  ;;  %v7938_v44 = vor.u32 %v10061_v35, %v7935_v36 }
 0x29b   : > { %3016 = vmatpush.bf16.msra.mxu0 %v7730_v61  ;;  %v8063_v40 = vld [vmem:[#allocation12 + $0x390] sm:$0xf0]  ;;  %v7666_v45 = vor.u32 %v9993_v34, %v7663_v38  ;;  %v9989_v48 = vld [vmem:[#allocation12 + $0x44] sm:$0xf]  ;;  %v10012_v38 = vld [vmem:[#allocation12 + $0xf4] sm:$0xf0] }
 0x29c   : > { %3029 = vmatpush.bf16.msra.mxu1 %v7858_v2  ;;  %v7791_v43 = vld [vmem:[#allocation12 + $0x170] sm:$0xf0]  ;;  %v8066_v46 = vor.u32 %v10093_v39, %v8063_v40  ;;  %v10021_v51 = vld [vmem:[#allocation12 + $0x144] sm:$0xf] }
 0x29d   : > { %3042 = vmatpush.bf16.msra.mxu2 %v7986_v10  ;;  %v7794_v47 = vor.u32 %v10025_v41, %v7791_v43  ;;  %v7647_v50 = vld [vmem:[#allocation12 + $0x50] sm:$0xf0]  ;;  %v10057_v56 = vld [vmem:[#allocation12 + $0x264] sm:$0xf]  ;;  %v7861_v41 = vld [vmem:[#allocation12 + $0x1e8] sm:$0xf] }
 0x29e   : > { %3055 = vmatpush.bf16.msra.mxu3 %v8114_v12  ;;  %v7650_v52 = vor.u32 %v9989_v48, %v7647_v50  ;;  %v7775_v53 = vld [vmem:[#allocation12 + $0x150] sm:$0xf0]  ;;  %v10089_v58 = vld [vmem:[#allocation12 + $0x364] sm:$0xf]  ;;  %v10044_v43 = vld [vmem:[#allocation12 + $0x1f4] sm:$0xf0] }
 0x29f   : > { %3017 = vmatpush.bf16.msra.mxu0 %v7714_v11  ;;  %v7778_v54 = vor.u32 %v10021_v51, %v7775_v53  ;;  %v7919_v57 = vld [vmem:[#allocation12 + $0x270] sm:$0xf0]  ;;  %v9985_v61 = vld [vmem:[#allocation12 + $0x24] sm:$0xf]  ;;  %v7862_v53 = vor.u32 %v10044_v43, %v7861_v41 }
 0x2a0   : > { %3030 = vmatpush.bf16.msra.mxu1 %v7842_v16  ;;  %v7922_v59 = vor.u32 %v10057_v56, %v7919_v57  ;;  %v8047_v60 = vld [vmem:[#allocation12 + $0x370] sm:$0xf0]  ;;  %v10017_v0 = vld [vmem:[#allocation12 + $0x124] sm:$0xf]  ;;  %v10008_v56 = vld [vmem:[#allocation12 + $0xd4] sm:$0xf0] }
 0x2a1   : > { %3043 = vmatpush.bf16.msra.mxu2 %v7970_v23  ;;  %v8050_v62 = vor.u32 %v10089_v58, %v8047_v60  ;;  %v7631_v63 = vld [vmem:[#allocation12 + $0x30] sm:$0xf0]  ;;  %v10053_v5 = vld [vmem:[#allocation12 + $0x244] sm:$0xf] }
 0x2a2   : > { %3056 = vmatpush.bf16.msra.mxu3 %v8098_v49  ;;  %v7759_v2 = vld [vmem:[#allocation12 + $0x130] sm:$0xf0]  ;;  %v7634_v3 = vor.u32 %v9985_v61, %v7631_v63  ;;  %v10085_v7 = vld [vmem:[#allocation12 + $0x344] sm:$0xf]  ;;  %v7845_v61 = vld [vmem:[#allocation12 + $0x1c8] sm:$0xf] }
 0x2a3   : > { %3018 = vmatpush.bf16.msra.mxu0 %v7698_v25  ;;  %v7762_v4 = vor.u32 %v10017_v0, %v7759_v2  ;;  %v7903_v6 = vld [vmem:[#allocation12 + $0x250] sm:$0xf0]  ;;  %v9981_v11 = vld [vmem:[#allocation12 + $0x4] sm:$0xf] }
 0x2a4   : > { %3031 = vmatpush.bf16.msra.mxu1 %v7826_v55  ;;  %v7906_v8 = vor.u32 %v10053_v5, %v7903_v6  ;;  %v8031_v9 = vld [vmem:[#allocation12 + $0x350] sm:$0xf0]  ;;  %v10013_v14 = vld [vmem:[#allocation12 + $0x104] sm:$0xf]  ;;  %v10076_v5 = vld [vmem:[#allocation12 + $0x2f4] sm:$0xf0] }
 0x2a5   : > { %3044 = vmatpush.bf16.msra.mxu2 %v7954_v21  ;;  %v8034_v10 = vor.u32 %v10085_v7, %v8031_v9  ;;  %v7615_v12 = vld [vmem:[#allocation12 + $0x10] sm:$0xf0]  ;;  %v10049_v17 = vld [vmem:[#allocation12 + $0x224] sm:$0xf]  ;;  %v8117_v6 = vld [vmem:[#allocation12 + $0x3e8] sm:$0xf] }
 0x2a6   : > { %3057 = vmatpush.bf16.msra.mxu3 %v8082_v33  ;;  %v7618_v13 = vor.u32 %v9981_v11, %v7615_v12  ;;  %v7743_v42 = vld [vmem:[#allocation12 + $0x110] sm:$0xf0]  ;;  %v10081_v19 = vld [vmem:[#allocation12 + $0x324] sm:$0xf]  ;;  %v10108_v9 = vld [vmem:[#allocation12 + $0x3f4] sm:$0xf0] }
 0x2a7   : > { %3019 = vmatpush.bf16.msra.mxu0 %v7682_v32  ;;  %v7746_v16 = vor.u32 %v10013_v14, %v7743_v42  ;;  %v7887_v18 = vld [vmem:[#allocation12 + $0x230] sm:$0xf0]  ;;  %v10045_v25 = vld [vmem:[#allocation12 + $0x204] sm:$0xf]  ;;  %v10004_v11 = vld [vmem:[#allocation12 + $0xb4] sm:$0xf0] }
 0x2a8   : > { %3032 = vmatpush.bf16.msra.mxu1 %v7810_v37  ;;  %v8015_v20 = vld [vmem:[#allocation12 + $0x330] sm:$0xf0]  ;;  %v7890_v22 = vor.u32 %v10049_v17, %v7887_v18  ;;  %v10077_v26 = vld [vmem:[#allocation12 + $0x304] sm:$0xf]  ;;  %v7733_v37 = vld [vmem:[#allocation12 + $0xe8] sm:$0xf]  ;;  %v8118_v18 = vor.u32 %v10108_v9, %v8117_v6 }
 0x2a9   : > { %3045 = vmatpush.bf16.msra.mxu2 %v7938_v44  ;;  %v8018_v23 = vor.u32 %v10081_v19, %v8015_v20  ;;  %v7871_v49 = vld [vmem:[#allocation12 + $0x210] sm:$0xf0]  ;;  %v7734_v48 = vor.u32 %v10012_v38, %v7733_v37  ;;  %v10036_v14 = vld [vmem:[#allocation12 + $0x1b4] sm:$0xf0]  ;;  %v7973_v20 = vld [vmem:[#allocation12 + $0x2c8] sm:$0xf] }
 0x2aa   : > { %3058 = vmatpush.bf16.msra.mxu3 %v8066_v46  ;;  %v7874_v24 = vor.u32 %v10045_v25, %v7871_v49  ;;  %v7999_v27 = vld [vmem:[#allocation12 + $0x310] sm:$0xf0]  ;;  %v7669_v37 = vld [vmem:[#allocation12 + $0x68] sm:$0xf]  ;;  %v9996_v38 = vld [vmem:[#allocation12 + $0x74] sm:$0xf0] }
 0x2ab   : > { %3020 = vmatpush.bf16.msra.mxu0 %v7666_v45  ;;  %v8002_v55 = vor.u32 %v10077_v26, %v7999_v27  ;;  %v2159_v28 = vld [vmem:[#allocation3] ss:$8 sm:$0xf]  ;;  %v2161_v29 = vld [vmem:[#allocation3 + $0x1] ss:$8 sm:$0xf] }
 0x2ac   : > { %3033 = vmatpush.bf16.msra.mxu1 %v7794_v47  ;;  %v2163_v30 = vperm.slane %v2159_v28, 0  ;;  %v2164_v15 = vperm.slane %v2159_v28, 1  ;;  %v2176_v31 = vperm.slane %v2161_v29, 0  ;;  %v2177_v32 = vperm.slane %v2161_v29, 1  ;;  %v10104_v26 = vld [vmem:[#allocation12 + $0x3d4] sm:$0xf0] }
 0x2ad   : > { %3046 = vmatpush.bf16.msra.mxu2 %v7922_v59  ;;  %v2165_v40 = vperm.slane %v2159_v28, 2  ;;  %v2166_v45 = vperm.slane %v2159_v28, 3  ;;  %v2178_v47 = vperm.slane %v2161_v29, 2  ;;  %v7685_v27 = vld [vmem:[#allocation12 + $0x88] sm:$0xf] }
 0x2ae   : > { %3059 = vmatpush.bf16.msra.mxu3 %v8050_v62  ;;  %v10040_v62 = vld [vmem:[#allocation12 + $0x1d4] sm:$0xf0]  ;;  %v7909_v9 = vld [vmem:[#allocation12 + $0x248] sm:$0xf] }
 0x2af   : > { %3021 = vmatpush.bf16.msra.mxu0 %v7650_v52  ;;  %v2179_v52 = vperm.slane %v2161_v29, 3  ;;  %v7813_v29 = vld [vmem:[#allocation12 + $0x188] sm:$0xf]  ;;  %v10020_v6 = vld [vmem:[#allocation12 + $0x134] sm:$0xf0] }
 0x2b0   : > { %3034 = vmatpush.bf16.msra.mxu1 %v7778_v54  ;;  %v7717_v54 = vld [vmem:[#allocation12 + $0xc8] sm:$0xf] }
 0x2b1   : > { %3047 = vmatpush.bf16.msra.mxu2 %v7906_v8  ;;  %v7846_v8 = vor.u32 %v10040_v62, %v7845_v61  ;;  %v10060_v61 = vld [vmem:[#allocation12 + $0x274] sm:$0xf0] }
 0x2b2   : > { %3060 = vmatpush.bf16.msra.mxu3 %v8034_v10  ;;  %v7701_v10 = vld [vmem:[#allocation12 + $0xa8] sm:$0xf] }
 0x2b3   : > { %3022 = vmatpush.bf16.msra.mxu0 %v7634_v3  ;;  %v7718_v3 = vor.u32 %v10008_v56, %v7717_v54  ;;  %v7702_v19 = vor.u32 %v10004_v11, %v7701_v10  ;;  %v7781_v54 = vld [vmem:[#allocation12 + $0x148] sm:$0xf]  ;;  %v10024_v56 = vld [vmem:[#allocation12 + $0x154] sm:$0xf0] }
 0x2b4   : > { %3035 = vmatpush.bf16.msra.mxu1 %v7762_v4  ;;  %v7989_v4 = vld [vmem:[#allocation12 + $0x2e8] sm:$0xf]  ;;  %v10056_v10 = vld [vmem:[#allocation12 + $0x254] sm:$0xf0] }
 0x2b5   : > { %3048 = vmatpush.bf16.msra.mxu2 %v7890_v22  ;;  %v10072_v22 = vld [vmem:[#allocation12 + $0x2d4] sm:$0xf0]  ;;  %v8037_v11 = vld [vmem:[#allocation12 + $0x348] sm:$0xf] }
 0x2b6   : > { %3061 = vmatpush.bf16.msra.mxu3 %v8018_v23  ;;  %v8101_v23 = vld [vmem:[#allocation12 + $0x3c8] sm:$0xf] }
 0x2b7   : > { %3023 = vmatpush.bf16.msra.mxu0 %v7618_v13  ;;  %v7829_v13 = vld [vmem:[#allocation12 + $0x1a8] sm:$0xf] }
 0x2b8   : > { %3036 = vmatpush.bf16.msra.mxu1 %v7746_v16  ;;  %v7990_v16 = vor.u32 %v10076_v5, %v7989_v4  ;;  %v9988_v4 = vld [vmem:[#allocation12 + $0x34] sm:$0xf0]  ;;  %v7765_v5 = vld [vmem:[#allocation12 + $0x128] sm:$0xf] }
 0x2b9   : > { %3049 = vmatpush.bf16.msra.mxu2 %v7874_v24  ;;  %v7830_v24 = vor.u32 %v10036_v14, %v7829_v13  ;;  %v7766_v13 = vor.u32 %v10020_v6, %v7765_v5  ;;  %v10088_v14 = vld [vmem:[#allocation12 + $0x354] sm:$0xf0]  ;;  %v7687_v5 = vld [vmem:[#allocation12 + $0x98] sm:$0xf0]  ;;  %v10030_v6 = vld [vmem:[#allocation12 + $0x18c] sm:$0xf] }
 0x2ba   : > { %3062 = vmatpush.bf16.msra.mxu3 %v8002_v55  ;;  %v10000_v55 = vld [vmem:[#allocation12 + $0x94] sm:$0xf0] }
 0x2f7   : > { %v2116_v21 = vpop.f32.mrf.mxu0 }
 0x2f8   : > { %v2171_v33 = vmul.f32 %v2163_v30, %v2116_v21  ;;  %v2129_v34 = vpop.f32.mrf.mxu1  ;;  %v10032_v30 = vld [vmem:[#allocation12 + $0x194] sm:$0xf0]  ;;  %v7686_v21 = vor.u32 %v10000_v55, %v7685_v27  ;;  %v7893_v27 = vld [vmem:[#allocation12 + $0x228] sm:$0xf] }
 0x2f9   : > { %v2172_v35 = vmul.f32 %v2164_v15, %v2129_v34  ;;  %v7974_v15 = vor.u32 %v10072_v22, %v7973_v20  ;;  %v7814_v34 = vor.u32 %v10032_v30, %v7813_v29  ;;  %v10010_v20 = vld [vmem:[#allocation12 + $0xec] sm:$0xf]  ;;  %v7910_v22 = vor.u32 %v10056_v10, %v7909_v9  ;;  %v10052_v55 = vld [vmem:[#allocation12 + $0x234] sm:$0xf0]  ;;  %v8021_v30 = vld [vmem:[#allocation12 + $0x328] sm:$0xf] }
 0x2fa   : > { %v2184_v36 = vadd.f32 %v2176_v31, %v2171_v33  ;;  %v8102_v31 = vor.u32 %v10104_v26, %v8101_v23  ;;  %v10068_v33 = vld [vmem:[#allocation12 + $0x2b4] sm:$0xf0]  ;;  %v7735_v23 = vld [vmem:[#allocation12 + $0xf8] sm:$0xf0]  ;;  %v8038_v26 = vor.u32 %v10088_v14, %v8037_v11  ;;  %v10066_v10 = vld [vmem:[#allocation12 + $0x2ac] sm:$0xf] }
 0x2fb   : > { %v2185_v39 = vadd.f32 %v2177_v32, %v2172_v35  ;;  %v7957_v32 = vld [vmem:[#allocation12 + $0x2a8] sm:$0xf]  ;;  %v7959_v11 = vld [vmem:[#allocation12 + $0x2b8] sm:$0xf0]  ;;  %v10098_v14 = vld [vmem:[#allocation12 + $0x3ac] sm:$0xf] }
 0x2fc   : > { %v2188_v44 = vmax.f32 %v2184_v36, 0.0  ;;  %v8085_v35 = vld [vmem:[#allocation12 + $0x3a8] sm:$0xf]  ;;  %v10100_v36 = vld [vmem:[#allocation12 + $0x3b4] sm:$0xf0]  ;;  %v7958_v41 = vor.u32 %v10068_v33, %v7957_v32  ;;  %v7894_v33 = vor.u32 %v10052_v55, %v7893_v27 }
 0x2fd   : > { %v2189_v46 = vmax.f32 %v2185_v39, 0.0  ;;  %v7797_v39 = vld [vmem:[#allocation12 + $0x168] sm:$0xf]  ;;  %v8086_v43 = vor.u32 %v10100_v36, %v8085_v35  ;;  %v10006_v32 = vld [vmem:[#allocation12 + $0xcc] sm:$0xf] }
 0x2fe   : > { %v11287_v50 = vpack.c.bf16 %v2188_v44, %v2188_v44  ;;  %v7941_v44 = vld [vmem:[#allocation12 + $0x288] sm:$0xf]  ;;  %v10038_v35 = vld [vmem:[#allocation12 + $0x1cc] sm:$0xf]  ;;  %v7847_v36 = vld [vmem:[#allocation12 + $0x1d8] sm:$0xf0] }
 0x2ff   : > { %v2142_v51 = vpop.f32.mrf.mxu2  ;;  %v11289_v57 = vpack.c.bf16 %v2189_v46, %v2189_v46  ;;  %v2118_v60 = vpop.f32.mrf.mxu0  ;;  %v7670_v46 = vor.u32 %v9996_v38, %v7669_v37  ;;  %v7877_v38 = vld [vmem:[#allocation12 + $0x208] sm:$0xf]  ;;  %v10094_v55 = vld [vmem:[#allocation12 + $0x38c] sm:$0xf] }
 0x300   : > { %v2173_v58 = vmul.f32 %v2165_v40, %v2142_v51  ;;  %v2155_v59 = vpop.f32.mrf.mxu3  ;;  %2972 = vmatmul.bf16.vlgmr.msrb.gmra.mxu0 %v11287_v50  ;;  %v2131_v0 = vpop.f32.mrf.mxu1  ;;  %v10028_v40 = vld [vmem:[#allocation12 + $0x174] sm:$0xf0]  ;;  %v7925_v60 = vld [vmem:[#allocation12 + $0x268] sm:$0xf] }
 0x301   : > { %v2174_v63 = vmul.f32 %v2166_v45, %v2155_v59  ;;  %2985 = vmatmul.bf16.vlgmr.msrb.gmra.mxu1 %v11289_v57  ;;  %3068 = vmatpush.bf16.msrb.mxu0 %v7734_v48  ;;  %v10064_v45 = vld [vmem:[#allocation12 + $0x294] sm:$0xf0]  ;;  %v8069_v48 = vld [vmem:[#allocation12 + $0x388] sm:$0xf] }
 0x302   : > { %v2186_v2 = vadd.f32 %v2178_v47, %v2173_v58  ;;  %3081 = vmatpush.bf16.msrb.mxu1 %v7862_v53  ;;  %v7798_v47 = vor.u32 %v10028_v40, %v7797_v39  ;;  %v10096_v51 = vld [vmem:[#allocation12 + $0x394] sm:$0xf0]  ;;  %v7942_v58 = vor.u32 %v10064_v45, %v7941_v44  ;;  %v8053_v0 = vld [vmem:[#allocation12 + $0x368] sm:$0xf]  ;;  %v7991_v44 = vld [vmem:[#allocation12 + $0x2f8] sm:$0xf0] }
 0x303   : > { %v2187_v7 = vadd.f32 %v2179_v52, %v2174_v63  ;;  %v7653_v52 = vld [vmem:[#allocation12 + $0x48] sm:$0xf]  ;;  %v9992_v53 = vld [vmem:[#allocation12 + $0x54] sm:$0xf0]  ;;  %v8070_v59 = vor.u32 %v10096_v51, %v8069_v48  ;;  %v7782_v63 = vor.u32 %v10024_v56, %v7781_v54  ;;  %v8119_v48 = vld [vmem:[#allocation12 + $0x3f8] sm:$0xf0] }
 0x304   : > { %v2190_v12 = vmax.f32 %v2186_v2, 0.0  ;;  %v7654_v62 = vor.u32 %v9992_v53, %v7653_v52  ;;  %v10092_v2 = vld [vmem:[#allocation12 + $0x374] sm:$0xf0]  ;;  %v8005_v40 = vld [vmem:[#allocation12 + $0x308] sm:$0xf] }
 0x305   : > { %v2191_v42 = vmax.f32 %v2187_v7, 0.0  ;;  %3069 = vmatpush.bf16.msrb.mxu0 %v7718_v3  ;;  %v7637_v3 = vld [vmem:[#allocation12 + $0x28] sm:$0xf]  ;;  %v7926_v7 = vor.u32 %v10060_v61, %v7925_v60  ;;  %v10048_v39 = vld [vmem:[#allocation12 + $0x214] sm:$0xf0] }
 0x306   : > { %v11293_v17 = vpack.c.bf16 %v2190_v12, %v2190_v12  ;;  %3082 = vmatpush.bf16.msrb.mxu1 %v7846_v8  ;;  %v8054_v8 = vor.u32 %v10092_v2, %v8053_v0  ;;  %v7638_v12 = vor.u32 %v9988_v4, %v7637_v3  ;;  %v10002_v51 = vld [vmem:[#allocation12 + $0xac] sm:$0xf]  ;;  %v7878_v52 = vor.u32 %v10048_v39, %v7877_v38  ;;  %v7703_v53 = vld [vmem:[#allocation12 + $0xb8] sm:$0xf0] }
 0x307   : > { %v11295_v25 = vpack.c.bf16 %v2191_v42, %v2191_v42  ;;  %v2144_v49 = vpop.f32.mrf.mxu2  ;;  %v7621_v42 = vld [vmem:[#allocation12 + $0x8] sm:$0xf]  ;;  %v10034_v54 = vld [vmem:[#allocation12 + $0x1ac] sm:$0xf]  ;;  %v7831_v56 = vld [vmem:[#allocation12 + $0x1b8] sm:$0xf0] }
 0x308   : > { %v2157_v28 = vpop.f32.mrf.mxu3  ;;  %2998 = vmatmul.bf16.vlgmr.msrb.gmra.mxu2 %v11293_v17  ;;  %v10042_v49 = vld [vmem:[#allocation12 + $0x1ec] sm:$0xf]  ;;  %v7834_v0 = vor.u32 %v10034_v54, %v7831_v56  ;;  %v8103_v3 = vld [vmem:[#allocation12 + $0x3d8] sm:$0xf0] }
 0x309   : > { %3011 = vmatmul.bf16.vlgmr.msrb.gmra.mxu3 %v11295_v25  ;;  %3094 = vmatpush.bf16.msrb.mxu2 %v7990_v16  ;;  %v9984_v16 = vld [vmem:[#allocation12 + $0x14] sm:$0xf0]  ;;  %v10070_v61 = vld [vmem:[#allocation12 + $0x2cc] sm:$0xf]  ;;  %v8055_v38 = vld [vmem:[#allocation12 + $0x378] sm:$0xf0] }
 0x30a   : > { %3107 = vmatpush.bf16.msrb.mxu3 %v8118_v18  ;;  %3070 = vmatpush.bf16.msrb.mxu0 %v7702_v19  ;;  %v7749_v18 = vld [vmem:[#allocation12 + $0x108] sm:$0xf]  ;;  %v10016_v19 = vld [vmem:[#allocation12 + $0x114] sm:$0xf0]  ;;  %v7622_v28 = vor.u32 %v9984_v16, %v7621_v42  ;;  %v10102_v2 = vld [vmem:[#allocation12 + $0x3cc] sm:$0xf] }
 0x30b   : > { %3083 = vmatpush.bf16.msrb.mxu1 %v7830_v24  ;;  %v7863_v24 = vld [vmem:[#allocation12 + $0x1f8] sm:$0xf0]  ;;  %v7750_v29 = vor.u32 %v10016_v19, %v7749_v18  ;;  %v9998_v4 = vld [vmem:[#allocation12 + $0x8c] sm:$0xf]  ;;  %v8106_v9 = vor.u32 %v10102_v2, %v8103_v3 }
 0x30c   : > { %v8087_v42 = vld [vmem:[#allocation12 + $0x3b8] sm:$0xf0]  ;;  %v9994_v16 = vld [vmem:[#allocation12 + $0x6c] sm:$0xf] }
 0x30d   : > { %3095 = vmatpush.bf16.msrb.mxu2 %v7974_v15  ;;  %v10084_v15 = vld [vmem:[#allocation12 + $0x334] sm:$0xf0]  ;;  %v7671_v18 = vld [vmem:[#allocation12 + $0x78] sm:$0xf0]  ;;  %v10026_v19 = vld [vmem:[#allocation12 + $0x16c] sm:$0xf] }
 0x30e   : > { %3108 = vmatpush.bf16.msrb.mxu3 %v8102_v31  ;;  %3071 = vmatpush.bf16.msrb.mxu0 %v7686_v21  ;;  %v7738_v31 = vor.u32 %v10010_v20, %v7735_v23  ;;  %v7866_v21 = vor.u32 %v10042_v49, %v7863_v24  ;;  %v8022_v37 = vor.u32 %v10084_v15, %v8021_v30  ;;  %v7799_v20 = vld [vmem:[#allocation12 + $0x178] sm:$0xf0]  ;;  %v10062_v49 = vld [vmem:[#allocation12 + $0x28c] sm:$0xf] }
 0x30f   : > { %3084 = vmatpush.bf16.msrb.mxu1 %v7814_v34  ;;  %v7719_v34 = vld [vmem:[#allocation12 + $0xd8] sm:$0xf0]  ;;  %v8090_v23 = vor.u32 %v10098_v14, %v8087_v42  ;;  %v7802_v27 = vor.u32 %v10026_v19, %v7799_v20  ;;  %v10022_v15 = vld [vmem:[#allocation12 + $0x14c] sm:$0xf]  ;;  %v8349_v14 = vld [vmem:[#allocation15 + $0x1c0] sm:$0xf] }
 0x310   : > { %3024 = vmatmul.bf16.vlgmr.msra.gmra.mxu0 %v11287_v50  ;;  %v7722_v45 = vor.u32 %v10006_v32, %v7719_v34  ;;  %v7943_v24 = vld [vmem:[#allocation12 + $0x298] sm:$0xf0]  ;;  %v9986_v39 = vld [vmem:[#allocation12 + $0x2c] sm:$0xf]  ;;  %v10167_v42 = vld [vmem:[#allocation15 + $0x1cc] sm:$0xf0] }
 0x311   : > { %3096 = vmatpush.bf16.msrb.mxu2 %v7958_v41  ;;  %3037 = vmatmul.bf16.vlgmr.msra.gmra.mxu1 %v11289_v57  ;;  %v10080_v41 = vld [vmem:[#allocation12 + $0x314] sm:$0xf0]  ;;  %v7655_v30 = vld [vmem:[#allocation12 + $0x58] sm:$0xf0]  ;;  %v9982_v54 = vld [vmem:[#allocation12 + $0xc] sm:$0xf] }
 0x312   : > { %3109 = vmatpush.bf16.msrb.mxu3 %v8086_v43  ;;  %3072 = vmatpush.bf16.msrb.mxu0 %v7670_v46  ;;  %v10074_v43 = vld [vmem:[#allocation12 + $0x2ec] sm:$0xf]  ;;  %v7850_v46 = vor.u32 %v10038_v35, %v7847_v36  ;;  %v7927_v34 = vld [vmem:[#allocation12 + $0x278] sm:$0xf0] }
 0x313   : > { %3085 = vmatpush.bf16.msrb.mxu1 %v7798_v47  ;;  %v10106_v47 = vld [vmem:[#allocation12 + $0x3ec] sm:$0xf]  ;;  %v7623_v56 = vld [vmem:[#allocation12 + $0x18] sm:$0xf0] }
 0x314   : > { %v8122_v60 = vor.u32 %v10106_v47, %v8119_v48  ;;  %v7911_v47 = vld [vmem:[#allocation12 + $0x258] sm:$0xf0]  ;;  %v10086_v48 = vld [vmem:[#allocation12 + $0x34c] sm:$0xf] }
 0x315   : > { %3097 = vmatpush.bf16.msrb.mxu2 %v7942_v58  ;;  %v8006_v58 = vor.u32 %v10080_v41, %v8005_v40  ;;  %v7639_v40 = vld [vmem:[#allocation12 + $0x38] sm:$0xf0]  ;;  %v10018_v41 = vld [vmem:[#allocation12 + $0x12c] sm:$0xf] }
 0x316   : > { %3110 = vmatpush.bf16.msrb.mxu3 %v8070_v59  ;;  %3073 = vmatpush.bf16.msrb.mxu0 %v7654_v62  ;;  %v7994_v59 = vor.u32 %v10074_v43, %v7991_v44  ;;  %v7975_v62 = vld [vmem:[#allocation12 + $0x2d8] sm:$0xf0]  ;;  %v10050_v3 = vld [vmem:[#allocation12 + $0x22c] sm:$0xf] }
 0x317   : > { %3086 = vmatpush.bf16.msrb.mxu1 %v7782_v63  ;;  %v7706_v63 = vor.u32 %v10002_v51, %v7703_v53  ;;  %v7767_v43 = vld [vmem:[#allocation12 + $0x138] sm:$0xf0]  ;;  %v7642_v51 = vor.u32 %v9986_v39, %v7639_v40  ;;  %v10078_v20 = vld [vmem:[#allocation12 + $0x30c] sm:$0xf]  ;;  %v8301_v39 = vld [vmem:[#allocation15 + $0x160] sm:$0xf] }
 0x318   : > { %3050 = vmatmul.bf16.vlgmr.msra.gmra.mxu2 %v11293_v17  ;;  %v8039_v53 = vld [vmem:[#allocation12 + $0x358] sm:$0xf0]  ;;  %v10155_v40 = vld [vmem:[#allocation15 + $0x16c] sm:$0xf0] }
 0x319   : > { %3063 = vmatmul.bf16.vlgmr.msra.gmra.mxu3 %v11295_v25  ;;  %3098 = vmatpush.bf16.msrb.mxu2 %v7926_v7  ;;  %v7815_v7 = vld [vmem:[#allocation12 + $0x198] sm:$0xf0]  ;;  %v8042_v2 = vor.u32 %v10086_v48, %v8039_v53  ;;  %v8141_v53 = vld [vmem:[#allocation15 + $0x20] sm:$0xf] }
 0x31a   : > { %3111 = vmatpush.bf16.msrb.mxu3 %v8054_v8  ;;  %3074 = vmatpush.bf16.msrb.mxu0 %v7638_v12  ;;  %v7978_v8 = vor.u32 %v10070_v61, %v7975_v62  ;;  %v7690_v12 = vor.u32 %v9998_v4, %v7687_v5  ;;  %v10139_v62 = vld [vmem:[#allocation15 + $0xec] sm:$0xf0]  ;;  %v7895_v4 = vld [vmem:[#allocation12 + $0x238] sm:$0xf0]  ;;  %v7626_v5 = vor.u32 %v9982_v54, %v7623_v56 }
 0x31b   : > { %3087 = vmatpush.bf16.msrb.mxu1 %v7766_v13  ;;  %v7818_v13 = vor.u32 %v10030_v6, %v7815_v7  ;;  %v10082_v7 = vld [vmem:[#allocation12 + $0x32c] sm:$0xf]  ;;  %v7879_v19 = vld [vmem:[#allocation12 + $0x218] sm:$0xf0]  ;;  %v10115_v54 = vld [vmem:[#allocation15 + $0x2c] sm:$0xf0] }
 0x31d   : > { %3099 = vmatpush.bf16.msrb.mxu2 %v7910_v22  ;;  %v7962_v22 = vor.u32 %v10066_v10, %v7959_v11  ;;  %v8221_v10 = vld [vmem:[#allocation15 + $0xc0] sm:$0xf] }
 0x31e   : > { %3112 = vmatpush.bf16.msrb.mxu3 %v8038_v26  ;;  %3075 = vmatpush.bf16.msrb.mxu0 %v7622_v28  ;;  %v7674_v26 = vor.u32 %v9994_v16, %v7671_v18  ;;  %v8071_v28 = vld [vmem:[#allocation12 + $0x398] sm:$0xf0]  ;;  %v10046_v18 = vld [vmem:[#allocation12 + $0x20c] sm:$0xf] }
 0x31f   : > { %3088 = vmatpush.bf16.msrb.mxu1 %v7750_v29  ;;  %v9990_v29 = vld [vmem:[#allocation12 + $0x4c] sm:$0xf]  ;;  %v8074_v32 = vor.u32 %v10094_v55, %v8071_v28  ;;  %v8205_v55 = vld [vmem:[#allocation15 + $0xa0] sm:$0xf]  ;;  %v10131_v28 = vld [vmem:[#allocation15 + $0xac] sm:$0xf0] }
 0x320   : > { %v7658_v35 = vor.u32 %v9990_v29, %v7655_v30  ;;  %v8333_v30 = vld [vmem:[#allocation15 + $0x1a0] sm:$0xf] }
 0x321   : > { %3100 = vmatpush.bf16.msrb.mxu2 %v7894_v33  ;;  %3076 = vmatmul.bf16.vlgmr.msrb.gmra.mxu0 %v11287_v50  ;;  %v10058_v33 = vld [vmem:[#allocation12 + $0x26c] sm:$0xf] }
 0x322   : > { %3120 = vmatpush.bf16.msra.mxu0 %v7738_v31  ;;  %3113 = vmatpush.bf16.msrb.mxu3 %v8022_v37  ;;  %v7783_v31 = vld [vmem:[#allocation12 + $0x158] sm:$0xf0]  ;;  %v10090_v37 = vld [vmem:[#allocation12 + $0x36c] sm:$0xf]  ;;  %v7930_v44 = vor.u32 %v10058_v33, %v7927_v34  ;;  %v10127_v33 = vld [vmem:[#allocation15 + $0x8c] sm:$0xf0] }
 0x323   : > { %3133 = vmatpush.bf16.msra.mxu1 %v7866_v21  ;;  %v7946_v21 = vor.u32 %v10062_v49, %v7943_v24  ;;  %v7786_v36 = vor.u32 %v10022_v15, %v7783_v31  ;;  %v10203_v49 = vld [vmem:[#allocation15 + $0x2ec] sm:$0xf0] }
 0x324   : > { %3089 = vmatmul.bf16.vlgmr.msrb.gmra.mxu1 %v11289_v57  ;;  %v10163_v15 = vld [vmem:[#allocation15 + $0x1ac] sm:$0xf0] }
 0x325   : > { %3101 = vmatpush.bf16.msrb.mxu2 %v7878_v52  ;;  %v7770_v52 = vor.u32 %v10018_v41, %v7767_v43  ;;  %v8334_v34 = vor.u32 %v10163_v15, %v8333_v30  ;;  %v2021_v41 = vld [vmem:[#allocation2 + $0x2] ss:$8 sm:$0xf]  ;;  %v2042_v15 = vlaneseq }
 0x326   : > { %3121 = vmatpush.bf16.msra.mxu0 %v7722_v45  ;;  %3114 = vmatpush.bf16.msrb.mxu3 %v8006_v58  ;;  %v8058_v45 = vor.u32 %v10090_v37, %v8055_v38  ;;  %v10014_v58 = vld [vmem:[#allocation12 + $0x10c] sm:$0xf]  ;;  %v8173_v37 = vld [vmem:[#allocation15 + $0x60] sm:$0xf]  ;;  %v10123_v38 = vld [vmem:[#allocation15 + $0x6c] sm:$0xf0] }
 0x327   : > { %3134 = vmatpush.bf16.msra.mxu1 %v7850_v46  ;;  %v10054_v46 = vld [vmem:[#allocation12 + $0x24c] sm:$0xf]  ;;  %v11311_v43 = vmul.f32 0.125, %v2021_v41  ;;  %vm11319_vm1 = vcmp.lt.s32.totalorder %v2042_v15, 512  ;;  %v10121_v41 = vld [vmem:[#allocation15 + $0x64] sm:$0xf] }
 0x328   : > { %3102 = vmatmul.bf16.vlgmr.msrb.gmra.mxu2 %v11293_v17  ;;  %v7914_v61 = vor.u32 %v10054_v46, %v7911_v47  ;;  %v8157_v46 = vld [vmem:[#allocation15 + $0x40] sm:$0xf]  ;;  %v10119_v47 = vld [vmem:[#allocation15 + $0x4c] sm:$0xf0]  ;;  %v10149_v15 = vld [vmem:[#allocation15 + $0x144] sm:$0xf] }
 0x329   : > { %3146 = vmatpush.bf16.msra.mxu2 %v7994_v59  ;;  %3115 = vmatmul.bf16.vlgmr.msrb.gmra.mxu3 %v11295_v25  ;;  %v7751_v59 = vld [vmem:[#allocation12 + $0x118] sm:$0xf0] }
 0x32a   : > { %3159 = vmatpush.bf16.msra.mxu3 %v8122_v60  ;;  %3122 = vmatpush.bf16.msra.mxu0 %v7706_v63  ;;  %v8237_v60 = vld [vmem:[#allocation15 + $0xe0] sm:$0xf]  ;;  %v7754_v6 = vor.u32 %v10014_v58, %v7751_v59  ;;  %v8142_v59 = vor.u32 %v10115_v54, %v8141_v53  ;;  %v10165_v53 = vld [vmem:[#allocation15 + $0x1c4] sm:$0xf] }
 0x32b   : > { %3135 = vmatpush.bf16.msra.mxu1 %v7834_v0  ;;  %v8365_v63 = vld [vmem:[#allocation15 + $0x1e0] sm:$0xf]  ;;  %v10171_v0 = vld [vmem:[#allocation15 + $0x1ec] sm:$0xf0] }
 0x32c   : > { %v8366_v11 = vor.u32 %v10171_v0, %v8365_v63  ;;  %v8239_v63 = vld [vmem:[#allocation15 + $0xf0] sm:$0xf0] }
 0x32d   : > { %3147 = vmatpush.bf16.msra.mxu2 %v7978_v8  ;;  %v8023_v8 = vld [vmem:[#allocation12 + $0x338] sm:$0xf0] }
 0x32e   : > { %3160 = vmatpush.bf16.msra.mxu3 %v8106_v9  ;;  %3123 = vmatpush.bf16.msra.mxu0 %v7690_v12  ;;  %v8238_v9 = vor.u32 %v10139_v62, %v8237_v60  ;;  %v7898_v12 = vor.u32 %v10050_v3, %v7895_v4  ;;  %v8026_v16 = vor.u32 %v10082_v7, %v8023_v8  ;;  %v8125_v60 = vld [vmem:[#allocation15] sm:$0xf]  ;;  %v10137_v62 = vld [vmem:[#allocation15 + $0xe4] sm:$0xf]  ;;  %v8223_v8 = vld [vmem:[#allocation15 + $0xd0] sm:$0xf0] }
 0x32f   : > { %3136 = vmatpush.bf16.msra.mxu1 %v7818_v13  ;;  %v10135_v13 = vld [vmem:[#allocation15 + $0xcc] sm:$0xf0]  ;;  %v10133_v7 = vld [vmem:[#allocation15 + $0xc4] sm:$0xf] }
 0x330   : > { %v8222_v24 = vor.u32 %v10135_v13, %v8221_v10  ;;  %v8477_v13 = vld [vmem:[#allocation15 + $0x2c0] sm:$0xf] }
 0x331   : > { %3148 = vmatpush.bf16.msra.mxu2 %v7962_v22  ;;  %v8007_v22 = vld [vmem:[#allocation12 + $0x318] sm:$0xf0] }
 0x332   : > { %3161 = vmatpush.bf16.msra.mxu3 %v8090_v23  ;;  %3124 = vmatpush.bf16.msra.mxu0 %v7674_v26  ;;  %v8493_v23 = vld [vmem:[#allocation15 + $0x2e0] sm:$0xf]  ;;  %v8350_v26 = vor.u32 %v10167_v42, %v8349_v14  ;;  %v8010_v29 = vor.u32 %v10078_v20, %v8007_v22  ;;  %v10199_v42 = vld [vmem:[#allocation15 + $0x2cc] sm:$0xf0] }
 0x333   : > { %3137 = vmatpush.bf16.msra.mxu1 %v7802_v27  ;;  %v7882_v27 = vor.u32 %v10046_v18, %v7879_v19  ;;  %v8494_v31 = vor.u32 %v10203_v49, %v8493_v23  ;;  %v8207_v18 = vld [vmem:[#allocation15 + $0xb0] sm:$0xf0]  ;;  %v8478_v20 = vor.u32 %v10199_v42, %v8477_v13  ;;  %v8269_v23 = vld [vmem:[#allocation15 + $0x120] sm:$0xf]  ;;  %v10147_v49 = vld [vmem:[#allocation15 + $0x12c] sm:$0xf0] }
 0x334   : > { %v10175_v42 = vld [vmem:[#allocation15 + $0x20c] sm:$0xf0] }
 0x335   : > { %3149 = vmatpush.bf16.msra.mxu2 %v7946_v21  ;;  %v8206_v21 = vor.u32 %v10131_v28, %v8205_v55  ;;  %v2029_v55 = vld [vmem:[%s11497_s5] sm:$0xf] }
 0x336   : > { %3162 = vmatpush.bf16.msra.mxu3 %v8074_v32  ;;  %3125 = vmatpush.bf16.msra.mxu0 %v7658_v35  ;;  %v8189_v32 = vld [vmem:[#allocation15 + $0x80] sm:$0xf] }
 0x337   : > { %3138 = vmatpush.bf16.msra.mxu1 %v7786_v36  ;;  %v8317_v35 = vld [vmem:[#allocation15 + $0x180] sm:$0xf]  ;;  %v10159_v36 = vld [vmem:[#allocation15 + $0x18c] sm:$0xf0] }
 0x339   : > { %3150 = vmatpush.bf16.msra.mxu2 %v7930_v44  ;;  %v8174_v44 = vor.u32 %v10123_v38, %v8173_v37  ;;  %v10191_v37 = vld [vmem:[#allocation15 + $0x28c] sm:$0xf0] }
 0x33a   : > { %3163 = vmatpush.bf16.msra.mxu3 %v8058_v45  ;;  %3126 = vmatpush.bf16.msra.mxu0 %v7642_v51  ;;  %v2024_v45 = vld [vmem:[#allocation2 + $0x3] ss:$8 sm:$0xf] }
 0x33b   : > { %3139 = vmatpush.bf16.msra.mxu1 %v7770_v52  ;;  %v2025_v48 = vmul.f32 0.125, %v2024_v45  ;;  %v8158_v52 = vor.u32 %v10119_v47, %v8157_v46  ;;  %v10169_v45 = vld [vmem:[#allocation15 + $0x1e4] sm:$0xf]  ;;  %v8367_v46 = vld [vmem:[#allocation15 + $0x1f0] sm:$0xf0] }
 0x33c   : > { %v8370_v47 = vor.u32 %v10169_v45, %v8367_v46  ;;  %v10223_v46 = vld [vmem:[#allocation15 + $0x38c] sm:$0xf0] }
 0x33d   : > { %3151 = vmatpush.bf16.msra.mxu2 %v7914_v61  ;;  %v10111_v61 = vld [vmem:[#allocation15 + $0xc] sm:$0xf0] }
 0x33e   : > { %3164 = vmatpush.bf16.msra.mxu3 %v8042_v2  ;;  %3127 = vmatpush.bf16.msra.mxu0 %v7626_v5  ;;  %v8126_v0 = vor.u32 %v10111_v61, %v8125_v60  ;;  %v8242_v2 = vor.u32 %v10137_v62, %v8239_v63  ;;  %v10183_v60 = vld [vmem:[#allocation15 + $0x24c] sm:$0xf0]  ;;  %v10113_v62 = vld [vmem:[#allocation15 + $0x24] sm:$0xf]  ;;  %v8143_v63 = vld [vmem:[#allocation15 + $0x30] sm:$0xf0] }
 0x33f   : > { %3140 = vmatpush.bf16.msra.mxu1 %v7754_v6 }
 0x341   : > { %3152 = vmatpush.bf16.msra.mxu2 %v7898_v12  ;;  %3128 = vmatmul.bf16.vlgmr.msra.gmra.mxu0 %v11287_v50  ;;  %v8190_v50 = vor.u32 %v10127_v33, %v8189_v32  ;;  %v10151_v12 = vld [vmem:[#allocation15 + $0x14c] sm:$0xf0]  ;;  %v8253_v33 = vld [vmem:[#allocation15 + $0x100] sm:$0xf] }
 0x342   : > { %3978 = vmatpush.bf16.msrb.mxu0 %v8238_v9  ;;  %3165 = vmatpush.bf16.msra.mxu3 %v8026_v16  ;;  %v8226_v9 = vor.u32 %v10133_v7, %v8223_v8  ;;  %v10129_v16 = vld [vmem:[#allocation15 + $0xa4] sm:$0xf] }
 0x343   : > { %3991 = vmatpush.bf16.msrb.mxu1 %v8366_v11  ;;  %v8285_v11 = vld [vmem:[#allocation15 + $0x140] sm:$0xf]  ;;  %v8210_v22 = vor.u32 %v10129_v16, %v8207_v18  ;;  %v10109_v8 = vld [vmem:[#allocation15 + $0x4] sm:$0xf] }
 0x344   : > { %3141 = vmatmul.bf16.vlgmr.msra.gmra.mxu1 %v11289_v57  ;;  %v8318_v57 = vor.u32 %v10159_v36, %v8317_v35  ;;  %v8286_v14 = vor.u32 %v10151_v12, %v8285_v11  ;;  %v8445_v35 = vld [vmem:[#allocation15 + $0x280] sm:$0xf]  ;;  %v8319_v12 = vld [vmem:[#allocation15 + $0x190] sm:$0xf0] }
 0x345   : > { %3153 = vmatpush.bf16.msra.mxu2 %v7882_v27  ;;  %v10195_v27 = vld [vmem:[#allocation15 + $0x2ac] sm:$0xf0]  ;;  %v8621_v16 = vld [vmem:[#allocation15 + $0x3e0] sm:$0xf] }
 0x346   : > { %3979 = vmatpush.bf16.msrb.mxu0 %v8222_v24  ;;  %3166 = vmatpush.bf16.msra.mxu3 %v8010_v29  ;;  %v8461_v24 = vld [vmem:[#allocation15 + $0x2a0] sm:$0xf] }
 0x347   : > { %3992 = vmatpush.bf16.msrb.mxu1 %v8350_v26  ;;  %v8270_v26 = vor.u32 %v10147_v49, %v8269_v23  ;;  %v8462_v28 = vor.u32 %v10195_v27, %v8461_v24  ;;  %v10201_v24 = vld [vmem:[#allocation15 + $0x2e4] sm:$0xf] }
 0x348   : > { %3154 = vmatmul.bf16.vlgmr.msra.gmra.mxu2 %v11293_v17  ;;  %v8302_v17 = vor.u32 %v10155_v40, %v8301_v39  ;;  %v8446_v39 = vor.u32 %v10191_v37, %v8445_v35 }
 0x349   : > { %4004 = vmatpush.bf16.msrb.mxu2 %v8494_v31  ;;  %3167 = vmatmul.bf16.vlgmr.msra.gmra.mxu3 %v11295_v25  ;;  %v2026_v25 = vmul.f32 %v11311_v43, %v11311_v43  ;;  %v10125_v31 = vld [vmem:[#allocation15 + $0x84] sm:$0xf] }
 0x34a   : > { %3980 = vmatpush.bf16.msrb.mxu0 %v8206_v21  ;;  %v8191_v21 = vld [vmem:[#allocation15 + $0x90] sm:$0xf0] }
 0x34b   : > { %3993 = vmatpush.bf16.msrb.mxu1 %v8334_v34  ;;  %v2027_v51 = vsub.f32 %v2025_v48, %v2026_v25  ;;  %v8194_v32 = vor.u32 %v10125_v31, %v8191_v21  ;;  %v10143_v34 = vld [vmem:[#allocation15 + $0x10c] sm:$0xf0]  ;;  %v8287_v31 = vld [vmem:[#allocation15 + $0x150] sm:$0xf0] }
 0x34c   : > { %v10187_v48 = vld [vmem:[#allocation15 + $0x26c] sm:$0xf0] }
 0x34d   : > { %v2028_v56 = vmax.f32 %v2027_v51, 0.0  ;;  %4005 = vmatpush.bf16.msrb.mxu2 %v8478_v20  ;;  %v10117_v51 = vld [vmem:[#allocation15 + $0x44] sm:$0xf] }
 0x34e   : > { %3981 = vmatpush.bf16.msrb.mxu0 %v8190_v50  ;;  %v8254_v50 = vor.u32 %v10143_v34, %v8253_v33  ;;  %v10153_v20 = vld [vmem:[#allocation15 + $0x164] sm:$0xf]  ;;  %v8479_v34 = vld [vmem:[#allocation15 + $0x2d0] sm:$0xf0] }
 0x34f   : > { %3994 = vmatpush.bf16.msrb.mxu1 %v8318_v57  ;;  %v2030_v58 = vadd.f32 1e-05, %v2028_v56  ;;  %v2049_v57 = vld [vmem:[#allocation13] sm:$0xf]  ;;  %v8351_v56 = vld [vmem:[#allocation15 + $0x1d0] sm:$0xf0] }
 0x350   : > { %v10197_v33 = vld [vmem:[#allocation15 + $0x2c4] sm:$0xf] }
 0x351   : > { %10667 = vrsqrt.f32 %v2030_v58  ;;  %vm2037_vm14 = vweird.f32 %v2030_v58  ;;  %4006 = vmatpush.bf16.msrb.mxu2 %v8462_v28  ;;  %v10231_v28 = vld [vmem:[#allocation15 + $0x3cc] sm:$0xf0]  ;;  %v8482_v35 = vor.u32 %v10197_v33, %v8479_v34  ;;  %v8509_v33 = vld [vmem:[#allocation15 + $0x300] sm:$0xf] }
 0x352   : > { %3982 = vmatpush.bf16.msrb.mxu0 %v8174_v44  ;;  %v8175_v44 = vld [vmem:[#allocation15 + $0x70] sm:$0xf0]  ;;  %v10207_v34 = vld [vmem:[#allocation15 + $0x30c] sm:$0xf0] }
 0x353   : > { %3995 = vmatpush.bf16.msrb.mxu1 %v8302_v17  ;;  %v8429_v17 = vld [vmem:[#allocation15 + $0x260] sm:$0xf] }
 0x354   : > { %v8430_v25 = vor.u32 %v10187_v48, %v8429_v17  ;;  %v10141_v48 = vld [vmem:[#allocation15 + $0x104] sm:$0xf] }
 0x355   : > { %4007 = vmatpush.bf16.msrb.mxu2 %v8446_v39  ;;  %v8271_v39 = vld [vmem:[#allocation15 + $0x130] sm:$0xf0] }
 0x356   : > { %3983 = vmatpush.bf16.msrb.mxu0 %v8158_v52  ;;  %v8159_v52 = vld [vmem:[#allocation15 + $0x50] sm:$0xf0] }
 0x357   : > { %v10668_v3 = vpop.eup %10667  ;;  %3996 = vmatpush.bf16.msrb.mxu1 %v8286_v14  ;;  %v8162_v54 = vor.u32 %v10117_v51, %v8159_v52  ;;  %v8381_v14 = vld [vmem:[#allocation15 + $0x200] sm:$0xf]  ;;  %v10189_v51 = vld [vmem:[#allocation15 + $0x284] sm:$0xf] }
 0x358   : > { %v2032_v4 = vmul.f32 %v10668_v3, %v2030_v58  ;;  %vm2038_vm15 = vweird.f32 %v10668_v3  ;;  %v8354_v58 = vor.u32 %v10165_v53, %v8351_v56  ;;  %v8382_v18 = vor.u32 %v10175_v42, %v8381_v14  ;;  %v10181_v14 = vld [vmem:[#allocation15 + $0x244] sm:$0xf]  ;;  %v8415_v42 = vld [vmem:[#allocation15 + $0x250] sm:$0xf0] }
 0x359   : > { %vm2039_vm0 = vmor %vm2037_vm14, %vm2038_vm15  ;;  %4008 = vmatpush.bf16.msrb.mxu2 %v8430_v25  ;;  %v8255_v25 = vld [vmem:[#allocation15 + $0x110] sm:$0xf0] }
 0x35a   : > { %3984 = vmatpush.bf16.msrb.mxu0 %v8142_v59  ;;  %v2033_v5 = vmul.f32 %v10668_v3, %v2032_v4  ;;  %v8413_v59 = vld [vmem:[#allocation15 + $0x240] sm:$0xf]  ;;  %v8258_v53 = vor.u32 %v10141_v48, %v8255_v25  ;;  %v10229_v48 = vld [vmem:[#allocation15 + $0x3c4] sm:$0xf]  ;;  %v8607_v25 = vld [vmem:[#allocation15 + $0x3d0] sm:$0xf0] }
 0x35b   : > { %3997 = vmatpush.bf16.msrb.mxu1 %v8270_v26  ;;  %v8414_v61 = vor.u32 %v10183_v60, %v8413_v59  ;;  %v8495_v26 = vld [vmem:[#allocation15 + $0x2f0] sm:$0xf0]  ;;  %v8557_v60 = vld [vmem:[#allocation15 + $0x360] sm:$0xf] }
 0x35c   : > { %v2034_v6 = vmul.f32 0.5, %v2033_v5  ;;  %v8397_v5 = vld [vmem:[#allocation15 + $0x220] sm:$0xf]  ;;  %v8498_v27 = vor.u32 %v10201_v24, %v8495_v26  ;;  %v10140_v24 = vld [vmem:[#allocation15 + $0xf4] sm:$0xf0] }
 0x35d   : > { %4009 = vmatpush.bf16.msrb.mxu2 %v8414_v61  ;;  %v10219_v61 = vld [vmem:[#allocation15 + $0x36c] sm:$0xf0] }
 0x35e   : > { %3985 = vmatpush.bf16.msrb.mxu0 %v8126_v0  ;;  %v2035_v10 = vsub.f32 1.5, %v2034_v6  ;;  %v10161_v0 = vld [vmem:[#allocation15 + $0x1a4] sm:$0xf]  ;;  %v10179_v6 = vld [vmem:[#allocation15 + $0x22c] sm:$0xf0] }
 0x35f   : > { %3998 = vmatpush.bf16.msrb.mxu1 %v8254_v50  ;;  %v8398_v7 = vor.u32 %v10179_v6, %v8397_v5  ;;  %v10227_v50 = vld [vmem:[#allocation15 + $0x3ac] sm:$0xf0] }
 0x360   : > { %v2036_v19 = vmul.f32 %v10668_v3, %v2035_v10  ;;  %v10157_v10 = vld [vmem:[#allocation15 + $0x184] sm:$0xf] }
 0x361   : > { %4010 = vmatpush.bf16.msrb.mxu2 %v8398_v7  ;;  %v8322_v13 = vor.u32 %v10157_v10, %v8319_v12 }
 0x362   : > { %4030 = vmatpush.bf16.msra.mxu0 %v8242_v2  ;;  %v2040_v29 = vsel %vm2039_vm0, %v10668_v3, %v2036_v19  ;;  %v8146_v2 = vor.u32 %v10113_v62, %v8143_v63  ;;  %v8335_v3 = vld [vmem:[#allocation15 + $0x1b0] sm:$0xf0]  ;;  %v10235_v19 = vld [vmem:[#allocation15 + $0x3ec] sm:$0xf0]  ;;  %v8558_v62 = vor.u32 %v10219_v61, %v8557_v60  ;;  %v10185_v63 = vld [vmem:[#allocation15 + $0x264] sm:$0xf] }
 0x363   : > { %v2041_v30 = vmul.f32 %v2040_v29, %v2029_v55  ;;  %4043 = vmatpush.bf16.msra.mxu1 %v8370_v47  ;;  %v8338_v4 = vor.u32 %v10161_v0, %v8335_v3  ;;  %v8622_v23 = vor.u32 %v10235_v19, %v8621_v16  ;;  %v8605_v55 = vld [vmem:[#allocation15 + $0x3c0] sm:$0xf]  ;;  %v8431_v0 = vld [vmem:[#allocation15 + $0x270] sm:$0xf0]  ;;  %v8197_v61 = vld [vmem:[#allocation15 + $0x88] sm:$0xf] }
 0x365   : > { %v2050_v36 = vmul.f32 %v2041_v30, %v11311_v43  ;;  %2047 = vst.msk [vmem:[#allocation3 + $0x2] ss:$8 sm:$0xf] %vm11319_vm1, %v2041_v30  ;;  %v8178_v43 = vor.u32 %v10121_v41, %v8175_v44  ;;  %4011 = vmatpush.bf16.msrb.mxu2 %v8382_v18  ;;  %4017 = vmatpush.bf16.msrb.mxu3 %v8622_v23  ;;  %v8463_v44 = vld [vmem:[#allocation15 + $0x2b0] sm:$0xf0] }
 0x366   : > { %4031 = vmatpush.bf16.msra.mxu0 %v8226_v9  ;;  %v8127_v9 = vld [vmem:[#allocation15 + $0x10] sm:$0xf0]  ;;  %v8606_v30 = vor.u32 %v10231_v28, %v8605_v55  ;;  %v8418_v18 = vor.u32 %v10181_v14, %v8415_v42  ;;  %v10211_v23 = vld [vmem:[#allocation15 + $0x32c] sm:$0xf0]  ;;  %v10221_v14 = vld [vmem:[#allocation15 + $0x384] sm:$0xf] }
 0x367   : > { %v2051_v40 = vsub.f32 %v2049_v57, %v2050_v36  ;;  %4044 = vmatpush.bf16.msra.mxu1 %v8354_v58  ;;  %v8130_v11 = vor.u32 %v10109_v8, %v8127_v9  ;;  %v8589_v36 = vld [vmem:[#allocation15 + $0x3a0] sm:$0xf]  ;;  %v10145_v57 = vld [vmem:[#allocation15 + $0x124] sm:$0xf]  ;;  %v10215_v9 = vld [vmem:[#allocation15 + $0x34c] sm:$0xf0] }
 0x368   : > { %v8590_v37 = vor.u32 %v10227_v50, %v8589_v36  ;;  %v8274_v41 = vor.u32 %v10145_v57, %v8271_v39  ;;  %v8541_v8 = vld [vmem:[#allocation15 + $0x340] sm:$0xf]  ;;  %v8399_v55 = vld [vmem:[#allocation15 + $0x230] sm:$0xf0]  ;;  %v8510_v50 = vor.u32 %v10207_v34, %v8509_v33  ;;  %v10233_v39 = vld [vmem:[#allocation15 + $0x3e4] sm:$0xf] }
 0x369   : > { %2053 = vst.msk [vmem:[#allocation3 + $0x3] ss:$8 sm:$0xf] %vm11319_vm1, %v2051_v40  ;;  %4056 = vmatpush.bf16.msra.mxu2 %v8498_v27  ;;  %4018 = vmatpush.bf16.msrb.mxu3 %v8606_v30  ;;  %v10193_v40 = vld [vmem:[#allocation15 + $0x2a4] sm:$0xf] }
 0x36a   : > { %4032 = vmatpush.bf16.msra.mxu0 %v8210_v22  ;;  %v8303_v22 = vld [vmem:[#allocation15 + $0x170] sm:$0xf0]  ;;  %v8466_v45 = vor.u32 %v10193_v40, %v8463_v44  ;;  %v10177_v27 = vld [vmem:[#allocation15 + $0x224] sm:$0xf]  ;;  %v8149_v33 = vld [vmem:[#allocation15 + $0x28] sm:$0xf] }
 0x36b   : > { %4045 = vmatpush.bf16.msra.mxu1 %v8338_v4  ;;  %v8306_v49 = vor.u32 %v10153_v20, %v8303_v22  ;;  %v8434_v4 = vor.u32 %v10185_v63, %v8431_v0  ;;  %v8245_v20 = vld [vmem:[#allocation15 + $0xe8] sm:$0xf]  ;;  %v8525_v22 = vld [vmem:[#allocation15 + $0x320] sm:$0xf]  ;;  %v8383_v57 = vld [vmem:[#allocation15 + $0x210] sm:$0xf0] }
 0x36c   : > { %v11327_v58 = vld [vmem:[#allocation3 + $0x2] ss:$8 sm:$0xf]  ;;  %v8526_v26 = vor.u32 %v10211_v23, %v8525_v22  ;;  %v8623_v44 = vld [vmem:[#allocation15 + $0x3f0] sm:$0xf0] }
 0x36d   : > { %4057 = vmatpush.bf16.msra.mxu2 %v8482_v35  ;;  %4019 = vmatpush.bf16.msrb.mxu3 %v8590_v37  ;;  %v3177_v7 = vperm.slane %v11327_v58, 0  ;;  %v10173_v37 = vld [vmem:[#allocation15 + $0x204] sm:$0xf]  ;;  %v10128_v63 = vld [vmem:[#allocation15 + $0x94] sm:$0xf0] }
 0x36e   : > { %4033 = vmatpush.bf16.msra.mxu0 %v8194_v32  ;;  %v8290_v32 = vor.u32 %v10149_v15, %v8287_v31  ;;  %v8229_v31 = vld [vmem:[#allocation15 + $0xc8] sm:$0xf]  ;;  %v10225_v0 = vld [vmem:[#allocation15 + $0x3a4] sm:$0xf]  ;;  %v8575_v42 = vld [vmem:[#allocation15 + $0x390] sm:$0xf0] }
 0x36f   : > { %4046 = vmatpush.bf16.msra.mxu1 %v8322_v13  ;;  %v8542_v13 = vor.u32 %v10215_v9, %v8541_v8  ;;  %v8198_v8 = vor.u32 %v10128_v63, %v8197_v61  ;;  %v8181_v9 = vld [vmem:[#allocation15 + $0x68] sm:$0xf]  ;;  %v10116_v34 = vld [vmem:[#allocation15 + $0x34] sm:$0xf0] }
 0x370   : > { %v11329_v3 = vld [vmem:[#allocation3 + $0x3] ss:$8 sm:$0xf] }
 0x371   : > { %4058 = vmatpush.bf16.msra.mxu2 %v8466_v45  ;;  %v8626_v45 = vor.u32 %v10233_v39, %v8623_v44 }
 0x372   : > { %4034 = vmatpush.bf16.msra.mxu0 %v8178_v43  ;;  %v8573_v43 = vld [vmem:[#allocation15 + $0x380] sm:$0xf] }
 0x373   : > { %4047 = vmatpush.bf16.msra.mxu1 %v8306_v49  ;;  %v8574_v17 = vor.u32 %v10223_v46, %v8573_v43  ;;  %v8213_v46 = vld [vmem:[#allocation15 + $0xa8] sm:$0xf] }
 0x375   : > { %4020 = vmatpush.bf16.msrb.mxu3 %v8574_v17  ;;  %v10132_v17 = vld [vmem:[#allocation15 + $0xb4] sm:$0xf0] }
 0x376   : > { %4035 = vmatpush.bf16.msra.mxu0 %v8162_v54  ;;  %v8447_v54 = vld [vmem:[#allocation15 + $0x290] sm:$0xf0]  ;;  %v8214_v60 = vor.u32 %v10132_v17, %v8213_v46  ;;  %v8150_v46 = vor.u32 %v10116_v34, %v8149_v33  ;;  %v8133_v17 = vld [vmem:[#allocation15 + $0x8] sm:$0xf]  ;;  %v10196_v33 = vld [vmem:[#allocation15 + $0x2b4] sm:$0xf0] }
 0x377   : > { %4048 = vmatpush.bf16.msra.mxu1 %v8290_v32  ;;  %v8450_v59 = vor.u32 %v10189_v51, %v8447_v54  ;;  %v10136_v32 = vld [vmem:[#allocation15 + $0xd4] sm:$0xf0]  ;;  %v10126_v34 = vld [vmem:[#allocation15 + $0x8c] sm:$0xf] }
 0x378   : > { %v8230_v43 = vor.u32 %v10136_v32, %v8229_v31 }
 0x379   : > { %4059 = vmatpush.bf16.msra.mxu2 %v8450_v59  ;;  %4021 = vmatpush.bf16.msrb.mxu3 %v8558_v62  ;;  %v3191_v59 = vperm.slane %v11329_v3, 1 }
 0x37a   : > { %4036 = vmatpush.bf16.msra.mxu0 %v8146_v2 }
 0x37b   : > { %4049 = vmatpush.bf16.msra.mxu1 %v8274_v41  ;;  %v8386_v41 = vor.u32 %v10173_v37, %v8383_v57  ;;  %v10213_v37 = vld [vmem:[#allocation15 + $0x344] sm:$0xf]  ;;  %v8543_v57 = vld [vmem:[#allocation15 + $0x350] sm:$0xf0] }
 0x37d   : > { %v2973_v29 = vpop.f32.mrf.mxu0  ;;  %4060 = vmatpush.bf16.msra.mxu2 %v8434_v4  ;;  %4022 = vmatpush.bf16.msrb.mxu3 %v8542_v13  ;;  %v10172_v13 = vld [vmem:[#allocation15 + $0x1f4] sm:$0xf0] }
 0x37e   : > { %4037 = vmatpush.bf16.msra.mxu0 %v8130_v11  ;;  %v2986_v21 = vpop.f32.mrf.mxu1  ;;  %v3190_v11 = vperm.slane %v11329_v3, 0 }
 0x37f   : > { %v2987_v56 = vadd.f32 %v2986_v21, %v2973_v29  ;;  %4050 = vmatpush.bf16.msra.mxu1 %v8258_v53  ;;  %v8402_v29 = vor.u32 %v10177_v27, %v8399_v55  ;;  %v8246_v21 = vor.u32 %v10140_v24, %v8245_v20  ;;  %v10120_v24 = vld [vmem:[#allocation15 + $0x54] sm:$0xf0] }
 0x380   : > { %v10168_v55 = vld [vmem:[#allocation15 + $0x1d4] sm:$0xf0] }
 0x381   : > { %4061 = vmatpush.bf16.msra.mxu2 %v8418_v18  ;;  %4023 = vmatpush.bf16.msrb.mxu3 %v8526_v26  ;;  %v8578_v18 = vor.u32 %v10221_v14, %v8575_v42  ;;  %v8357_v26 = vld [vmem:[#allocation15 + $0x1c8] sm:$0xf] }
 0x382   : > { %v8358_v32 = vor.u32 %v10168_v55, %v8357_v26  ;;  %v10200_v26 = vld [vmem:[#allocation15 + $0x2d4] sm:$0xf0]  ;;  %v10130_v55 = vld [vmem:[#allocation15 + $0xac] sm:$0xf] }
 0x385   : > { %v2975_v47 = vpop.f32.mrf.mxu0  ;;  %4062 = vmatpush.bf16.msra.mxu2 %v8402_v29  ;;  %4024 = vmatpush.bf16.msrb.mxu3 %v8510_v50  ;;  %v8559_v29 = vld [vmem:[#allocation15 + $0x370] sm:$0xf0]  ;;  %v10164_v50 = vld [vmem:[#allocation15 + $0x1b4] sm:$0xf0] }
 0x386   : > { %v2988_v52 = vpop.f32.mrf.mxu1 }
 0x387   : > { %v8610_v52 = vor.u32 %v10229_v48, %v8607_v25  ;;  %v10112_v48 = vld [vmem:[#allocation15 + $0x14] sm:$0xf0]  ;;  %v8325_v25 = vld [vmem:[#allocation15 + $0x188] sm:$0xf] }
 0x388   : > { %v8134_v63 = vor.u32 %v10112_v48, %v8133_v17  ;;  %v10170_v17 = vld [vmem:[#allocation15 + $0x1ec] sm:$0xf]  ;;  %v8375_v48 = vld [vmem:[#allocation15 + $0x1f8] sm:$0xf0] }
 0x389   : > { %4063 = vmatpush.bf16.msra.mxu2 %v8386_v41  ;;  %4069 = vmatpush.bf16.msra.mxu3 %v8626_v45  ;;  %v3179_v45 = vperm.slane %v11327_v58, 2 }
 0x38b   : > { %v2999_v2 = vpop.f32.mrf.mxu2 }
 0x38c   : > { %v3000_v5 = vadd.f32 %v2999_v2, %v2987_v56  ;;  %v3012_v6 = vpop.f32.mrf.mxu3  ;;  %v3178_v56 = vperm.slane %v11327_v58, 1  ;;  %v8591_v2 = vld [vmem:[#allocation15 + $0x3b0] sm:$0xf0] }
 0x38d   : > { %v3025_v12 = vpop.f32.mrf.mxu0  ;;  %4070 = vmatpush.bf16.msra.mxu3 %v8610_v52  ;;  %v10209_v52 = vld [vmem:[#allocation15 + $0x324] sm:$0xf] }
 0x38e   : > { %v3013_v10 = vadd.f32 %v3012_v6, %v3000_v5  ;;  %v3038_v16 = vpop.f32.mrf.mxu1  ;;  %v8594_v5 = vor.u32 %v10225_v0, %v8591_v2  ;;  %v8309_v2 = vld [vmem:[#allocation15 + $0x168] sm:$0xf] }
 0x38f   : > { %v3039_v47 = vadd.f32 %v3038_v16, %v3025_v12 }
 0x390   : > { %v3185_v19 = vmul.f32 %v3177_v7, %v3013_v10  ;;  %v10124_v10 = vld [vmem:[#allocation15 + $0x74] sm:$0xf0] }
 0x391   : > { %4071 = vmatpush.bf16.msra.mxu3 %v8594_v5  ;;  %v8182_v22 = vor.u32 %v10124_v10, %v8181_v9  ;;  %v10204_v10 = vld [vmem:[#allocation15 + $0x2f4] sm:$0xf0] }
 0x392   : > { %v3198_v49 = vadd.f32 %v3190_v11, %v3185_v19  ;;  %v8373_v11 = vld [vmem:[#allocation15 + $0x1e8] sm:$0xf] }
 0x393   : > { %v3001_v28 = vpop.f32.mrf.mxu2  ;;  %v8374_v23 = vor.u32 %v10172_v13, %v8373_v11  ;;  %v10134_v11 = vld [vmem:[#allocation15 + $0xcc] sm:$0xf] }
 0x394   : > { %v3202_v30 = vmax.f32 %v3198_v49, 0.0  ;;  %v3014_v15 = vpop.f32.mrf.mxu3  ;;  %v8165_v49 = vld [vmem:[#allocation15 + $0x48] sm:$0xf]  ;;  %v10217_v28 = vld [vmem:[#allocation15 + $0x364] sm:$0xf] }
 0x395   : > { %v3027_v36 = vpop.f32.mrf.mxu0  ;;  %4072 = vmatpush.bf16.msra.mxu3 %v8578_v18  ;;  %v8562_v15 = vor.u32 %v10217_v28, %v8559_v29  ;;  %v8215_v28 = vld [vmem:[#allocation15 + $0xb8] sm:$0xf0] }
 0x396   : > { %v11333_v35 = vpack.c.bf16 %v3202_v30, %v3202_v30  ;;  %v3040_v40 = vpop.f32.mrf.mxu1  ;;  %v8341_v36 = vld [vmem:[#allocation15 + $0x1a8] sm:$0xf] }
 0x397   : > { %v8546_v40 = vor.u32 %v10213_v37, %v8543_v57 }
 0x398   : > { %3986 = vmatmul.bf16.vlgmr.msrb.gmra.mxu0 %v11333_v35 }
 0x399   : > { %4082 = vmatpush.bf16.msrb.mxu0 %v8246_v21  ;;  %v8166_v21 = vor.u32 %v10120_v24, %v8165_v49  ;;  %4073 = vmatpush.bf16.msra.mxu3 %v8562_v15  ;;  %v8485_v49 = vld [vmem:[#allocation15 + $0x2c8] sm:$0xf]  ;;  %v8218_v15 = vor.u32 %v10130_v55, %v8215_v28  ;;  %v10110_v55 = vld [vmem:[#allocation15 + $0xc] sm:$0xf]  ;;  %v8135_v28 = vld [vmem:[#allocation15 + $0x18] sm:$0xf0] }
 0x39b   : > { %v3051_v51 = vpop.f32.mrf.mxu2 }
 0x39c   : > { %v3052_v53 = vadd.f32 %v3051_v51, %v3039_v47  ;;  %v3064_v54 = vpop.f32.mrf.mxu3  ;;  %v8342_v47 = vor.u32 %v10164_v50, %v8341_v36  ;;  %v10160_v51 = vld [vmem:[#allocation15 + $0x194] sm:$0xf0]  ;;  %v8199_v36 = vld [vmem:[#allocation15 + $0x98] sm:$0xf0] }
 0x39d   : > { %4083 = vmatpush.bf16.msrb.mxu0 %v8230_v43  ;;  %4074 = vmatpush.bf16.msra.mxu3 %v8546_v40  ;;  %v8326_v0 = vor.u32 %v10160_v51, %v8325_v25  ;;  %v8202_v40 = vor.u32 %v10126_v34, %v8199_v36  ;;  %v8629_v34 = vld [vmem:[#allocation15 + $0x3e8] sm:$0xf]  ;;  %v10236_v36 = vld [vmem:[#allocation15 + $0x3f4] sm:$0xf0] }
 0x39e   : > { %v3065_v62 = vadd.f32 %v3064_v54, %v3052_v53  ;;  %v3077_v4 = vpop.f32.mrf.mxu0  ;;  %v8527_v53 = vld [vmem:[#allocation15 + $0x330] sm:$0xf0] }
 0x39f   : > { %v8530_v61 = vor.u32 %v10209_v52, %v8527_v53  ;;  %v8437_v53 = vld [vmem:[#allocation15 + $0x268] sm:$0xf] }
 0x3a0   : > { %v3186_v6 = vmul.f32 %v3178_v56, %v3065_v62  ;;  %v3192_v56 = vperm.slane %v11329_v3, 2 }
 0x3a1   : > { %v3090_v7 = vpop.f32.mrf.mxu1  ;;  %4084 = vmatpush.bf16.msrb.mxu0 %v8214_v60  ;;  %v8247_v60 = vld [vmem:[#allocation15 + $0xf8] sm:$0xf0]  ;;  %4075 = vmatpush.bf16.msra.mxu3 %v8530_v61 }
 0x3a2   : > { %v3199_v12 = vadd.f32 %v3191_v59, %v3186_v6  ;;  %v3091_v39 = vadd.f32 %v3090_v7, %v3077_v4  ;;  %v10138_v59 = vld [vmem:[#allocation15 + $0xec] sm:$0xf]  ;;  %v10156_v4 = vld [vmem:[#allocation15 + $0x174] sm:$0xf0]  ;;  %v8501_v6 = vld [vmem:[#allocation15 + $0x2e8] sm:$0xf] }
 0x3a3   : > { %v3053_v16 = vpop.f32.mrf.mxu2  ;;  %v8250_v5 = vor.u32 %v10138_v59, %v8247_v60  ;;  %v10205_v7 = vld [vmem:[#allocation15 + $0x304] sm:$0xf]  ;;  %v8310_v18 = vor.u32 %v10156_v4, %v8309_v2  ;;  %v10118_v59 = vld [vmem:[#allocation15 + $0x4c] sm:$0xf]  ;;  %v8167_v60 = vld [vmem:[#allocation15 + $0x58] sm:$0xf0] }
 0x3a4   : > { %v3203_v19 = vmax.f32 %v3199_v12, 0.0  ;;  %v3066_v20 = vpop.f32.mrf.mxu3  ;;  %v8231_v12 = vld [vmem:[#allocation15 + $0xd8] sm:$0xf0]  ;;  %v8170_v4 = vor.u32 %v10118_v59, %v8167_v60 }
 0x3a5   : > { %4085 = vmatpush.bf16.msrb.mxu0 %v8198_v8  ;;  %v8511_v8 = vld [vmem:[#allocation15 + $0x310] sm:$0xf0]  ;;  %v8234_v20 = vor.u32 %v10134_v11, %v8231_v12  ;;  %v10162_v12 = vld [vmem:[#allocation15 + $0x1ac] sm:$0xf] }
 0x3a6   : > { %v11338_v27 = vpack.c.bf16 %v3203_v19, %v3203_v19  ;;  %v3079_v30 = vpop.f32.mrf.mxu0  ;;  %v8514_v13 = vor.u32 %v10205_v7, %v8511_v8  ;;  %v8502_v19 = vor.u32 %v10204_v10, %v8501_v6  ;;  %v10184_v8 = vld [vmem:[#allocation15 + $0x254] sm:$0xf0]  ;;  %v8151_v10 = vld [vmem:[#allocation15 + $0x38] sm:$0xf0] }
 0x3a7   : > { %v8486_v30 = vor.u32 %v10200_v26, %v8485_v49  ;;  %v10180_v26 = vld [vmem:[#allocation15 + $0x234] sm:$0xf0] }
 0x3a8   : > { %3999 = vmatmul.bf16.vlgmr.msrb.gmra.mxu1 %v11338_v27  ;;  %4038 = vmatmul.bf16.vlgmr.msra.gmra.mxu0 %v11333_v35 }
 0x3a9   : > { %v3092_v31 = vpop.f32.mrf.mxu1  ;;  %4086 = vmatpush.bf16.msrb.mxu0 %v8182_v22  ;;  %4095 = vmatpush.bf16.msrb.mxu1 %v8374_v23  ;;  %v8293_v22 = vld [vmem:[#allocation15 + $0x148] sm:$0xf]  ;;  %v10152_v23 = vld [vmem:[#allocation15 + $0x154] sm:$0xf0] }
 0x3aa   : > { %4076 = vmatpush.bf16.msra.mxu3 %v8514_v13  ;;  %v8294_v29 = vor.u32 %v10152_v23, %v8293_v22  ;;  %v8277_v31 = vld [vmem:[#allocation15 + $0x128] sm:$0xf]  ;;  %v8343_v13 = vld [vmem:[#allocation15 + $0x1b8] sm:$0xf0] }
 0x3ab   : > { %v3103_v41 = vpop.f32.mrf.mxu2  ;;  %v8405_v22 = vld [vmem:[#allocation15 + $0x228] sm:$0xf]  ;;  %v8346_v49 = vor.u32 %v10162_v12, %v8343_v13  ;;  %v8455_v12 = vld [vmem:[#allocation15 + $0x298] sm:$0xf0] }
 0x3ac   : > { %v3116_v44 = vpop.f32.mrf.mxu3  ;;  %v3104_v43 = vadd.f32 %v3103_v41, %v3091_v39  ;;  %v8261_v41 = vld [vmem:[#allocation15 + $0x108] sm:$0xf] }
 0x3ad   : > { %4087 = vmatpush.bf16.msrb.mxu0 %v8166_v21  ;;  %4096 = vmatpush.bf16.msrb.mxu1 %v8358_v32  ;;  %v10148_v21 = vld [vmem:[#allocation15 + $0x134] sm:$0xf0]  ;;  %v8469_v32 = vld [vmem:[#allocation15 + $0x2a8] sm:$0xf] }
 0x3ae   : > { %v3117_v54 = vadd.f32 %v3116_v44, %v3104_v43  ;;  %v8278_v57 = vor.u32 %v10148_v21, %v8277_v31  ;;  %v8470_v39 = vor.u32 %v10196_v33, %v8469_v32  ;;  %v10144_v44 = vld [vmem:[#allocation15 + $0x114] sm:$0xf0]  ;;  %v8138_v31 = vor.u32 %v10110_v55, %v8135_v28  ;;  %v8389_v21 = vld [vmem:[#allocation15 + $0x208] sm:$0xf]  ;;  %v10182_v55 = vld [vmem:[#allocation15 + $0x24c] sm:$0xf] }
 0x3af   : > { %v10192_v43 = vld [vmem:[#allocation15 + $0x294] sm:$0xf0]  ;;  %v8262_v25 = vor.u32 %v10144_v44, %v8261_v41  ;;  %v8423_v28 = vld [vmem:[#allocation15 + $0x258] sm:$0xf0] }
 0x3b0   : > { %v3187_v62 = vmul.f32 %v3179_v45, %v3117_v54  ;;  %v8453_v45 = vld [vmem:[#allocation15 + $0x288] sm:$0xf]  ;;  %v8378_v54 = vor.u32 %v10170_v17, %v8375_v48 }
 0x3b1   : > { %4088 = vmatpush.bf16.msrb.mxu0 %v8150_v46  ;;  %4097 = vmatpush.bf16.msrb.mxu1 %v8342_v47  ;;  %v10122_v46 = vld [vmem:[#allocation15 + $0x6c] sm:$0xf]  ;;  %v8183_v47 = vld [vmem:[#allocation15 + $0x78] sm:$0xf0]  ;;  %v8454_v51 = vor.u32 %v10192_v43, %v8453_v45  ;;  %v8630_v43 = vor.u32 %v10236_v36, %v8629_v34  ;;  %v8613_v48 = vld [vmem:[#allocation15 + $0x3c8] sm:$0xf] }
 0x3b2   : > { %v3200_v9 = vadd.f32 %v3192_v56, %v3187_v62  ;;  %v8186_v52 = vor.u32 %v10122_v46, %v8183_v47  ;;  %v10188_v56 = vld [vmem:[#allocation15 + $0x274] sm:$0xf0]  ;;  %v10166_v62 = vld [vmem:[#allocation15 + $0x1cc] sm:$0xf] }
 0x3b3   : > { %v3105_v14 = vpop.f32.mrf.mxu2  ;;  %v8438_v2 = vor.u32 %v10188_v56, %v8437_v53  ;;  %v10198_v53 = vld [vmem:[#allocation15 + $0x2cc] sm:$0xf]  ;;  %v10208_v34 = vld [vmem:[#allocation15 + $0x314] sm:$0xf0] }
 0x3b4   : > { %v3118_v42 = vpop.f32.mrf.mxu3  ;;  %v3204_v16 = vmax.f32 %v3200_v9, 0.0  ;;  %v10114_v9 = vld [vmem:[#allocation15 + $0x2c] sm:$0xf] }
 0x3b5   : > { %4089 = vmatpush.bf16.msrb.mxu0 %v8134_v63  ;;  %4098 = vmatpush.bf16.msrb.mxu1 %v8326_v0  ;;  %v8359_v63 = vld [vmem:[#allocation15 + $0x1d8] sm:$0xf0]  ;;  %v10174_v36 = vld [vmem:[#allocation15 + $0x20c] sm:$0xf] }
 0x3b6   : > { %v11344_v24 = vpack.c.bf16 %v3204_v16, %v3204_v16  ;;  %v8362_v7 = vor.u32 %v10166_v62, %v8359_v63  ;;  %v3180_v16 = vperm.slane %v11327_v58, 3  ;;  %v8406_v58 = vor.u32 %v10180_v26, %v8405_v22  ;;  %v10228_v62 = vld [vmem:[#allocation15 + $0x3b4] sm:$0xf0]  ;;  %v10146_v63 = vld [vmem:[#allocation15 + $0x12c] sm:$0xf] }
 0x3b7   : > { %v10216_v26 = vld [vmem:[#allocation15 + $0x354] sm:$0xf0] }
 0x3b8   : > { %4051 = vmatmul.bf16.vlgmr.msra.gmra.mxu1 %v11338_v27  ;;  %4090 = vmatmul.bf16.vlgmr.msrb.gmra.mxu0 %v11333_v35 }
 0x3b9   : > { %4134 = vmatpush.bf16.msra.mxu0 %v8250_v5  ;;  %4012 = vmatmul.bf16.vlgmr.msrb.gmra.mxu2 %v11344_v24  ;;  %v8421_v5 = vld [vmem:[#allocation15 + $0x248] sm:$0xf] }
 0x3ba   : > { %4099 = vmatpush.bf16.msrb.mxu1 %v8310_v18  ;;  %4108 = vmatpush.bf16.msrb.mxu2 %v8502_v19  ;;  %v3193_v18 = vperm.slane %v11329_v3, 3  ;;  %v8422_v19 = vor.u32 %v10184_v8, %v8421_v5  ;;  %v10176_v3 = vld [vmem:[#allocation15 + $0x214] sm:$0xf0] }
 0x3bb   : > { %v8390_v45 = vor.u32 %v10176_v3, %v8389_v21  ;;  %v10224_v8 = vld [vmem:[#allocation15 + $0x394] sm:$0xf0]  ;;  %v8407_v21 = vld [vmem:[#allocation15 + $0x238] sm:$0xf0] }
 0x3bd   : > { %4135 = vmatpush.bf16.msra.mxu0 %v8234_v20  ;;  %v8154_v20 = vor.u32 %v10114_v9, %v8151_v10  ;;  %v10142_v9 = vld [vmem:[#allocation15 + $0x10c] sm:$0xf]  ;;  %v8263_v10 = vld [vmem:[#allocation15 + $0x118] sm:$0xf0] }
 0x3be   : > { %v3129_v50 = vpop.f32.mrf.mxu0  ;;  %4100 = vmatpush.bf16.msrb.mxu1 %v8294_v29  ;;  %4109 = vmatpush.bf16.msrb.mxu2 %v8486_v30  ;;  %v10158_v29 = vld [vmem:[#allocation15 + $0x18c] sm:$0xf]  ;;  %v8327_v30 = vld [vmem:[#allocation15 + $0x198] sm:$0xf0] }
 0x3bf   : > { %v8330_v33 = vor.u32 %v10158_v29, %v8327_v30  ;;  %v8426_v30 = vor.u32 %v10182_v55, %v8423_v28 }
 0x3c1   : > { %v3142_v37 = vpop.f32.mrf.mxu1  ;;  %4136 = vmatpush.bf16.msra.mxu0 %v8218_v15 }
 0x3c2   : > { %4101 = vmatpush.bf16.msrb.mxu1 %v8278_v57  ;;  %4110 = vmatpush.bf16.msrb.mxu2 %v8470_v39  ;;  %v3143_v6 = vadd.f32 %v3142_v37, %v3129_v50  ;;  %v10154_v50 = vld [vmem:[#allocation15 + $0x16c] sm:$0xf]  ;;  %v8311_v57 = vld [vmem:[#allocation15 + $0x178] sm:$0xf0] }
 0x3c3   : > { %v10202_v39 = vld [vmem:[#allocation15 + $0x2ec] sm:$0xf]  ;;  %v8314_v47 = vor.u32 %v10154_v50, %v8311_v57  ;;  %v8391_v50 = vld [vmem:[#allocation15 + $0x218] sm:$0xf0] }
 0x3c4   : > { %v8631_v57 = vld [vmem:[#allocation15 + $0x3f8] sm:$0xf0] }
 0x3c5   : > { %4137 = vmatpush.bf16.msra.mxu0 %v8202_v40  ;;  %v8503_v40 = vld [vmem:[#allocation15 + $0x2f8] sm:$0xf0] }
 0x3c6   : > { %v3131_v61 = vpop.f32.mrf.mxu0  ;;  %4102 = vmatpush.bf16.msrb.mxu1 %v8262_v25  ;;  %4111 = vmatpush.bf16.msrb.mxu2 %v8454_v51  ;;  %v8506_v17 = vor.u32 %v10202_v39, %v8503_v40  ;;  %v10232_v25 = vld [vmem:[#allocation15 + $0x3d4] sm:$0xf0]  ;;  %v10150_v51 = vld [vmem:[#allocation15 + $0x14c] sm:$0xf] }
 0x3c7   : > { %v8614_v56 = vor.u32 %v10232_v25, %v8613_v48  ;;  %v8597_v61 = vld [vmem:[#allocation15 + $0x3a8] sm:$0xf]  ;;  %v10222_v48 = vld [vmem:[#allocation15 + $0x38c] sm:$0xf]  ;;  %v8583_v25 = vld [vmem:[#allocation15 + $0x398] sm:$0xf0] }
 0x3c8   : > { %v8598_v5 = vor.u32 %v10228_v62, %v8597_v61  ;;  %v10210_v61 = vld [vmem:[#allocation15 + $0x32c] sm:$0xf]  ;;  %v8535_v62 = vld [vmem:[#allocation15 + $0x338] sm:$0xf0] }
 0x3c9   : > { %v3144_v0 = vpop.f32.mrf.mxu1  ;;  %4138 = vmatpush.bf16.msra.mxu0 %v8186_v52  ;;  %4103 = vmatmul.bf16.vlgmr.msrb.gmra.mxu1 %v11338_v27  ;;  %v8295_v52 = vld [vmem:[#allocation15 + $0x158] sm:$0xf0] }
 0x3ca   : > { %4147 = vmatpush.bf16.msra.mxu1 %v8378_v54  ;;  %4064 = vmatmul.bf16.vlgmr.msra.gmra.mxu2 %v11344_v24  ;;  %v8487_v54 = vld [vmem:[#allocation15 + $0x2d8] sm:$0xf0]  ;;  %v8298_v59 = vor.u32 %v10150_v51, %v8295_v52  ;;  %v8586_v51 = vor.u32 %v10222_v48, %v8583_v25  ;;  %v10218_v52 = vld [vmem:[#allocation15 + $0x36c] sm:$0xf] }
 0x3cb   : > { %v3155_v11 = vpop.f32.mrf.mxu2  ;;  %4112 = vmatpush.bf16.msrb.mxu2 %v8438_v2  ;;  %v8490_v60 = vor.u32 %v10198_v53, %v8487_v54  ;;  %v8279_v0 = vld [vmem:[#allocation15 + $0x138] sm:$0xf0]  ;;  %v10194_v2 = vld [vmem:[#allocation15 + $0x2ac] sm:$0xf] }
 0x3cc   : > { %v3156_v14 = vadd.f32 %v3155_v11, %v3143_v6  ;;  %v3168_v42 = vpop.f32.mrf.mxu3  ;;  %v10190_v11 = vld [vmem:[#allocation15 + $0x28c] sm:$0xf]  ;;  %v8567_v53 = vld [vmem:[#allocation15 + $0x378] sm:$0xf0] }
 0x3cd   : > { %4139 = vmatpush.bf16.msra.mxu0 %v8170_v4  ;;  %v8471_v4 = vld [vmem:[#allocation15 + $0x2b8] sm:$0xf0]  ;;  %v8570_v54 = vor.u32 %v10218_v52, %v8567_v53 }
 0x3ce   : > { %v3169_v23 = vadd.f32 %v3168_v42, %v3156_v14  ;;  %4148 = vmatpush.bf16.msra.mxu1 %v8362_v7  ;;  %v8474_v6 = vor.u32 %v10194_v2, %v8471_v4  ;;  %v8581_v7 = vld [vmem:[#allocation15 + $0x388] sm:$0xf]  ;;  %v8266_v14 = vor.u32 %v10142_v9, %v8263_v10  ;;  %v8458_v42 = vor.u32 %v10190_v11, %v8455_v12 }
 0x3cf   : > { %4113 = vmatpush.bf16.msrb.mxu2 %v8422_v19  ;;  %v8582_v13 = vor.u32 %v10224_v8, %v8581_v7  ;;  %v10186_v19 = vld [vmem:[#allocation15 + $0x26c] sm:$0xf] }
 0x3d0   : > { %v3188_v15 = vmul.f32 %v3180_v16, %v3169_v23  ;;  %v8565_v16 = vld [vmem:[#allocation15 + $0x368] sm:$0xf] }
 0x3d1   : > { %4140 = vmatpush.bf16.msra.mxu0 %v8154_v20  ;;  %v8439_v20 = vld [vmem:[#allocation15 + $0x278] sm:$0xf0] }
 0x3d2   : > { %v3201_v32 = vadd.f32 %v3193_v18, %v3188_v15  ;;  %4149 = vmatpush.bf16.msra.mxu1 %v8346_v49  ;;  %v10220_v18 = vld [vmem:[#allocation15 + $0x374] sm:$0xf0]  ;;  %v8442_v23 = vor.u32 %v10186_v19, %v8439_v20  ;;  %v8549_v49 = vld [vmem:[#allocation15 + $0x348] sm:$0xf] }
 0x3d3   : > { %v3157_v37 = vpop.f32.mrf.mxu2  ;;  %4114 = vmatpush.bf16.msrb.mxu2 %v8406_v58  ;;  %v8566_v22 = vor.u32 %v10220_v18, %v8565_v16  ;;  %v8550_v29 = vor.u32 %v10216_v26, %v8549_v49  ;;  %v8533_v15 = vld [vmem:[#allocation15 + $0x328] sm:$0xf]  ;;  %v10212_v58 = vld [vmem:[#allocation15 + $0x334] sm:$0xf0] }
 0x3d4   : > { %v3205_v41 = vmax.f32 %v3201_v32, 0.0  ;;  %v3170_v44 = vpop.f32.mrf.mxu3  ;;  %v8534_v3 = vor.u32 %v10212_v58, %v8533_v15  ;;  %v10234_v37 = vld [vmem:[#allocation15 + $0x3ec] sm:$0xf] }
 0x3d5   : > { %4141 = vmatpush.bf16.msra.mxu0 %v8138_v31  ;;  %v10178_v31 = vld [vmem:[#allocation15 + $0x22c] sm:$0xf]  ;;  %v8634_v40 = vor.u32 %v10234_v37, %v8631_v57  ;;  %v8615_v44 = vld [vmem:[#allocation15 + $0x3d8] sm:$0xf0] }
 0x3d6   : > { %v11353_v46 = vpack.c.bf16 %v3205_v41, %v3205_v41  ;;  %4150 = vmatpush.bf16.msra.mxu1 %v8330_v33  ;;  %v8410_v32 = vor.u32 %v10178_v31, %v8407_v21  ;;  %v8517_v33 = vld [vmem:[#allocation15 + $0x308] sm:$0xf]  ;;  %v10230_v41 = vld [vmem:[#allocation15 + $0x3cc] sm:$0xf] }
 0x3d7   : > { %4115 = vmatpush.bf16.msrb.mxu2 %v8390_v45  ;;  %v8518_v39 = vor.u32 %v10208_v34, %v8517_v33  ;;  %v8618_v45 = vor.u32 %v10230_v41, %v8615_v44 }
 0x3d8   : > { %4025 = vmatmul.bf16.vlgmr.msrb.gmra.mxu3 %v11353_v46  ;;  %4142 = vmatmul.bf16.vlgmr.msra.gmra.mxu0 %v11333_v35  ;;  %v8282_v35 = vor.u32 %v10146_v63, %v8279_v0  ;;  %v8538_v63 = vor.u32 %v10210_v61, %v8535_v62  ;;  %v10206_v0 = vld [vmem:[#allocation15 + $0x30c] sm:$0xf] }
 0x3d9   : > { %4121 = vmatpush.bf16.msrb.mxu3 %v8630_v43  ;;  %v10226_v43 = vld [vmem:[#allocation15 + $0x3ac] sm:$0xf] }
 0x3da   : > { %4151 = vmatpush.bf16.msra.mxu1 %v8314_v47  ;;  %4116 = vmatmul.bf16.vlgmr.msrb.gmra.mxu2 %v11344_v24  ;;  %v8599_v47 = vld [vmem:[#allocation15 + $0x3b8] sm:$0xf0] }
 0x3db   : > { %4160 = vmatpush.bf16.msra.mxu2 %v8506_v17  ;;  %v8602_v17 = vor.u32 %v10226_v43, %v8599_v47 }
 0x3dd   : > { %4122 = vmatpush.bf16.msrb.mxu3 %v8614_v56  ;;  %v10214_v56 = vld [vmem:[#allocation15 + $0x34c] sm:$0xf] }
 0x3de   : > { %4152 = vmatpush.bf16.msra.mxu1 %v8298_v59  ;;  %v8551_v59 = vld [vmem:[#allocation15 + $0x358] sm:$0xf0] }
 0x3df   : > { %4161 = vmatpush.bf16.msra.mxu2 %v8490_v60  ;;  %v8554_v60 = vor.u32 %v10214_v56, %v8551_v59 }
 0x3e1   : > { %4123 = vmatpush.bf16.msrb.mxu3 %v8598_v5 }
 0x3e2   : > { %4153 = vmatpush.bf16.msra.mxu1 %v8282_v35 }
 0x3e3   : > { %4162 = vmatpush.bf16.msra.mxu2 %v8474_v6 }
 0x3e5   : > { %4124 = vmatpush.bf16.msrb.mxu3 %v8582_v13 }
 0x3e6   : > { %4154 = vmatpush.bf16.msra.mxu1 %v8266_v14 }
 0x3e7   : > { %4163 = vmatpush.bf16.msra.mxu2 %v8458_v42 }
 0x3e8   : > { %4077 = vmatmul.bf16.vlgmr.msra.gmra.mxu3 %v11353_v46 }
 0x3e9   : > { %4125 = vmatpush.bf16.msrb.mxu3 %v8566_v22  ;;  %4155 = vmatmul.bf16.vlgmr.msra.gmra.mxu1 %v11338_v27  ;;  %v8394_v27 = vor.u32 %v10174_v36, %v8391_v50 }
 0x3eb   : > { %4164 = vmatpush.bf16.msra.mxu2 %v8442_v23 }
 0x3ed   : > { %4126 = vmatpush.bf16.msrb.mxu3 %v8550_v29 }
 0x3ef   : > { %4165 = vmatpush.bf16.msra.mxu2 %v8426_v30 }
 0x3f1   : > { %4127 = vmatpush.bf16.msrb.mxu3 %v8534_v3 }
 0x3f3   : > { %4166 = vmatpush.bf16.msra.mxu2 %v8410_v32 }
 0x3f5   : > { %4128 = vmatpush.bf16.msrb.mxu3 %v8518_v39 }
 0x3f7   : > { %4167 = vmatpush.bf16.msra.mxu2 %v8394_v27 }
 0x3f8   : > { %4129 = vmatmul.bf16.vlgmr.msrb.gmra.mxu3 %v11353_v46 }
 0x3f9   : > { %4173 = vmatpush.bf16.msra.mxu3 %v8634_v40 }
 0x3fa   : > { %4168 = vmatmul.bf16.vlgmr.msra.gmra.mxu2 %v11344_v24  ;;  %v8519_v24 = vld [vmem:[#allocation15 + $0x318] sm:$0xf0] }
 0x3fb   : > { %v8522_v2 = vor.u32 %v10206_v0, %v8519_v24 }
 0x3fd   : > { %4174 = vmatpush.bf16.msra.mxu3 %v8618_v45 }
 0x401   : > { %4175 = vmatpush.bf16.msra.mxu3 %v8602_v17 }
 0x405   : > { %4176 = vmatpush.bf16.msra.mxu3 %v8586_v51 }
 0x409   : > { %4177 = vmatpush.bf16.msra.mxu3 %v8570_v54 }
 0x40d   : > { %4178 = vmatpush.bf16.msra.mxu3 %v8554_v60 }
 0x411   : > { %4179 = vmatpush.bf16.msra.mxu3 %v8538_v63 }
 0x415   : > { %4180 = vmatpush.bf16.msra.mxu3 %v8522_v2  ;;  %v3987_v4 = vpop.f32.mrf.mxu0 }
 0x418   : > { %4181 = vmatmul.bf16.vlgmr.msra.gmra.mxu3 %v11353_v46 }
 0x41d   : > { %v3989_v5 = vpop.f32.mrf.mxu0 }
 0x425   : > { %v4000_v35 = vpop.f32.mrf.mxu1  ;;  %v4039_v6 = vpop.f32.mrf.mxu0 }
 0x426   : > { %v4001_v7 = vadd.f32 %v4000_v35, %v3987_v4 }
 0x42d   : > { %v4002_v8 = vpop.f32.mrf.mxu1  ;;  %v4041_v9 = vpop.f32.mrf.mxu0 }
 0x435   : > { %v4052_v10 = vpop.f32.mrf.mxu1  ;;  %v4091_v11 = vpop.f32.mrf.mxu0 }
 0x436   : > { %v4053_v12 = vadd.f32 %v4052_v10, %v4039_v6 }
 0x43c   : > { %v4013_v13 = vpop.f32.mrf.mxu2 }
 0x43d   : > { %v4014_v14 = vadd.f32 %v4013_v13, %v4001_v7  ;;  %v4054_v42 = vpop.f32.mrf.mxu1  ;;  %v4093_v16 = vpop.f32.mrf.mxu0 }
 0x444   : > { %v4015_v18 = vpop.f32.mrf.mxu2 }
 0x446   : > { %v4104_v19 = vpop.f32.mrf.mxu1 }
 0x447   : > { %v4105_v20 = vadd.f32 %v4104_v19, %v4091_v11 }
 0x44d   : > { %v4065_v22 = vpop.f32.mrf.mxu2 }
 0x44e   : > { %v4066_v23 = vadd.f32 %v4065_v22, %v4053_v12  ;;  %v4106_v46 = vpop.f32.mrf.mxu1 }
 0x455   : > { %v4143_v49 = vpop.f32.mrf.mxu0  ;;  %v4067_v26 = vpop.f32.mrf.mxu2 }
 0x45b   : > { %v4026_v55 = vpop.f32.mrf.mxu3 }
 0x45c   : > { %v4027_v30 = vadd.f32 %v4026_v55, %v4014_v14 }
 0x45d   : > { %v4145_v28 = vpop.f32.mrf.mxu0  ;;  %v4117_v29 = vpop.f32.mrf.mxu2 }
 0x45e   : > { %v4235_v58 = vmul.f32 %v4027_v30, %v4027_v30  ;;  %v4188_v31 = vrot.slane %v4027_v30, 4  ;;  %v4118_v8 = vadd.f32 %v4117_v29, %v4105_v20 }
 0x460   : > { %v4239_v32 = vrot.slane %v4235_v58, 4  ;;  %v4189_v33 = vadd.f32 %v4188_v31, %v4027_v30 }
 0x462   : > { %v4240_v36 = vadd.f32 %v4239_v32, %v4235_v58  ;;  %v4190_v37 = vrot.slane %v4189_v33, 2 }
 0x463   : > { %v4028_v15 = vpop.f32.mrf.mxu3 }
 0x464   : > { %v4241_v40 = vrot.slane %v4240_v36, 2  ;;  %v4191_v45 = vadd.f32 %v4190_v37, %v4189_v33 }
 0x465   : > { %v4119_v3 = vpop.f32.mrf.mxu2 }
 0x466   : > { %v4156_v21 = vpop.f32.mrf.mxu1  ;;  %v4242_v48 = vadd.f32 %v4241_v40, %v4240_v36  ;;  %v4192_v52 = vrot.slane %v4191_v45, 1  ;;  %v4187_v40 = vld [vmem:[#allocation2 + $0x4] ss:$8 sm:$0xf] }
 0x467   : > { %v4157_v14 = vadd.f32 %v4156_v21, %v4143_v49 }
 0x468   : > { %v4243_v56 = vrot.slane %v4242_v48, 1  ;;  %v4193_v61 = vadd.f32 %v4192_v52, %v4191_v45 }
 0x46a   : > { %v4244_v24 = vadd.f32 %v4243_v56, %v4242_v48 }
 0x46b   : > { %v4078_v34 = vpop.f32.mrf.mxu3 }
 0x46c   : > { %v4079_v50 = vadd.f32 %v4078_v34, %v4066_v23 }
 0x46e   : > { %v4194_v57 = vrot.slane %v4079_v50, 4  ;;  %v4236_v39 = vmul.f32 %v4079_v50, %v4079_v50  ;;  %v4158_v27 = vpop.f32.mrf.mxu1 }
 0x470   : > { %v4195_v41 = vadd.f32 %v4194_v57, %v4079_v50  ;;  %v4245_v44 = vrot.slane %v4236_v39, 4 }
 0x472   : > { %v4196_v43 = vrot.slane %v4195_v41, 2  ;;  %v4246_v47 = vadd.f32 %v4245_v44, %v4236_v39 }
 0x473   : > { %v4080_v17 = vpop.f32.mrf.mxu3 }
 0x474   : > { %v4197_v25 = vadd.f32 %v4196_v43, %v4195_v41  ;;  %v4247_v51 = vrot.slane %v4246_v47, 2 }
 0x476   : > { %v4198_v53 = vrot.slane %v4197_v25, 1  ;;  %v4248_v54 = vadd.f32 %v4247_v51, %v4246_v47  ;;  %v4234_v47 = vld [vmem:[#allocation2 + $0x5] ss:$8 sm:$0xf] }
 0x478   : > { %v4199_v59 = vadd.f32 %v4198_v53, %v4197_v25  ;;  %v4249_v60 = vrot.slane %v4248_v54, 1 }
 0x47a   : > { %v4216_v62 = vrot.slane %v4199_v59, 7  ;;  %v4250_v63 = vadd.f32 %v4249_v60, %v4248_v54 }
 0x47b   : > { %v4130_v0 = vpop.f32.mrf.mxu3 }
 0x47c   : > { %v4220_v2 = vsel %vm4219_vm2, %v4193_v61, %v4216_v62  ;;  %v4267_v4 = vrot.slane %v4250_v63, 7  ;;  %v4131_v9 = vadd.f32 %v4130_v0, %v4118_v8 }
 0x47d   : > { %v4169_v5 = vpop.f32.mrf.mxu2 }
 0x47e   : > { %v4270_v35 = vsel %vm4219_vm2, %v4244_v24, %v4267_v4  ;;  %v4237_v10 = vmul.f32 %v4131_v9, %v4131_v9  ;;  %v4200_v11 = vrot.slane %v4131_v9, 4  ;;  %v4170_v18 = vadd.f32 %v4169_v5, %v4157_v14 }
 0x480   : > { %v4251_v12 = vrot.slane %v4237_v10, 4  ;;  %v4201_v13 = vadd.f32 %v4200_v11, %v4131_v9 }
 0x482   : > { %v4252_v42 = vadd.f32 %v4251_v12, %v4237_v10  ;;  %v4202_v16 = vrot.slane %v4201_v13, 2 }
 0x483   : > { %v4132_v6 = vpop.f32.mrf.mxu3 }
 0x484   : > { %v4253_v22 = vrot.slane %v4252_v42, 2  ;;  %v4203_v46 = vadd.f32 %v4202_v16, %v4201_v13 }
 0x485   : > { %v4171_v7 = vpop.f32.mrf.mxu2 }
 0x486   : > { %v4254_v28 = vadd.f32 %v4253_v22, %v4252_v42  ;;  %v4204_v58 = vrot.slane %v4203_v46, 1 }
 0x488   : > { %v4255_v3 = vrot.slane %v4254_v28, 1  ;;  %v4205_v49 = vadd.f32 %v4204_v58, %v4203_v46 }
 0x48a   : > { %v4256_v36 = vadd.f32 %v4255_v3, %v4254_v28  ;;  %v4217_v57 = vrot.slane %v4205_v49, 6 }
 0x48c   : > { %v4268_v41 = vrot.slane %v4256_v36, 6 }
 0x49b   : > { %v4182_v19 = vpop.f32.mrf.mxu3 }
 0x49c   : > { %v4183_v23 = vadd.f32 %v4182_v19, %v4170_v18 }
 0x49e   : > { %v4206_v26 = vrot.slane %v4183_v23, 4  ;;  %v4238_v55 = vmul.f32 %v4183_v23, %v4183_v23 }
 0x4a0   : > { %v4207_v30 = vadd.f32 %v4206_v26, %v4183_v23  ;;  %v4257_v15 = vrot.slane %v4238_v55, 4 }
 0x4a2   : > { %v4208_v20 = vrot.slane %v4207_v30, 2  ;;  %v4258_v29 = vadd.f32 %v4257_v15, %v4238_v55 }
 0x4a3   : > { %v4184_v31 = vpop.f32.mrf.mxu3 }
 0x4a4   : > { %v4209_v32 = vadd.f32 %v4208_v20, %v4207_v30  ;;  %v4259_v33 = vrot.slane %v4258_v29, 2 }
 0x4a6   : > { %v4210_v21 = vrot.slane %v4209_v32, 1  ;;  %v4260_v34 = vadd.f32 %v4259_v33, %v4258_v29 }
 0x4a8   : > { %v4211_v50 = vadd.f32 %v4210_v21, %v4209_v32  ;;  %v4261_v37 = vrot.slane %v4260_v34, 1 }
 0x4aa   : > { %v4218_v39 = vrot.slane %v4211_v50, 5  ;;  %v4262_v27 = vadd.f32 %v4261_v37, %v4260_v34 }
 0x4ac   : > { %v4222_v44 = vsel %vm4221_vm3, %v4217_v57, %v4218_v39  ;;  %v4269_v45 = vrot.slane %v4262_v27, 5 }
 0x4ad   : > { %v4224_v43 = vsel %vm4223_vm4, %v4220_v2, %v4222_v44 }
 0x4ae   : > { %v4226_v17 = vadd.f32 %v4224_v43, %v4187_v40  ;;  %v4271_v48 = vsel %vm4221_vm3, %v4268_v41, %v4269_v45 }
 0x4af   : > { %v4272_v25 = vsel %vm4223_vm4, %v4270_v35, %v4271_v48 }
 0x4b0   : > { %4231 = vst.msk [vmem:[#allocation2 + $0x4] ss:$8 sm:$0xf] %vm11319_vm1, %v4226_v17  ;;  %v4274_v51 = vadd.f32 %v4272_v25, %v4234_v47 }
 0x4b2   : > { %4275 = vst.msk [vmem:[#allocation2 + $0x5] ss:$8 sm:$0xf] %vm11319_vm1, %v4274_v51 }
 0x4b3 PF: > { %p8635_p11 = scmp.ne.s32.totalorder %s11008_s21, 3 }
 0x4b5   : > { %4280 = sbr.rel (%p8635_p11) target bundleno = 1916 (0x77c), region = 132 }
 0x4ba   : > { %v8654_v52 = vld [vmem:[#allocation7 + $0x20] sm:$0xf]  ;;  %v10243_v53 = vld [vmem:[#allocation7 + $0x2c] sm:$0xf0]  ;;  %v10241_v54 = vld [vmem:[#allocation7 + $0x24] sm:$0xf] }
 0x4bb   : > { %v8655_v56 = vor.u32 %v10243_v53, %v8654_v52  ;;  %v8656_v59 = vld [vmem:[#allocation7 + $0x30] sm:$0xf0]  ;;  %v8662_v60 = vld [vmem:[#allocation7 + $0x28] sm:$0xf]  ;;  %v10244_v61 = vld [vmem:[#allocation7 + $0x34] sm:$0xf0] }
 0x4bc   : > { %v8659_v62 = vor.u32 %v10241_v54, %v8656_v59  ;;  %v8663_v63 = vor.u32 %v10244_v61, %v8662_v60  ;;  %v10242_v0 = vld [vmem:[#allocation7 + $0x2c] sm:$0xf]  ;;  %v8664_v24 = vld [vmem:[#allocation7 + $0x38] sm:$0xf0]  ;;  %v8638_v2 = vld [vmem:[#allocation7] sm:$0xf] }
 0x4bd   : > { %4377 = vmatpush.bf16.msra.mxu0 %v8655_v56  ;;  %v8667_v4 = vor.u32 %v10242_v0, %v8664_v24  ;;  %v10239_v38 = vld [vmem:[#allocation7 + $0xc] sm:$0xf0]  ;;  %v10237_v5 = vld [vmem:[#allocation7 + $0x4] sm:$0xf]  ;;  %v8640_v35 = vld [vmem:[#allocation7 + $0x10] sm:$0xf0] }
 0x4be   : > { %4390 = vmatpush.bf16.msra.mxu1 %v8659_v62  ;;  %4403 = vmatpush.bf16.msra.mxu2 %v8663_v63  ;;  %v8639_v6 = vor.u32 %v10239_v38, %v8638_v2  ;;  %v8643_v7 = vor.u32 %v10237_v5, %v8640_v35  ;;  %v8646_v8 = vld [vmem:[#allocation7 + $0x8] sm:$0xf]  ;;  %v10240_v9 = vld [vmem:[#allocation7 + $0x14] sm:$0xf0]  ;;  %v10238_v10 = vld [vmem:[#allocation7 + $0xc] sm:$0xf] }
 0x4bf   : > { %4416 = vmatpush.bf16.msra.mxu3 %v8667_v4  ;;  %v8647_v11 = vor.u32 %v10240_v9, %v8646_v8  ;;  %v8648_v12 = vld [vmem:[#allocation7 + $0x18] sm:$0xf0]  ;;  %vm4367_vm5 = vcmask 261120   ;;  %v8786_v13 = vld [vmem:[#allocation12 + $0xe0] sm:$0xf] }
 0x4c0   : > { %v8651_v14 = vor.u32 %v10238_v10, %v8648_v12  ;;  %v10275_v42 = vld [vmem:[#allocation12 + $0xec] sm:$0xf0]  ;;  %v8914_v16 = vld [vmem:[#allocation12 + $0x1e0] sm:$0xf] }
 0x4c1   : > { %v10307_v18 = vld [vmem:[#allocation12 + $0x1ec] sm:$0xf0]  ;;  %4378 = vmatpush.bf16.msra.mxu0 %v8639_v6  ;;  %v8787_v19 = vor.u32 %v10275_v42, %v8786_v13  ;;  %v8770_v23 = vld [vmem:[#allocation12 + $0xc0] sm:$0xf] }
 0x4c2   : > { %v8915_v22 = vor.u32 %v10307_v18, %v8914_v16  ;;  %v10271_v46 = vld [vmem:[#allocation12 + $0xcc] sm:$0xf0]  ;;  %v8898_v26 = vld [vmem:[#allocation12 + $0x1c0] sm:$0xf]  ;;  %4391 = vmatpush.bf16.msra.mxu1 %v8643_v7  ;;  %4404 = vmatpush.bf16.msra.mxu2 %v8647_v11 }
 0x4c3   : > { %v10303_v55 = vld [vmem:[#allocation12 + $0x1cc] sm:$0xf0]  ;;  %v9042_v28 = vld [vmem:[#allocation12 + $0x2e0] sm:$0xf]  ;;  %4417 = vmatpush.bf16.msra.mxu3 %v8651_v14  ;;  %v8771_v15 = vor.u32 %v10271_v46, %v8770_v23 }
 0x4c4   : > { %v10339_v30 = vld [vmem:[#allocation12 + $0x2ec] sm:$0xf0]  ;;  %v9170_v20 = vld [vmem:[#allocation12 + $0x3e0] sm:$0xf]  ;;  %8668 = vmatmul.msk.bf16.vlgmr.msra.gmra.mxu0 %vm4367_vm5, %v11215_v1  ;;  %v8899_v3 = vor.u32 %v10303_v55, %v8898_v26 }
 0x4c5   : > { %5228 = vmatpush.bf16.msrb.mxu0 %v8787_v19  ;;  %v9043_v58 = vor.u32 %v10339_v30, %v9042_v28  ;;  %v10371_v29 = vld [vmem:[#allocation12 + $0x3ec] sm:$0xf0]  ;;  %v8754_v31 = vld [vmem:[#allocation12 + $0xa0] sm:$0xf]  ;;  %8669 = vmatmul.msk.bf16.vlgmr.msra.gmra.mxu1 %vm4367_vm5, %v11215_v1 }
 0x4c6   : > { %5241 = vmatpush.bf16.msrb.mxu1 %v8915_v22  ;;  %v9171_v32 = vor.u32 %v10371_v29, %v9170_v20  ;;  %v10267_v33 = vld [vmem:[#allocation12 + $0xac] sm:$0xf0]  ;;  %v8882_v49 = vld [vmem:[#allocation12 + $0x1a0] sm:$0xf]  ;;  %8670 = vmatmul.msk.bf16.vlgmr.msra.gmra.mxu2 %vm4367_vm5, %v11215_v1 }
 0x4c7   : > { %v10299_v21 = vld [vmem:[#allocation12 + $0x1ac] sm:$0xf0]  ;;  %v9026_v34 = vld [vmem:[#allocation12 + $0x2c0] sm:$0xf]  ;;  %8671 = vmatmul.msk.bf16.vlgmr.msra.gmra.mxu3 %vm4367_vm5, %v11215_v1  ;;  %5254 = vmatpush.bf16.msrb.mxu2 %v9043_v58  ;;  %v8755_v39 = vor.u32 %v10267_v33, %v8754_v31 }
 0x4c8   : > { %v10335_v36 = vld [vmem:[#allocation12 + $0x2cc] sm:$0xf0]  ;;  %v9154_v50 = vld [vmem:[#allocation12 + $0x3c0] sm:$0xf]  ;;  %5267 = vmatpush.bf16.msrb.mxu3 %v9171_v32  ;;  %v8883_v45 = vor.u32 %v10299_v21, %v8882_v49 }
 0x4c9   : > { %v9027_v37 = vor.u32 %v10335_v36, %v9026_v34  ;;  %v10367_v57 = vld [vmem:[#allocation12 + $0x3cc] sm:$0xf0]  ;;  %5229 = vmatpush.bf16.msrb.mxu0 %v8771_v15  ;;  %v8738_v40 = vld [vmem:[#allocation12 + $0x80] sm:$0xf]  ;;  %v10273_v34 = vld [vmem:[#allocation12 + $0xe4] sm:$0xf] }
 0x4ca   : > { %v9155_v27 = vor.u32 %v10367_v57, %v9154_v50  ;;  %v10263_v41 = vld [vmem:[#allocation12 + $0x8c] sm:$0xf0]  ;;  %v9010_v44 = vld [vmem:[#allocation12 + $0x2a0] sm:$0xf]  ;;  %5242 = vmatpush.bf16.msrb.mxu1 %v8899_v3  ;;  %v8788_v36 = vld [vmem:[#allocation12 + $0xf0] sm:$0xf0] }
 0x4cb   : > { %v10331_v43 = vld [vmem:[#allocation12 + $0x2ac] sm:$0xf0]  ;;  %v9138_v47 = vld [vmem:[#allocation12 + $0x3a0] sm:$0xf]  ;;  %5255 = vmatpush.bf16.msrb.mxu2 %v9027_v37  ;;  %v8739_v1 = vor.u32 %v10263_v41, %v8738_v40  ;;  %v10305_v50 = vld [vmem:[#allocation12 + $0x1e4] sm:$0xf] }
 0x4cc   : > { %v10363_v17 = vld [vmem:[#allocation12 + $0x3ac] sm:$0xf0]  ;;  %v8866_v48 = vld [vmem:[#allocation12 + $0x180] sm:$0xf]  ;;  %v9011_v51 = vor.u32 %v10331_v43, %v9010_v44  ;;  %5268 = vmatpush.bf16.msrb.mxu3 %v9155_v27  ;;  %v8916_v37 = vld [vmem:[#allocation12 + $0x1f0] sm:$0xf0] }
 0x4cd   : > { %v10295_v25 = vld [vmem:[#allocation12 + $0x18c] sm:$0xf0]  ;;  %5230 = vmatpush.bf16.msrb.mxu0 %v8755_v39  ;;  %v9139_v52 = vor.u32 %v10363_v17, %v9138_v47  ;;  %v8722_v53 = vld [vmem:[#allocation12 + $0x60] sm:$0xf]  ;;  %v10269_v40 = vld [vmem:[#allocation12 + $0xc4] sm:$0xf]  ;;  %v8791_v47 = vor.u32 %v10273_v34, %v8788_v36 }
 0x4ce   : > { %v8994_v54 = vld [vmem:[#allocation12 + $0x280] sm:$0xf]  ;;  %v10327_v56 = vld [vmem:[#allocation12 + $0x28c] sm:$0xf0]  ;;  %5243 = vmatpush.bf16.msrb.mxu1 %v8883_v45  ;;  %v8867_v59 = vor.u32 %v10295_v25, %v8866_v48  ;;  %v10337_v48 = vld [vmem:[#allocation12 + $0x2e4] sm:$0xf] }
 0x4cf   : > { %v10259_v60 = vld [vmem:[#allocation12 + $0x6c] sm:$0xf0]  ;;  %v9122_v61 = vld [vmem:[#allocation12 + $0x380] sm:$0xf]  ;;  %5256 = vmatpush.bf16.msrb.mxu2 %v9011_v51  ;;  %v8995_v24 = vor.u32 %v10327_v56, %v8994_v54  ;;  %v9044_v25 = vld [vmem:[#allocation12 + $0x2f0] sm:$0xf0]  ;;  %v8919_v51 = vor.u32 %v10305_v50, %v8916_v37 }
 0x4d0   : > { %v10359_v62 = vld [vmem:[#allocation12 + $0x38c] sm:$0xf0]  ;;  %v8850_v63 = vld [vmem:[#allocation12 + $0x160] sm:$0xf]  ;;  %5269 = vmatpush.bf16.msrb.mxu3 %v9139_v52  ;;  %v8723_v2 = vor.u32 %v10259_v60, %v8722_v53  ;;  %v10369_v52 = vld [vmem:[#allocation12 + $0x3e4] sm:$0xf] }
 0x4d1   : > { %v10291_v0 = vld [vmem:[#allocation12 + $0x16c] sm:$0xf0]  ;;  %5231 = vmatpush.bf16.msrb.mxu0 %v8739_v1  ;;  %v9123_v4 = vor.u32 %v10359_v62, %v9122_v61  ;;  %v8706_v38 = vld [vmem:[#allocation12 + $0x40] sm:$0xf]  ;;  %v8772_v1 = vld [vmem:[#allocation12 + $0xd0] sm:$0xf0]  ;;  %v9047_v61 = vor.u32 %v10337_v48, %v9044_v25 }
 0x4d2   : > { %v8978_v5 = vld [vmem:[#allocation12 + $0x260] sm:$0xf]  ;;  %v10323_v35 = vld [vmem:[#allocation12 + $0x26c] sm:$0xf0]  ;;  %5244 = vmatpush.bf16.msrb.mxu1 %v8867_v59  ;;  %v8851_v6 = vor.u32 %v10291_v0, %v8850_v63  ;;  %v9172_v53 = vld [vmem:[#allocation12 + $0x3f0] sm:$0xf0]  ;;  %v8775_v63 = vor.u32 %v10269_v40, %v8772_v1 }
 0x4d3   : > { %v10255_v7 = vld [vmem:[#allocation12 + $0x4c] sm:$0xf0]  ;;  %v9106_v8 = vld [vmem:[#allocation12 + $0x360] sm:$0xf]  ;;  %5257 = vmatpush.bf16.msrb.mxu2 %v8995_v24  ;;  %v8979_v12 = vor.u32 %v10323_v35, %v8978_v5  ;;  %v10301_v54 = vld [vmem:[#allocation12 + $0x1c4] sm:$0xf]  ;;  %v9175_v0 = vor.u32 %v10369_v52, %v9172_v53 }
 0x4d4   : > { %v10355_v9 = vld [vmem:[#allocation12 + $0x36c] sm:$0xf0]  ;;  %v8834_v10 = vld [vmem:[#allocation12 + $0x140] sm:$0xf]  ;;  %5270 = vmatpush.bf16.msrb.mxu3 %v9123_v4  ;;  %v8707_v13 = vor.u32 %v10255_v7, %v8706_v38  ;;  %v8900_v56 = vld [vmem:[#allocation12 + $0x1d0] sm:$0xf0] }
 0x4d5   : > { %v10287_v11 = vld [vmem:[#allocation12 + $0x14c] sm:$0xf0]  ;;  %5232 = vmatpush.bf16.msrb.mxu0 %v8723_v2  ;;  %v9107_v14 = vor.u32 %v10355_v9, %v9106_v8  ;;  %v8690_v42 = vld [vmem:[#allocation12 + $0x20] sm:$0xf]  ;;  %v10265_v62 = vld [vmem:[#allocation12 + $0xa4] sm:$0xf]  ;;  %v8903_v38 = vor.u32 %v10301_v54, %v8900_v56 }
 0x4d6   : > { %v8962_v16 = vld [vmem:[#allocation12 + $0x240] sm:$0xf]  ;;  %v10319_v18 = vld [vmem:[#allocation12 + $0x24c] sm:$0xf0]  ;;  %5245 = vmatpush.bf16.msrb.mxu1 %v8851_v6  ;;  %v8835_v19 = vor.u32 %v10287_v11, %v8834_v10  ;;  %v8756_v24 = vld [vmem:[#allocation12 + $0xb0] sm:$0xf0] }
 0x4d7   : > { %v10251_v22 = vld [vmem:[#allocation12 + $0x2c] sm:$0xf0]  ;;  %v9090_v23 = vld [vmem:[#allocation12 + $0x340] sm:$0xf]  ;;  %5258 = vmatpush.bf16.msrb.mxu2 %v8979_v12  ;;  %v8963_v28 = vor.u32 %v10319_v18, %v8962_v16  ;;  %v10333_v2 = vld [vmem:[#allocation12 + $0x2c4] sm:$0xf]  ;;  %v8759_v9 = vor.u32 %v10265_v62, %v8756_v24 }
 0x4d8   : > { %v10351_v46 = vld [vmem:[#allocation12 + $0x34c] sm:$0xf0]  ;;  %v8818_v26 = vld [vmem:[#allocation12 + $0x120] sm:$0xf]  ;;  %5271 = vmatpush.bf16.msrb.mxu3 %v9107_v14  ;;  %v8691_v15 = vor.u32 %v10251_v22, %v8690_v42  ;;  %v9028_v4 = vld [vmem:[#allocation12 + $0x2d0] sm:$0xf0] }
 0x4d9   : > { %v10283_v55 = vld [vmem:[#allocation12 + $0x12c] sm:$0xf0]  ;;  %v8674_v30 = vld [vmem:[#allocation12] sm:$0xf]  ;;  %5233 = vmatpush.bf16.msrb.mxu0 %v8707_v13  ;;  %v9091_v58 = vor.u32 %v10351_v46, %v9090_v23  ;;  %v10365_v5 = vld [vmem:[#allocation12 + $0x3c4] sm:$0xf]  ;;  %v9031_v8 = vor.u32 %v10333_v2, %v9028_v4 }
 0x4da   : > { %v10247_v20 = vld [vmem:[#allocation12 + $0xc] sm:$0xf0]  ;;  %v8946_v29 = vld [vmem:[#allocation12 + $0x220] sm:$0xf]  ;;  %5246 = vmatpush.bf16.msrb.mxu1 %v8835_v19  ;;  %v8819_v3 = vor.u32 %v10283_v55, %v8818_v26  ;;  %v9156_v35 = vld [vmem:[#allocation12 + $0x3d0] sm:$0xf0] }
 0x4db   : > { %v10315_v31 = vld [vmem:[#allocation12 + $0x22c] sm:$0xf0]  ;;  %v8802_v32 = vld [vmem:[#allocation12 + $0x100] sm:$0xf]  ;;  %5259 = vmatpush.bf16.msrb.mxu2 %v8963_v28  ;;  %v8675_v39 = vor.u32 %v10247_v20, %v8674_v30  ;;  %v10297_v6 = vld [vmem:[#allocation12 + $0x1a4] sm:$0xf]  ;;  %v9159_v10 = vor.u32 %v10365_v5, %v9156_v35 }
 0x4dc   : > { %v9074_v33 = vld [vmem:[#allocation12 + $0x320] sm:$0xf]  ;;  %v10347_v49 = vld [vmem:[#allocation12 + $0x32c] sm:$0xf0]  ;;  %v8947_v57 = vor.u32 %v10315_v31, %v8946_v29  ;;  %5272 = vmatpush.bf16.msrb.mxu3 %v9091_v58  ;;  %v8884_v7 = vld [vmem:[#allocation12 + $0x1b0] sm:$0xf0] }
 0x4dd   : > { %v10279_v21 = vld [vmem:[#allocation12 + $0x10c] sm:$0xf0]  ;;  %5234 = vmatpush.bf16.msrb.mxu0 %v8691_v15  ;;  %v9075_v27 = vor.u32 %v10347_v49, %v9074_v33  ;;  %v8930_v41 = vld [vmem:[#allocation12 + $0x200] sm:$0xf]  ;;  %v10261_v11 = vld [vmem:[#allocation12 + $0x84] sm:$0xf]  ;;  %v8887_v14 = vor.u32 %v10297_v6, %v8884_v7 }
 0x4de   : > { %v10311_v44 = vld [vmem:[#allocation12 + $0x20c] sm:$0xf0]  ;;  %v9058_v45 = vld [vmem:[#allocation12 + $0x300] sm:$0xf]  ;;  %5247 = vmatpush.bf16.msrb.mxu1 %v8819_v3  ;;  %v8803_v43 = vor.u32 %v10279_v21, %v8802_v32  ;;  %v10329_v12 = vld [vmem:[#allocation12 + $0x2a4] sm:$0xf] }
 0x4df   : > { %v10343_v17 = vld [vmem:[#allocation12 + $0x30c] sm:$0xf0]  ;;  %5260 = vmatpush.bf16.msrb.mxu2 %v8947_v57  ;;  %v8931_v59 = vor.u32 %v10311_v44, %v8930_v41  ;;  %v9012_v13 = vld [vmem:[#allocation12 + $0x2b0] sm:$0xf0]  ;;  %v10361_v16 = vld [vmem:[#allocation12 + $0x3a4] sm:$0xf] }
 0x4e0   : > { %5273 = vmatpush.bf16.msrb.mxu3 %v9075_v27  ;;  %v9059_v60 = vor.u32 %v10343_v17, %v9058_v45  ;;  %v8740_v42 = vld [vmem:[#allocation12 + $0x90] sm:$0xf0]  ;;  %v10293_v19 = vld [vmem:[#allocation12 + $0x184] sm:$0xf]  ;;  %v9015_v23 = vor.u32 %v10329_v12, %v9012_v13 }
 0x4e1   : > { %5235 = vmatpush.bf16.msrb.mxu0 %v8675_v39  ;;  %v9140_v18 = vld [vmem:[#allocation12 + $0x3b0] sm:$0xf0]  ;;  %v8743_v46 = vor.u32 %v10261_v11, %v8740_v42  ;;  %v10257_v55 = vld [vmem:[#allocation12 + $0x64] sm:$0xf] }
 0x4e2   : > { %5248 = vmatpush.bf16.msrb.mxu1 %v8803_v43  ;;  %v8868_v22 = vld [vmem:[#allocation12 + $0x190] sm:$0xf0]  ;;  %v9143_v26 = vor.u32 %v10361_v16, %v9140_v18  ;;  %v10325_v28 = vld [vmem:[#allocation12 + $0x284] sm:$0xf] }
 0x4e3   : > { %5261 = vmatpush.bf16.msrb.mxu2 %v8931_v59  ;;  %v8996_v30 = vld [vmem:[#allocation12 + $0x290] sm:$0xf0]  ;;  %v8871_v15 = vor.u32 %v10293_v19, %v8868_v22  ;;  %v10357_v20 = vld [vmem:[#allocation12 + $0x384] sm:$0xf] }
 0x4e4   : > { %5274 = vmatpush.bf16.msrb.mxu3 %v9059_v60  ;;  %v8724_v58 = vld [vmem:[#allocation12 + $0x70] sm:$0xf0]  ;;  %v10289_v31 = vld [vmem:[#allocation12 + $0x164] sm:$0xf]  ;;  %v8999_v32 = vor.u32 %v10325_v28, %v8996_v30  ;;  %v8794_v30 = vld [vmem:[#allocation12 + $0xe8] sm:$0xf] }
 0x4e5   : > { %5280 = vmatpush.bf16.msra.mxu0 %v8791_v47  ;;  %v9124_v29 = vld [vmem:[#allocation12 + $0x390] sm:$0xf0]  ;;  %v8727_v33 = vor.u32 %v10257_v55, %v8724_v58  ;;  %v10253_v34 = vld [vmem:[#allocation12 + $0x44] sm:$0xf] }
 0x4e6   : > { %5293 = vmatpush.bf16.msra.mxu1 %v8919_v51  ;;  %v8852_v3 = vld [vmem:[#allocation12 + $0x170] sm:$0xf0]  ;;  %v9127_v49 = vor.u32 %v10357_v20, %v9124_v29  ;;  %v10285_v50 = vld [vmem:[#allocation12 + $0x144] sm:$0xf]  ;;  %v8922_v29 = vld [vmem:[#allocation12 + $0x1e8] sm:$0xf] }
 0x4e7   : > { %5306 = vmatpush.bf16.msra.mxu2 %v9047_v61  ;;  %v8855_v21 = vor.u32 %v10289_v31, %v8852_v3  ;;  %v8708_v36 = vld [vmem:[#allocation12 + $0x50] sm:$0xf0]  ;;  %v10321_v27 = vld [vmem:[#allocation12 + $0x264] sm:$0xf]  ;;  %v10308_v31 = vld [vmem:[#allocation12 + $0x1f4] sm:$0xf0] }
 0x4e8   : > { %5319 = vmatpush.bf16.msra.mxu3 %v9175_v0  ;;  %v8711_v37 = vor.u32 %v10253_v34, %v8708_v36  ;;  %v8836_v57 = vld [vmem:[#allocation12 + $0x150] sm:$0xf0]  ;;  %v10353_v41 = vld [vmem:[#allocation12 + $0x364] sm:$0xf] }
 0x4e9   : > { %5281 = vmatpush.bf16.msra.mxu0 %v8775_v63  ;;  %v8839_v39 = vor.u32 %v10285_v50, %v8836_v57  ;;  %v8980_v40 = vld [vmem:[#allocation12 + $0x270] sm:$0xf0]  ;;  %v10249_v43 = vld [vmem:[#allocation12 + $0x24] sm:$0xf]  ;;  %v8778_v57 = vld [vmem:[#allocation12 + $0xc8] sm:$0xf] }
 0x4ea   : > { %5294 = vmatpush.bf16.msra.mxu1 %v8903_v38  ;;  %v8983_v44 = vor.u32 %v10321_v27, %v8980_v40  ;;  %v9108_v45 = vld [vmem:[#allocation12 + $0x370] sm:$0xf0]  ;;  %v10281_v48 = vld [vmem:[#allocation12 + $0x124] sm:$0xf] }
 0x4eb   : > { %5307 = vmatpush.bf16.msra.mxu2 %v9031_v8  ;;  %v9111_v47 = vor.u32 %v10353_v41, %v9108_v45  ;;  %v8692_v17 = vld [vmem:[#allocation12 + $0x30] sm:$0xf0]  ;;  %v10317_v52 = vld [vmem:[#allocation12 + $0x244] sm:$0xf]  ;;  %v8906_v45 = vld [vmem:[#allocation12 + $0x1c8] sm:$0xf] }
 0x4ec   : > { %5320 = vmatpush.bf16.msra.mxu3 %v9159_v10  ;;  %v8820_v25 = vld [vmem:[#allocation12 + $0x130] sm:$0xf0]  ;;  %v8695_v51 = vor.u32 %v10249_v43, %v8692_v17  ;;  %v10349_v54 = vld [vmem:[#allocation12 + $0x344] sm:$0xf]  ;;  %v10304_v43 = vld [vmem:[#allocation12 + $0x1d4] sm:$0xf0] }
 0x4ed   : > { %5282 = vmatpush.bf16.msra.mxu0 %v8759_v9  ;;  %v8823_v1 = vor.u32 %v10281_v48, %v8820_v25  ;;  %v8964_v53 = vld [vmem:[#allocation12 + $0x250] sm:$0xf0]  ;;  %v10245_v61 = vld [vmem:[#allocation12 + $0x4] sm:$0xf] }
 0x4ee   : > { %5295 = vmatpush.bf16.msra.mxu1 %v8887_v14  ;;  %v8967_v56 = vor.u32 %v10317_v52, %v8964_v53  ;;  %v9092_v59 = vld [vmem:[#allocation12 + $0x350] sm:$0xf0]  ;;  %v10277_v0 = vld [vmem:[#allocation12 + $0x104] sm:$0xf]  ;;  %v9178_v52 = vld [vmem:[#allocation12 + $0x3e8] sm:$0xf] }
 0x4ef   : > { %5308 = vmatpush.bf16.msra.mxu2 %v9015_v23  ;;  %v9095_v60 = vor.u32 %v10349_v54, %v9092_v59  ;;  %v8676_v62 = vld [vmem:[#allocation12 + $0x10] sm:$0xf0]  ;;  %v10313_v4 = vld [vmem:[#allocation12 + $0x224] sm:$0xf]  ;;  %v8907_v54 = vor.u32 %v10304_v43, %v8906_v45  ;;  %v8762_v59 = vld [vmem:[#allocation12 + $0xa8] sm:$0xf] }
 0x4f0   : > { %5321 = vmatpush.bf16.msra.mxu3 %v9143_v26  ;;  %v8679_v63 = vor.u32 %v10245_v61, %v8676_v62  ;;  %v8804_v24 = vld [vmem:[#allocation12 + $0x110] sm:$0xf0]  ;;  %v10345_v5 = vld [vmem:[#allocation12 + $0x324] sm:$0xf]  ;;  %v8890_v62 = vld [vmem:[#allocation12 + $0x1a8] sm:$0xf] }
 0x4f1   : > { %5283 = vmatpush.bf16.msra.mxu0 %v8743_v46  ;;  %v8807_v2 = vor.u32 %v10277_v0, %v8804_v24  ;;  %v8948_v38 = vld [vmem:[#allocation12 + $0x230] sm:$0xf0]  ;;  %v10309_v8 = vld [vmem:[#allocation12 + $0x204] sm:$0xf] }
 0x4f2   : > { %5296 = vmatpush.bf16.msra.mxu1 %v8871_v15  ;;  %v9076_v35 = vld [vmem:[#allocation12 + $0x330] sm:$0xf0]  ;;  %v8951_v6 = vor.u32 %v10313_v4, %v8948_v38  ;;  %v10341_v11 = vld [vmem:[#allocation12 + $0x304] sm:$0xf]  ;;  %v10276_v15 = vld [vmem:[#allocation12 + $0xf4] sm:$0xf0] }
 0x4f3   : > { %5309 = vmatpush.bf16.msra.mxu2 %v8999_v32  ;;  %v9079_v7 = vor.u32 %v10345_v5, %v9076_v35  ;;  %v8932_v9 = vld [vmem:[#allocation12 + $0x210] sm:$0xf0]  ;;  %v9034_v5 = vld [vmem:[#allocation12 + $0x2c8] sm:$0xf]  ;;  %v10336_v35 = vld [vmem:[#allocation12 + $0x2d4] sm:$0xf0] }
 0x4f4   : > { %5322 = vmatpush.bf16.msra.mxu3 %v9127_v49  ;;  %v8935_v10 = vor.u32 %v10309_v8, %v8932_v9  ;;  %v9060_v12 = vld [vmem:[#allocation12 + $0x310] sm:$0xf0] }
 0x4f5   : > { %5284 = vmatpush.bf16.msra.mxu0 %v8727_v33  ;;  %v9063_v13 = vor.u32 %v10341_v11, %v9060_v12  ;;  %v4423_v14 = vld [vmem:[#allocation3] ss:$8 sm:$0xf]  ;;  %v4425_v42 = vld [vmem:[#allocation3 + $0x1] ss:$8 sm:$0xf] }
 0x4f6   : > { %5297 = vmatpush.bf16.msra.mxu1 %v8855_v21  ;;  %v4427_v16 = vperm.slane %v4423_v14, 0  ;;  %v4428_v18 = vperm.slane %v4423_v14, 1  ;;  %v4440_v19 = vperm.slane %v4425_v42, 0  ;;  %v4441_v23 = vperm.slane %v4425_v42, 1  ;;  %v8746_v11 = vld [vmem:[#allocation12 + $0x88] sm:$0xf] }
 0x4f7   : > { %5310 = vmatpush.bf16.msra.mxu2 %v8983_v44  ;;  %v4429_v20 = vperm.slane %v4423_v14, 2  ;;  %v4430_v32 = vperm.slane %v4423_v14, 3  ;;  %v4442_v49 = vperm.slane %v4425_v42, 2  ;;  %v8795_v21 = vor.u32 %v10276_v15, %v8794_v30  ;;  %v10264_v12 = vld [vmem:[#allocation12 + $0x94] sm:$0xf0] }
 0x4f8   : > { %5323 = vmatpush.bf16.msra.mxu3 %v9111_v47  ;;  %v4443_v50 = vperm.slane %v4425_v42, 3  ;;  %v8874_v14 = vld [vmem:[#allocation12 + $0x188] sm:$0xf]  ;;  %v10296_v42 = vld [vmem:[#allocation12 + $0x194] sm:$0xf0] }
 0x4f9   : > { %5285 = vmatpush.bf16.msra.mxu0 %v8711_v37  ;;  %v8923_v37 = vor.u32 %v10308_v31, %v8922_v29  ;;  %v10260_v30 = vld [vmem:[#allocation12 + $0x74] sm:$0xf0]  ;;  %v8858_v15 = vld [vmem:[#allocation12 + $0x168] sm:$0xf] }
 0x4fa   : > { %5298 = vmatpush.bf16.msra.mxu1 %v8839_v39  ;;  %v10272_v39 = vld [vmem:[#allocation12 + $0xd4] sm:$0xf0]  ;;  %v9002_v31 = vld [vmem:[#allocation12 + $0x288] sm:$0xf] }
 0x4fb   : > { %5311 = vmatpush.bf16.msra.mxu2 %v8967_v56  ;;  %v8779_v25 = vor.u32 %v10272_v39, %v8778_v57  ;;  %v10372_v56 = vld [vmem:[#allocation12 + $0x3f4] sm:$0xf0] }
 0x4fc   : > { %5324 = vmatpush.bf16.msra.mxu3 %v9095_v60  ;;  %v10268_v60 = vld [vmem:[#allocation12 + $0xb4] sm:$0xf0]  ;;  %v9179_v4 = vor.u32 %v10372_v56, %v9178_v52 }
 0x4fd   : > { %5286 = vmatpush.bf16.msra.mxu0 %v8695_v51  ;;  %v9050_v51 = vld [vmem:[#allocation12 + $0x2e8] sm:$0xf]  ;;  %v8763_v38 = vor.u32 %v10268_v60, %v8762_v59  ;;  %v10288_v57 = vld [vmem:[#allocation12 + $0x154] sm:$0xf0] }
 0x4fe   : > { %5299 = vmatpush.bf16.msra.mxu1 %v8823_v1  ;;  %v10340_v1 = vld [vmem:[#allocation12 + $0x2f4] sm:$0xf0]  ;;  %v9098_v59 = vld [vmem:[#allocation12 + $0x348] sm:$0xf] }
 0x4ff   : > { %5312 = vmatpush.bf16.msra.mxu2 %v8951_v6  ;;  %v9051_v24 = vor.u32 %v10340_v1, %v9050_v51  ;;  %v9162_v6 = vld [vmem:[#allocation12 + $0x3c8] sm:$0xf]  ;;  %v10284_v1 = vld [vmem:[#allocation12 + $0x134] sm:$0xf0] }
 0x500   : > { %5325 = vmatpush.bf16.msra.mxu3 %v9079_v7  ;;  %v8826_v51 = vld [vmem:[#allocation12 + $0x128] sm:$0xf]  ;;  %v10320_v56 = vld [vmem:[#allocation12 + $0x254] sm:$0xf0] }
 0x501   : > { %5287 = vmatpush.bf16.msra.mxu0 %v8679_v63  ;;  %v10300_v63 = vld [vmem:[#allocation12 + $0x1b4] sm:$0xf0] }
 0x502   : > { %5300 = vmatpush.bf16.msra.mxu1 %v8807_v2  ;;  %v8891_v9 = vor.u32 %v10300_v63, %v8890_v62  ;;  %v10352_v62 = vld [vmem:[#allocation12 + $0x354] sm:$0xf0]  ;;  %v8682_v63 = vld [vmem:[#allocation12 + $0x8] sm:$0xf] }
 0x503   : > { %5313 = vmatpush.bf16.msra.mxu2 %v8935_v10  ;;  %v10368_v10 = vld [vmem:[#allocation12 + $0x3d4] sm:$0xf0] }
 0x504   : > { %5326 = vmatpush.bf16.msra.mxu3 %v9063_v13 }
 0x541   : > { %v4380_v22 = vpop.f32.mrf.mxu0 }
 0x542   : > { %v4435_v46 = vmul.f32 %v4427_v16, %v4380_v22  ;;  %v4393_v26 = vpop.f32.mrf.mxu1  ;;  %v9035_v16 = vor.u32 %v10336_v35, %v9034_v5  ;;  %v9018_v22 = vld [vmem:[#allocation12 + $0x2a8] sm:$0xf]  ;;  %v8796_v35 = vld [vmem:[#allocation12 + $0xf8] sm:$0xf0] }
 0x543   : > { %v4436_v55 = vmul.f32 %v4428_v18, %v4393_v26  ;;  %v9163_v18 = vor.u32 %v10368_v10, %v9162_v6  ;;  %v9146_v26 = vld [vmem:[#allocation12 + $0x3a8] sm:$0xf]  ;;  %v10306_v6 = vld [vmem:[#allocation12 + $0x1ec] sm:$0xf] }
 0x544   : > { %v4448_v28 = vadd.f32 %v4440_v19, %v4435_v46  ;;  %v8747_v19 = vor.u32 %v10264_v12, %v8746_v11  ;;  %v8875_v46 = vor.u32 %v10296_v42, %v8874_v14  ;;  %v8954_v10 = vld [vmem:[#allocation12 + $0x228] sm:$0xf]  ;;  %v10316_v11 = vld [vmem:[#allocation12 + $0x234] sm:$0xf0] }
 0x545   : > { %v4449_v58 = vadd.f32 %v4441_v23, %v4436_v55  ;;  %v10332_v23 = vld [vmem:[#allocation12 + $0x2b4] sm:$0xf0]  ;;  %v9082_v14 = vld [vmem:[#allocation12 + $0x328] sm:$0xf] }
 0x546   : > { %v4452_v3 = vmax.f32 %v4448_v28, 0.0  ;;  %v10364_v55 = vld [vmem:[#allocation12 + $0x3b4] sm:$0xf0]  ;;  %v8730_v28 = vld [vmem:[#allocation12 + $0x68] sm:$0xf] }
 0x547   : > { %v4453_v33 = vmax.f32 %v4449_v58, 0.0  ;;  %v10292_v58 = vld [vmem:[#allocation12 + $0x174] sm:$0xf0]  ;;  %v9147_v29 = vor.u32 %v10364_v55, %v9146_v26  ;;  %v8908_v26 = vld [vmem:[#allocation12 + $0x1d8] sm:$0xf0] }
 0x548   : > { %v11376_v34 = vpack.c.bf16 %v4452_v3, %v4452_v3  ;;  %v10328_v3 = vld [vmem:[#allocation12 + $0x294] sm:$0xf0] }
 0x549   : > { %v4406_v36 = vpop.f32.mrf.mxu2  ;;  %v11378_v27 = vpack.c.bf16 %v4453_v33, %v4453_v33  ;;  %v4382_v44 = vpop.f32.mrf.mxu0  ;;  %v8859_v33 = vor.u32 %v10292_v58, %v8858_v15  ;;  %v9003_v39 = vor.u32 %v10328_v3, %v9002_v31  ;;  %v10348_v42 = vld [vmem:[#allocation12 + $0x334] sm:$0xf0]  ;;  %v9066_v15 = vld [vmem:[#allocation12 + $0x308] sm:$0xf] }
 0x54a   : > { %v4437_v40 = vmul.f32 %v4429_v20, %v4406_v36  ;;  %v4419_v41 = vpop.f32.mrf.mxu3  ;;  %5236 = vmatmul.bf16.vlgmr.msrb.gmra.mxu0 %v11376_v34  ;;  %v4395_v17 = vpop.f32.mrf.mxu1  ;;  %v9019_v20 = vor.u32 %v10332_v23, %v9018_v22  ;;  %v8714_v36 = vld [vmem:[#allocation12 + $0x48] sm:$0xf]  ;;  %v10324_v44 = vld [vmem:[#allocation12 + $0x274] sm:$0xf0]  ;;  %v8955_v22 = vor.u32 %v10316_v11, %v8954_v10  ;;  %v8780_v23 = vld [vmem:[#allocation12 + $0xd8] sm:$0xf0]  ;;  %v9083_v55 = vor.u32 %v10348_v42, %v9082_v14 }
 0x54b   : > { %v4438_v47 = vmul.f32 %v4430_v32, %v4419_v41  ;;  %5249 = vmatmul.bf16.vlgmr.msrb.gmra.mxu1 %v11378_v27  ;;  %5332 = vmatpush.bf16.msrb.mxu0 %v8795_v21  ;;  %v8731_v32 = vor.u32 %v10260_v30, %v8730_v28  ;;  %v10360_v21 = vld [vmem:[#allocation12 + $0x394] sm:$0xf0]  ;;  %v8986_v41 = vld [vmem:[#allocation12 + $0x268] sm:$0xf]  ;;  %v10358_v10 = vld [vmem:[#allocation12 + $0x38c] sm:$0xf] }
 0x54c   : > { %v4450_v48 = vadd.f32 %v4442_v49, %v4437_v40  ;;  %5345 = vmatpush.bf16.msrb.mxu1 %v8923_v37  ;;  %v9130_v49 = vld [vmem:[#allocation12 + $0x388] sm:$0xf]  ;;  %v10356_v17 = vld [vmem:[#allocation12 + $0x374] sm:$0xf0]  ;;  %v8987_v52 = vor.u32 %v10324_v44, %v8986_v41  ;;  %v10334_v41 = vld [vmem:[#allocation12 + $0x2cc] sm:$0xf] }
 0x54d   : > { %v4451_v53 = vadd.f32 %v4443_v50, %v4438_v47  ;;  %v10256_v50 = vld [vmem:[#allocation12 + $0x54] sm:$0xf0]  ;;  %v8842_v37 = vld [vmem:[#allocation12 + $0x148] sm:$0xf]  ;;  %v9131_v40 = vor.u32 %v10360_v21, %v9130_v49  ;;  %v10266_v49 = vld [vmem:[#allocation12 + $0xac] sm:$0xf] }
 0x54e   : > { %v4454_v61 = vmax.f32 %v4450_v48, 0.0  ;;  %v8715_v45 = vor.u32 %v10256_v50, %v8714_v36  ;;  %v8843_v43 = vor.u32 %v10288_v57, %v8842_v37  ;;  %v9114_v47 = vld [vmem:[#allocation12 + $0x368] sm:$0xf]  ;;  %v10312_v30 = vld [vmem:[#allocation12 + $0x214] sm:$0xf0] }
 0x54f   : > { %v4455_v0 = vmax.f32 %v4451_v53, 0.0  ;;  %5333 = vmatpush.bf16.msrb.mxu0 %v8779_v25  ;;  %v8698_v48 = vld [vmem:[#allocation12 + $0x28] sm:$0xf]  ;;  %v10252_v25 = vld [vmem:[#allocation12 + $0x34] sm:$0xf0]  ;;  %v9115_v53 = vor.u32 %v10356_v17, %v9114_v47 }
 0x550   : > { %v11382_v2 = vpack.c.bf16 %v4454_v61, %v4454_v61  ;;  %5346 = vmatpush.bf16.msrb.mxu1 %v8907_v54  ;;  %v8970_v54 = vld [vmem:[#allocation12 + $0x248] sm:$0xf]  ;;  %v8699_v60 = vor.u32 %v10252_v25, %v8698_v48  ;;  %v8827_v61 = vor.u32 %v10284_v1, %v8826_v51  ;;  %v10344_v58 = vld [vmem:[#allocation12 + $0x314] sm:$0xf0]  ;;  %v8764_v36 = vld [vmem:[#allocation12 + $0xb8] sm:$0xf0] }
 0x551   : > { %v11384_v7 = vpack.c.bf16 %v4455_v0, %v4455_v0  ;;  %v4408_v8 = vpop.f32.mrf.mxu2  ;;  %v10248_v0 = vld [vmem:[#allocation12 + $0x14] sm:$0xf0]  ;;  %v8971_v5 = vor.u32 %v10320_v56, %v8970_v54  ;;  %v8938_v28 = vld [vmem:[#allocation12 + $0x208] sm:$0xf]  ;;  %v10298_v50 = vld [vmem:[#allocation12 + $0x1ac] sm:$0xf]  ;;  %v9067_v57 = vor.u32 %v10344_v58, %v9066_v15 }
 0x552   : > { %v4421_v13 = vpop.f32.mrf.mxu3  ;;  %5262 = vmatmul.bf16.vlgmr.msrb.gmra.mxu2 %v11382_v2  ;;  %v8924_v8 = vld [vmem:[#allocation12 + $0x1f8] sm:$0xf0]  ;;  %v8683_v12 = vor.u32 %v10248_v0, %v8682_v63  ;;  %v8939_v21 = vor.u32 %v10312_v30, %v8938_v28  ;;  %v10366_v47 = vld [vmem:[#allocation12 + $0x3cc] sm:$0xf] }
 0x553   : > { %5275 = vmatmul.bf16.vlgmr.msrb.gmra.mxu3 %v11384_v7  ;;  %5358 = vmatpush.bf16.msrb.mxu2 %v9051_v24  ;;  %v8810_v24 = vld [vmem:[#allocation12 + $0x108] sm:$0xf]  ;;  %v8892_v37 = vld [vmem:[#allocation12 + $0x1b8] sm:$0xf0]  ;;  %v10262_v48 = vld [vmem:[#allocation12 + $0x8c] sm:$0xf] }
 0x554   : > { %5371 = vmatpush.bf16.msrb.mxu3 %v9179_v4  ;;  %5334 = vmatpush.bf16.msrb.mxu0 %v8763_v38  ;;  %v10280_v4 = vld [vmem:[#allocation12 + $0x114] sm:$0xf0]  ;;  %v10274_v38 = vld [vmem:[#allocation12 + $0xec] sm:$0xf]  ;;  %v9036_v44 = vld [vmem:[#allocation12 + $0x2d8] sm:$0xf0] }
 0x555   : > { %5347 = vmatpush.bf16.msrb.mxu1 %v8891_v9  ;;  %v9099_v9 = vor.u32 %v10352_v62, %v9098_v59  ;;  %v8811_v13 = vor.u32 %v10280_v4, %v8810_v24  ;;  %v9164_v17 = vld [vmem:[#allocation12 + $0x3d8] sm:$0xf0]  ;;  %v10294_v51 = vld [vmem:[#allocation12 + $0x18c] sm:$0xf] }
 0x556   : > { %v8748_v25 = vld [vmem:[#allocation12 + $0x98] sm:$0xf0]  ;;  %v10330_v54 = vld [vmem:[#allocation12 + $0x2ac] sm:$0xf] }
 0x557   : > { %5359 = vmatpush.bf16.msrb.mxu2 %v9035_v16  ;;  %v8799_v16 = vor.u32 %v10274_v38, %v8796_v35  ;;  %v8876_v1 = vld [vmem:[#allocation12 + $0x198] sm:$0xf0]  ;;  %v8751_v59 = vor.u32 %v10262_v48, %v8748_v25  ;;  %v10258_v63 = vld [vmem:[#allocation12 + $0x6c] sm:$0xf] }
 0x558   : > { %5372 = vmatpush.bf16.msrb.mxu3 %v9163_v18  ;;  %5335 = vmatpush.bf16.msrb.mxu0 %v8747_v19  ;;  %v8927_v18 = vor.u32 %v10306_v6, %v8924_v8  ;;  %v10270_v19 = vld [vmem:[#allocation12 + $0xcc] sm:$0xf]  ;;  %v9020_v56 = vld [vmem:[#allocation12 + $0x2b8] sm:$0xf0] }
 0x559   : > { %5348 = vmatpush.bf16.msrb.mxu1 %v8875_v46  ;;  %v10302_v46 = vld [vmem:[#allocation12 + $0x1cc] sm:$0xf]  ;;  %v8783_v31 = vor.u32 %v10270_v19, %v8780_v23  ;;  %v9148_v62 = vld [vmem:[#allocation12 + $0x3b8] sm:$0xf0]  ;;  %v9023_v38 = vor.u32 %v10330_v54, %v9020_v56 }
 0x55a   : > { %5288 = vmatmul.bf16.vlgmr.msra.gmra.mxu0 %v11376_v34  ;;  %v8911_v3 = vor.u32 %v10302_v46, %v8908_v26  ;;  %v8732_v0 = vld [vmem:[#allocation12 + $0x78] sm:$0xf0]  ;;  %v10290_v24 = vld [vmem:[#allocation12 + $0x16c] sm:$0xf] }
 0x55b   : > { %5360 = vmatpush.bf16.msrb.mxu2 %v9019_v20  ;;  %5301 = vmatmul.bf16.vlgmr.msra.gmra.mxu1 %v11378_v27  ;;  %v10338_v20 = vld [vmem:[#allocation12 + $0x2ec] sm:$0xf]  ;;  %v8860_v4 = vld [vmem:[#allocation12 + $0x178] sm:$0xf0]  ;;  %v8735_v8 = vor.u32 %v10258_v63, %v8732_v0 }
 0x55c   : > { %5373 = vmatpush.bf16.msrb.mxu3 %v9147_v29  ;;  %5336 = vmatpush.bf16.msrb.mxu0 %v8731_v32  ;;  %v9052_v29 = vld [vmem:[#allocation12 + $0x2f8] sm:$0xf0]  ;;  %v10370_v32 = vld [vmem:[#allocation12 + $0x3ec] sm:$0xf] }
 0x55d   : > { %5349 = vmatpush.bf16.msrb.mxu1 %v8859_v33  ;;  %v9180_v33 = vld [vmem:[#allocation12 + $0x3f8] sm:$0xf0]  ;;  %v10326_v35 = vld [vmem:[#allocation12 + $0x28c] sm:$0xf] }
 0x55e   : > { %v9004_v6 = vld [vmem:[#allocation12 + $0x298] sm:$0xf0]  ;;  %v10286_v14 = vld [vmem:[#allocation12 + $0x14c] sm:$0xf] }
 0x55f   : > { %5361 = vmatpush.bf16.msrb.mxu2 %v9003_v39  ;;  %v9055_v39 = vor.u32 %v10338_v20, %v9052_v29  ;;  %v9132_v11 = vld [vmem:[#allocation12 + $0x398] sm:$0xf0]  ;;  %v10322_v19 = vld [vmem:[#allocation12 + $0x26c] sm:$0xf] }
 0x560   : > { %5374 = vmatpush.bf16.msrb.mxu3 %v9131_v40  ;;  %5337 = vmatpush.bf16.msrb.mxu0 %v8715_v45  ;;  %v9183_v40 = vor.u32 %v10370_v32, %v9180_v33  ;;  %v8767_v45 = vor.u32 %v10266_v49, %v8764_v36  ;;  %v8844_v42 = vld [vmem:[#allocation12 + $0x158] sm:$0xf0]  ;;  %v10354_v26 = vld [vmem:[#allocation12 + $0x36c] sm:$0xf] }
 0x561   : > { %5350 = vmatpush.bf16.msrb.mxu1 %v8843_v43  ;;  %v8895_v43 = vor.u32 %v10298_v50, %v8892_v37  ;;  %v8847_v46 = vor.u32 %v10286_v14, %v8844_v42  ;;  %v10250_v28 = vld [vmem:[#allocation12 + $0x2c] sm:$0xf]  ;;  %v8700_v30 = vld [vmem:[#allocation12 + $0x38] sm:$0xf0] }
 0x562   : > { %5314 = vmatmul.bf16.vlgmr.msra.gmra.mxu2 %v11382_v2  ;;  %v10282_v15 = vld [vmem:[#allocation12 + $0x12c] sm:$0xf]  ;;  %v8828_v58 = vld [vmem:[#allocation12 + $0x138] sm:$0xf0]  ;;  %v8703_v33 = vor.u32 %v10250_v28, %v8700_v30  ;;  %v10419_v28 = vld [vmem:[#allocation15 + $0x16c] sm:$0xf0] }
 0x563   : > { %5327 = vmatmul.bf16.vlgmr.msra.gmra.mxu3 %v11384_v7  ;;  %5362 = vmatpush.bf16.msrb.mxu2 %v8987_v52  ;;  %v9039_v52 = vor.u32 %v10334_v41, %v9036_v44  ;;  %v10350_v32 = vld [vmem:[#allocation12 + $0x34c] sm:$0xf]  ;;  %v8831_v49 = vor.u32 %v10282_v15, %v8828_v58  ;;  %v8684_v50 = vld [vmem:[#allocation12 + $0x18] sm:$0xf0]  ;;  %v10403_v41 = vld [vmem:[#allocation15 + $0xec] sm:$0xf0] }
 0x564   : > { %5375 = vmatpush.bf16.msrb.mxu3 %v9115_v53  ;;  %5338 = vmatpush.bf16.msrb.mxu0 %v8699_v60  ;;  %v9167_v53 = vor.u32 %v10366_v47, %v9164_v17  ;;  %v8879_v60 = vor.u32 %v10294_v51, %v8876_v1  ;;  %v10246_v36 = vld [vmem:[#allocation12 + $0xc] sm:$0xf]  ;;  %v9426_v44 = vld [vmem:[#allocation15 + $0x1e0] sm:$0xf]  ;;  %v8956_v17 = vld [vmem:[#allocation12 + $0x238] sm:$0xf0] }
 0x565   : > { %5351 = vmatpush.bf16.msrb.mxu1 %v8827_v61  ;;  %v10362_v61 = vld [vmem:[#allocation12 + $0x3ac] sm:$0xf]  ;;  %v8687_v48 = vor.u32 %v10246_v36, %v8684_v50  ;;  %v9084_v1 = vld [vmem:[#allocation12 + $0x338] sm:$0xf0]  ;;  %v9218_v15 = vld [vmem:[#allocation15 + $0x40] sm:$0xf] }
 0x566   : > { %v10278_v37 = vld [vmem:[#allocation12 + $0x10c] sm:$0xf]  ;;  %v8940_v0 = vld [vmem:[#allocation12 + $0x218] sm:$0xf0]  ;;  %v10383_v58 = vld [vmem:[#allocation15 + $0x4c] sm:$0xf0] }
 0x567   : > { %5363 = vmatpush.bf16.msrb.mxu2 %v8971_v5  ;;  %v9151_v5 = vor.u32 %v10362_v61, %v9148_v62  ;;  %v10314_v47 = vld [vmem:[#allocation12 + $0x22c] sm:$0xf]  ;;  %v10431_v61 = vld [vmem:[#allocation15 + $0x1cc] sm:$0xf0]  ;;  %v10397_v50 = vld [vmem:[#allocation15 + $0xc4] sm:$0xf] }
 0x568   : > { %5376 = vmatpush.bf16.msrb.mxu3 %v9099_v9  ;;  %5339 = vmatpush.bf16.msrb.mxu0 %v8683_v12  ;;  %v8863_v9 = vor.u32 %v10290_v24, %v8860_v4  ;;  %v10254_v12 = vld [vmem:[#allocation12 + $0x4c] sm:$0xf]  ;;  %v8959_v56 = vor.u32 %v10314_v47, %v8956_v17  ;;  %v9068_v4 = vld [vmem:[#allocation12 + $0x318] sm:$0xf0]  ;;  %v9268_v47 = vld [vmem:[#allocation15 + $0xb0] sm:$0xf0] }
 0x569   : > { %5352 = vmatpush.bf16.msrb.mxu1 %v8811_v13  ;;  %v8716_v13 = vld [vmem:[#allocation12 + $0x58] sm:$0xf0]  ;;  %v10346_v51 = vld [vmem:[#allocation12 + $0x32c] sm:$0xf] }
 0x56a   : > { %v8719_v23 = vor.u32 %v10254_v12, %v8716_v13  ;;  %v9087_v62 = vor.u32 %v10346_v51, %v9084_v1  ;;  %v10310_v63 = vld [vmem:[#allocation12 + $0x20c] sm:$0xf]  ;;  %v9394_v12 = vld [vmem:[#allocation15 + $0x1a0] sm:$0xf]  ;;  %v10427_v13 = vld [vmem:[#allocation15 + $0x1ac] sm:$0xf0] }
 0x56b   : > { %5364 = vmatpush.bf16.msrb.mxu2 %v8955_v22  ;;  %5340 = vmatmul.bf16.vlgmr.msrb.gmra.mxu0 %v11376_v34  ;;  %v8988_v22 = vld [vmem:[#allocation12 + $0x278] sm:$0xf0]  ;;  %v10342_v24 = vld [vmem:[#allocation12 + $0x30c] sm:$0xf]  ;;  %v10411_v51 = vld [vmem:[#allocation15 + $0x12c] sm:$0xf0] }
 0x56c   : > { %5384 = vmatpush.bf16.msra.mxu0 %v8799_v16  ;;  %5377 = vmatpush.bf16.msrb.mxu3 %v9083_v55  ;;  %v9007_v16 = vor.u32 %v10326_v35, %v9004_v6  ;;  %v9116_v55 = vld [vmem:[#allocation12 + $0x378] sm:$0xf0]  ;;  %v8991_v20 = vor.u32 %v10322_v19, %v8988_v22  ;;  %v9395_v19 = vor.u32 %v10427_v13, %v9394_v12  ;;  %v9378_v22 = vld [vmem:[#allocation15 + $0x180] sm:$0xf]  ;;  %v10381_v13 = vld [vmem:[#allocation15 + $0x44] sm:$0xf] }
 0x56d   : > { %5397 = vmatpush.bf16.msra.mxu1 %v8927_v18  ;;  %v9135_v18 = vor.u32 %v10358_v10, %v9132_v11  ;;  %v9119_v29 = vor.u32 %v10354_v26, %v9116_v55  ;;  %v10395_v10 = vld [vmem:[#allocation15 + $0xac] sm:$0xf0]  ;;  %v9071_v11 = vor.u32 %v10342_v24, %v9068_v4  ;;  %v9362_v55 = vld [vmem:[#allocation15 + $0x160] sm:$0xf] }
 0x56e   : > { %5353 = vmatmul.bf16.vlgmr.msrb.gmra.mxu1 %v11378_v27  ;;  %v10387_v26 = vld [vmem:[#allocation15 + $0x6c] sm:$0xf0]  ;;  %v9522_v1 = vld [vmem:[#allocation15 + $0x2a0] sm:$0xf] }
 0x56f   : > { %5365 = vmatpush.bf16.msrb.mxu2 %v8939_v21  ;;  %v9100_v21 = vld [vmem:[#allocation12 + $0x358] sm:$0xf0]  ;;  %v10455_v24 = vld [vmem:[#allocation15 + $0x28c] sm:$0xf0] }
 0x570   : > { %5385 = vmatpush.bf16.msra.mxu0 %v8783_v31  ;;  %5378 = vmatpush.bf16.msrb.mxu3 %v9067_v57  ;;  %v10318_v31 = vld [vmem:[#allocation12 + $0x24c] sm:$0xf]  ;;  %v8812_v57 = vld [vmem:[#allocation12 + $0x118] sm:$0xf0] }
 0x571   : > { %5398 = vmatpush.bf16.msra.mxu1 %v8911_v3  ;;  %v8972_v3 = vld [vmem:[#allocation12 + $0x258] sm:$0xf0]  ;;  %v8815_v25 = vor.u32 %v10278_v37, %v8812_v57  ;;  %v9284_v37 = vld [vmem:[#allocation15 + $0xd0] sm:$0xf0] }
 0x572   : > { %5366 = vmatmul.bf16.vlgmr.msrb.gmra.mxu2 %v11382_v2  ;;  %v9287_v57 = vor.u32 %v10397_v50, %v9284_v37  ;;  %v10499_v50 = vld [vmem:[#allocation15 + $0x3ec] sm:$0xf0]  ;;  %v10417_v37 = vld [vmem:[#allocation15 + $0x164] sm:$0xf] }
 0x573   : > { %5410 = vmatpush.bf16.msra.mxu2 %v9055_v39  ;;  %5379 = vmatmul.bf16.vlgmr.msrb.gmra.mxu3 %v11384_v7  ;;  %v9298_v39 = vld [vmem:[#allocation15 + $0xe0] sm:$0xf] }
 0x574   : > { %5423 = vmatpush.bf16.msra.mxu3 %v9183_v40  ;;  %5386 = vmatpush.bf16.msra.mxu0 %v8767_v45  ;;  %v8975_v40 = vor.u32 %v10318_v31, %v8972_v3  ;;  %v10435_v45 = vld [vmem:[#allocation15 + $0x1ec] sm:$0xf0]  ;;  %v9202_v31 = vld [vmem:[#allocation15 + $0x20] sm:$0xf] }
 0x575   : > { %5399 = vmatpush.bf16.msra.mxu1 %v8895_v43  ;;  %v9103_v43 = vor.u32 %v10350_v32, %v9100_v21  ;;  %v9427_v54 = vor.u32 %v10435_v45, %v9426_v44  ;;  %v10375_v32 = vld [vmem:[#allocation15 + $0xc] sm:$0xf0] }
 0x576   : > { %v10463_v45 = vld [vmem:[#allocation15 + $0x2cc] sm:$0xf0] }
 0x577   : > { %5411 = vmatpush.bf16.msra.mxu2 %v9039_v52  ;;  %v9299_v52 = vor.u32 %v10403_v41, %v9298_v39  ;;  %v9346_v39 = vld [vmem:[#allocation15 + $0x140] sm:$0xf] }
 0x578   : > { %5424 = vmatpush.bf16.msra.mxu3 %v9167_v53  ;;  %5387 = vmatpush.bf16.msra.mxu0 %v8751_v59  ;;  %v9282_v53 = vld [vmem:[#allocation15 + $0xc0] sm:$0xf]  ;;  %v10399_v59 = vld [vmem:[#allocation15 + $0xcc] sm:$0xf0] }
 0x579   : > { %5400 = vmatpush.bf16.msra.mxu1 %v8879_v60  ;;  %v9410_v60 = vld [vmem:[#allocation15 + $0x1c0] sm:$0xf]  ;;  %v9283_v35 = vor.u32 %v10399_v59, %v9282_v53  ;;  %v10459_v53 = vld [vmem:[#allocation15 + $0x2ac] sm:$0xf0]  ;;  %v9252_v59 = vld [vmem:[#allocation15 + $0x90] sm:$0xf0] }
 0x57a   : > { %v9411_v6 = vor.u32 %v10431_v61, %v9410_v60  ;;  %v9538_v41 = vld [vmem:[#allocation15 + $0x2c0] sm:$0xf] }
 0x57b   : > { %5412 = vmatpush.bf16.msra.mxu2 %v9023_v38  ;;  %v9554_v38 = vld [vmem:[#allocation15 + $0x2e0] sm:$0xf]  ;;  %v9539_v17 = vor.u32 %v10463_v45, %v9538_v41  ;;  %v10465_v41 = vld [vmem:[#allocation15 + $0x2e4] sm:$0xf] }
 0x57c   : > { %5425 = vmatpush.bf16.msra.mxu3 %v9151_v5  ;;  %5388 = vmatpush.bf16.msra.mxu0 %v8735_v8  ;;  %v10467_v5 = vld [vmem:[#allocation15 + $0x2ec] sm:$0xf0]  ;;  %v8943_v8 = vor.u32 %v10310_v63, %v8940_v0  ;;  %v9314_v61 = vld [vmem:[#allocation15 + $0x100] sm:$0xf] }
 0x57d   : > { %5401 = vmatpush.bf16.msra.mxu1 %v8863_v9  ;;  %v9266_v9 = vld [vmem:[#allocation15 + $0xa0] sm:$0xf]  ;;  %v9555_v14 = vor.u32 %v10467_v5, %v9554_v38  ;;  %v10385_v38 = vld [vmem:[#allocation15 + $0x64] sm:$0xf]  ;;  %v9236_v5 = vld [vmem:[#allocation15 + $0x70] sm:$0xf0] }
 0x57e   : > { %v9267_v42 = vor.u32 %v10395_v10, %v9266_v9  ;;  %v9506_v63 = vld [vmem:[#allocation15 + $0x280] sm:$0xf] }
 0x57f   : > { %5413 = vmatpush.bf16.msra.mxu2 %v9007_v16  ;;  %v9250_v16 = vld [vmem:[#allocation15 + $0x80] sm:$0xf]  ;;  %v9507_v4 = vor.u32 %v10455_v24, %v9506_v63  ;;  %v9332_v63 = vld [vmem:[#allocation15 + $0x130] sm:$0xf0] }
 0x580   : > { %5426 = vmatpush.bf16.msra.mxu3 %v9135_v18  ;;  %5389 = vmatpush.bf16.msra.mxu0 %v8719_v23  ;;  %v10391_v18 = vld [vmem:[#allocation15 + $0x8c] sm:$0xf0]  ;;  %v9490_v10 = vld [vmem:[#allocation15 + $0x260] sm:$0xf] }
 0x581   : > { %5402 = vmatpush.bf16.msra.mxu1 %v8847_v46  ;;  %v10423_v23 = vld [vmem:[#allocation15 + $0x18c] sm:$0xf0]  ;;  %v9234_v46 = vld [vmem:[#allocation15 + $0x60] sm:$0xf] }
 0x582   : > { %v9235_v30 = vor.u32 %v10387_v26, %v9234_v46  ;;  %v10377_v46 = vld [vmem:[#allocation15 + $0x24] sm:$0xf]  ;;  %v9204_v26 = vld [vmem:[#allocation15 + $0x30] sm:$0xf0] }
 0x583   : > { %5414 = vmatpush.bf16.msra.mxu2 %v8991_v20  ;;  %v9363_v20 = vor.u32 %v10419_v28, %v9362_v55  ;;  %v9207_v55 = vor.u32 %v10377_v46, %v9204_v26  ;;  %v9396_v28 = vld [vmem:[#allocation15 + $0x1b0] sm:$0xf0] }
 0x584   : > { %5427 = vmatpush.bf16.msra.mxu3 %v9119_v29  ;;  %5390 = vmatpush.bf16.msra.mxu0 %v8703_v33  ;;  %v9219_v29 = vor.u32 %v10383_v58, %v9218_v15  ;;  %v10401_v33 = vld [vmem:[#allocation15 + $0xe4] sm:$0xf]  ;;  %v9458_v15 = vld [vmem:[#allocation15 + $0x220] sm:$0xf]  ;;  %v10443_v58 = vld [vmem:[#allocation15 + $0x22c] sm:$0xf0] }
 0x585   : > { %5403 = vmatpush.bf16.msra.mxu1 %v8831_v49  ;;  %v9300_v49 = vld [vmem:[#allocation15 + $0xf0] sm:$0xf0] }
 0x586   : > { %v9303_v36 = vor.u32 %v10401_v33, %v9300_v49  ;;  %v9442_v33 = vld [vmem:[#allocation15 + $0x200] sm:$0xf]  ;;  %v10439_v49 = vld [vmem:[#allocation15 + $0x20c] sm:$0xf0]  ;;  %v9492_v46 = vld [vmem:[#allocation15 + $0x270] sm:$0xf0] }
 0x587   : > { %5415 = vmatpush.bf16.msra.mxu2 %v8975_v40  ;;  %v10415_v40 = vld [vmem:[#allocation15 + $0x14c] sm:$0xf0] }
 0x588   : > { %5428 = vmatpush.bf16.msra.mxu3 %v9103_v43  ;;  %5391 = vmatpush.bf16.msra.mxu0 %v8687_v48  ;;  %v9347_v44 = vor.u32 %v10415_v40, %v9346_v39  ;;  %v10393_v43 = vld [vmem:[#allocation15 + $0xa4] sm:$0xf] }
 0x589   : > { %5404 = vmatpush.bf16.msra.mxu1 %v8815_v25  ;;  %v9271_v48 = vor.u32 %v10393_v43, %v9268_v47  ;;  %v9330_v25 = vld [vmem:[#allocation15 + $0x120] sm:$0xf]  ;;  %v10495_v47 = vld [vmem:[#allocation15 + $0x3cc] sm:$0xf0] }
 0x58a   : > { %v9666_v43 = vld [vmem:[#allocation15 + $0x3c0] sm:$0xf] }
 0x58b   : > { %5416 = vmatpush.bf16.msra.mxu2 %v8959_v56  ;;  %5392 = vmatmul.bf16.vlgmr.msra.gmra.mxu0 %v11376_v34  ;;  %v9251_v34 = vor.u32 %v10391_v18, %v9250_v16  ;;  %v10389_v56 = vld [vmem:[#allocation15 + $0x84] sm:$0xf]  ;;  %v9412_v18 = vld [vmem:[#allocation15 + $0x1d0] sm:$0xf0] }
 0x58c   : > { %6242 = vmatpush.bf16.msrb.mxu0 %v9299_v52  ;;  %5429 = vmatpush.bf16.msra.mxu3 %v9087_v62  ;;  %v9331_v52 = vor.u32 %v10411_v51, %v9330_v25  ;;  %v9255_v60 = vor.u32 %v10389_v56, %v9252_v59  ;;  %v10407_v62 = vld [vmem:[#allocation15 + $0x10c] sm:$0xf0]  ;;  %v10429_v16 = vld [vmem:[#allocation15 + $0x1c4] sm:$0xf]  ;;  %v9348_v51 = vld [vmem:[#allocation15 + $0x150] sm:$0xf0] }
 0x58d   : > { %6255 = vmatpush.bf16.msrb.mxu1 %v9427_v54  ;;  %v9523_v54 = vor.u32 %v10459_v53, %v9522_v1  ;;  %v9315_v0 = vor.u32 %v10407_v62, %v9314_v61  ;;  %v10413_v25 = vld [vmem:[#allocation15 + $0x144] sm:$0xf]  ;;  %v9650_v59 = vld [vmem:[#allocation15 + $0x3a0] sm:$0xf] }
 0x58e   : > { %5405 = vmatmul.bf16.vlgmr.msra.gmra.mxu1 %v11378_v27  ;;  %v9379_v27 = vor.u32 %v10423_v23, %v9378_v22  ;;  %v9474_v22 = vld [vmem:[#allocation15 + $0x240] sm:$0xf]  ;;  %v10447_v23 = vld [vmem:[#allocation15 + $0x24c] sm:$0xf0]  ;;  %v10461_v53 = vld [vmem:[#allocation15 + $0x2c4] sm:$0xf] }
 0x58f   : > { %5417 = vmatpush.bf16.msra.mxu2 %v8943_v8  ;;  %v9428_v8 = vld [vmem:[#allocation15 + $0x1f0] sm:$0xf0]  ;;  %v10409_v62 = vld [vmem:[#allocation15 + $0x124] sm:$0xf] }
 0x590   : > { %6243 = vmatpush.bf16.msrb.mxu0 %v9283_v35  ;;  %5430 = vmatpush.bf16.msra.mxu3 %v9071_v11  ;;  %v10433_v35 = vld [vmem:[#allocation15 + $0x1e4] sm:$0xf]  ;;  %v10451_v11 = vld [vmem:[#allocation15 + $0x26c] sm:$0xf0]  ;;  %v9335_v24 = vor.u32 %v10409_v62, %v9332_v63 }
 0x591   : > { %6256 = vmatpush.bf16.msrb.mxu1 %v9411_v6  ;;  %v9239_v6 = vor.u32 %v10385_v38, %v9236_v5  ;;  %v9431_v9 = vor.u32 %v10433_v35, %v9428_v8  ;;  %v9491_v12 = vor.u32 %v10451_v11, %v9490_v10  ;;  %v9634_v5 = vld [vmem:[#allocation15 + $0x380] sm:$0xf]  ;;  %v10487_v35 = vld [vmem:[#allocation15 + $0x38c] sm:$0xf0]  ;;  %v9316_v10 = vld [vmem:[#allocation15 + $0x110] sm:$0xf0] }
 0x592   : > { %5418 = vmatmul.bf16.vlgmr.msra.gmra.mxu2 %v11382_v2  ;;  %v10379_v2 = vld [vmem:[#allocation15 + $0x2c] sm:$0xf0]  ;;  %v9635_v8 = vor.u32 %v10487_v35, %v9634_v5  ;;  %v10453_v11 = vld [vmem:[#allocation15 + $0x284] sm:$0xf]  ;;  %v10396_v35 = vld [vmem:[#allocation15 + $0xb4] sm:$0xf0] }
 0x593   : > { %6268 = vmatpush.bf16.msrb.mxu2 %v9555_v14  ;;  %5431 = vmatmul.bf16.vlgmr.msra.gmra.mxu3 %v11384_v7  ;;  %v9203_v3 = vor.u32 %v10379_v2, %v9202_v31  ;;  %v9186_v7 = vld [vmem:[#allocation15] sm:$0xf]  ;;  %v9220_v14 = vld [vmem:[#allocation15 + $0x50] sm:$0xf0]  ;;  %v10421_v2 = vld [vmem:[#allocation15 + $0x184] sm:$0xf] }
 0x594   : > { %6244 = vmatpush.bf16.msrb.mxu0 %v9267_v42  ;;  %v9187_v21 = vor.u32 %v10375_v32, %v9186_v7  ;;  %v9223_v42 = vor.u32 %v10381_v13, %v9220_v14  ;;  %v9188_v31 = vld [vmem:[#allocation15 + $0x10] sm:$0xf0] }
 0x595   : > { %6257 = vmatpush.bf16.msrb.mxu1 %v9395_v19  ;;  %v9415_v19 = vor.u32 %v10429_v16, %v9412_v18  ;;  %v9380_v7 = vld [vmem:[#allocation15 + $0x190] sm:$0xf0]  ;;  %v11400_v16 = vld [vmem:[#allocation3 + $0x2] ss:$8 sm:$0xf] }
 0x596   : > { %v9383_v32 = vor.u32 %v10421_v2, %v9380_v7  ;;  %v9508_v14 = vld [vmem:[#allocation15 + $0x290] sm:$0xf0]  ;;  %v10445_v7 = vld [vmem:[#allocation15 + $0x244] sm:$0xf] }
 0x597   : > { %6269 = vmatpush.bf16.msrb.mxu2 %v9539_v17  ;;  %v9511_v18 = vor.u32 %v10453_v11, %v9508_v14 }
 0x598   : > { %6245 = vmatpush.bf16.msrb.mxu0 %v9251_v34  ;;  %v9475_v34 = vor.u32 %v10447_v23, %v9474_v22  ;;  %v10483_v22 = vld [vmem:[#allocation15 + $0x36c] sm:$0xf0] }
 0x599   : > { %6258 = vmatpush.bf16.msrb.mxu1 %v9379_v27  ;;  %v10425_v27 = vld [vmem:[#allocation15 + $0x1a4] sm:$0xf] }
 0x59b   : > { %6270 = vmatpush.bf16.msrb.mxu2 %v9523_v54  ;;  %v9540_v54 = vld [vmem:[#allocation15 + $0x2d0] sm:$0xf0] }
 0x59c   : > { %6246 = vmatpush.bf16.msrb.mxu0 %v9235_v30  ;;  %v9399_v30 = vor.u32 %v10425_v27, %v9396_v28  ;;  %v9543_v56 = vor.u32 %v10461_v53, %v9540_v54  ;;  %v11402_v27 = vld [vmem:[#allocation3 + $0x3] ss:$8 sm:$0xf] }
 0x59d   : > { %6259 = vmatpush.bf16.msrb.mxu1 %v9363_v20  ;;  %v9459_v20 = vor.u32 %v10443_v58, %v9458_v15  ;;  %v5441_v15 = vperm.slane %v11400_v16, 0  ;;  %v9602_v58 = vld [vmem:[#allocation15 + $0x340] sm:$0xf]  ;;  %v5455_v14 = vperm.slane %v11402_v27, 1 }
 0x59f   : > { %6271 = vmatpush.bf16.msrb.mxu2 %v9507_v4  ;;  %v9524_v4 = vld [vmem:[#allocation15 + $0x2b0] sm:$0xf0] }
 0x5a0   : > { %6247 = vmatpush.bf16.msrb.mxu0 %v9219_v29  ;;  %v10373_v29 = vld [vmem:[#allocation15 + $0x4] sm:$0xf] }
 0x5a1   : > { %6260 = vmatpush.bf16.msrb.mxu1 %v9347_v44  ;;  %v9556_v44 = vld [vmem:[#allocation15 + $0x2f0] sm:$0xf0] }
 0x5a2   : > { %v9559_v45 = vor.u32 %v10465_v41, %v9556_v44  ;;  %v10441_v41 = vld [vmem:[#allocation15 + $0x224] sm:$0xf]  ;;  %v9460_v44 = vld [vmem:[#allocation15 + $0x230] sm:$0xf0] }
 0x5a3   : > { %6272 = vmatpush.bf16.msrb.mxu2 %v9491_v12 }
 0x5a4   : > { %6248 = vmatpush.bf16.msrb.mxu0 %v9203_v3  ;;  %v9191_v3 = vor.u32 %v10373_v29, %v9188_v31  ;;  %v5454_v31 = vperm.slane %v11402_v27, 0 }
 0x5a5   : > { %6261 = vmatpush.bf16.msrb.mxu1 %v9331_v52  ;;  %v9351_v52 = vor.u32 %v10413_v25, %v9348_v51  ;;  %v10400_v51 = vld [vmem:[#allocation15 + $0xd4] sm:$0xf0] }
 0x5a7   : > { %6273 = vmatpush.bf16.msrb.mxu2 %v9475_v34  ;;  %v10449_v34 = vld [vmem:[#allocation15 + $0x264] sm:$0xf] }
 0x5a8   : > { %6249 = vmatpush.bf16.msrb.mxu0 %v9187_v21  ;;  %v9682_v21 = vld [vmem:[#allocation15 + $0x3e0] sm:$0xf] }
 0x5a9   : > { %6262 = vmatpush.bf16.msrb.mxu1 %v9315_v0  ;;  %v9683_v39 = vor.u32 %v10499_v50, %v9682_v21  ;;  %v10457_v0 = vld [vmem:[#allocation15 + $0x2a4] sm:$0xf]  ;;  %v9586_v50 = vld [vmem:[#allocation15 + $0x320] sm:$0xf] }
 0x5aa   : > { %v9527_v38 = vor.u32 %v10457_v0, %v9524_v4  ;;  %v9684_v0 = vld [vmem:[#allocation15 + $0x3f0] sm:$0xf0] }
 0x5ab   : > { %6274 = vmatpush.bf16.msrb.mxu2 %v9459_v20  ;;  %6281 = vmatpush.bf16.msrb.mxu3 %v9683_v39  ;;  %v10479_v20 = vld [vmem:[#allocation15 + $0x34c] sm:$0xf0]  ;;  %v10404_v39 = vld [vmem:[#allocation15 + $0xf4] sm:$0xf0] }
 0x5ac   : > { %6294 = vmatpush.bf16.msra.mxu0 %v9303_v36  ;;  %v9443_v36 = vor.u32 %v10439_v49, %v9442_v33 }
 0x5ad   : > { %6307 = vmatpush.bf16.msra.mxu1 %v9431_v9  ;;  %v10405_v9 = vld [vmem:[#allocation15 + $0x104] sm:$0xf] }
 0x5ae   : > { %v9319_v13 = vor.u32 %v10405_v9, %v9316_v10 }
 0x5af   : > { %6275 = vmatpush.bf16.msrb.mxu2 %v9443_v36  ;;  %v9306_v36 = vld [vmem:[#allocation15 + $0xe8] sm:$0xf] }
 0x5b0   : > { %6295 = vmatpush.bf16.msra.mxu0 %v9287_v57  ;;  %v9364_v57 = vld [vmem:[#allocation15 + $0x170] sm:$0xf0]  ;;  %v9307_v25 = vor.u32 %v10404_v39, %v9306_v36 }
 0x5b1   : > { %6308 = vmatpush.bf16.msra.mxu1 %v9415_v19  ;;  %v9367_v40 = vor.u32 %v10417_v37, %v9364_v57  ;;  %v9618_v19 = vld [vmem:[#allocation15 + $0x360] sm:$0xf]  ;;  %v10475_v37 = vld [vmem:[#allocation15 + $0x32c] sm:$0xf0] }
 0x5b2   : > { %v9619_v23 = vor.u32 %v10483_v22, %v9618_v19  ;;  %v10392_v22 = vld [vmem:[#allocation15 + $0x94] sm:$0xf0] }
 0x5b3   : > { %6320 = vmatpush.bf16.msra.mxu2 %v9559_v45 }
 0x5b4   : > { %6296 = vmatpush.bf16.msra.mxu0 %v9271_v48  ;;  %v9667_v48 = vor.u32 %v10495_v47, %v9666_v43  ;;  %v9463_v43 = vor.u32 %v10441_v41, %v9460_v44  ;;  %v10481_v41 = vld [vmem:[#allocation15 + $0x364] sm:$0xf]  ;;  %v9620_v44 = vld [vmem:[#allocation15 + $0x370] sm:$0xf0] }
 0x5b5   : > { %6309 = vmatpush.bf16.msra.mxu1 %v9399_v30 }
 0x5b6   : > { %6282 = vmatpush.bf16.msrb.mxu3 %v9667_v48  ;;  %v9290_v48 = vld [vmem:[#allocation15 + $0xc8] sm:$0xf] }
 0x5b7   : > { %6321 = vmatpush.bf16.msra.mxu2 %v9543_v56  ;;  %v9291_v4 = vor.u32 %v10400_v51, %v9290_v48  ;;  %v10380_v51 = vld [vmem:[#allocation15 + $0x34] sm:$0xf0] }
 0x5b8   : > { %6297 = vmatpush.bf16.msra.mxu0 %v9255_v60  ;;  %v10491_v60 = vld [vmem:[#allocation15 + $0x3ac] sm:$0xf0] }
 0x5b9   : > { %6310 = vmatpush.bf16.msra.mxu1 %v9383_v32  ;;  %v9651_v61 = vor.u32 %v10491_v60, %v9650_v59  ;;  %v9476_v32 = vld [vmem:[#allocation15 + $0x250] sm:$0xf0]  ;;  %v10437_v59 = vld [vmem:[#allocation15 + $0x204] sm:$0xf] }
 0x5ba   : > { %v9479_v49 = vor.u32 %v10445_v7, %v9476_v32  ;;  %v9444_v60 = vld [vmem:[#allocation15 + $0x210] sm:$0xf0] }
 0x5bb   : > { %6283 = vmatpush.bf16.msrb.mxu3 %v9651_v61  ;;  %6322 = vmatpush.bf16.msra.mxu2 %v9527_v38  ;;  %v10497_v61 = vld [vmem:[#allocation15 + $0x3e4] sm:$0xf]  ;;  %v9447_v63 = vor.u32 %v10437_v59, %v9444_v60  ;;  %v9274_v38 = vld [vmem:[#allocation15 + $0xa8] sm:$0xf] }
 0x5bc   : > { %6298 = vmatpush.bf16.msra.mxu0 %v9239_v6 }
 0x5bd   : > { %6311 = vmatpush.bf16.msra.mxu1 %v9367_v40  ;;  %v9587_v40 = vor.u32 %v10475_v37, %v9586_v50  ;;  %v9226_v50 = vld [vmem:[#allocation15 + $0x48] sm:$0xf]  ;;  %v10384_v37 = vld [vmem:[#allocation15 + $0x54] sm:$0xf0] }
 0x5bf   : > { %6284 = vmatpush.bf16.msrb.mxu3 %v9635_v8  ;;  %6323 = vmatpush.bf16.msra.mxu2 %v9511_v18  ;;  %v9668_v8 = vld [vmem:[#allocation15 + $0x3d0] sm:$0xf0]  ;;  %v9258_v18 = vld [vmem:[#allocation15 + $0x88] sm:$0xf] }
 0x5c0   : > { %6299 = vmatpush.bf16.msra.mxu0 %v9223_v42 }
 0x5c1   : > { %6312 = vmatpush.bf16.msra.mxu1 %v9351_v52  ;;  %v10471_v52 = vld [vmem:[#allocation15 + $0x30c] sm:$0xf0] }
 0x5c3   : > { %6285 = vmatpush.bf16.msrb.mxu3 %v9619_v23  ;;  %v10489_v23 = vld [vmem:[#allocation15 + $0x3a4] sm:$0xf] }
 0x5c4   : > { %6300 = vmatpush.bf16.msra.mxu0 %v9207_v55  ;;  %v9495_v55 = vor.u32 %v10449_v34, %v9492_v46  ;;  %v9652_v34 = vld [vmem:[#allocation15 + $0x3b0] sm:$0xf0] }
 0x5c5   : > { %6313 = vmatpush.bf16.msra.mxu1 %v9335_v24  ;;  %v9687_v24 = vor.u32 %v10497_v61, %v9684_v0 }
 0x5c6   : > { %6324 = vmatpush.bf16.msra.mxu2 %v9495_v55 }
 0x5c7   : > { %v5237_v17 = vpop.f32.mrf.mxu0 }
 0x5c8   : > { %6301 = vmatpush.bf16.msra.mxu0 %v9191_v3  ;;  %v5250_v1 = vpop.f32.mrf.mxu1  ;;  %v9603_v3 = vor.u32 %v10479_v20, %v9602_v58  ;;  %v10388_v58 = vld [vmem:[#allocation15 + $0x74] sm:$0xf0]  ;;  %v9434_v20 = vld [vmem:[#allocation15 + $0x1e8] sm:$0xf] }
 0x5c9   : > { %v5251_v42 = vadd.f32 %v5250_v1, %v5237_v17  ;;  %6314 = vmatpush.bf16.msra.mxu1 %v9319_v13  ;;  %v9570_v1 = vld [vmem:[#allocation15 + $0x300] sm:$0xf]  ;;  %v5442_v13 = vperm.slane %v11400_v16, 1 }
 0x5ca   : > { %6286 = vmatpush.bf16.msrb.mxu3 %v9603_v3  ;;  %6325 = vmatpush.bf16.msra.mxu2 %v9479_v49  ;;  %v9571_v56 = vor.u32 %v10471_v52, %v9570_v1  ;;  %v9636_v3 = vld [vmem:[#allocation15 + $0x390] sm:$0xf0]  ;;  %v9402_v1 = vld [vmem:[#allocation15 + $0x1a8] sm:$0xf]  ;;  %v10428_v52 = vld [vmem:[#allocation15 + $0x1b4] sm:$0xf0] }
 0x5ce   : > { %6287 = vmatpush.bf16.msrb.mxu3 %v9587_v40  ;;  %6326 = vmatpush.bf16.msra.mxu2 %v9463_v43  ;;  %v10432_v40 = vld [vmem:[#allocation15 + $0x1d4] sm:$0xf0]  ;;  %v9623_v43 = vor.u32 %v10481_v41, %v9620_v44 }
 0x5cf   : > { %v5239_v6 = vpop.f32.mrf.mxu0 }
 0x5d0   : > { %v5252_v12 = vpop.f32.mrf.mxu1  ;;  %v10493_v6 = vld [vmem:[#allocation15 + $0x3c4] sm:$0xf] }
 0x5d1   : > { %v9671_v10 = vor.u32 %v10493_v6, %v9668_v8  ;;  %v10424_v6 = vld [vmem:[#allocation15 + $0x194] sm:$0xf0]  ;;  %v10473_v8 = vld [vmem:[#allocation15 + $0x324] sm:$0xf] }
 0x5d2   : > { %6288 = vmatpush.bf16.msrb.mxu3 %v9571_v56  ;;  %6327 = vmatpush.bf16.msra.mxu2 %v9447_v63  ;;  %v9604_v56 = vld [vmem:[#allocation15 + $0x350] sm:$0xf0]  ;;  %v5443_v63 = vperm.slane %v11400_v16, 2 }
 0x5d5   : > { %v5263_v26 = vpop.f32.mrf.mxu2 }
 0x5d6   : > { %v5264_v28 = vadd.f32 %v5263_v26, %v5251_v42  ;;  %v5276_v30 = vpop.f32.mrf.mxu3  ;;  %6333 = vmatpush.bf16.msra.mxu3 %v9687_v24  ;;  %v9275_v42 = vor.u32 %v10396_v35, %v9274_v38  ;;  %v9655_v26 = vor.u32 %v10489_v23, %v9652_v34  ;;  %v9194_v38 = vld [vmem:[#allocation15 + $0x8] sm:$0xf]  ;;  %v10420_v23 = vld [vmem:[#allocation15 + $0x174] sm:$0xf0] }
 0x5d7   : > { %v5289_v2 = vpop.f32.mrf.mxu0  ;;  %v9386_v35 = vld [vmem:[#allocation15 + $0x188] sm:$0xf] }
 0x5d8   : > { %v5277_v29 = vadd.f32 %v5276_v30, %v5264_v28  ;;  %v5302_v33 = vpop.f32.mrf.mxu1  ;;  %v9259_v30 = vor.u32 %v10392_v22, %v9258_v18  ;;  %v9370_v22 = vld [vmem:[#allocation15 + $0x168] sm:$0xf] }
 0x5d9   : > { %v5303_v5 = vadd.f32 %v5302_v33, %v5289_v2  ;;  %v10485_v2 = vld [vmem:[#allocation15 + $0x384] sm:$0xf] }
 0x5da   : > { %v5449_v21 = vmul.f32 %v5441_v15, %v5277_v29  ;;  %6334 = vmatpush.bf16.msra.mxu3 %v9671_v10  ;;  %v9242_v15 = vld [vmem:[#allocation15 + $0x68] sm:$0xf]  ;;  %v9639_v32 = vor.u32 %v10485_v2, %v9636_v3  ;;  %v9371_v3 = vor.u32 %v10420_v23, %v9370_v22 }
 0x5db   : > { %v9482_v22 = vld [vmem:[#allocation15 + $0x248] sm:$0xf] }
 0x5dc   : > { %v5462_v57 = vadd.f32 %v5454_v31, %v5449_v21  ;;  %v10436_v31 = vld [vmem:[#allocation15 + $0x1f4] sm:$0xf0]  ;;  %v9243_v21 = vor.u32 %v10388_v58, %v9242_v15  ;;  %v10398_v15 = vld [vmem:[#allocation15 + $0xcc] sm:$0xf]  ;;  %v9292_v58 = vld [vmem:[#allocation15 + $0xd8] sm:$0xf0] }
 0x5dd   : > { %v5265_v45 = vpop.f32.mrf.mxu2  ;;  %v9435_v36 = vor.u32 %v10436_v31, %v9434_v20 }
 0x5de   : > { %v5466_v47 = vmax.f32 %v5462_v57, 0.0  ;;  %v5278_v17 = vpop.f32.mrf.mxu3  ;;  %6335 = vmatpush.bf16.msra.mxu3 %v9655_v26  ;;  %v9418_v57 = vld [vmem:[#allocation15 + $0x1c8] sm:$0xf]  ;;  %v10469_v26 = vld [vmem:[#allocation15 + $0x304] sm:$0xf] }
 0x5df   : > { %v5291_v54 = vpop.f32.mrf.mxu0  ;;  %v9227_v17 = vor.u32 %v10384_v37, %v9226_v50  ;;  %v9419_v48 = vor.u32 %v10432_v40, %v9418_v57  ;;  %v10464_v50 = vld [vmem:[#allocation15 + $0x2d4] sm:$0xf0]  ;;  %v10394_v37 = vld [vmem:[#allocation15 + $0xac] sm:$0xf]  ;;  %v9276_v57 = vld [vmem:[#allocation15 + $0xb8] sm:$0xf0] }
 0x5e0   : > { %v11406_v53 = vpack.c.bf16 %v5466_v47, %v5466_v47  ;;  %v5304_v62 = vpop.f32.mrf.mxu1  ;;  %v10477_v54 = vld [vmem:[#allocation15 + $0x344] sm:$0xf]  ;;  %v9279_v44 = vor.u32 %v10394_v37, %v9276_v57  ;;  %v10422_v37 = vld [vmem:[#allocation15 + $0x18c] sm:$0xf]  ;;  %v9388_v57 = vld [vmem:[#allocation15 + $0x198] sm:$0xf0] }
 0x5e1   : > { %v9607_v60 = vor.u32 %v10477_v54, %v9604_v56 }
 0x5e2   : > { %6250 = vmatmul.bf16.vlgmr.msrb.gmra.mxu0 %v11406_v53  ;;  %6336 = vmatpush.bf16.msra.mxu3 %v9639_v32  ;;  %v9295_v32 = vor.u32 %v10398_v15, %v9292_v58  ;;  %v9404_v15 = vld [vmem:[#allocation15 + $0x1b8] sm:$0xf0] }
 0x5e3   : > { %6346 = vmatpush.bf16.msrb.mxu0 %v9307_v25  ;;  %v9210_v25 = vld [vmem:[#allocation15 + $0x28] sm:$0xf] }
 0x5e4   : > { %v9211_v24 = vor.u32 %v10380_v51, %v9210_v25  ;;  %v9260_v25 = vld [vmem:[#allocation15 + $0x98] sm:$0xf0] }
 0x5e5   : > { %v5315_v9 = vpop.f32.mrf.mxu2 }
 0x5e6   : > { %v5316_v11 = vadd.f32 %v5315_v9, %v5303_v5  ;;  %v5328_v12 = vpop.f32.mrf.mxu3  ;;  %6337 = vmatpush.bf16.msra.mxu3 %v9623_v43  ;;  %v10376_v5 = vld [vmem:[#allocation15 + $0x14] sm:$0xf0]  ;;  %v9588_v9 = vld [vmem:[#allocation15 + $0x330] sm:$0xf0] }
 0x5e7   : > { %6347 = vmatpush.bf16.msrb.mxu0 %v9291_v4  ;;  %v9403_v4 = vor.u32 %v10428_v52, %v9402_v1  ;;  %v9195_v18 = vor.u32 %v10376_v5, %v9194_v38  ;;  %v10412_v43 = vld [vmem:[#allocation15 + $0x134] sm:$0xf0] }
 0x5e8   : > { %v5329_v19 = vadd.f32 %v5328_v12, %v5316_v11  ;;  %v5341_v46 = vpop.f32.mrf.mxu0  ;;  %v5456_v11 = vperm.slane %v11402_v27, 2  ;;  %v10402_v12 = vld [vmem:[#allocation15 + $0xec] sm:$0xf] }
 0x5ea   : > { %v5450_v55 = vmul.f32 %v5442_v13, %v5329_v19  ;;  %6338 = vmatpush.bf16.msra.mxu3 %v9607_v60  ;;  %v9308_v13 = vld [vmem:[#allocation15 + $0xf8] sm:$0xf0]  ;;  %v9387_v19 = vor.u32 %v10424_v6, %v9386_v35  ;;  %v10408_v60 = vld [vmem:[#allocation15 + $0x114] sm:$0xf0]  ;;  %v9498_v6 = vld [vmem:[#allocation15 + $0x268] sm:$0xf] }
 0x5eb   : > { %v5354_v28 = vpop.f32.mrf.mxu1  ;;  %6348 = vmatpush.bf16.msrb.mxu0 %v9275_v42  ;;  %v9311_v34 = vor.u32 %v10402_v12, %v9308_v13  ;;  %v10430_v13 = vld [vmem:[#allocation15 + $0x1cc] sm:$0xf] }
 0x5ec   : > { %v5463_v29 = vadd.f32 %v5455_v14, %v5450_v55  ;;  %v5355_v59 = vadd.f32 %v5354_v28, %v5341_v46  ;;  %v9591_v14 = vor.u32 %v10473_v8, %v9588_v9  ;;  %v9562_v46 = vld [vmem:[#allocation15 + $0x2e8] sm:$0xf]  ;;  %v9572_v55 = vld [vmem:[#allocation15 + $0x310] sm:$0xf0]  ;;  %v10452_v9 = vld [vmem:[#allocation15 + $0x274] sm:$0xf0] }
 0x5ed   : > { %v5317_v7 = vpop.f32.mrf.mxu2  ;;  %v9575_v20 = vor.u32 %v10469_v26, %v9572_v55  ;;  %v10378_v26 = vld [vmem:[#allocation15 + $0x2c] sm:$0xf]  ;;  %v9212_v55 = vld [vmem:[#allocation15 + $0x38] sm:$0xf0] }
 0x5ee   : > { %v5467_v33 = vmax.f32 %v5463_v29, 0.0  ;;  %v5330_v49 = vpop.f32.mrf.mxu3  ;;  %6339 = vmatpush.bf16.msra.mxu3 %v9591_v14  ;;  %v9420_v14 = vld [vmem:[#allocation15 + $0x1d8] sm:$0xf0] }
 0x5ef   : > { %6349 = vmatpush.bf16.msrb.mxu0 %v9259_v30  ;;  %v10468_v30 = vld [vmem:[#allocation15 + $0x2f4] sm:$0xf0] }
 0x5f0   : > { %v11411_v39 = vpack.c.bf16 %v5467_v33, %v5467_v33  ;;  %v5343_v45 = vpop.f32.mrf.mxu0  ;;  %v9563_v7 = vor.u32 %v10468_v30, %v9562_v46  ;;  %v9354_v33 = vld [vmem:[#allocation15 + $0x148] sm:$0xf]  ;;  %v10416_v49 = vld [vmem:[#allocation15 + $0x154] sm:$0xf0]  ;;  %v10426_v30 = vld [vmem:[#allocation15 + $0x1ac] sm:$0xf] }
 0x5f1   : > { %v9355_v40 = vor.u32 %v10416_v49, %v9354_v33  ;;  %v9338_v45 = vld [vmem:[#allocation15 + $0x128] sm:$0xf]  ;;  %v10448_v46 = vld [vmem:[#allocation15 + $0x254] sm:$0xf0]  ;;  %v9407_v33 = vor.u32 %v10426_v30, %v9404_v15 }
 0x5f2   : > { %6263 = vmatmul.bf16.vlgmr.msrb.gmra.mxu1 %v11411_v39  ;;  %6302 = vmatmul.bf16.vlgmr.msra.gmra.mxu0 %v11406_v53  ;;  %v9339_v52 = vor.u32 %v10412_v43, %v9338_v45  ;;  %v10444_v49 = vld [vmem:[#allocation15 + $0x234] sm:$0xf0]  ;;  %v9391_v43 = vor.u32 %v10422_v37, %v9388_v57  ;;  %v9594_v37 = vld [vmem:[#allocation15 + $0x328] sm:$0xf] }
 0x5f3   : > { %v5356_v47 = vpop.f32.mrf.mxu1  ;;  %6350 = vmatpush.bf16.msrb.mxu0 %v9243_v21  ;;  %6359 = vmatpush.bf16.msrb.mxu1 %v9435_v36  ;;  %v9546_v21 = vld [vmem:[#allocation15 + $0x2c8] sm:$0xf]  ;;  %v10476_v57 = vld [vmem:[#allocation15 + $0x334] sm:$0xf0] }
 0x5f4   : > { %6340 = vmatpush.bf16.msra.mxu3 %v9575_v20  ;;  %v9547_v41 = vor.u32 %v10464_v50, %v9546_v21  ;;  %v9530_v47 = vld [vmem:[#allocation15 + $0x2a8] sm:$0xf]  ;;  %v10374_v21 = vld [vmem:[#allocation15 + $0xc] sm:$0xf]  ;;  %v9196_v50 = vld [vmem:[#allocation15 + $0x18] sm:$0xf0] }
 0x5f5   : > { %v5367_v61 = vpop.f32.mrf.mxu2 }
 0x5f6   : > { %v5380_v62 = vpop.f32.mrf.mxu3  ;;  %v5368_v0 = vadd.f32 %v5367_v61, %v5355_v59  ;;  %v9322_v59 = vld [vmem:[#allocation15 + $0x108] sm:$0xf] }
 0x5f7   : > { %6351 = vmatpush.bf16.msrb.mxu0 %v9227_v17  ;;  %6360 = vmatpush.bf16.msrb.mxu1 %v9419_v48  ;;  %v10460_v17 = vld [vmem:[#allocation15 + $0x2b4] sm:$0xf0]  ;;  %v10390_v48 = vld [vmem:[#allocation15 + $0x8c] sm:$0xf]  ;;  %v9514_v61 = vld [vmem:[#allocation15 + $0x288] sm:$0xf]  ;;  %v9323_v38 = vor.u32 %v10408_v60, %v9322_v59 }
 0x5f8   : > { %v5381_v10 = vadd.f32 %v5380_v62, %v5368_v0  ;;  %v9531_v54 = vor.u32 %v10460_v17, %v9530_v47  ;;  %v9263_v56 = vor.u32 %v10390_v48, %v9260_v25  ;;  %v10456_v62 = vld [vmem:[#allocation15 + $0x294] sm:$0xf0]  ;;  %v9244_v0 = vld [vmem:[#allocation15 + $0x78] sm:$0xf0]  ;;  %v9690_v47 = vld [vmem:[#allocation15 + $0x3e8] sm:$0xf] }
 0x5f9   : > { %v9515_v5 = vor.u32 %v10456_v62, %v9514_v61  ;;  %v10500_v17 = vld [vmem:[#allocation15 + $0x3f4] sm:$0xf0]  ;;  %v10418_v48 = vld [vmem:[#allocation15 + $0x16c] sm:$0xf] }
 0x5fa   : > { %v5451_v42 = vmul.f32 %v5443_v63, %v5381_v10  ;;  %v10386_v63 = vld [vmem:[#allocation15 + $0x6c] sm:$0xf]  ;;  %v9691_v60 = vor.u32 %v10500_v17, %v9690_v47  ;;  %v9452_v47 = vld [vmem:[#allocation15 + $0x218] sm:$0xf0] }
 0x5fb   : > { %6352 = vmatpush.bf16.msrb.mxu0 %v9211_v24  ;;  %6361 = vmatpush.bf16.msrb.mxu1 %v9403_v4  ;;  %v10434_v24 = vld [vmem:[#allocation15 + $0x1ec] sm:$0xf]  ;;  %v9436_v4 = vld [vmem:[#allocation15 + $0x1f8] sm:$0xf0]  ;;  %v9247_v35 = vor.u32 %v10386_v63, %v9244_v0  ;;  %v9674_v0 = vld [vmem:[#allocation15 + $0x3c8] sm:$0xf] }
 0x5fc   : > { %v5464_v28 = vadd.f32 %v5456_v11, %v5451_v42  ;;  %v9439_v8 = vor.u32 %v10434_v24, %v9436_v4  ;;  %v10382_v10 = vld [vmem:[#allocation15 + $0x4c] sm:$0xf]  ;;  %v9228_v11 = vld [vmem:[#allocation15 + $0x58] sm:$0xf0]  ;;  %v10496_v24 = vld [vmem:[#allocation15 + $0x3d4] sm:$0xf0] }
 0x5fd   : > { %v5369_v29 = vpop.f32.mrf.mxu2  ;;  %v10414_v4 = vld [vmem:[#allocation15 + $0x14c] sm:$0xf] }
 0x5fe   : > { %v5382_v31 = vpop.f32.mrf.mxu3  ;;  %v5468_v2 = vmax.f32 %v5464_v28, 0.0  ;;  %v5444_v29 = vperm.slane %v11400_v16, 3  ;;  %v10498_v17 = vld [vmem:[#allocation15 + $0x3ec] sm:$0xf] }
 0x5ff   : > { %6353 = vmatpush.bf16.msrb.mxu0 %v9195_v18  ;;  %6362 = vmatpush.bf16.msrb.mxu1 %v9387_v19  ;;  %v9499_v18 = vor.u32 %v10452_v9, %v9498_v6  ;;  %v9231_v19 = vor.u32 %v10382_v10, %v9228_v11  ;;  %v5457_v31 = vperm.slane %v11402_v27, 3  ;;  %v10440_v27 = vld [vmem:[#allocation15 + $0x214] sm:$0xf0]  ;;  %v9675_v6 = vor.u32 %v10496_v24, %v9674_v0  ;;  %v9658_v10 = vld [vmem:[#allocation15 + $0x3a8] sm:$0xf] }
 0x600   : > { %v11417_v36 = vpack.c.bf16 %v5468_v2, %v5468_v2  ;;  %v9483_v2 = vor.u32 %v10448_v46, %v9482_v22  ;;  %v10492_v11 = vld [vmem:[#allocation15 + $0x3b4] sm:$0xf0]  ;;  %v9642_v22 = vld [vmem:[#allocation15 + $0x388] sm:$0xf]  ;;  %v9324_v46 = vld [vmem:[#allocation15 + $0x118] sm:$0xf0] }
 0x601   : > { %v10482_v24 = vld [vmem:[#allocation15 + $0x36c] sm:$0xf] }
 0x602   : > { %6315 = vmatmul.bf16.vlgmr.msra.gmra.mxu1 %v11411_v39  ;;  %6354 = vmatmul.bf16.vlgmr.msrb.gmra.mxu0 %v11406_v53 }
 0x603   : > { %6398 = vmatpush.bf16.msra.mxu0 %v9311_v34  ;;  %6276 = vmatmul.bf16.vlgmr.msrb.gmra.mxu2 %v11417_v36  ;;  %v9423_v34 = vor.u32 %v10430_v13, %v9420_v14  ;;  %v9340_v13 = vld [vmem:[#allocation15 + $0x138] sm:$0xf0]  ;;  %v10458_v14 = vld [vmem:[#allocation15 + $0x2ac] sm:$0xf] }
 0x604   : > { %6363 = vmatpush.bf16.msrb.mxu1 %v9371_v3  ;;  %6372 = vmatpush.bf16.msrb.mxu2 %v9563_v7  ;;  %v9215_v3 = vor.u32 %v10378_v26, %v9212_v55  ;;  %v9466_v7 = vld [vmem:[#allocation15 + $0x228] sm:$0xf]  ;;  %v10454_v26 = vld [vmem:[#allocation15 + $0x28c] sm:$0xf]  ;;  %v9516_v55 = vld [vmem:[#allocation15 + $0x298] sm:$0xf0] }
 0x605   : > { %v9467_v16 = vor.u32 %v10444_v49, %v9466_v7  ;;  %v9519_v15 = vor.u32 %v10454_v26, %v9516_v55  ;;  %v9610_v7 = vld [vmem:[#allocation15 + $0x348] sm:$0xf]  ;;  %v9484_v49 = vld [vmem:[#allocation15 + $0x258] sm:$0xf0] }
 0x606   : > { %v10508_v55 = vld [vmem:[#allocation18 + $0x38] sm:$0xff] }
 0x607   : > { %6399 = vmatpush.bf16.msra.mxu0 %v9295_v32 }
 0x608   : > { %v5393_v51 = vpop.f32.mrf.mxu0  ;;  %6364 = vmatpush.bf16.msrb.mxu1 %v9355_v40  ;;  %6373 = vmatpush.bf16.msrb.mxu2 %v9547_v41  ;;  %v9199_v41 = vor.u32 %v10374_v21, %v9196_v50 }
 0x60b   : > { %v5406_v1 = vpop.f32.mrf.mxu1  ;;  %6400 = vmatpush.bf16.msra.mxu0 %v9279_v44  ;;  %v9450_v44 = vld [vmem:[#allocation15 + $0x208] sm:$0xf] }
 0x60c   : > { %6365 = vmatpush.bf16.msrb.mxu1 %v9339_v52  ;;  %6374 = vmatpush.bf16.msrb.mxu2 %v9531_v54  ;;  %v5407_v23 = vadd.f32 %v5406_v1, %v5393_v51  ;;  %v9372_v51 = vld [vmem:[#allocation15 + $0x178] sm:$0xf0]  ;;  %v10466_v1 = vld [vmem:[#allocation15 + $0x2ec] sm:$0xf]  ;;  %v9451_v59 = vor.u32 %v10440_v27, %v9450_v44  ;;  %v9578_v27 = vld [vmem:[#allocation15 + $0x308] sm:$0xf] }
 0x60d   : > { %v9564_v52 = vld [vmem:[#allocation15 + $0x2f8] sm:$0xf0]  ;;  %v9375_v62 = vor.u32 %v10418_v48, %v9372_v51 }
 0x60e   : > { %v9567_v63 = vor.u32 %v10466_v1, %v9564_v52  ;;  %v9692_v48 = vld [vmem:[#allocation15 + $0x3f8] sm:$0xf0]  ;;  %v10494_v1 = vld [vmem:[#allocation15 + $0x3cc] sm:$0xf] }
 0x60f   : > { %6401 = vmatpush.bf16.msra.mxu0 %v9263_v56  ;;  %v9695_v51 = vor.u32 %v10498_v17, %v9692_v48  ;;  %v9676_v52 = vld [vmem:[#allocation15 + $0x3d8] sm:$0xf0]  ;;  %v10514_v17 = vld [vmem:[#allocation18 + $0x68] sm:$0xff] }
 0x610   : > { %v5395_v12 = vpop.f32.mrf.mxu0  ;;  %6366 = vmatpush.bf16.msrb.mxu1 %v9323_v38  ;;  %6375 = vmatpush.bf16.msrb.mxu2 %v9515_v5  ;;  %v9356_v38 = vld [vmem:[#allocation15 + $0x158] sm:$0xf0]  ;;  %v10462_v5 = vld [vmem:[#allocation15 + $0x2cc] sm:$0xf] }
 0x611   : > { %v10410_v12 = vld [vmem:[#allocation15 + $0x12c] sm:$0xf] }
 0x613   : > { %v5408_v42 = vpop.f32.mrf.mxu1  ;;  %6402 = vmatpush.bf16.msra.mxu0 %v9247_v35  ;;  %6367 = vmatmul.bf16.vlgmr.msrb.gmra.mxu1 %v11411_v39  ;;  %v9548_v35 = vld [vmem:[#allocation15 + $0x2d8] sm:$0xf0] }
 0x614   : > { %6411 = vmatpush.bf16.msra.mxu1 %v9439_v8  ;;  %6328 = vmatmul.bf16.vlgmr.msra.gmra.mxu2 %v11417_v36  ;;  %v9359_v8 = vor.u32 %v10414_v4, %v9356_v38  ;;  %v9551_v9 = vor.u32 %v10462_v5, %v9548_v35  ;;  %v9532_v42 = vld [vmem:[#allocation15 + $0x2b8] sm:$0xf0]  ;;  %v10478_v5 = vld [vmem:[#allocation15 + $0x34c] sm:$0xf] }
 0x615   : > { %v5419_v28 = vpop.f32.mrf.mxu2  ;;  %6376 = vmatpush.bf16.msrb.mxu2 %v9499_v18  ;;  %v9659_v18 = vor.u32 %v10492_v11, %v9658_v10  ;;  %v9628_v4 = vld [vmem:[#allocation15 + $0x378] sm:$0xf0]  ;;  %v10470_v11 = vld [vmem:[#allocation15 + $0x30c] sm:$0xf] }
 0x616   : > { %v5420_v58 = vadd.f32 %v5419_v28, %v5407_v23  ;;  %v5432_v20 = vpop.f32.mrf.mxu3  ;;  %v10488_v23 = vld [vmem:[#allocation15 + $0x394] sm:$0xf0]  ;;  %v9631_v38 = vor.u32 %v10482_v24, %v9628_v4  ;;  %v9612_v35 = vld [vmem:[#allocation15 + $0x358] sm:$0xf0] }
 0x617   : > { %6403 = vmatpush.bf16.msra.mxu0 %v9231_v19  ;;  %v9535_v19 = vor.u32 %v10458_v14, %v9532_v42  ;;  %v9643_v28 = vor.u32 %v10488_v23, %v9642_v22  ;;  %v4288_v42 = vld [vmem:[#allocation2 + $0x5] ss:$8 sm:$0xf] }
 0x618   : > { %v5433_v32 = vadd.f32 %v5432_v20, %v5420_v58  ;;  %6412 = vmatpush.bf16.msra.mxu1 %v9423_v34  ;;  %v10406_v34 = vld [vmem:[#allocation15 + $0x10c] sm:$0xf]  ;;  %v9626_v58 = vld [vmem:[#allocation15 + $0x368] sm:$0xf]  ;;  %v10484_v20 = vld [vmem:[#allocation15 + $0x374] sm:$0xf0] }
 0x619   : > { %6377 = vmatpush.bf16.msrb.mxu2 %v9483_v2  ;;  %v9327_v30 = vor.u32 %v10406_v34, %v9324_v46  ;;  %v9627_v2 = vor.u32 %v10484_v20, %v9626_v58  ;;  %v10507_v58 = vld [vmem:[#allocation18 + $0x30] sm:$0xff] }
 0x61a   : > { %v5452_v40 = vmul.f32 %v5444_v29, %v5433_v32  ;;  %v10450_v29 = vld [vmem:[#allocation15 + $0x26c] sm:$0xf]  ;;  %v10480_v32 = vld [vmem:[#allocation15 + $0x354] sm:$0xf0] }
 0x61b   : > { %6404 = vmatpush.bf16.msra.mxu0 %v9215_v3  ;;  %v9611_v21 = vor.u32 %v10480_v32, %v9610_v7  ;;  %v10505_v32 = vld [vmem:[#allocation18 + $0x20] sm:$0xff] }
 0x61c   : > { %v5465_v45 = vadd.f32 %v5457_v31, %v5452_v40  ;;  %6413 = vmatpush.bf16.msra.mxu1 %v9407_v33  ;;  %v9500_v31 = vld [vmem:[#allocation15 + $0x278] sm:$0xf0]  ;;  %v10446_v33 = vld [vmem:[#allocation15 + $0x24c] sm:$0xf] }
 0x61d   : > { %v5421_v25 = vpop.f32.mrf.mxu2  ;;  %6378 = vmatpush.bf16.msrb.mxu2 %v9467_v16  ;;  %v9503_v3 = vor.u32 %v10450_v29, %v9500_v31  ;;  %v9487_v50 = vor.u32 %v10446_v33, %v9484_v49  ;;  %v10442_v40 = vld [vmem:[#allocation15 + $0x22c] sm:$0xf]  ;;  %v9468_v16 = vld [vmem:[#allocation15 + $0x238] sm:$0xf0]  ;;  %v4293_v33 = vld [vmem:[#allocation16] sm:$0xf] }
 0x61e   : > { %v5469_v54 = vmax.f32 %v5465_v45, 0.0  ;;  %v5434_v56 = vpop.f32.mrf.mxu3  ;;  %v9471_v44 = vor.u32 %v10442_v40, %v9468_v16  ;;  %v10472_v45 = vld [vmem:[#allocation15 + $0x314] sm:$0xf0]  ;;  %v10506_v31 = vld [vmem:[#allocation18 + $0x28] sm:$0xff]  ;;  %v10504_v16 = vld [vmem:[#allocation18 + $0x18] sm:$0xff] }
 0x61f   : > { %6405 = vmatpush.bf16.msra.mxu0 %v9199_v41  ;;  %v9595_v41 = vor.u32 %v10476_v57, %v9594_v37  ;;  %v9579_v25 = vor.u32 %v10472_v45, %v9578_v27  ;;  %v10490_v56 = vld [vmem:[#allocation15 + $0x3ac] sm:$0xf]  ;;  %v4313_v57 = vld [vmem:[%s11501_s9] sm:$0xf]  ;;  %v10503_v45 = vld [vmem:[#allocation18 + $0x10] sm:$0xff] }
 0x620   : > { %v11426_v61 = vpack.c.bf16 %v5469_v54, %v5469_v54  ;;  %6414 = vmatpush.bf16.msra.mxu1 %v9391_v43  ;;  %v10438_v43 = vld [vmem:[#allocation15 + $0x20c] sm:$0xf]  ;;  %v9679_v54 = vor.u32 %v10494_v1, %v9676_v52  ;;  %v10513_v1 = vld [vmem:[#allocation18 + $0x60] sm:$0xff]  ;;  %v10512_v52 = vld [vmem:[#allocation18 + $0x58] sm:$0xff] }
 0x621   : > { %6379 = vmatpush.bf16.msrb.mxu2 %v9451_v59  ;;  %v9660_v59 = vld [vmem:[#allocation15 + $0x3b8] sm:$0xf0] }
 0x622   : > { %6289 = vmatmul.bf16.vlgmr.msrb.gmra.mxu3 %v11426_v61  ;;  %6406 = vmatmul.bf16.vlgmr.msra.gmra.mxu0 %v11406_v53  ;;  %v9343_v53 = vor.u32 %v10410_v12, %v9340_v13  ;;  %v4285_v13 = vld [vmem:[#allocation2 + $0x4] ss:$8 sm:$0xf] }
 0x623   : > { %6385 = vmatpush.bf16.msrb.mxu3 %v9691_v60  ;;  %v9663_v60 = vor.u32 %v10490_v56, %v9660_v59  ;;  %v4286_v14 = vmul.f32 0.125, %v4285_v13  ;;  %6748 = vmatpush.bf16.msrb.mxu0 %v10508_v55  ;;  %v10519_v13 = vld [vmem:[#allocation18 + $0x90] sm:$0xff]  ;;  %v10532_v55 = vld [vmem:[#allocation18 + $0xf8] sm:$0xff] }
 0x624   : > { %6415 = vmatpush.bf16.msra.mxu1 %v9375_v62  ;;  %6380 = vmatmul.bf16.vlgmr.msrb.gmra.mxu2 %v11417_v36  ;;  %v10486_v62 = vld [vmem:[#allocation15 + $0x38c] sm:$0xf] }
 0x625   : > { %6424 = vmatpush.bf16.msra.mxu2 %v9567_v63  ;;  %v9644_v63 = vld [vmem:[#allocation15 + $0x398] sm:$0xf0] }
 0x626   : > { %v9647_v0 = vor.u32 %v10486_v62, %v9644_v63  ;;  %v10523_v62 = vld [vmem:[#allocation18 + $0xb0] sm:$0xff]  ;;  %v10510_v63 = vld [vmem:[#allocation18 + $0x48] sm:$0xff] }
 0x627   : > { %6386 = vmatpush.bf16.msrb.mxu3 %v9675_v6  ;;  %v9615_v6 = vor.u32 %v10478_v5, %v9612_v35  ;;  %6749 = vmatpush.bf16.msrb.mxu0 %v10507_v58  ;;  %v10521_v5 = vld [vmem:[#allocation18 + $0xa0] sm:$0xff]  ;;  %v10531_v58 = vld [vmem:[#allocation18 + $0xf0] sm:$0xff] }
 0x628   : > { %6416 = vmatpush.bf16.msra.mxu1 %v9359_v8  ;;  %v10474_v8 = vld [vmem:[#allocation15 + $0x32c] sm:$0xf] }
 0x629   : > { %6425 = vmatpush.bf16.msra.mxu2 %v9551_v9  ;;  %v9596_v9 = vld [vmem:[#allocation15 + $0x338] sm:$0xf0] }
 0x62a   : > { %v9599_v10 = vor.u32 %v10474_v8, %v9596_v9 }
 0x62b   : > { %6387 = vmatpush.bf16.msrb.mxu3 %v9659_v18  ;;  %v4289_v18 = vmul.f32 0.125, %v4288_v42  ;;  %6750 = vmatpush.bf16.msrb.mxu0 %v10506_v31  ;;  %v10530_v31 = vld [vmem:[#allocation18 + $0xe8] sm:$0xff] }
 0x62c   : > { %6417 = vmatpush.bf16.msra.mxu1 %v9343_v53  ;;  %v4290_v53 = vmul.f32 %v4286_v14, %v4286_v14 }
 0x62d   : > { %6426 = vmatpush.bf16.msra.mxu2 %v9535_v19 }
 0x62e   : > { %v4291_v22 = vsub.f32 %v4289_v18, %v4290_v53 }
 0x62f   : > { %6388 = vmatpush.bf16.msrb.mxu3 %v9643_v28  ;;  %6751 = vmatpush.bf16.msrb.mxu0 %v10505_v32 }
 0x630   : > { %6418 = vmatpush.bf16.msra.mxu1 %v9327_v30  ;;  %v4292_v23 = vmax.f32 %v4291_v22, 0.0 }
 0x631   : > { %6427 = vmatpush.bf16.msra.mxu2 %v9519_v15 }
 0x632   : > { %6341 = vmatmul.bf16.vlgmr.msra.gmra.mxu3 %v11426_v61  ;;  %v4294_v34 = vadd.f32 1e-05, %v4292_v23  ;;  %v10518_v23 = vld [vmem:[#allocation18 + $0x88] sm:$0xff] }
 0x633   : > { %6389 = vmatpush.bf16.msrb.mxu3 %v9627_v2  ;;  %6419 = vmatmul.bf16.vlgmr.msra.gmra.mxu1 %v11411_v39  ;;  %v9455_v39 = vor.u32 %v10438_v43, %v9452_v47  ;;  %v10515_v43 = vld [vmem:[#allocation18 + $0x70] sm:$0xff]  ;;  %v10502_v47 = vld [vmem:[#allocation18 + $0x8] sm:$0xff] }
 0x634   : > { %10670 = vrsqrt.f32 %v4294_v34  ;;  %vm4301_vm6 = vweird.f32 %v4294_v34  ;;  %6752 = vmatpush.bf16.msrb.mxu0 %v10504_v16 }
 0x635   : > { %6428 = vmatpush.bf16.msra.mxu2 %v9503_v3 }
 0x637   : > { %6390 = vmatpush.bf16.msrb.mxu3 %v9611_v21 }
 0x638   : > { %6753 = vmatpush.bf16.msrb.mxu0 %v10503_v45 }
 0x639   : > { %6429 = vmatpush.bf16.msra.mxu2 %v9487_v50  ;;  %v4306_v50 = vlaneseq }
 0x63a   : > { %v10671_v26 = vpop.eup %10670 }
 0x63b   : > { %6391 = vmatpush.bf16.msrb.mxu3 %v9595_v41  ;;  %v4296_v28 = vmul.f32 %v10671_v26, %v4294_v34  ;;  %vm4302_vm7 = vweird.f32 %v10671_v26  ;;  %vm4308_vm9 = vcmp.lt.s32.totalorder %v4306_v50, 512  ;;  %v10516_v41 = vld [vmem:[#allocation18 + $0x78] sm:$0xff] }
 0x63c   : > { %vm4303_vm8 = vmor %vm4301_vm6, %vm4302_vm7  ;;  %6761 = vmatpush.bf16.msrb.mxu1 %v10516_v41  ;;  %6754 = vmatpush.bf16.msrb.mxu0 %v10502_v47  ;;  %v10526_v47 = vld [vmem:[#allocation18 + $0xc8] sm:$0xff] }
 0x63d   : > { %6430 = vmatpush.bf16.msra.mxu2 %v9471_v44 }
 0x63f   : > { %6392 = vmatpush.bf16.msrb.mxu3 %v9579_v25 }
 0x640   : > { %6762 = vmatpush.bf16.msrb.mxu1 %v10515_v43 }
 0x641   : > { %6431 = vmatpush.bf16.msra.mxu2 %v9455_v39 }
 0x642   : > { %6393 = vmatmul.bf16.vlgmr.msrb.gmra.mxu3 %v11426_v61 }
 0x643   : > { %6437 = vmatpush.bf16.msra.mxu3 %v9695_v51  ;;  %v10501_v51 = vld [vmem:[#allocation18] sm:$0xff] }
 0x644   : > { %6432 = vmatmul.bf16.vlgmr.msra.gmra.mxu2 %v11417_v36  ;;  %v9580_v36 = vld [vmem:[#allocation15 + $0x318] sm:$0xf0]  ;;  %6763 = vmatpush.bf16.msrb.mxu1 %v10514_v17 }
 0x645   : > { %v9583_v12 = vor.u32 %v10470_v11, %v9580_v36  ;;  %6755 = vmatpush.bf16.msrb.mxu0 %v10501_v51 }
 0x647   : > { %6438 = vmatpush.bf16.msra.mxu3 %v9679_v54  ;;  %v10524_v54 = vld [vmem:[#allocation18 + $0xb8] sm:$0xff] }
 0x648   : > { %6764 = vmatpush.bf16.msrb.mxu1 %v10513_v1  ;;  %6774 = vmatpush.bf16.msrb.mxu2 %v10524_v54  ;;  %v10525_v1 = vld [vmem:[#allocation18 + $0xc0] sm:$0xff] }
 0x64b   : > { %6439 = vmatpush.bf16.msra.mxu3 %v9663_v60  ;;  %v10511_v60 = vld [vmem:[#allocation18 + $0x50] sm:$0xff] }
 0x64c   : > { %6765 = vmatpush.bf16.msrb.mxu1 %v10512_v52  ;;  %6775 = vmatpush.bf16.msrb.mxu2 %v10523_v62 }
 0x64f   : > { %6440 = vmatpush.bf16.msra.mxu3 %v9647_v0  ;;  %v10522_v0 = vld [vmem:[#allocation18 + $0xa8] sm:$0xff] }
 0x650   : > { %6766 = vmatpush.bf16.msrb.mxu1 %v10511_v60  ;;  %6776 = vmatpush.bf16.msrb.mxu2 %v10522_v0 }
 0x653   : > { %6441 = vmatpush.bf16.msra.mxu3 %v9631_v38  ;;  %v10509_v38 = vld [vmem:[#allocation18 + $0x40] sm:$0xff] }
 0x654   : > { %6767 = vmatpush.bf16.msrb.mxu1 %v10510_v63  ;;  %6777 = vmatpush.bf16.msrb.mxu2 %v10521_v5 }
 0x657   : > { %6442 = vmatpush.bf16.msra.mxu3 %v9615_v6  ;;  %v10520_v6 = vld [vmem:[#allocation18 + $0x98] sm:$0xff] }
 0x658   : > { %6768 = vmatpush.bf16.msrb.mxu1 %v10509_v38  ;;  %6778 = vmatpush.bf16.msrb.mxu2 %v10520_v6 }
 0x65b   : > { %6443 = vmatpush.bf16.msra.mxu3 %v9599_v10 }
 0x65c   : > { %6779 = vmatpush.bf16.msrb.mxu2 %v10519_v13 }
 0x65f   : > { %6444 = vmatpush.bf16.msra.mxu3 %v9583_v12  ;;  %v11436_v19 = vpop.f32.mrf.mxu0 }
 0x660   : > { %6780 = vmatpush.bf16.msrb.mxu2 %v10518_v23 }
 0x662   : > { %6445 = vmatmul.bf16.vlgmr.msra.gmra.mxu3 %v11426_v61  ;;  %v4297_v61 = vmul.f32 %v10671_v26, %v4296_v28 }
 0x663   : > { %6787 = vmatpush.bf16.msrb.mxu3 %v10532_v55 }
 0x664   : > { %v4298_v20 = vmul.f32 0.5, %v4297_v61 }
 0x666   : > { %v4299_v29 = vsub.f32 1.5, %v4298_v20 }
 0x667   : > { %v6253_v46 = vpop.f32.mrf.mxu0  ;;  %6788 = vmatpush.bf16.msrb.mxu3 %v10531_v58 }
 0x668   : > { %v4300_v2 = vmul.f32 %v10671_v26, %v4299_v29 }
 0x66a   : > { %v4304_v49 = vsel %vm4303_vm8, %v10671_v26, %v4300_v2 }
 0x66b   : > { %v4305_v21 = vmul.f32 %v4304_v49, %v4293_v33  ;;  %6789 = vmatpush.bf16.msrb.mxu3 %v10530_v31  ;;  %v10529_v49 = vld [vmem:[#allocation18 + $0xe0] sm:$0xff] }
 0x66d   : > { %v4314_v37 = vmul.f32 %v4305_v21, %v4286_v14  ;;  %4311 = vst.msk [vmem:[#allocation3 + $0x4] ss:$8 sm:$0xf] %vm4308_vm9, %v4305_v21 }
 0x66f   : > { %v11438_v30 = vpop.f32.mrf.mxu1  ;;  %v11440_v15 = vpop.f32.mrf.mxu0  ;;  %v4315_v40 = vsub.f32 %v4313_v57, %v4314_v37  ;;  %6790 = vmatpush.bf16.msrb.mxu3 %v10529_v49  ;;  %v10528_v57 = vld [vmem:[#allocation18 + $0xd8] sm:$0xff] }
 0x670   : > { %v6265_v10 = vadd.f32 %v11438_v30, %v11436_v19  ;;  %v10517_v19 = vld [vmem:[#allocation18 + $0x80] sm:$0xff] }
 0x671   : > { %4317 = vst.msk [vmem:[#allocation3 + $0x5] ss:$8 sm:$0xf] %vm4308_vm9, %v4315_v40  ;;  %6781 = vmatpush.bf16.msrb.mxu2 %v10517_v19 }
 0x673   : > { %6791 = vmatpush.bf16.msrb.mxu3 %v10528_v57 }
 0x674   : > { %v11453_v9 = vld [vmem:[#allocation3 + $0x4] ss:$8 sm:$0xf] }
 0x675   : > { %v6455_v12 = vperm.slane %v11453_v9, 0  ;;  %v6457_v43 = vperm.slane %v11453_v9, 2  ;;  %v6458_v63 = vperm.slane %v11453_v9, 3 }
 0x677   : > { %v6266_v3 = vpop.f32.mrf.mxu1  ;;  %v6305_v7 = vpop.f32.mrf.mxu0 }
 0x678   : > { %v11457_v11 = vld [vmem:[#allocation3 + $0x5] ss:$8 sm:$0xf]  ;;  %v6456_v3 = vperm.slane %v11453_v9, 1 }
 0x679   : > { %v6468_v18 = vperm.slane %v11457_v11, 0  ;;  %v6469_v33 = vperm.slane %v11457_v11, 1 }
 0x67f   : > { %v11445_v44 = vpop.f32.mrf.mxu1  ;;  %v11447_v27 = vpop.f32.mrf.mxu0 }
 0x680   : > { %v6317_v29 = vadd.f32 %v11445_v44, %v11440_v15  ;;  %v10527_v15 = vld [vmem:[#allocation18 + $0xd0] sm:$0xff] }
 0x681   : > { %6792 = vmatpush.bf16.msrb.mxu3 %v10527_v15 }
 0x685   : > { %6793 = vmatpush.bf16.msrb.mxu3 %v10526_v47 }
 0x686   : > { %v6277_v48 = vpop.f32.mrf.mxu2 }
 0x687   : > { %v6318_v25 = vpop.f32.mrf.mxu1  ;;  %v6357_v39 = vpop.f32.mrf.mxu0  ;;  %v6278_v36 = vadd.f32 %v6277_v48, %v6265_v10 }
 0x688   : > { %v6470_v25 = vperm.slane %v11457_v11, 2 }
 0x689   : > { %6794 = vmatpush.bf16.msrb.mxu3 %v10525_v1 }
 0x68e   : > { %v6279_v56 = vpop.f32.mrf.mxu2 }
 0x690   : > { %v11449_v59 = vpop.f32.mrf.mxu1 }
 0x691   : > { %v6369_v44 = vadd.f32 %v11449_v59, %v11447_v27 }
 0x697   : > { %v6329_v24 = vpop.f32.mrf.mxu2 }
 0x698   : > { %v6370_v4 = vpop.f32.mrf.mxu1  ;;  %v6330_v2 = vadd.f32 %v6329_v24, %v6317_v29 }
 0x699   : > { %v6471_v4 = vperm.slane %v11457_v11, 3 }
 0x69f   : > { %v11451_v35 = vpop.f32.mrf.mxu0  ;;  %v6331_v8 = vpop.f32.mrf.mxu2 }
 0x6a5   : > { %v6290_v14 = vpop.f32.mrf.mxu3 }
 0x6a6   : > { %v6291_v42 = vadd.f32 %v6290_v14, %v6278_v36 }
 0x6a7   : > { %v6409_v53 = vpop.f32.mrf.mxu0  ;;  %v6381_v34 = vpop.f32.mrf.mxu2 }
 0x6a8   : > { %v6463_v22 = vmul.f32 %v6455_v12, %v6291_v42  ;;  %v6382_v45 = vadd.f32 %v6381_v34, %v6369_v44 }
 0x6aa   : > { %v6476_v46 = vadd.f32 %v6468_v18, %v6463_v22 }
 0x6ac   : > { %v6480_v26 = vmax.f32 %v6476_v46, 0.0 }
 0x6ad   : > { %v6292_v28 = vpop.f32.mrf.mxu3 }
 0x6ae   : > { %v6484_v30 = vpack.c.bf16 %v6480_v26, %v6480_v26 }
 0x6af   : > { %v6383_v20 = vpop.f32.mrf.mxu2 }
 0x6b0   : > { %v6420_v61 = vpop.f32.mrf.mxu1  ;;  %6756 = vmatmul.bf16.vlgmr.msrb.gmra.mxu0 %v6484_v30 }
 0x6b1   : > { %v6421_v27 = vadd.f32 %v6420_v61, %v11451_v35  ;;  %v10669_v35 = vld [vmem:[%s11503_s11] ss:$0 sm:$0xff] }
 0x6b5   : > { %v6342_v7 = vpop.f32.mrf.mxu3 }
 0x6b6   : > { %v6343_v32 = vadd.f32 %v6342_v7, %v6330_v2 }
 0x6b8   : > { %v6464_v21 = vmul.f32 %v6456_v3, %v6343_v32  ;;  %v6422_v50 = vpop.f32.mrf.mxu1 }
 0x6ba   : > { %v6477_v37 = vadd.f32 %v6469_v33, %v6464_v21 }
 0x6bc   : > { %v6481_v40 = vmax.f32 %v6477_v37, 0.0 }
 0x6bd   : > { %v6344_v16 = vpop.f32.mrf.mxu3 }
 0x6be   : > { %v6485_v41 = vpack.c.bf16 %v6481_v40, %v6481_v40 }
 0x6c0   : > { %6769 = vmatmul.bf16.vlgmr.msrb.gmra.mxu1 %v6485_v41 }
 0x6c5   : > { %v6394_v17 = vpop.f32.mrf.mxu3 }
 0x6c6   : > { %v6395_v48 = vadd.f32 %v6394_v17, %v6382_v45 }
 0x6c7   : > { %v6433_v39 = vpop.f32.mrf.mxu2 }
 0x6c8   : > { %v6465_v51 = vmul.f32 %v6457_v43, %v6395_v48  ;;  %v6434_v59 = vadd.f32 %v6433_v39, %v6421_v27 }
 0x6ca   : > { %v6478_v52 = vadd.f32 %v6470_v25, %v6465_v51 }
 0x6cc   : > { %v6482_v54 = vmax.f32 %v6478_v52, 0.0 }
 0x6cd   : > { %v6396_v56 = vpop.f32.mrf.mxu3 }
 0x6ce   : > { %v6486_v60 = vpack.c.bf16 %v6482_v54, %v6482_v54 }
 0x6cf   : > { %v6435_v62 = vpop.f32.mrf.mxu2 }
 0x6d0   : > { %6782 = vmatmul.bf16.vlgmr.msrb.gmra.mxu2 %v6486_v60 }
 0x6e5   : > { %v6446_v0 = vpop.f32.mrf.mxu3 }
 0x6e6   : > { %v6447_v24 = vadd.f32 %v6446_v0, %v6434_v59 }
 0x6e8   : > { %v6466_v38 = vmul.f32 %v6458_v63, %v6447_v24 }
 0x6ea   : > { %v6479_v5 = vadd.f32 %v6471_v4, %v6466_v38 }
 0x6ec   : > { %v6483_v6 = vmax.f32 %v6479_v5, 0.0 }
 0x6ed   : > { %v6448_v8 = vpop.f32.mrf.mxu3 }
 0x6ee   : > { %v6487_v10 = vpack.c.bf16 %v6483_v6, %v6483_v6 }
 0x6f0   : > { %6795 = vmatmul.bf16.vlgmr.msrb.gmra.mxu3 %v6487_v10 }
 0x72d   : > { %v6757_v36 = vpop.f32.mrf.mxu0 }
 0x72e   : > { %v6758_v9 = vadd.f32 %v10669_v35, %v6757_v36 }
 0x735   : > { %v6759_v12 = vpop.f32.mrf.mxu0 }
 0x73d   : > { %v6770_v13 = vpop.f32.mrf.mxu1 }
 0x73e   : > { %v6771_v53 = vadd.f32 %v6770_v13, %v6758_v9 }
 0x745   : > { %v6772_v14 = vpop.f32.mrf.mxu1 }
 0x753   : > { %v6783_v42 = vpop.f32.mrf.mxu2 }
 0x754   : > { %v6784_v22 = vadd.f32 %v6783_v42, %v6771_v53 }
 0x75b   : > { %v6785_v18 = vpop.f32.mrf.mxu2 }
 0x773   : > { %v6796_v11 = vpop.f32.mrf.mxu3 }
 0x774   : > { %v6797_v23 = vadd.f32 %v6796_v11, %v6784_v22 }
 0x776   : > { %v6800_v34 = vpack.c.bf16 %v6797_v23, %v6797_v23 }
 0x778   : > { %6801 = vst [vmem:[#allocation19] sm:$0xf] %v6800_v34 }
 0x77b   : > { %v6798_v46 = vpop.f32.mrf.mxu3 }
 0x77c PF: > { %s11525_s25 = sadd.s32 4294967295, %s11016_s23   ;;  %s6819_s24 = sshll.u32 %s11504_s12, 4  ;;  %s6820_s24 = int_to_ptr.hbm [resolvable:$true] %s6819_s24 }
 0x77d   : > { %p10623_p12 = scmp.eq.s32.totalorder %s11525_s25, 3  ;;  %s11032_s3 = smov [#allocation19]  }
 0x77e   : > { %s6817_s28 = sshll.u32 %s11032_s3, 4  ;;  %s6818_s28 = int_to_ptr.vmem [resolvable:$true] %s6817_s28 }
 0x77f   : > { %10570 = dma.vmem_to_hbm [thread:$0]  (%p10623_p12), %s6818_s28, 64, %s6820_s24, [#allocation6]  }
 0x780 PF: > { %p10624_p13 = scmp.ge.s32.totalorder %s11016_s23, 2  ;;  %s11526_s20 = sadd.s32 4294967294, %s11016_s23  }
 0x781   : > { %p10625_p0 = scmp.eq.s32.totalorder %s11526_s20, 3 }
 0x783   : > { %p10602_p1 = pnand %p10625_p0, %p10624_p13 }
 0x785   : > { %p10603_p2 = pneg %p10602_p1 }
 0x787   : > { %11003 = dma.done.wait (%p10603_p2), [#allocation6], 64  }
 0x788   : > { %11005 = vsyncadd (%p10603_p2), [#allocation6], 4294967232  ;;  %s30_s23 = sadd.s32 1, %s11016_s23   ;;  %s11527_s21 = smov %s11012_s22 }
 0x789   : > { %p27_p3 = scmp.ge.s32.totalorder %s30_s23, 6   ;;  %s11528_s22 = smov %s11530_s26 }
 0x78b   :  { %29 = sbr.rel (!%p27_p3) target bundleno = 12 (0xc), region = 194 }
 0x790   :  { %6838 = vsyncpa [#allocation5], 1 }
 0x791   :  { %6840 = vsyncpa [#allocation5 + $0x1], 1 }
 0x792   :  { %6841 = vsyncpa [#allocation8], 1 }
 0x793   :  { %6842 = vsyncpa [#allocation11], 1 }
 0x794   :  { %6843 = vsyncpa [#allocation14], 1 }
 0x795   :  { %6844 = vsyncpa [#allocation17], 1 }
 0x796   :  { %6845 = vsyncpa [#allocation6], 1 }
 0x797   :  { %6847 = vsyncpa [#allocation6 + $0x1], 1 }

</bundles_post_ra>
